<compile_context>
chip_gen: v6e
topology: v6e:2x2x1
jax: 0.10.0
libtpu: 0.0.40
codegen_flags: <defaults>
</compile_context>

<pallas_src>
import functools
import math

import jax
import jax.numpy as jnp
from jax.experimental import pallas as pl
from jax.experimental.pallas import tpu as pltpu

# Make the pure-JAX reference matmuls run in true f32 so the 1e-4 comparison
# against the (f32-accumulating) kernel is meaningful.
jax.config.update("jax_default_matmul_precision", "highest")

# ----------------------------- configuration --------------------------------
MODEL_DIM = 32
NUM_HEADS = 4
NUM_LAYERS = 2
FF_DIM = 64
PATCH = 4
TIME_MAX_LEN = 16
FREQ_MAX_LEN = 16
BATCH = 2
TIME = 16
FREQ = 16
LN_EPS = 1e-5

SLAB_W = max(3 * MODEL_DIM, FF_DIM)          # lane width of the packed weight slab


# --------------------------- parameter setup (glue) --------------------------
def posemb_sincos_2d(h, w, dim, temperature=10000.0):
    """Exact JAX transcription of the torch reference (incl. the view/permute)."""
    y, x = jnp.meshgrid(jnp.arange(h, dtype=jnp.float32),
                        jnp.arange(w, dtype=jnp.float32), indexing="ij")
    assert dim % 4 == 0
    omega = jnp.arange(dim // 4, dtype=jnp.float32) / (dim // 4 - 1)
    omega = 1.0 / (temperature ** omega)
    y = y.reshape(-1)[:, None] * omega[None, :]
    x = x.reshape(-1)[:, None] * omega[None, :]
    pe = jnp.concatenate([jnp.sin(x), jnp.cos(x), jnp.sin(y), jnp.cos(y)], axis=1)
    pe = pe.reshape(w, h, dim).transpose(1, 0, 2)      # (h, w, dim)
    return pe.astype(jnp.float32)


def init_params(key):
    """Raw params in torch conventions (used by the reference and the packer)."""
    D, Fd, P, L = MODEL_DIM, FF_DIM, PATCH, NUM_LAYERS
    keys = jax.random.split(key, 1 + L)
    kcw, kcb = jax.random.split(keys[0])
    params = {
        "conv_w": jax.random.normal(kcw, (D, 1, P, P), jnp.float32) * 0.05,
        "conv_b": jax.random.normal(kcb, (D,), jnp.float32) * 0.05,
        "pos": posemb_sincos_2d(TIME_MAX_LEN // P, FREQ_MAX_LEN // P, D),
        "layers": [],
    }
    for l in range(L):
        k = jax.random.split(keys[1 + l], 12)
        params["layers"].append({
            "in_proj_w": jax.random.normal(k[0], (3 * D, D), jnp.float32) * 0.05,
            "in_proj_b": jax.random.normal(k[1], (3 * D,), jnp.float32) * 0.05,
            "out_w": jax.random.normal(k[2], (D, D), jnp.float32) * 0.05,
            "out_b": jax.random.normal(k[3], (D,), jnp.float32) * 0.05,
            "lin1_w": jax.random.normal(k[4], (Fd, D), jnp.float32) * 0.05,
            "lin1_b": jax.random.normal(k[5], (Fd,), jnp.float32) * 0.05,
            "lin2_w": jax.random.normal(k[6], (D, Fd), jnp.float32) * 0.05,
            "lin2_b": jax.random.normal(k[7], (D,), jnp.float32) * 0.05,
            "ln1_g": 1.0 + 0.05 * jax.random.normal(k[8], (D,), jnp.float32),
            "ln1_b": 0.05 * jax.random.normal(k[9], (D,), jnp.float32),
            "ln2_g": 1.0 + 0.05 * jax.random.normal(k[10], (D,), jnp.float32),
            "ln2_b": 0.05 * jax.random.normal(k[11], (D,), jnp.float32),
        })
    return params


# ----------------------- weight-slab packing (one DMA) ------------------------
def make_layout(batch, seq):
    """Static map: block name -> (row_start, n_rows, n_cols) inside the slab."""
    D, Fd, P2, L = MODEL_DIM, FF_DIM, PATCH * PATCH, NUM_LAYERS
    layout, row = {}, 0

    def add(name, nr, nc):
        nonlocal row
        layout[name] = (row, nr, nc)
        row += nr

    add("posb", batch * seq, D)          # pos embedding + conv bias, tiled over batch
    add("patch_w", P2, D)
    for l in range(L):
        add(f"wqkv{l}", D, 3 * D)
        add(f"wo{l}", D, D)
        add(f"w1{l}", D, Fd)
        add(f"w2{l}", Fd, D)
        add(f"vec{l}", 8, SLAB_W)        # rows: bqkv, bo, b1, b2, g1, be1, g2, be2
    # keep every block start 8-sublane aligned
    assert all(r % 8 == 0 for (r, _, _) in layout.values())
    return layout, row


def pack_params(params, batch, time_len, freq_len):
    D, Fd, P, L = MODEL_DIM, FF_DIM, PATCH, NUM_LAYERS
    Tp, Fp = time_len // P, freq_len // P
    S = Tp * Fp
    layout, nrows = make_layout(batch, S)
    slab = jnp.zeros((nrows, SLAB_W), jnp.float32)

    def put(sl, name, val):
        r0, nr, nc = layout[name]
        assert val.shape == (nr, nc), (name, val.shape, (nr, nc))
        return sl.at[r0:r0 + nr, 0:nc].set(val)

    pos_flat = params["pos"][:Tp, :Fp, :].reshape(S, D)
    posb = jnp.tile(pos_flat + params["conv_b"][None, :], (batch, 1))   # (B*S, D)
    slab = put(slab, "posb", posb)
    slab = put(slab, "patch_w", params["conv_w"].reshape(D, P * P).T)   # (P2, D)
    for l, lp in enumerate(params["layers"]):
        slab = put(slab, f"wqkv{l}", lp["in_proj_w"].T)                 # (D, 3D)
        slab = put(slab, f"wo{l}", lp["out_w"].T)                       # (D, D)
        slab = put(slab, f"w1{l}", lp["lin1_w"].T)                      # (D, F)
        slab = put(slab, f"w2{l}", lp["lin2_w"].T)                      # (F, D)
        vecblk = jnp.zeros((8, SLAB_W), jnp.float32)
        vecblk = vecblk.at[0, :3 * D].set(lp["in_proj_b"])
        vecblk = vecblk.at[1, :D].set(lp["out_b"])
        vecblk = vecblk.at[2, :Fd].set(lp["lin1_b"])
        vecblk = vecblk.at[3, :D].set(lp["lin2_b"])
        vecblk = vecblk.at[4, :D].set(lp["ln1_g"])
        vecblk = vecblk.at[5, :D].set(lp["ln1_b"])
        vecblk = vecblk.at[6, :D].set(lp["ln2_g"])
        vecblk = vecblk.at[7, :D].set(lp["ln2_b"])
        slab = put(slab, f"vec{l}", vecblk)
    return slab


# ------------------------------- Pallas kernel --------------------------------
def _recip(x):
    # EUP approximate reciprocal (otherwise-idle slot) + one Newton step.
    r = pl.reciprocal(x, approx=True)
    return r * (2.0 - x * r)


def _layer_norm(x, g, b, eps=LN_EPS):
    # One pass: var = E[x^2] - E[x]^2 (the two lane reduces are independent).
    mu = jnp.mean(x, axis=-1, keepdims=True)
    ex2 = jnp.mean(x * x, axis=-1, keepdims=True)
    var = ex2 - mu * mu
    return (x - mu) * jax.lax.rsqrt(var + eps) * g + b


def fused_encoder_kernel(p_ref, slab_ref, o_ref, qkv_s, attn_s, *,
                         layout, batch, seq, dim, heads, ff, num_layers):
    hd = dim // heads
    scale = 1.0 / math.sqrt(hd)

    def blk(name):
        r0, nr, nc = layout[name]
        return slab_ref[r0:r0 + nr, 0:nc]

    def vec(l, row, width):
        r0, _, _ = layout[f"vec{l}"]
        return slab_ref[r0 + row:r0 + row + 1, 0:width]

    # ---- patch embedding: (B*S, P2) @ (P2, D) + (pos + conv-bias) ------------
    x = jnp.dot(p_ref[...], blk("patch_w"),
                preferred_element_type=jnp.float32) + blk("posb")        # (B*S, D)

    # ---- transformer encoder layers (unrolled; residual stays in vregs) ------
    for l in range(num_layers):
        # fused QKV projection, staged through VMEM scratch so per-head q/k/v
        # are static ref-view loads instead of vreg lane extracts
        qkv_s[...] = (jnp.dot(x, blk(f"wqkv{l}"),
                              preferred_element_type=jnp.float32)
                      + vec(l, 0, 3 * dim))

        for b in range(batch):
            r0, r1 = b * seq, (b + 1) * seq
            for h in range(heads):
                q = qkv_s[r0:r1, h * hd:(h + 1) * hd]
                k = qkv_s[r0:r1, dim + h * hd:dim + (h + 1) * hd]
                v = qkv_s[r0:r1, 2 * dim + h * hd:2 * dim + (h + 1) * hd]
                # scores without an explicit k transpose
                s = jax.lax.dot_general(
                    q, k, (((1,), (1,)), ((), ())),
                    preferred_element_type=jnp.float32) * scale
                s = s - jnp.max(s, axis=-1, keepdims=True)
                e = jnp.exp(s)
                p = e * _recip(jnp.sum(e, axis=-1, keepdims=True))
                # head output written straight into its (S, hd) window: the
                # head concat is free and W_o is one matmul below
                attn_s[r0:r1, h * hd:(h + 1) * hd] = jnp.dot(
                    p, v, preferred_element_type=jnp.float32)

        attn = (jnp.dot(attn_s[...], blk(f"wo{l}"),
                        preferred_element_type=jnp.float32) + vec(l, 1, dim))
        x = _layer_norm(x + attn, vec(l, 4, dim), vec(l, 5, dim))

        hmid = (jnp.dot(x, blk(f"w1{l}"),
                        preferred_element_type=jnp.float32) + vec(l, 2, ff))
        hmid = jnp.maximum(hmid, 0.0)
        ffo = (jnp.dot(hmid, blk(f"w2{l}"),
                       preferred_element_type=jnp.float32) + vec(l, 3, dim))
        x = _layer_norm(x + ffo, vec(l, 6, dim), vec(l, 7, dim))

    # ---- per-batch mean over the patch sequence; single (B, D) store ----------
    rows = [jnp.mean(x[b * seq:(b + 1) * seq, :], axis=0, keepdims=True)
            for b in range(batch)]
    o_ref[...] = jnp.concatenate(rows, axis=0)


# ------------------------------- wrapper --------------------------------------
def extract_patches(x, p):
    """(B, T, F) -> (B, Tp*Fp, p*p) matching Conv2d(kernel=stride=p) flattening."""
    B, T, Fq = x.shape
    Tp, Fp = T // p, Fq // p
    return (x.reshape(B, Tp, p, Fp, p)
             .transpose(0, 1, 3, 2, 4)
             .reshape(B, Tp * Fp, p * p))


@jax.jit
def forward(x, slab):
    B, T, Fq = x.shape
    P, D, Fd, H, L = PATCH, MODEL_DIM, FF_DIM, NUM_HEADS, NUM_LAYERS
    Tp, Fp = T // P, Fq // P
    S = Tp * Fp
    hd = D // H
    layout, _ = make_layout(B, S)

    # TODO(synk): patch extraction stays as a (jitted) XLA reshape/transpose in
    # front of the kernel rather than in-kernel sublane slicing.
    patches = extract_patches(x, P).reshape(B * S, P * P)

    kernel = functools.partial(
        fused_encoder_kernel, layout=layout, batch=B, seq=S,
        dim=D, heads=H, ff=Fd, num_layers=L)

    flops = (2 * B * S * P * P * D
             + L * (2 * B * S * D * 3 * D            # fused QKV
                    + B * H * 4 * S * S * hd         # scores + PV
                    + 2 * B * S * D * D              # W_o
                    + 4 * B * S * D * Fd))           # FFN
    transcendentals = L * (B * H * S * S + B * H * S + 2 * B * S)
    bytes_accessed = (patches.size + slab.size + B * D) * 4

    return pl.pallas_call(
        kernel,
        out_shape=jax.ShapeDtypeStruct((B, D), jnp.float32),
        in_specs=[pl.BlockSpec(memory_space=pltpu.MemorySpace.VMEM),
                  pl.BlockSpec(memory_space=pltpu.MemorySpace.VMEM)],
        out_specs=pl.BlockSpec(memory_space=pltpu.MemorySpace.VMEM),
        scratch_shapes=[pltpu.VMEM((B * S, 3 * D), jnp.float32),   # fused QKV
                        pltpu.VMEM((B * S, D), jnp.float32)],      # head outputs
        cost_estimate=pl.CostEstimate(flops=int(flops),
                                      transcendentals=int(transcendentals),
                                      bytes_accessed=int(bytes_accessed)),
    )(patches, slab)


# ----------------------------- pure-JAX reference -----------------------------
def _ref_layer_norm(x, g, b, eps=LN_EPS):
    mu = jnp.mean(x, axis=-1, keepdims=True)
    var = jnp.mean((x - mu) ** 2, axis=-1, keepdims=True)
    return (x - mu) / jnp.sqrt(var + eps) * g + b


def reference(x, params):
    D, H, P = MODEL_DIM, NUM_HEADS, PATCH
    B, T, Fq = x.shape
    Tp, Fp = T // P, Fq // P
    S = Tp * Fp
    hd = D // H
    patches = extract_patches(x, P)                                   # (B, S, P2)
    pw = params["conv_w"].reshape(D, P * P).T
    h = patches @ pw + params["conv_b"][None, None, :]
    h = h + params["pos"][:Tp, :Fp, :].reshape(1, S, D)
    for lp in params["layers"]:
        qkv = h @ lp["in_proj_w"].T + lp["in_proj_b"]
        q = qkv[..., :D].reshape(B, S, H, hd)
        k = qkv[..., D:2 * D].reshape(B, S, H, hd)
        v = qkv[..., 2 * D:].reshape(B, S, H, hd)
        s = jnp.einsum("bqhd,bkhd->bhqk", q, k) / math.sqrt(hd)
        p = jax.nn.softmax(s, axis=-1)
        a = jnp.einsum("bhqk,bkhd->bqhd", p, v).reshape(B, S, D)
        a = a @ lp["out_w"].T + lp["out_b"]
        h = _ref_layer_norm(h + a, lp["ln1_g"], lp["ln1_b"])
        f = jnp.maximum(h @ lp["lin1_w"].T + lp["lin1_b"], 0.0)
        f = f @ lp["lin2_w"].T + lp["lin2_b"]
        h = _ref_layer_norm(h + f, lp["ln2_g"], lp["ln2_b"])
    return h.mean(axis=1)


# ----------------------------------- main -------------------------------------
if __name__ == "__main__":
    key = jax.random.PRNGKey(0)
    kx, kp = jax.random.split(key)
    x = jax.random.normal(kx, (BATCH, TIME, FREQ), jnp.float32)
    params = init_params(kp)
    slab = pack_params(params, BATCH, TIME, FREQ)

    out = jax.block_until_ready(forward(x, slab))
    ref = jax.block_until_ready(reference(x, params))

    assert out.shape == (BATCH, MODEL_DIM)
    max_diff = float(jnp.max(jnp.abs(out - ref)))
    assert jnp.allclose(out, ref, atol=1e-4, rtol=1e-4), f"mismatch: {max_diff}"

    print("KERNEL_OK")
</pallas_src>

<mosaic_0001>
module attributes {stable_mosaic.version = 11 : i64} {
  func.func @fused_encoder_kernel(%arg0: memref<32x16xf32, #tpu.memory_space<vmem>>, %arg1: memref<384x96xf32, #tpu.memory_space<vmem>>, %arg2: memref<2x32xf32, #tpu.memory_space<vmem>>, %arg3: memref<32x96xf32, #tpu.memory_space<vmem>>, %arg4: memref<32x32xf32, #tpu.memory_space<vmem>>) attributes {dimension_semantics = [], scalar_prefetch = 0 : i64, scratch_operands = 2 : i64, tpu.core_type = #tpu.core_type<tc>} {
    %c0 = arith.constant 0 : index
    %c0_0 = arith.constant 0 : index
    %0 = vector.load %arg0[%c0, %c0_0] : memref<32x16xf32, #tpu.memory_space<vmem>>, vector<32x16xf32>
    %c32 = arith.constant 32 : index
    %c0_1 = arith.constant 0 : index
    %1 = vector.load %arg1[%c32, %c0_1] : memref<384x96xf32, #tpu.memory_space<vmem>>, vector<16x32xf32>
    %cst = arith.constant dense<0.000000e+00> : vector<32x32xf32>
    %2 = tpu.matmul %0, %1, %cst {dimension_numbers = #tpu.dot_dimension_numbers<[1], [0], [0], [1], [0, 0, 1, 1], [], []>, precision = #tpu.contract_precision<fp32>} : vector<32x16xf32>, vector<16x32xf32>, vector<32x32xf32> -> vector<32x32xf32>
    %c0_2 = arith.constant 0 : index
    %c0_3 = arith.constant 0 : index
    %3 = vector.load %arg1[%c0_2, %c0_3] : memref<384x96xf32, #tpu.memory_space<vmem>>, vector<32x32xf32>
    %4 = arith.addf %2, %3 : vector<32x32xf32>
    %c48 = arith.constant 48 : index
    %c0_4 = arith.constant 0 : index
    %5 = vector.load %arg1[%c48, %c0_4] : memref<384x96xf32, #tpu.memory_space<vmem>>, vector<32x96xf32>
    %cst_5 = arith.constant dense<0.000000e+00> : vector<32x96xf32>
    %6 = tpu.matmul %4, %5, %cst_5 {dimension_numbers = #tpu.dot_dimension_numbers<[1], [0], [0], [1], [0, 0, 1, 1], [], []>, precision = #tpu.contract_precision<fp32>} : vector<32x32xf32>, vector<32x96xf32>, vector<32x96xf32> -> vector<32x96xf32>
    %c208 = arith.constant 208 : index
    %c0_6 = arith.constant 0 : index
    %7 = vector.load %arg1[%c208, %c0_6] : memref<384x96xf32, #tpu.memory_space<vmem>>, vector<1x96xf32>
    %8 = vector.broadcast %7 : vector<1x96xf32> to vector<32x96xf32>
    %9 = arith.addf %6, %8 : vector<32x96xf32>
    %c0_7 = arith.constant 0 : index
    %c0_8 = arith.constant 0 : index
    %10 = vector.load %arg3[%c0_7, %c0_8] : memref<32x96xf32, #tpu.memory_space<vmem>>, vector<32x96xf32>
    tpu.vector_store %arg3[%c0_7, %c0_8], %9 {strides = array<i32>} : memref<32x96xf32, #tpu.memory_space<vmem>>, vector<32x96xf32>,
    %c0_9 = arith.constant 0 : index
    %c0_10 = arith.constant 0 : index
    %11 = vector.load %arg3[%c0_9, %c0_10] : memref<32x96xf32, #tpu.memory_space<vmem>>, vector<16x8xf32>
    %c0_11 = arith.constant 0 : index
    %c32_12 = arith.constant 32 : index
    %12 = vector.load %arg3[%c0_11, %c32_12] : memref<32x96xf32, #tpu.memory_space<vmem>>, vector<16x8xf32>
    %c0_13 = arith.constant 0 : index
    %c64 = arith.constant 64 : index
    %13 = vector.load %arg3[%c0_13, %c64] : memref<32x96xf32, #tpu.memory_space<vmem>>, vector<16x8xf32>
    %cst_14 = arith.constant dense<0.000000e+00> : vector<16x16xf32>
    %14 = tpu.matmul %11, %12, %cst_14 {dimension_numbers = #tpu.dot_dimension_numbers<[1], [1], [0], [0], [0, 0, 1, 0], [], []>, precision = #tpu.contract_precision<fp32>} : vector<16x8xf32>, vector<16x8xf32>, vector<16x16xf32> -> vector<16x16xf32>
    %cst_15 = arith.constant 0.353553385 : f32
    %15 = vector.broadcast %cst_15 : f32 to vector<16x16xf32>
    %16 = arith.mulf %14, %15 : vector<16x16xf32>
    %cst_16 = arith.constant dense<0xFF800000> : vector<16xf32>
    %17 = vector.multi_reduction <maximumf>, %16, %cst_16 [1] : vector<16x16xf32> to vector<16xf32>
    %18 = vector.shape_cast %17 : vector<16xf32> to vector<16x1xf32>
    %19 = vector.broadcast %18 : vector<16x1xf32> to vector<16x16xf32>
    %20 = arith.subf %16, %19 : vector<16x16xf32>
    %21 = math.exp %20 : vector<16x16xf32>
    %cst_17 = arith.constant dense<0.000000e+00> : vector<16xf32>
    %22 = vector.multi_reduction <add>, %21, %cst_17 [1] : vector<16x16xf32> to vector<16xf32>
    %23 = vector.shape_cast %22 : vector<16xf32> to vector<16x1xf32>
    %24 = tpu.reciprocal %23 {approx = true} : vector<16x1xf32> -> vector<16x1xf32>
    %25 = arith.mulf %23, %24 : vector<16x1xf32>
    %cst_18 = arith.constant 2.000000e+00 : f32
    %26 = vector.broadcast %cst_18 : f32 to vector<16x1xf32>
    %27 = arith.subf %26, %25 : vector<16x1xf32>
    %28 = arith.mulf %24, %27 : vector<16x1xf32>
    %29 = vector.broadcast %28 : vector<16x1xf32> to vector<16x16xf32>
    %30 = arith.mulf %21, %29 : vector<16x16xf32>
    %cst_19 = arith.constant dense<0.000000e+00> : vector<16x8xf32>
    %31 = tpu.matmul %30, %13, %cst_19 {dimension_numbers = #tpu.dot_dimension_numbers<[1], [0], [0], [1], [0, 0, 1, 1], [], []>, precision = #tpu.contract_precision<fp32>} : vector<16x16xf32>, vector<16x8xf32>, vector<16x8xf32> -> vector<16x8xf32>
    %c0_20 = arith.constant 0 : index
    %c0_21 = arith.constant 0 : index
    %32 = vector.load %arg4[%c0_20, %c0_21] : memref<32x32xf32, #tpu.memory_space<vmem>>, vector<16x8xf32>
    tpu.vector_store %arg4[%c0_20, %c0_21], %31 {strides = array<i32>} : memref<32x32xf32, #tpu.memory_space<vmem>>, vector<16x8xf32>,
    %c0_22 = arith.constant 0 : index
    %c8 = arith.constant 8 : index
    %33 = vector.load %arg3[%c0_22, %c8] : memref<32x96xf32, #tpu.memory_space<vmem>>, vector<16x8xf32>
    %c0_23 = arith.constant 0 : index
    %c40 = arith.constant 40 : index
    %34 = vector.load %arg3[%c0_23, %c40] : memref<32x96xf32, #tpu.memory_space<vmem>>, vector<16x8xf32>
    %c0_24 = arith.constant 0 : index
    %c72 = arith.constant 72 : index
    %35 = vector.load %arg3[%c0_24, %c72] : memref<32x96xf32, #tpu.memory_space<vmem>>, vector<16x8xf32>
    %cst_25 = arith.constant dense<0.000000e+00> : vector<16x16xf32>
    %36 = tpu.matmul %33, %34, %cst_25 {dimension_numbers = #tpu.dot_dimension_numbers<[1], [1], [0], [0], [0, 0, 1, 0], [], []>, precision = #tpu.contract_precision<fp32>} : vector<16x8xf32>, vector<16x8xf32>, vector<16x16xf32> -> vector<16x16xf32>
    %cst_26 = arith.constant 0.353553385 : f32
    %37 = vector.broadcast %cst_26 : f32 to vector<16x16xf32>
    %38 = arith.mulf %36, %37 : vector<16x16xf32>
    %cst_27 = arith.constant dense<0xFF800000> : vector<16xf32>
    %39 = vector.multi_reduction <maximumf>, %38, %cst_27 [1] : vector<16x16xf32> to vector<16xf32>
    %40 = vector.shape_cast %39 : vector<16xf32> to vector<16x1xf32>
    %41 = vector.broadcast %40 : vector<16x1xf32> to vector<16x16xf32>
    %42 = arith.subf %38, %41 : vector<16x16xf32>
    %43 = math.exp %42 : vector<16x16xf32>
    %cst_28 = arith.constant dense<0.000000e+00> : vector<16xf32>
    %44 = vector.multi_reduction <add>, %43, %cst_28 [1] : vector<16x16xf32> to vector<16xf32>
    %45 = vector.shape_cast %44 : vector<16xf32> to vector<16x1xf32>
    %46 = tpu.reciprocal %45 {approx = true} : vector<16x1xf32> -> vector<16x1xf32>
    %47 = arith.mulf %45, %46 : vector<16x1xf32>
    %cst_29 = arith.constant 2.000000e+00 : f32
    %48 = vector.broadcast %cst_29 : f32 to vector<16x1xf32>
    %49 = arith.subf %48, %47 : vector<16x1xf32>
    %50 = arith.mulf %46, %49 : vector<16x1xf32>
    %51 = vector.broadcast %50 : vector<16x1xf32> to vector<16x16xf32>
    %52 = arith.mulf %43, %51 : vector<16x16xf32>
    %cst_30 = arith.constant dense<0.000000e+00> : vector<16x8xf32>
    %53 = tpu.matmul %52, %35, %cst_30 {dimension_numbers = #tpu.dot_dimension_numbers<[1], [0], [0], [1], [0, 0, 1, 1], [], []>, precision = #tpu.contract_precision<fp32>} : vector<16x16xf32>, vector<16x8xf32>, vector<16x8xf32> -> vector<16x8xf32>
    %c0_31 = arith.constant 0 : index
    %c8_32 = arith.constant 8 : index
    %54 = vector.load %arg4[%c0_31, %c8_32] : memref<32x32xf32, #tpu.memory_space<vmem>>, vector<16x8xf32>
    tpu.vector_store %arg4[%c0_31, %c8_32], %53 {strides = array<i32>} : memref<32x32xf32, #tpu.memory_space<vmem>>, vector<16x8xf32>,
    %c0_33 = arith.constant 0 : index
    %c16 = arith.constant 16 : index
    %55 = vector.load %arg3[%c0_33, %c16] : memref<32x96xf32, #tpu.memory_space<vmem>>, vector<16x8xf32>
    %c0_34 = arith.constant 0 : index
    %c48_35 = arith.constant 48 : index
    %56 = vector.load %arg3[%c0_34, %c48_35] : memref<32x96xf32, #tpu.memory_space<vmem>>, vector<16x8xf32>
    %c0_36 = arith.constant 0 : index
    %c80 = arith.constant 80 : index
    %57 = vector.load %arg3[%c0_36, %c80] : memref<32x96xf32, #tpu.memory_space<vmem>>, vector<16x8xf32>
    %cst_37 = arith.constant dense<0.000000e+00> : vector<16x16xf32>
    %58 = tpu.matmul %55, %56, %cst_37 {dimension_numbers = #tpu.dot_dimension_numbers<[1], [1], [0], [0], [0, 0, 1, 0], [], []>, precision = #tpu.contract_precision<fp32>} : vector<16x8xf32>, vector<16x8xf32>, vector<16x16xf32> -> vector<16x16xf32>
    %cst_38 = arith.constant 0.353553385 : f32
    %59 = vector.broadcast %cst_38 : f32 to vector<16x16xf32>
    %60 = arith.mulf %58, %59 : vector<16x16xf32>
    %cst_39 = arith.constant dense<0xFF800000> : vector<16xf32>
    %61 = vector.multi_reduction <maximumf>, %60, %cst_39 [1] : vector<16x16xf32> to vector<16xf32>
    %62 = vector.shape_cast %61 : vector<16xf32> to vector<16x1xf32>
    %63 = vector.broadcast %62 : vector<16x1xf32> to vector<16x16xf32>
    %64 = arith.subf %60, %63 : vector<16x16xf32>
    %65 = math.exp %64 : vector<16x16xf32>
    %cst_40 = arith.constant dense<0.000000e+00> : vector<16xf32>
    %66 = vector.multi_reduction <add>, %65, %cst_40 [1] : vector<16x16xf32> to vector<16xf32>
    %67 = vector.shape_cast %66 : vector<16xf32> to vector<16x1xf32>
    %68 = tpu.reciprocal %67 {approx = true} : vector<16x1xf32> -> vector<16x1xf32>
    %69 = arith.mulf %67, %68 : vector<16x1xf32>
    %cst_41 = arith.constant 2.000000e+00 : f32
    %70 = vector.broadcast %cst_41 : f32 to vector<16x1xf32>
    %71 = arith.subf %70, %69 : vector<16x1xf32>
    %72 = arith.mulf %68, %71 : vector<16x1xf32>
    %73 = vector.broadcast %72 : vector<16x1xf32> to vector<16x16xf32>
    %74 = arith.mulf %65, %73 : vector<16x16xf32>
    %cst_42 = arith.constant dense<0.000000e+00> : vector<16x8xf32>
    %75 = tpu.matmul %74, %57, %cst_42 {dimension_numbers = #tpu.dot_dimension_numbers<[1], [0], [0], [1], [0, 0, 1, 1], [], []>, precision = #tpu.contract_precision<fp32>} : vector<16x16xf32>, vector<16x8xf32>, vector<16x8xf32> -> vector<16x8xf32>
    %c0_43 = arith.constant 0 : index
    %c16_44 = arith.constant 16 : index
    %76 = vector.load %arg4[%c0_43, %c16_44] : memref<32x32xf32, #tpu.memory_space<vmem>>, vector<16x8xf32>
    tpu.vector_store %arg4[%c0_43, %c16_44], %75 {strides = array<i32>} : memref<32x32xf32, #tpu.memory_space<vmem>>, vector<16x8xf32>,
    %c0_45 = arith.constant 0 : index
    %c24 = arith.constant 24 : index
    %77 = vector.load %arg3[%c0_45, %c24] : memref<32x96xf32, #tpu.memory_space<vmem>>, vector<16x8xf32>
    %c0_46 = arith.constant 0 : index
    %c56 = arith.constant 56 : index
    %78 = vector.load %arg3[%c0_46, %c56] : memref<32x96xf32, #tpu.memory_space<vmem>>, vector<16x8xf32>
    %c0_47 = arith.constant 0 : index
    %c88 = arith.constant 88 : index
    %79 = vector.load %arg3[%c0_47, %c88] : memref<32x96xf32, #tpu.memory_space<vmem>>, vector<16x8xf32>
    %cst_48 = arith.constant dense<0.000000e+00> : vector<16x16xf32>
    %80 = tpu.matmul %77, %78, %cst_48 {dimension_numbers = #tpu.dot_dimension_numbers<[1], [1], [0], [0], [0, 0, 1, 0], [], []>, precision = #tpu.contract_precision<fp32>} : vector<16x8xf32>, vector<16x8xf32>, vector<16x16xf32> -> vector<16x16xf32>
    %cst_49 = arith.constant 0.353553385 : f32
    %81 = vector.broadcast %cst_49 : f32 to vector<16x16xf32>
    %82 = arith.mulf %80, %81 : vector<16x16xf32>
    %cst_50 = arith.constant dense<0xFF800000> : vector<16xf32>
    %83 = vector.multi_reduction <maximumf>, %82, %cst_50 [1] : vector<16x16xf32> to vector<16xf32>
    %84 = vector.shape_cast %83 : vector<16xf32> to vector<16x1xf32>
    %85 = vector.broadcast %84 : vector<16x1xf32> to vector<16x16xf32>
    %86 = arith.subf %82, %85 : vector<16x16xf32>
    %87 = math.exp %86 : vector<16x16xf32>
    %cst_51 = arith.constant dense<0.000000e+00> : vector<16xf32>
    %88 = vector.multi_reduction <add>, %87, %cst_51 [1] : vector<16x16xf32> to vector<16xf32>
    %89 = vector.shape_cast %88 : vector<16xf32> to vector<16x1xf32>
    %90 = tpu.reciprocal %89 {approx = true} : vector<16x1xf32> -> vector<16x1xf32>
    %91 = arith.mulf %89, %90 : vector<16x1xf32>
    %cst_52 = arith.constant 2.000000e+00 : f32
    %92 = vector.broadcast %cst_52 : f32 to vector<16x1xf32>
    %93 = arith.subf %92, %91 : vector<16x1xf32>
    %94 = arith.mulf %90, %93 : vector<16x1xf32>
    %95 = vector.broadcast %94 : vector<16x1xf32> to vector<16x16xf32>
    %96 = arith.mulf %87, %95 : vector<16x16xf32>
    %cst_53 = arith.constant dense<0.000000e+00> : vector<16x8xf32>
    %97 = tpu.matmul %96, %79, %cst_53 {dimension_numbers = #tpu.dot_dimension_numbers<[1], [0], [0], [1], [0, 0, 1, 1], [], []>, precision = #tpu.contract_precision<fp32>} : vector<16x16xf32>, vector<16x8xf32>, vector<16x8xf32> -> vector<16x8xf32>
    %c0_54 = arith.constant 0 : index
    %c24_55 = arith.constant 24 : index
    %98 = vector.load %arg4[%c0_54, %c24_55] : memref<32x32xf32, #tpu.memory_space<vmem>>, vector<16x8xf32>
    tpu.vector_store %arg4[%c0_54, %c24_55], %97 {strides = array<i32>} : memref<32x32xf32, #tpu.memory_space<vmem>>, vector<16x8xf32>,
    %c16_56 = arith.constant 16 : index
    %c0_57 = arith.constant 0 : index
    %99 = vector.load %arg3[%c16_56, %c0_57] : memref<32x96xf32, #tpu.memory_space<vmem>>, vector<16x8xf32>
    %c16_58 = arith.constant 16 : index
    %c32_59 = arith.constant 32 : index
    %100 = vector.load %arg3[%c16_58, %c32_59] : memref<32x96xf32, #tpu.memory_space<vmem>>, vector<16x8xf32>
    %c16_60 = arith.constant 16 : index
    %c64_61 = arith.constant 64 : index
    %101 = vector.load %arg3[%c16_60, %c64_61] : memref<32x96xf32, #tpu.memory_space<vmem>>, vector<16x8xf32>
    %cst_62 = arith.constant dense<0.000000e+00> : vector<16x16xf32>
    %102 = tpu.matmul %99, %100, %cst_62 {dimension_numbers = #tpu.dot_dimension_numbers<[1], [1], [0], [0], [0, 0, 1, 0], [], []>, precision = #tpu.contract_precision<fp32>} : vector<16x8xf32>, vector<16x8xf32>, vector<16x16xf32> -> vector<16x16xf32>
    %cst_63 = arith.constant 0.353553385 : f32
    %103 = vector.broadcast %cst_63 : f32 to vector<16x16xf32>
    %104 = arith.mulf %102, %103 : vector<16x16xf32>
    %cst_64 = arith.constant dense<0xFF800000> : vector<16xf32>
    %105 = vector.multi_reduction <maximumf>, %104, %cst_64 [1] : vector<16x16xf32> to vector<16xf32>
    %106 = vector.shape_cast %105 : vector<16xf32> to vector<16x1xf32>
    %107 = vector.broadcast %106 : vector<16x1xf32> to vector<16x16xf32>
    %108 = arith.subf %104, %107 : vector<16x16xf32>
    %109 = math.exp %108 : vector<16x16xf32>
    %cst_65 = arith.constant dense<0.000000e+00> : vector<16xf32>
    %110 = vector.multi_reduction <add>, %109, %cst_65 [1] : vector<16x16xf32> to vector<16xf32>
    %111 = vector.shape_cast %110 : vector<16xf32> to vector<16x1xf32>
    %112 = tpu.reciprocal %111 {approx = true} : vector<16x1xf32> -> vector<16x1xf32>
    %113 = arith.mulf %111, %112 : vector<16x1xf32>
    %cst_66 = arith.constant 2.000000e+00 : f32
    %114 = vector.broadcast %cst_66 : f32 to vector<16x1xf32>
    %115 = arith.subf %114, %113 : vector<16x1xf32>
    %116 = arith.mulf %112, %115 : vector<16x1xf32>
    %117 = vector.broadcast %116 : vector<16x1xf32> to vector<16x16xf32>
    %118 = arith.mulf %109, %117 : vector<16x16xf32>
    %cst_67 = arith.constant dense<0.000000e+00> : vector<16x8xf32>
    %119 = tpu.matmul %118, %101, %cst_67 {dimension_numbers = #tpu.dot_dimension_numbers<[1], [0], [0], [1], [0, 0, 1, 1], [], []>, precision = #tpu.contract_precision<fp32>} : vector<16x16xf32>, vector<16x8xf32>, vector<16x8xf32> -> vector<16x8xf32>
    %c16_68 = arith.constant 16 : index
    %c0_69 = arith.constant 0 : index
    %120 = vector.load %arg4[%c16_68, %c0_69] : memref<32x32xf32, #tpu.memory_space<vmem>>, vector<16x8xf32>
    tpu.vector_store %arg4[%c16_68, %c0_69], %119 {strides = array<i32>} : memref<32x32xf32, #tpu.memory_space<vmem>>, vector<16x8xf32>,
    %c16_70 = arith.constant 16 : index
    %c8_71 = arith.constant 8 : index
    %121 = vector.load %arg3[%c16_70, %c8_71] : memref<32x96xf32, #tpu.memory_space<vmem>>, vector<16x8xf32>
    %c16_72 = arith.constant 16 : index
    %c40_73 = arith.constant 40 : index
    %122 = vector.load %arg3[%c16_72, %c40_73] : memref<32x96xf32, #tpu.memory_space<vmem>>, vector<16x8xf32>
    %c16_74 = arith.constant 16 : index
    %c72_75 = arith.constant 72 : index
    %123 = vector.load %arg3[%c16_74, %c72_75] : memref<32x96xf32, #tpu.memory_space<vmem>>, vector<16x8xf32>
    %cst_76 = arith.constant dense<0.000000e+00> : vector<16x16xf32>
    %124 = tpu.matmul %121, %122, %cst_76 {dimension_numbers = #tpu.dot_dimension_numbers<[1], [1], [0], [0], [0, 0, 1, 0], [], []>, precision = #tpu.contract_precision<fp32>} : vector<16x8xf32>, vector<16x8xf32>, vector<16x16xf32> -> vector<16x16xf32>
    %cst_77 = arith.constant 0.353553385 : f32
    %125 = vector.broadcast %cst_77 : f32 to vector<16x16xf32>
    %126 = arith.mulf %124, %125 : vector<16x16xf32>
    %cst_78 = arith.constant dense<0xFF800000> : vector<16xf32>
    %127 = vector.multi_reduction <maximumf>, %126, %cst_78 [1] : vector<16x16xf32> to vector<16xf32>
    %128 = vector.shape_cast %127 : vector<16xf32> to vector<16x1xf32>
    %129 = vector.broadcast %128 : vector<16x1xf32> to vector<16x16xf32>
    %130 = arith.subf %126, %129 : vector<16x16xf32>
    %131 = math.exp %130 : vector<16x16xf32>
    %cst_79 = arith.constant dense<0.000000e+00> : vector<16xf32>
    %132 = vector.multi_reduction <add>, %131, %cst_79 [1] : vector<16x16xf32> to vector<16xf32>
    %133 = vector.shape_cast %132 : vector<16xf32> to vector<16x1xf32>
    %134 = tpu.reciprocal %133 {approx = true} : vector<16x1xf32> -> vector<16x1xf32>
    %135 = arith.mulf %133, %134 : vector<16x1xf32>
    %cst_80 = arith.constant 2.000000e+00 : f32
    %136 = vector.broadcast %cst_80 : f32 to vector<16x1xf32>
    %137 = arith.subf %136, %135 : vector<16x1xf32>
    %138 = arith.mulf %134, %137 : vector<16x1xf32>
    %139 = vector.broadcast %138 : vector<16x1xf32> to vector<16x16xf32>
    %140 = arith.mulf %131, %139 : vector<16x16xf32>
    %cst_81 = arith.constant dense<0.000000e+00> : vector<16x8xf32>
    %141 = tpu.matmul %140, %123, %cst_81 {dimension_numbers = #tpu.dot_dimension_numbers<[1], [0], [0], [1], [0, 0, 1, 1], [], []>, precision = #tpu.contract_precision<fp32>} : vector<16x16xf32>, vector<16x8xf32>, vector<16x8xf32> -> vector<16x8xf32>
    %c16_82 = arith.constant 16 : index
    %c8_83 = arith.constant 8 : index
    %142 = vector.load %arg4[%c16_82, %c8_83] : memref<32x32xf32, #tpu.memory_space<vmem>>, vector<16x8xf32>
    tpu.vector_store %arg4[%c16_82, %c8_83], %141 {strides = array<i32>} : memref<32x32xf32, #tpu.memory_space<vmem>>, vector<16x8xf32>,
    %c16_84 = arith.constant 16 : index
    %c16_85 = arith.constant 16 : index
    %143 = vector.load %arg3[%c16_84, %c16_85] : memref<32x96xf32, #tpu.memory_space<vmem>>, vector<16x8xf32>
    %c16_86 = arith.constant 16 : index
    %c48_87 = arith.constant 48 : index
    %144 = vector.load %arg3[%c16_86, %c48_87] : memref<32x96xf32, #tpu.memory_space<vmem>>, vector<16x8xf32>
    %c16_88 = arith.constant 16 : index
    %c80_89 = arith.constant 80 : index
    %145 = vector.load %arg3[%c16_88, %c80_89] : memref<32x96xf32, #tpu.memory_space<vmem>>, vector<16x8xf32>
    %cst_90 = arith.constant dense<0.000000e+00> : vector<16x16xf32>
    %146 = tpu.matmul %143, %144, %cst_90 {dimension_numbers = #tpu.dot_dimension_numbers<[1], [1], [0], [0], [0, 0, 1, 0], [], []>, precision = #tpu.contract_precision<fp32>} : vector<16x8xf32>, vector<16x8xf32>, vector<16x16xf32> -> vector<16x16xf32>
    %cst_91 = arith.constant 0.353553385 : f32
    %147 = vector.broadcast %cst_91 : f32 to vector<16x16xf32>
    %148 = arith.mulf %146, %147 : vector<16x16xf32>
    %cst_92 = arith.constant dense<0xFF800000> : vector<16xf32>
    %149 = vector.multi_reduction <maximumf>, %148, %cst_92 [1] : vector<16x16xf32> to vector<16xf32>
    %150 = vector.shape_cast %149 : vector<16xf32> to vector<16x1xf32>
    %151 = vector.broadcast %150 : vector<16x1xf32> to vector<16x16xf32>
    %152 = arith.subf %148, %151 : vector<16x16xf32>
    %153 = math.exp %152 : vector<16x16xf32>
    %cst_93 = arith.constant dense<0.000000e+00> : vector<16xf32>
    %154 = vector.multi_reduction <add>, %153, %cst_93 [1] : vector<16x16xf32> to vector<16xf32>
    %155 = vector.shape_cast %154 : vector<16xf32> to vector<16x1xf32>
    %156 = tpu.reciprocal %155 {approx = true} : vector<16x1xf32> -> vector<16x1xf32>
    %157 = arith.mulf %155, %156 : vector<16x1xf32>
    %cst_94 = arith.constant 2.000000e+00 : f32
    %158 = vector.broadcast %cst_94 : f32 to vector<16x1xf32>
    %159 = arith.subf %158, %157 : vector<16x1xf32>
    %160 = arith.mulf %156, %159 : vector<16x1xf32>
    %161 = vector.broadcast %160 : vector<16x1xf32> to vector<16x16xf32>
    %162 = arith.mulf %153, %161 : vector<16x16xf32>
    %cst_95 = arith.constant dense<0.000000e+00> : vector<16x8xf32>
    %163 = tpu.matmul %162, %145, %cst_95 {dimension_numbers = #tpu.dot_dimension_numbers<[1], [0], [0], [1], [0, 0, 1, 1], [], []>, precision = #tpu.contract_precision<fp32>} : vector<16x16xf32>, vector<16x8xf32>, vector<16x8xf32> -> vector<16x8xf32>
    %c16_96 = arith.constant 16 : index
    %c16_97 = arith.constant 16 : index
    %164 = vector.load %arg4[%c16_96, %c16_97] : memref<32x32xf32, #tpu.memory_space<vmem>>, vector<16x8xf32>
    tpu.vector_store %arg4[%c16_96, %c16_97], %163 {strides = array<i32>} : memref<32x32xf32, #tpu.memory_space<vmem>>, vector<16x8xf32>,
    %c16_98 = arith.constant 16 : index
    %c24_99 = arith.constant 24 : index
    %165 = vector.load %arg3[%c16_98, %c24_99] : memref<32x96xf32, #tpu.memory_space<vmem>>, vector<16x8xf32>
    %c16_100 = arith.constant 16 : index
    %c56_101 = arith.constant 56 : index
    %166 = vector.load %arg3[%c16_100, %c56_101] : memref<32x96xf32, #tpu.memory_space<vmem>>, vector<16x8xf32>
    %c16_102 = arith.constant 16 : index
    %c88_103 = arith.constant 88 : index
    %167 = vector.load %arg3[%c16_102, %c88_103] : memref<32x96xf32, #tpu.memory_space<vmem>>, vector<16x8xf32>
    %cst_104 = arith.constant dense<0.000000e+00> : vector<16x16xf32>
    %168 = tpu.matmul %165, %166, %cst_104 {dimension_numbers = #tpu.dot_dimension_numbers<[1], [1], [0], [0], [0, 0, 1, 0], [], []>, precision = #tpu.contract_precision<fp32>} : vector<16x8xf32>, vector<16x8xf32>, vector<16x16xf32> -> vector<16x16xf32>
    %cst_105 = arith.constant 0.353553385 : f32
    %169 = vector.broadcast %cst_105 : f32 to vector<16x16xf32>
    %170 = arith.mulf %168, %169 : vector<16x16xf32>
    %cst_106 = arith.constant dense<0xFF800000> : vector<16xf32>
    %171 = vector.multi_reduction <maximumf>, %170, %cst_106 [1] : vector<16x16xf32> to vector<16xf32>
    %172 = vector.shape_cast %171 : vector<16xf32> to vector<16x1xf32>
    %173 = vector.broadcast %172 : vector<16x1xf32> to vector<16x16xf32>
    %174 = arith.subf %170, %173 : vector<16x16xf32>
    %175 = math.exp %174 : vector<16x16xf32>
    %cst_107 = arith.constant dense<0.000000e+00> : vector<16xf32>
    %176 = vector.multi_reduction <add>, %175, %cst_107 [1] : vector<16x16xf32> to vector<16xf32>
    %177 = vector.shape_cast %176 : vector<16xf32> to vector<16x1xf32>
    %178 = tpu.reciprocal %177 {approx = true} : vector<16x1xf32> -> vector<16x1xf32>
    %179 = arith.mulf %177, %178 : vector<16x1xf32>
    %cst_108 = arith.constant 2.000000e+00 : f32
    %180 = vector.broadcast %cst_108 : f32 to vector<16x1xf32>
    %181 = arith.subf %180, %179 : vector<16x1xf32>
    %182 = arith.mulf %178, %181 : vector<16x1xf32>
    %183 = vector.broadcast %182 : vector<16x1xf32> to vector<16x16xf32>
    %184 = arith.mulf %175, %183 : vector<16x16xf32>
    %cst_109 = arith.constant dense<0.000000e+00> : vector<16x8xf32>
    %185 = tpu.matmul %184, %167, %cst_109 {dimension_numbers = #tpu.dot_dimension_numbers<[1], [0], [0], [1], [0, 0, 1, 1], [], []>, precision = #tpu.contract_precision<fp32>} : vector<16x16xf32>, vector<16x8xf32>, vector<16x8xf32> -> vector<16x8xf32>
    %c16_110 = arith.constant 16 : index
    %c24_111 = arith.constant 24 : index
    %186 = vector.load %arg4[%c16_110, %c24_111] : memref<32x32xf32, #tpu.memory_space<vmem>>, vector<16x8xf32>
    tpu.vector_store %arg4[%c16_110, %c24_111], %185 {strides = array<i32>} : memref<32x32xf32, #tpu.memory_space<vmem>>, vector<16x8xf32>,
    %c0_112 = arith.constant 0 : index
    %c0_113 = arith.constant 0 : index
    %187 = vector.load %arg4[%c0_112, %c0_113] : memref<32x32xf32, #tpu.memory_space<vmem>>, vector<32x32xf32>
    %c80_114 = arith.constant 80 : index
    %c0_115 = arith.constant 0 : index
    %188 = vector.load %arg1[%c80_114, %c0_115] : memref<384x96xf32, #tpu.memory_space<vmem>>, vector<32x32xf32>
    %cst_116 = arith.constant dense<0.000000e+00> : vector<32x32xf32>
    %189 = tpu.matmul %187, %188, %cst_116 {dimension_numbers = #tpu.dot_dimension_numbers<[1], [0], [0], [1], [0, 0, 1, 1], [], []>, precision = #tpu.contract_precision<fp32>} : vector<32x32xf32>, vector<32x32xf32>, vector<32x32xf32> -> vector<32x32xf32>
    %c209 = arith.constant 209 : index
    %c0_117 = arith.constant 0 : index
    %190 = vector.load %arg1[%c209, %c0_117] : memref<384x96xf32, #tpu.memory_space<vmem>>, vector<1x32xf32>
    %191 = vector.broadcast %190 : vector<1x32xf32> to vector<32x32xf32>
    %192 = arith.addf %189, %191 : vector<32x32xf32>
    %193 = arith.addf %4, %192 : vector<32x32xf32>
    %c212 = arith.constant 212 : index
    %c0_118 = arith.constant 0 : index
    %194 = vector.load %arg1[%c212, %c0_118] : memref<384x96xf32, #tpu.memory_space<vmem>>, vector<1x32xf32>
    %c213 = arith.constant 213 : index
    %c0_119 = arith.constant 0 : index
    %195 = vector.load %arg1[%c213, %c0_119] : memref<384x96xf32, #tpu.memory_space<vmem>>, vector<1x32xf32>
    %cst_120 = arith.constant dense<0.000000e+00> : vector<32xf32>
    %196 = vector.multi_reduction <add>, %193, %cst_120 [1] : vector<32x32xf32> to vector<32xf32>
    %197 = vector.shape_cast %196 : vector<32xf32> to vector<32x1xf32>
    %cst_121 = arith.constant 3.200000e+01 : f32
    %198 = vector.broadcast %cst_121 : f32 to vector<32x1xf32>
    %199 = arith.divf %197, %198 : vector<32x1xf32>
    %200 = arith.mulf %193, %193 : vector<32x32xf32>
    %cst_122 = arith.constant dense<0.000000e+00> : vector<32xf32>
    %201 = vector.multi_reduction <add>, %200, %cst_122 [1] : vector<32x32xf32> to vector<32xf32>
    %202 = vector.shape_cast %201 : vector<32xf32> to vector<32x1xf32>
    %cst_123 = arith.constant 3.200000e+01 : f32
    %203 = vector.broadcast %cst_123 : f32 to vector<32x1xf32>
    %204 = arith.divf %202, %203 : vector<32x1xf32>
    %205 = arith.mulf %199, %199 : vector<32x1xf32>
    %206 = arith.subf %204, %205 : vector<32x1xf32>
    %207 = vector.broadcast %199 : vector<32x1xf32> to vector<32x32xf32>
    %208 = arith.subf %193, %207 : vector<32x32xf32>
    %cst_124 = arith.constant 9.99999974E-6 : f32
    %209 = vector.broadcast %cst_124 : f32 to vector<32x1xf32>
    %210 = arith.addf %206, %209 : vector<32x1xf32>
    %211 = math.rsqrt %210 : vector<32x1xf32>
    %212 = vector.broadcast %211 : vector<32x1xf32> to vector<32x32xf32>
    %213 = arith.mulf %208, %212 : vector<32x32xf32>
    %214 = vector.broadcast %194 : vector<1x32xf32> to vector<32x32xf32>
    %215 = arith.mulf %213, %214 : vector<32x32xf32>
    %216 = vector.broadcast %195 : vector<1x32xf32> to vector<32x32xf32>
    %217 = arith.addf %215, %216 : vector<32x32xf32>
    %c112 = arith.constant 112 : index
    %c0_125 = arith.constant 0 : index
    %218 = vector.load %arg1[%c112, %c0_125] : memref<384x96xf32, #tpu.memory_space<vmem>>, vector<32x64xf32>
    %cst_126 = arith.constant dense<0.000000e+00> : vector<32x64xf32>
    %219 = tpu.matmul %217, %218, %cst_126 {dimension_numbers = #tpu.dot_dimension_numbers<[1], [0], [0], [1], [0, 0, 1, 1], [], []>, precision = #tpu.contract_precision<fp32>} : vector<32x32xf32>, vector<32x64xf32>, vector<32x64xf32> -> vector<32x64xf32>
    %c210 = arith.constant 210 : index
    %c0_127 = arith.constant 0 : index
    %220 = vector.load %arg1[%c210, %c0_127] : memref<384x96xf32, #tpu.memory_space<vmem>>, vector<1x64xf32>
    %221 = vector.broadcast %220 : vector<1x64xf32> to vector<32x64xf32>
    %222 = arith.addf %219, %221 : vector<32x64xf32>
    %cst_128 = arith.constant 0.000000e+00 : f32
    %223 = vector.broadcast %cst_128 : f32 to vector<32x64xf32>
    %224 = arith.maximumf %222, %223 : vector<32x64xf32>
    %c144 = arith.constant 144 : index
    %c0_129 = arith.constant 0 : index
    %225 = vector.load %arg1[%c144, %c0_129] : memref<384x96xf32, #tpu.memory_space<vmem>>, vector<64x32xf32>
    %cst_130 = arith.constant dense<0.000000e+00> : vector<32x32xf32>
    %226 = tpu.matmul %224, %225, %cst_130 {dimension_numbers = #tpu.dot_dimension_numbers<[1], [0], [0], [1], [0, 0, 1, 1], [], []>, precision = #tpu.contract_precision<fp32>} : vector<32x64xf32>, vector<64x32xf32>, vector<32x32xf32> -> vector<32x32xf32>
    %c211 = arith.constant 211 : index
    %c0_131 = arith.constant 0 : index
    %227 = vector.load %arg1[%c211, %c0_131] : memref<384x96xf32, #tpu.memory_space<vmem>>, vector<1x32xf32>
    %228 = vector.broadcast %227 : vector<1x32xf32> to vector<32x32xf32>
    %229 = arith.addf %226, %228 : vector<32x32xf32>
    %230 = arith.addf %217, %229 : vector<32x32xf32>
    %c214 = arith.constant 214 : index
    %c0_132 = arith.constant 0 : index
    %231 = vector.load %arg1[%c214, %c0_132] : memref<384x96xf32, #tpu.memory_space<vmem>>, vector<1x32xf32>
    %c215 = arith.constant 215 : index
    %c0_133 = arith.constant 0 : index
    %232 = vector.load %arg1[%c215, %c0_133] : memref<384x96xf32, #tpu.memory_space<vmem>>, vector<1x32xf32>
    %cst_134 = arith.constant dense<0.000000e+00> : vector<32xf32>
    %233 = vector.multi_reduction <add>, %230, %cst_134 [1] : vector<32x32xf32> to vector<32xf32>
    %234 = vector.shape_cast %233 : vector<32xf32> to vector<32x1xf32>
    %cst_135 = arith.constant 3.200000e+01 : f32
    %235 = vector.broadcast %cst_135 : f32 to vector<32x1xf32>
    %236 = arith.divf %234, %235 : vector<32x1xf32>
    %237 = arith.mulf %230, %230 : vector<32x32xf32>
    %cst_136 = arith.constant dense<0.000000e+00> : vector<32xf32>
    %238 = vector.multi_reduction <add>, %237, %cst_136 [1] : vector<32x32xf32> to vector<32xf32>
    %239 = vector.shape_cast %238 : vector<32xf32> to vector<32x1xf32>
    %cst_137 = arith.constant 3.200000e+01 : f32
    %240 = vector.broadcast %cst_137 : f32 to vector<32x1xf32>
    %241 = arith.divf %239, %240 : vector<32x1xf32>
    %242 = arith.mulf %236, %236 : vector<32x1xf32>
    %243 = arith.subf %241, %242 : vector<32x1xf32>
    %244 = vector.broadcast %236 : vector<32x1xf32> to vector<32x32xf32>
    %245 = arith.subf %230, %244 : vector<32x32xf32>
    %cst_138 = arith.constant 9.99999974E-6 : f32
    %246 = vector.broadcast %cst_138 : f32 to vector<32x1xf32>
    %247 = arith.addf %243, %246 : vector<32x1xf32>
    %248 = math.rsqrt %247 : vector<32x1xf32>
    %249 = vector.broadcast %248 : vector<32x1xf32> to vector<32x32xf32>
    %250 = arith.mulf %245, %249 : vector<32x32xf32>
    %251 = vector.broadcast %231 : vector<1x32xf32> to vector<32x32xf32>
    %252 = arith.mulf %250, %251 : vector<32x32xf32>
    %253 = vector.broadcast %232 : vector<1x32xf32> to vector<32x32xf32>
    %254 = arith.addf %252, %253 : vector<32x32xf32>
    %c216 = arith.constant 216 : index
    %c0_139 = arith.constant 0 : index
    %255 = vector.load %arg1[%c216, %c0_139] : memref<384x96xf32, #tpu.memory_space<vmem>>, vector<32x96xf32>
    %cst_140 = arith.constant dense<0.000000e+00> : vector<32x96xf32>
    %256 = tpu.matmul %254, %255, %cst_140 {dimension_numbers = #tpu.dot_dimension_numbers<[1], [0], [0], [1], [0, 0, 1, 1], [], []>, precision = #tpu.contract_precision<fp32>} : vector<32x32xf32>, vector<32x96xf32>, vector<32x96xf32> -> vector<32x96xf32>
    %c376 = arith.constant 376 : index
    %c0_141 = arith.constant 0 : index
    %257 = vector.load %arg1[%c376, %c0_141] : memref<384x96xf32, #tpu.memory_space<vmem>>, vector<1x96xf32>
    %258 = vector.broadcast %257 : vector<1x96xf32> to vector<32x96xf32>
    %259 = arith.addf %256, %258 : vector<32x96xf32>
    %c0_142 = arith.constant 0 : index
    %c0_143 = arith.constant 0 : index
    %260 = vector.load %arg3[%c0_142, %c0_143] : memref<32x96xf32, #tpu.memory_space<vmem>>, vector<32x96xf32>
    tpu.vector_store %arg3[%c0_142, %c0_143], %259 {strides = array<i32>} : memref<32x96xf32, #tpu.memory_space<vmem>>, vector<32x96xf32>,
    %c0_144 = arith.constant 0 : index
    %c0_145 = arith.constant 0 : index
    %261 = vector.load %arg3[%c0_144, %c0_145] : memref<32x96xf32, #tpu.memory_space<vmem>>, vector<16x8xf32>
    %c0_146 = arith.constant 0 : index
    %c32_147 = arith.constant 32 : index
    %262 = vector.load %arg3[%c0_146, %c32_147] : memref<32x96xf32, #tpu.memory_space<vmem>>, vector<16x8xf32>
    %c0_148 = arith.constant 0 : index
    %c64_149 = arith.constant 64 : index
    %263 = vector.load %arg3[%c0_148, %c64_149] : memref<32x96xf32, #tpu.memory_space<vmem>>, vector<16x8xf32>
    %cst_150 = arith.constant dense<0.000000e+00> : vector<16x16xf32>
    %264 = tpu.matmul %261, %262, %cst_150 {dimension_numbers = #tpu.dot_dimension_numbers<[1], [1], [0], [0], [0, 0, 1, 0], [], []>, precision = #tpu.contract_precision<fp32>} : vector<16x8xf32>, vector<16x8xf32>, vector<16x16xf32> -> vector<16x16xf32>
    %cst_151 = arith.constant 0.353553385 : f32
    %265 = vector.broadcast %cst_151 : f32 to vector<16x16xf32>
    %266 = arith.mulf %264, %265 : vector<16x16xf32>
    %cst_152 = arith.constant dense<0xFF800000> : vector<16xf32>
    %267 = vector.multi_reduction <maximumf>, %266, %cst_152 [1] : vector<16x16xf32> to vector<16xf32>
    %268 = vector.shape_cast %267 : vector<16xf32> to vector<16x1xf32>
    %269 = vector.broadcast %268 : vector<16x1xf32> to vector<16x16xf32>
    %270 = arith.subf %266, %269 : vector<16x16xf32>
    %271 = math.exp %270 : vector<16x16xf32>
    %cst_153 = arith.constant dense<0.000000e+00> : vector<16xf32>
    %272 = vector.multi_reduction <add>, %271, %cst_153 [1] : vector<16x16xf32> to vector<16xf32>
    %273 = vector.shape_cast %272 : vector<16xf32> to vector<16x1xf32>
    %274 = tpu.reciprocal %273 {approx = true} : vector<16x1xf32> -> vector<16x1xf32>
    %275 = arith.mulf %273, %274 : vector<16x1xf32>
    %cst_154 = arith.constant 2.000000e+00 : f32
    %276 = vector.broadcast %cst_154 : f32 to vector<16x1xf32>
    %277 = arith.subf %276, %275 : vector<16x1xf32>
    %278 = arith.mulf %274, %277 : vector<16x1xf32>
    %279 = vector.broadcast %278 : vector<16x1xf32> to vector<16x16xf32>
    %280 = arith.mulf %271, %279 : vector<16x16xf32>
    %cst_155 = arith.constant dense<0.000000e+00> : vector<16x8xf32>
    %281 = tpu.matmul %280, %263, %cst_155 {dimension_numbers = #tpu.dot_dimension_numbers<[1], [0], [0], [1], [0, 0, 1, 1], [], []>, precision = #tpu.contract_precision<fp32>} : vector<16x16xf32>, vector<16x8xf32>, vector<16x8xf32> -> vector<16x8xf32>
    %c0_156 = arith.constant 0 : index
    %c0_157 = arith.constant 0 : index
    %282 = vector.load %arg4[%c0_156, %c0_157] : memref<32x32xf32, #tpu.memory_space<vmem>>, vector<16x8xf32>
    tpu.vector_store %arg4[%c0_156, %c0_157], %281 {strides = array<i32>} : memref<32x32xf32, #tpu.memory_space<vmem>>, vector<16x8xf32>,
    %c0_158 = arith.constant 0 : index
    %c8_159 = arith.constant 8 : index
    %283 = vector.load %arg3[%c0_158, %c8_159] : memref<32x96xf32, #tpu.memory_space<vmem>>, vector<16x8xf32>
    %c0_160 = arith.constant 0 : index
    %c40_161 = arith.constant 40 : index
    %284 = vector.load %arg3[%c0_160, %c40_161] : memref<32x96xf32, #tpu.memory_space<vmem>>, vector<16x8xf32>
    %c0_162 = arith.constant 0 : index
    %c72_163 = arith.constant 72 : index
    %285 = vector.load %arg3[%c0_162, %c72_163] : memref<32x96xf32, #tpu.memory_space<vmem>>, vector<16x8xf32>
    %cst_164 = arith.constant dense<0.000000e+00> : vector<16x16xf32>
    %286 = tpu.matmul %283, %284, %cst_164 {dimension_numbers = #tpu.dot_dimension_numbers<[1], [1], [0], [0], [0, 0, 1, 0], [], []>, precision = #tpu.contract_precision<fp32>} : vector<16x8xf32>, vector<16x8xf32>, vector<16x16xf32> -> vector<16x16xf32>
    %cst_165 = arith.constant 0.353553385 : f32
    %287 = vector.broadcast %cst_165 : f32 to vector<16x16xf32>
    %288 = arith.mulf %286, %287 : vector<16x16xf32>
    %cst_166 = arith.constant dense<0xFF800000> : vector<16xf32>
    %289 = vector.multi_reduction <maximumf>, %288, %cst_166 [1] : vector<16x16xf32> to vector<16xf32>
    %290 = vector.shape_cast %289 : vector<16xf32> to vector<16x1xf32>
    %291 = vector.broadcast %290 : vector<16x1xf32> to vector<16x16xf32>
    %292 = arith.subf %288, %291 : vector<16x16xf32>
    %293 = math.exp %292 : vector<16x16xf32>
    %cst_167 = arith.constant dense<0.000000e+00> : vector<16xf32>
    %294 = vector.multi_reduction <add>, %293, %cst_167 [1] : vector<16x16xf32> to vector<16xf32>
    %295 = vector.shape_cast %294 : vector<16xf32> to vector<16x1xf32>
    %296 = tpu.reciprocal %295 {approx = true} : vector<16x1xf32> -> vector<16x1xf32>
    %297 = arith.mulf %295, %296 : vector<16x1xf32>
    %cst_168 = arith.constant 2.000000e+00 : f32
    %298 = vector.broadcast %cst_168 : f32 to vector<16x1xf32>
    %299 = arith.subf %298, %297 : vector<16x1xf32>
    %300 = arith.mulf %296, %299 : vector<16x1xf32>
    %301 = vector.broadcast %300 : vector<16x1xf32> to vector<16x16xf32>
    %302 = arith.mulf %293, %301 : vector<16x16xf32>
    %cst_169 = arith.constant dense<0.000000e+00> : vector<16x8xf32>
    %303 = tpu.matmul %302, %285, %cst_169 {dimension_numbers = #tpu.dot_dimension_numbers<[1], [0], [0], [1], [0, 0, 1, 1], [], []>, precision = #tpu.contract_precision<fp32>} : vector<16x16xf32>, vector<16x8xf32>, vector<16x8xf32> -> vector<16x8xf32>
    %c0_170 = arith.constant 0 : index
    %c8_171 = arith.constant 8 : index
    %304 = vector.load %arg4[%c0_170, %c8_171] : memref<32x32xf32, #tpu.memory_space<vmem>>, vector<16x8xf32>
    tpu.vector_store %arg4[%c0_170, %c8_171], %303 {strides = array<i32>} : memref<32x32xf32, #tpu.memory_space<vmem>>, vector<16x8xf32>,
    %c0_172 = arith.constant 0 : index
    %c16_173 = arith.constant 16 : index
    %305 = vector.load %arg3[%c0_172, %c16_173] : memref<32x96xf32, #tpu.memory_space<vmem>>, vector<16x8xf32>
    %c0_174 = arith.constant 0 : index
    %c48_175 = arith.constant 48 : index
    %306 = vector.load %arg3[%c0_174, %c48_175] : memref<32x96xf32, #tpu.memory_space<vmem>>, vector<16x8xf32>
    %c0_176 = arith.constant 0 : index
    %c80_177 = arith.constant 80 : index
    %307 = vector.load %arg3[%c0_176, %c80_177] : memref<32x96xf32, #tpu.memory_space<vmem>>, vector<16x8xf32>
    %cst_178 = arith.constant dense<0.000000e+00> : vector<16x16xf32>
    %308 = tpu.matmul %305, %306, %cst_178 {dimension_numbers = #tpu.dot_dimension_numbers<[1], [1], [0], [0], [0, 0, 1, 0], [], []>, precision = #tpu.contract_precision<fp32>} : vector<16x8xf32>, vector<16x8xf32>, vector<16x16xf32> -> vector<16x16xf32>
    %cst_179 = arith.constant 0.353553385 : f32
    %309 = vector.broadcast %cst_179 : f32 to vector<16x16xf32>
    %310 = arith.mulf %308, %309 : vector<16x16xf32>
    %cst_180 = arith.constant dense<0xFF800000> : vector<16xf32>
    %311 = vector.multi_reduction <maximumf>, %310, %cst_180 [1] : vector<16x16xf32> to vector<16xf32>
    %312 = vector.shape_cast %311 : vector<16xf32> to vector<16x1xf32>
    %313 = vector.broadcast %312 : vector<16x1xf32> to vector<16x16xf32>
    %314 = arith.subf %310, %313 : vector<16x16xf32>
    %315 = math.exp %314 : vector<16x16xf32>
    %cst_181 = arith.constant dense<0.000000e+00> : vector<16xf32>
    %316 = vector.multi_reduction <add>, %315, %cst_181 [1] : vector<16x16xf32> to vector<16xf32>
    %317 = vector.shape_cast %316 : vector<16xf32> to vector<16x1xf32>
    %318 = tpu.reciprocal %317 {approx = true} : vector<16x1xf32> -> vector<16x1xf32>
    %319 = arith.mulf %317, %318 : vector<16x1xf32>
    %cst_182 = arith.constant 2.000000e+00 : f32
    %320 = vector.broadcast %cst_182 : f32 to vector<16x1xf32>
    %321 = arith.subf %320, %319 : vector<16x1xf32>
    %322 = arith.mulf %318, %321 : vector<16x1xf32>
    %323 = vector.broadcast %322 : vector<16x1xf32> to vector<16x16xf32>
    %324 = arith.mulf %315, %323 : vector<16x16xf32>
    %cst_183 = arith.constant dense<0.000000e+00> : vector<16x8xf32>
    %325 = tpu.matmul %324, %307, %cst_183 {dimension_numbers = #tpu.dot_dimension_numbers<[1], [0], [0], [1], [0, 0, 1, 1], [], []>, precision = #tpu.contract_precision<fp32>} : vector<16x16xf32>, vector<16x8xf32>, vector<16x8xf32> -> vector<16x8xf32>
    %c0_184 = arith.constant 0 : index
    %c16_185 = arith.constant 16 : index
    %326 = vector.load %arg4[%c0_184, %c16_185] : memref<32x32xf32, #tpu.memory_space<vmem>>, vector<16x8xf32>
    tpu.vector_store %arg4[%c0_184, %c16_185], %325 {strides = array<i32>} : memref<32x32xf32, #tpu.memory_space<vmem>>, vector<16x8xf32>,
    %c0_186 = arith.constant 0 : index
    %c24_187 = arith.constant 24 : index
    %327 = vector.load %arg3[%c0_186, %c24_187] : memref<32x96xf32, #tpu.memory_space<vmem>>, vector<16x8xf32>
    %c0_188 = arith.constant 0 : index
    %c56_189 = arith.constant 56 : index
    %328 = vector.load %arg3[%c0_188, %c56_189] : memref<32x96xf32, #tpu.memory_space<vmem>>, vector<16x8xf32>
    %c0_190 = arith.constant 0 : index
    %c88_191 = arith.constant 88 : index
    %329 = vector.load %arg3[%c0_190, %c88_191] : memref<32x96xf32, #tpu.memory_space<vmem>>, vector<16x8xf32>
    %cst_192 = arith.constant dense<0.000000e+00> : vector<16x16xf32>
    %330 = tpu.matmul %327, %328, %cst_192 {dimension_numbers = #tpu.dot_dimension_numbers<[1], [1], [0], [0], [0, 0, 1, 0], [], []>, precision = #tpu.contract_precision<fp32>} : vector<16x8xf32>, vector<16x8xf32>, vector<16x16xf32> -> vector<16x16xf32>
    %cst_193 = arith.constant 0.353553385 : f32
    %331 = vector.broadcast %cst_193 : f32 to vector<16x16xf32>
    %332 = arith.mulf %330, %331 : vector<16x16xf32>
    %cst_194 = arith.constant dense<0xFF800000> : vector<16xf32>
    %333 = vector.multi_reduction <maximumf>, %332, %cst_194 [1] : vector<16x16xf32> to vector<16xf32>
    %334 = vector.shape_cast %333 : vector<16xf32> to vector<16x1xf32>
    %335 = vector.broadcast %334 : vector<16x1xf32> to vector<16x16xf32>
    %336 = arith.subf %332, %335 : vector<16x16xf32>
    %337 = math.exp %336 : vector<16x16xf32>
    %cst_195 = arith.constant dense<0.000000e+00> : vector<16xf32>
    %338 = vector.multi_reduction <add>, %337, %cst_195 [1] : vector<16x16xf32> to vector<16xf32>
    %339 = vector.shape_cast %338 : vector<16xf32> to vector<16x1xf32>
    %340 = tpu.reciprocal %339 {approx = true} : vector<16x1xf32> -> vector<16x1xf32>
    %341 = arith.mulf %339, %340 : vector<16x1xf32>
    %cst_196 = arith.constant 2.000000e+00 : f32
    %342 = vector.broadcast %cst_196 : f32 to vector<16x1xf32>
    %343 = arith.subf %342, %341 : vector<16x1xf32>
    %344 = arith.mulf %340, %343 : vector<16x1xf32>
    %345 = vector.broadcast %344 : vector<16x1xf32> to vector<16x16xf32>
    %346 = arith.mulf %337, %345 : vector<16x16xf32>
    %cst_197 = arith.constant dense<0.000000e+00> : vector<16x8xf32>
    %347 = tpu.matmul %346, %329, %cst_197 {dimension_numbers = #tpu.dot_dimension_numbers<[1], [0], [0], [1], [0, 0, 1, 1], [], []>, precision = #tpu.contract_precision<fp32>} : vector<16x16xf32>, vector<16x8xf32>, vector<16x8xf32> -> vector<16x8xf32>
    %c0_198 = arith.constant 0 : index
    %c24_199 = arith.constant 24 : index
    %348 = vector.load %arg4[%c0_198, %c24_199] : memref<32x32xf32, #tpu.memory_space<vmem>>, vector<16x8xf32>
    tpu.vector_store %arg4[%c0_198, %c24_199], %347 {strides = array<i32>} : memref<32x32xf32, #tpu.memory_space<vmem>>, vector<16x8xf32>,
    %c16_200 = arith.constant 16 : index
    %c0_201 = arith.constant 0 : index
    %349 = vector.load %arg3[%c16_200, %c0_201] : memref<32x96xf32, #tpu.memory_space<vmem>>, vector<16x8xf32>
    %c16_202 = arith.constant 16 : index
    %c32_203 = arith.constant 32 : index
    %350 = vector.load %arg3[%c16_202, %c32_203] : memref<32x96xf32, #tpu.memory_space<vmem>>, vector<16x8xf32>
    %c16_204 = arith.constant 16 : index
    %c64_205 = arith.constant 64 : index
    %351 = vector.load %arg3[%c16_204, %c64_205] : memref<32x96xf32, #tpu.memory_space<vmem>>, vector<16x8xf32>
    %cst_206 = arith.constant dense<0.000000e+00> : vector<16x16xf32>
    %352 = tpu.matmul %349, %350, %cst_206 {dimension_numbers = #tpu.dot_dimension_numbers<[1], [1], [0], [0], [0, 0, 1, 0], [], []>, precision = #tpu.contract_precision<fp32>} : vector<16x8xf32>, vector<16x8xf32>, vector<16x16xf32> -> vector<16x16xf32>
    %cst_207 = arith.constant 0.353553385 : f32
    %353 = vector.broadcast %cst_207 : f32 to vector<16x16xf32>
    %354 = arith.mulf %352, %353 : vector<16x16xf32>
    %cst_208 = arith.constant dense<0xFF800000> : vector<16xf32>
    %355 = vector.multi_reduction <maximumf>, %354, %cst_208 [1] : vector<16x16xf32> to vector<16xf32>
    %356 = vector.shape_cast %355 : vector<16xf32> to vector<16x1xf32>
    %357 = vector.broadcast %356 : vector<16x1xf32> to vector<16x16xf32>
    %358 = arith.subf %354, %357 : vector<16x16xf32>
    %359 = math.exp %358 : vector<16x16xf32>
    %cst_209 = arith.constant dense<0.000000e+00> : vector<16xf32>
    %360 = vector.multi_reduction <add>, %359, %cst_209 [1] : vector<16x16xf32> to vector<16xf32>
    %361 = vector.shape_cast %360 : vector<16xf32> to vector<16x1xf32>
    %362 = tpu.reciprocal %361 {approx = true} : vector<16x1xf32> -> vector<16x1xf32>
    %363 = arith.mulf %361, %362 : vector<16x1xf32>
    %cst_210 = arith.constant 2.000000e+00 : f32
    %364 = vector.broadcast %cst_210 : f32 to vector<16x1xf32>
    %365 = arith.subf %364, %363 : vector<16x1xf32>
    %366 = arith.mulf %362, %365 : vector<16x1xf32>
    %367 = vector.broadcast %366 : vector<16x1xf32> to vector<16x16xf32>
    %368 = arith.mulf %359, %367 : vector<16x16xf32>
    %cst_211 = arith.constant dense<0.000000e+00> : vector<16x8xf32>
    %369 = tpu.matmul %368, %351, %cst_211 {dimension_numbers = #tpu.dot_dimension_numbers<[1], [0], [0], [1], [0, 0, 1, 1], [], []>, precision = #tpu.contract_precision<fp32>} : vector<16x16xf32>, vector<16x8xf32>, vector<16x8xf32> -> vector<16x8xf32>
    %c16_212 = arith.constant 16 : index
    %c0_213 = arith.constant 0 : index
    %370 = vector.load %arg4[%c16_212, %c0_213] : memref<32x32xf32, #tpu.memory_space<vmem>>, vector<16x8xf32>
    tpu.vector_store %arg4[%c16_212, %c0_213], %369 {strides = array<i32>} : memref<32x32xf32, #tpu.memory_space<vmem>>, vector<16x8xf32>,
    %c16_214 = arith.constant 16 : index
    %c8_215 = arith.constant 8 : index
    %371 = vector.load %arg3[%c16_214, %c8_215] : memref<32x96xf32, #tpu.memory_space<vmem>>, vector<16x8xf32>
    %c16_216 = arith.constant 16 : index
    %c40_217 = arith.constant 40 : index
    %372 = vector.load %arg3[%c16_216, %c40_217] : memref<32x96xf32, #tpu.memory_space<vmem>>, vector<16x8xf32>
    %c16_218 = arith.constant 16 : index
    %c72_219 = arith.constant 72 : index
    %373 = vector.load %arg3[%c16_218, %c72_219] : memref<32x96xf32, #tpu.memory_space<vmem>>, vector<16x8xf32>
    %cst_220 = arith.constant dense<0.000000e+00> : vector<16x16xf32>
    %374 = tpu.matmul %371, %372, %cst_220 {dimension_numbers = #tpu.dot_dimension_numbers<[1], [1], [0], [0], [0, 0, 1, 0], [], []>, precision = #tpu.contract_precision<fp32>} : vector<16x8xf32>, vector<16x8xf32>, vector<16x16xf32> -> vector<16x16xf32>
    %cst_221 = arith.constant 0.353553385 : f32
    %375 = vector.broadcast %cst_221 : f32 to vector<16x16xf32>
    %376 = arith.mulf %374, %375 : vector<16x16xf32>
    %cst_222 = arith.constant dense<0xFF800000> : vector<16xf32>
    %377 = vector.multi_reduction <maximumf>, %376, %cst_222 [1] : vector<16x16xf32> to vector<16xf32>
    %378 = vector.shape_cast %377 : vector<16xf32> to vector<16x1xf32>
    %379 = vector.broadcast %378 : vector<16x1xf32> to vector<16x16xf32>
    %380 = arith.subf %376, %379 : vector<16x16xf32>
    %381 = math.exp %380 : vector<16x16xf32>
    %cst_223 = arith.constant dense<0.000000e+00> : vector<16xf32>
    %382 = vector.multi_reduction <add>, %381, %cst_223 [1] : vector<16x16xf32> to vector<16xf32>
    %383 = vector.shape_cast %382 : vector<16xf32> to vector<16x1xf32>
    %384 = tpu.reciprocal %383 {approx = true} : vector<16x1xf32> -> vector<16x1xf32>
    %385 = arith.mulf %383, %384 : vector<16x1xf32>
    %cst_224 = arith.constant 2.000000e+00 : f32
    %386 = vector.broadcast %cst_224 : f32 to vector<16x1xf32>
    %387 = arith.subf %386, %385 : vector<16x1xf32>
    %388 = arith.mulf %384, %387 : vector<16x1xf32>
    %389 = vector.broadcast %388 : vector<16x1xf32> to vector<16x16xf32>
    %390 = arith.mulf %381, %389 : vector<16x16xf32>
    %cst_225 = arith.constant dense<0.000000e+00> : vector<16x8xf32>
    %391 = tpu.matmul %390, %373, %cst_225 {dimension_numbers = #tpu.dot_dimension_numbers<[1], [0], [0], [1], [0, 0, 1, 1], [], []>, precision = #tpu.contract_precision<fp32>} : vector<16x16xf32>, vector<16x8xf32>, vector<16x8xf32> -> vector<16x8xf32>
    %c16_226 = arith.constant 16 : index
    %c8_227 = arith.constant 8 : index
    %392 = vector.load %arg4[%c16_226, %c8_227] : memref<32x32xf32, #tpu.memory_space<vmem>>, vector<16x8xf32>
    tpu.vector_store %arg4[%c16_226, %c8_227], %391 {strides = array<i32>} : memref<32x32xf32, #tpu.memory_space<vmem>>, vector<16x8xf32>,
    %c16_228 = arith.constant 16 : index
    %c16_229 = arith.constant 16 : index
    %393 = vector.load %arg3[%c16_228, %c16_229] : memref<32x96xf32, #tpu.memory_space<vmem>>, vector<16x8xf32>
    %c16_230 = arith.constant 16 : index
    %c48_231 = arith.constant 48 : index
    %394 = vector.load %arg3[%c16_230, %c48_231] : memref<32x96xf32, #tpu.memory_space<vmem>>, vector<16x8xf32>
    %c16_232 = arith.constant 16 : index
    %c80_233 = arith.constant 80 : index
    %395 = vector.load %arg3[%c16_232, %c80_233] : memref<32x96xf32, #tpu.memory_space<vmem>>, vector<16x8xf32>
    %cst_234 = arith.constant dense<0.000000e+00> : vector<16x16xf32>
    %396 = tpu.matmul %393, %394, %cst_234 {dimension_numbers = #tpu.dot_dimension_numbers<[1], [1], [0], [0], [0, 0, 1, 0], [], []>, precision = #tpu.contract_precision<fp32>} : vector<16x8xf32>, vector<16x8xf32>, vector<16x16xf32> -> vector<16x16xf32>
    %cst_235 = arith.constant 0.353553385 : f32
    %397 = vector.broadcast %cst_235 : f32 to vector<16x16xf32>
    %398 = arith.mulf %396, %397 : vector<16x16xf32>
    %cst_236 = arith.constant dense<0xFF800000> : vector<16xf32>
    %399 = vector.multi_reduction <maximumf>, %398, %cst_236 [1] : vector<16x16xf32> to vector<16xf32>
    %400 = vector.shape_cast %399 : vector<16xf32> to vector<16x1xf32>
    %401 = vector.broadcast %400 : vector<16x1xf32> to vector<16x16xf32>
    %402 = arith.subf %398, %401 : vector<16x16xf32>
    %403 = math.exp %402 : vector<16x16xf32>
    %cst_237 = arith.constant dense<0.000000e+00> : vector<16xf32>
    %404 = vector.multi_reduction <add>, %403, %cst_237 [1] : vector<16x16xf32> to vector<16xf32>
    %405 = vector.shape_cast %404 : vector<16xf32> to vector<16x1xf32>
    %406 = tpu.reciprocal %405 {approx = true} : vector<16x1xf32> -> vector<16x1xf32>
    %407 = arith.mulf %405, %406 : vector<16x1xf32>
    %cst_238 = arith.constant 2.000000e+00 : f32
    %408 = vector.broadcast %cst_238 : f32 to vector<16x1xf32>
    %409 = arith.subf %408, %407 : vector<16x1xf32>
    %410 = arith.mulf %406, %409 : vector<16x1xf32>
    %411 = vector.broadcast %410 : vector<16x1xf32> to vector<16x16xf32>
    %412 = arith.mulf %403, %411 : vector<16x16xf32>
    %cst_239 = arith.constant dense<0.000000e+00> : vector<16x8xf32>
    %413 = tpu.matmul %412, %395, %cst_239 {dimension_numbers = #tpu.dot_dimension_numbers<[1], [0], [0], [1], [0, 0, 1, 1], [], []>, precision = #tpu.contract_precision<fp32>} : vector<16x16xf32>, vector<16x8xf32>, vector<16x8xf32> -> vector<16x8xf32>
    %c16_240 = arith.constant 16 : index
    %c16_241 = arith.constant 16 : index
    %414 = vector.load %arg4[%c16_240, %c16_241] : memref<32x32xf32, #tpu.memory_space<vmem>>, vector<16x8xf32>
    tpu.vector_store %arg4[%c16_240, %c16_241], %413 {strides = array<i32>} : memref<32x32xf32, #tpu.memory_space<vmem>>, vector<16x8xf32>,
    %c16_242 = arith.constant 16 : index
    %c24_243 = arith.constant 24 : index
    %415 = vector.load %arg3[%c16_242, %c24_243] : memref<32x96xf32, #tpu.memory_space<vmem>>, vector<16x8xf32>
    %c16_244 = arith.constant 16 : index
    %c56_245 = arith.constant 56 : index
    %416 = vector.load %arg3[%c16_244, %c56_245] : memref<32x96xf32, #tpu.memory_space<vmem>>, vector<16x8xf32>
    %c16_246 = arith.constant 16 : index
    %c88_247 = arith.constant 88 : index
    %417 = vector.load %arg3[%c16_246, %c88_247] : memref<32x96xf32, #tpu.memory_space<vmem>>, vector<16x8xf32>
    %cst_248 = arith.constant dense<0.000000e+00> : vector<16x16xf32>
    %418 = tpu.matmul %415, %416, %cst_248 {dimension_numbers = #tpu.dot_dimension_numbers<[1], [1], [0], [0], [0, 0, 1, 0], [], []>, precision = #tpu.contract_precision<fp32>} : vector<16x8xf32>, vector<16x8xf32>, vector<16x16xf32> -> vector<16x16xf32>
    %cst_249 = arith.constant 0.353553385 : f32
    %419 = vector.broadcast %cst_249 : f32 to vector<16x16xf32>
    %420 = arith.mulf %418, %419 : vector<16x16xf32>
    %cst_250 = arith.constant dense<0xFF800000> : vector<16xf32>
    %421 = vector.multi_reduction <maximumf>, %420, %cst_250 [1] : vector<16x16xf32> to vector<16xf32>
    %422 = vector.shape_cast %421 : vector<16xf32> to vector<16x1xf32>
    %423 = vector.broadcast %422 : vector<16x1xf32> to vector<16x16xf32>
    %424 = arith.subf %420, %423 : vector<16x16xf32>
    %425 = math.exp %424 : vector<16x16xf32>
    %cst_251 = arith.constant dense<0.000000e+00> : vector<16xf32>
    %426 = vector.multi_reduction <add>, %425, %cst_251 [1] : vector<16x16xf32> to vector<16xf32>
    %427 = vector.shape_cast %426 : vector<16xf32> to vector<16x1xf32>
    %428 = tpu.reciprocal %427 {approx = true} : vector<16x1xf32> -> vector<16x1xf32>
    %429 = arith.mulf %427, %428 : vector<16x1xf32>
    %cst_252 = arith.constant 2.000000e+00 : f32
    %430 = vector.broadcast %cst_252 : f32 to vector<16x1xf32>
    %431 = arith.subf %430, %429 : vector<16x1xf32>
    %432 = arith.mulf %428, %431 : vector<16x1xf32>
    %433 = vector.broadcast %432 : vector<16x1xf32> to vector<16x16xf32>
    %434 = arith.mulf %425, %433 : vector<16x16xf32>
    %cst_253 = arith.constant dense<0.000000e+00> : vector<16x8xf32>
    %435 = tpu.matmul %434, %417, %cst_253 {dimension_numbers = #tpu.dot_dimension_numbers<[1], [0], [0], [1], [0, 0, 1, 1], [], []>, precision = #tpu.contract_precision<fp32>} : vector<16x16xf32>, vector<16x8xf32>, vector<16x8xf32> -> vector<16x8xf32>
    %c16_254 = arith.constant 16 : index
    %c24_255 = arith.constant 24 : index
    %436 = vector.load %arg4[%c16_254, %c24_255] : memref<32x32xf32, #tpu.memory_space<vmem>>, vector<16x8xf32>
    tpu.vector_store %arg4[%c16_254, %c24_255], %435 {strides = array<i32>} : memref<32x32xf32, #tpu.memory_space<vmem>>, vector<16x8xf32>,
    %c0_256 = arith.constant 0 : index
    %c0_257 = arith.constant 0 : index
    %437 = vector.load %arg4[%c0_256, %c0_257] : memref<32x32xf32, #tpu.memory_space<vmem>>, vector<32x32xf32>
    %c248 = arith.constant 248 : index
    %c0_258 = arith.constant 0 : index
    %438 = vector.load %arg1[%c248, %c0_258] : memref<384x96xf32, #tpu.memory_space<vmem>>, vector<32x32xf32>
    %cst_259 = arith.constant dense<0.000000e+00> : vector<32x32xf32>
    %439 = tpu.matmul %437, %438, %cst_259 {dimension_numbers = #tpu.dot_dimension_numbers<[1], [0], [0], [1], [0, 0, 1, 1], [], []>, precision = #tpu.contract_precision<fp32>} : vector<32x32xf32>, vector<32x32xf32>, vector<32x32xf32> -> vector<32x32xf32>
    %c377 = arith.constant 377 : index
    %c0_260 = arith.constant 0 : index
    %440 = vector.load %arg1[%c377, %c0_260] : memref<384x96xf32, #tpu.memory_space<vmem>>, vector<1x32xf32>
    %441 = vector.broadcast %440 : vector<1x32xf32> to vector<32x32xf32>
    %442 = arith.addf %439, %441 : vector<32x32xf32>
    %443 = arith.addf %254, %442 : vector<32x32xf32>
    %c380 = arith.constant 380 : index
    %c0_261 = arith.constant 0 : index
    %444 = vector.load %arg1[%c380, %c0_261] : memref<384x96xf32, #tpu.memory_space<vmem>>, vector<1x32xf32>
    %c381 = arith.constant 381 : index
    %c0_262 = arith.constant 0 : index
    %445 = vector.load %arg1[%c381, %c0_262] : memref<384x96xf32, #tpu.memory_space<vmem>>, vector<1x32xf32>
    %cst_263 = arith.constant dense<0.000000e+00> : vector<32xf32>
    %446 = vector.multi_reduction <add>, %443, %cst_263 [1] : vector<32x32xf32> to vector<32xf32>
    %447 = vector.shape_cast %446 : vector<32xf32> to vector<32x1xf32>
    %cst_264 = arith.constant 3.200000e+01 : f32
    %448 = vector.broadcast %cst_264 : f32 to vector<32x1xf32>
    %449 = arith.divf %447, %448 : vector<32x1xf32>
    %450 = arith.mulf %443, %443 : vector<32x32xf32>
    %cst_265 = arith.constant dense<0.000000e+00> : vector<32xf32>
    %451 = vector.multi_reduction <add>, %450, %cst_265 [1] : vector<32x32xf32> to vector<32xf32>
    %452 = vector.shape_cast %451 : vector<32xf32> to vector<32x1xf32>
    %cst_266 = arith.constant 3.200000e+01 : f32
    %453 = vector.broadcast %cst_266 : f32 to vector<32x1xf32>
    %454 = arith.divf %452, %453 : vector<32x1xf32>
    %455 = arith.mulf %449, %449 : vector<32x1xf32>
    %456 = arith.subf %454, %455 : vector<32x1xf32>
    %457 = vector.broadcast %449 : vector<32x1xf32> to vector<32x32xf32>
    %458 = arith.subf %443, %457 : vector<32x32xf32>
    %cst_267 = arith.constant 9.99999974E-6 : f32
    %459 = vector.broadcast %cst_267 : f32 to vector<32x1xf32>
    %460 = arith.addf %456, %459 : vector<32x1xf32>
    %461 = math.rsqrt %460 : vector<32x1xf32>
    %462 = vector.broadcast %461 : vector<32x1xf32> to vector<32x32xf32>
    %463 = arith.mulf %458, %462 : vector<32x32xf32>
    %464 = vector.broadcast %444 : vector<1x32xf32> to vector<32x32xf32>
    %465 = arith.mulf %463, %464 : vector<32x32xf32>
    %466 = vector.broadcast %445 : vector<1x32xf32> to vector<32x32xf32>
    %467 = arith.addf %465, %466 : vector<32x32xf32>
    %c280 = arith.constant 280 : index
    %c0_268 = arith.constant 0 : index
    %468 = vector.load %arg1[%c280, %c0_268] : memref<384x96xf32, #tpu.memory_space<vmem>>, vector<32x64xf32>
    %cst_269 = arith.constant dense<0.000000e+00> : vector<32x64xf32>
    %469 = tpu.matmul %467, %468, %cst_269 {dimension_numbers = #tpu.dot_dimension_numbers<[1], [0], [0], [1], [0, 0, 1, 1], [], []>, precision = #tpu.contract_precision<fp32>} : vector<32x32xf32>, vector<32x64xf32>, vector<32x64xf32> -> vector<32x64xf32>
    %c378 = arith.constant 378 : index
    %c0_270 = arith.constant 0 : index
    %470 = vector.load %arg1[%c378, %c0_270] : memref<384x96xf32, #tpu.memory_space<vmem>>, vector<1x64xf32>
    %471 = vector.broadcast %470 : vector<1x64xf32> to vector<32x64xf32>
    %472 = arith.addf %469, %471 : vector<32x64xf32>
    %cst_271 = arith.constant 0.000000e+00 : f32
    %473 = vector.broadcast %cst_271 : f32 to vector<32x64xf32>
    %474 = arith.maximumf %472, %473 : vector<32x64xf32>
    %c312 = arith.constant 312 : index
    %c0_272 = arith.constant 0 : index
    %475 = vector.load %arg1[%c312, %c0_272] : memref<384x96xf32, #tpu.memory_space<vmem>>, vector<64x32xf32>
    %cst_273 = arith.constant dense<0.000000e+00> : vector<32x32xf32>
    %476 = tpu.matmul %474, %475, %cst_273 {dimension_numbers = #tpu.dot_dimension_numbers<[1], [0], [0], [1], [0, 0, 1, 1], [], []>, precision = #tpu.contract_precision<fp32>} : vector<32x64xf32>, vector<64x32xf32>, vector<32x32xf32> -> vector<32x32xf32>
    %c379 = arith.constant 379 : index
    %c0_274 = arith.constant 0 : index
    %477 = vector.load %arg1[%c379, %c0_274] : memref<384x96xf32, #tpu.memory_space<vmem>>, vector<1x32xf32>
    %478 = vector.broadcast %477 : vector<1x32xf32> to vector<32x32xf32>
    %479 = arith.addf %476, %478 : vector<32x32xf32>
    %480 = arith.addf %467, %479 : vector<32x32xf32>
    %c382 = arith.constant 382 : index
    %c0_275 = arith.constant 0 : index
    %481 = vector.load %arg1[%c382, %c0_275] : memref<384x96xf32, #tpu.memory_space<vmem>>, vector<1x32xf32>
    %c383 = arith.constant 383 : index
    %c0_276 = arith.constant 0 : index
    %482 = vector.load %arg1[%c383, %c0_276] : memref<384x96xf32, #tpu.memory_space<vmem>>, vector<1x32xf32>
    %cst_277 = arith.constant dense<0.000000e+00> : vector<32xf32>
    %483 = vector.multi_reduction <add>, %480, %cst_277 [1] : vector<32x32xf32> to vector<32xf32>
    %484 = vector.shape_cast %483 : vector<32xf32> to vector<32x1xf32>
    %cst_278 = arith.constant 3.200000e+01 : f32
    %485 = vector.broadcast %cst_278 : f32 to vector<32x1xf32>
    %486 = arith.divf %484, %485 : vector<32x1xf32>
    %487 = arith.mulf %480, %480 : vector<32x32xf32>
    %cst_279 = arith.constant dense<0.000000e+00> : vector<32xf32>
    %488 = vector.multi_reduction <add>, %487, %cst_279 [1] : vector<32x32xf32> to vector<32xf32>
    %489 = vector.shape_cast %488 : vector<32xf32> to vector<32x1xf32>
    %cst_280 = arith.constant 3.200000e+01 : f32
    %490 = vector.broadcast %cst_280 : f32 to vector<32x1xf32>
    %491 = arith.divf %489, %490 : vector<32x1xf32>
    %492 = arith.mulf %486, %486 : vector<32x1xf32>
    %493 = arith.subf %491, %492 : vector<32x1xf32>
    %494 = vector.broadcast %486 : vector<32x1xf32> to vector<32x32xf32>
    %495 = arith.subf %480, %494 : vector<32x32xf32>
    %cst_281 = arith.constant 9.99999974E-6 : f32
    %496 = vector.broadcast %cst_281 : f32 to vector<32x1xf32>
    %497 = arith.addf %493, %496 : vector<32x1xf32>
    %498 = math.rsqrt %497 : vector<32x1xf32>
    %499 = vector.broadcast %498 : vector<32x1xf32> to vector<32x32xf32>
    %500 = arith.mulf %495, %499 : vector<32x32xf32>
    %501 = vector.broadcast %481 : vector<1x32xf32> to vector<32x32xf32>
    %502 = arith.mulf %500, %501 : vector<32x32xf32>
    %503 = vector.broadcast %482 : vector<1x32xf32> to vector<32x32xf32>
    %504 = arith.addf %502, %503 : vector<32x32xf32>
    %505 = vector.extract_strided_slice %504 {offsets = [0, 0], sizes = [16, 32], strides = [1, 1]} : vector<32x32xf32> to vector<16x32xf32>
    %cst_282 = arith.constant dense<0.000000e+00> : vector<32xf32>
    %506 = vector.multi_reduction <add>, %505, %cst_282 [0] : vector<16x32xf32> to vector<32xf32>
    %507 = vector.shape_cast %506 : vector<32xf32> to vector<1x32xf32>
    %cst_283 = arith.constant 1.600000e+01 : f32
    %508 = vector.broadcast %cst_283 : f32 to vector<1x32xf32>
    %509 = arith.divf %507, %508 : vector<1x32xf32>
    %510 = vector.extract_strided_slice %504 {offsets = [16, 0], sizes = [16, 32], strides = [1, 1]} : vector<32x32xf32> to vector<16x32xf32>
    %cst_284 = arith.constant dense<0.000000e+00> : vector<32xf32>
    %511 = vector.multi_reduction <add>, %510, %cst_284 [0] : vector<16x32xf32> to vector<32xf32>
    %512 = vector.shape_cast %511 : vector<32xf32> to vector<1x32xf32>
    %cst_285 = arith.constant 1.600000e+01 : f32
    %513 = vector.broadcast %cst_285 : f32 to vector<1x32xf32>
    %514 = arith.divf %512, %513 : vector<1x32xf32>
    %515 = tpu.concatenate %509, %514 in 0 : vector<1x32xf32>, vector<1x32xf32> -> vector<2x32xf32>
    %c0_286 = arith.constant 0 : index
    %c0_287 = arith.constant 0 : index
    %516 = vector.load %arg2[%c0_286, %c0_287] : memref<2x32xf32, #tpu.memory_space<vmem>>, vector<2x32xf32>
    tpu.vector_store %arg2[%c0_286, %c0_287], %515 {strides = array<i32>} : memref<2x32xf32, #tpu.memory_space<vmem>>, vector<2x32xf32>,
    return
  }
}

</mosaic_0001>

<bundles_post_ra>
// kernel: forward.1
= control target key start
LH: loop header
LB: loop body
LE: loop exit
PB: predicated region body
PF: predicated region fallthrough
CT: control target
= control target key end

     0   :  { %vm22_vm0 = vcmask 130048   ;;  %s30369_s0 = inlined_call_operand.vmem [shape: f32[32,16], index: 0, kind: input, shape index: {}]   ;;  %s30370_s1 = inlined_call_operand.vmem [shape: f32[384,96], index: 1, kind: input, shape index: {}]   ;;  %s30371_s2 = inlined_call_operand.hbm [shape: f32[2,32], index: 2, kind: output, shape index: {}]  }
   0x1   :  { %v17_v0 = vld [vmem:[%s30370_s1 + $0x28] sm:$0xff]  ;;  %v16_v1 = vld [vmem:[%s30370_s1 + $0x20] sm:$0xff]  ;;  %v14_v7 = vld [vmem:[%s30369_s0 + $0x10] sm:$0xff] }
   0x2   :  { %v12_v2 = vld [vmem:[%s30369_s0] sm:$0xff]  ;;  %v27050_v3 = vand.u32 4294901760, %v17_v0  ;;  %v27052_v4 = vand.u32 4294901760, %v16_v1  ;;  %v13_v6 = vld [vmem:[%s30369_s0 + $0x8] sm:$0xff]  ;;  %v15_v8 = vld [vmem:[%s30369_s0 + $0x18] sm:$0xff]  ;;  %v30_v11 = vsel %vm22_vm0, %v14_v7, 0 }
   0x3   :  { %v24_v5 = vsel %vm22_vm0, %v12_v2, 0  ;;  %v27_v10 = vsel %vm22_vm0, %v13_v6, 0  ;;  %v33_v12 = vsel %vm22_vm0, %v15_v8, 0  ;;  %v27074_v16 = vand.u32 4294901760, %v30_v11 }
   0x4   :  { %v27064_v9 = vand.u32 4294901760, %v24_v5  ;;  %24634 = vmatprep.subr.mxu0 %v27050_v3  ;;  %v172_v13 = vsub.f32 %v17_v0, %v27050_v3  ;;  %v27071_v14 = vand.u32 4294901760, %v27_v10  ;;  %v179_v15 = vsub.f32 %v16_v1, %v27052_v4 }
   0x5   :  { %7 = vsyncpa [#allocation5], 0  ;;  %24635 = vmatpush3.msra.mxu0 %v27050_v3  ;;  %v27079_v18 = vand.u32 4294901760, %v33_v12  ;;  %v123_v22 = vsub.f32 %v30_v11, %v27074_v16  ;;  %v626_v40 = vld [vmem:[%s30370_s1 + $0x48] sm:$0xff]  ;;  %v625_v42 = vld [vmem:[%s30370_s1 + $0x40] sm:$0xff]  ;;  %vm632_vm1 = vcmask 261120  }
   0x6   :  { %v103_v17 = vsub.f32 %v24_v5, %v27064_v9  ;;  %24648 = vmatprep.mubr.f32.mxu1 %v27064_v9  ;;  %24636 = vmatprep.subr.mxu0 %v27052_v4  ;;  %v173_v19 = vand.u32 4294901760, %v172_v13  ;;  %v113_v20 = vsub.f32 %v27_v10, %v27071_v14  ;;  %v180_v21 = vand.u32 4294901760, %v179_v15  ;;  %v624_v45 = vld [vmem:[%s30370_s1 + $0x38] sm:$0xff]  ;;  %v623_v49 = vld [vmem:[%s30370_s1 + $0x30] sm:$0xff]  ;;  %v19_v1 = vld [vmem:[%s30370_s1 + $0x8] sm:$0xff]  ;;  %s27011_s10 = smov 96  }
   0x7   :  { %24637 = vmatpush3.msra.mxu0 %v27052_v4  ;;  %v133_v24 = vsub.f32 %v33_v12, %v27079_v18  ;;  %v124_v28 = vand.u32 4294901760, %v123_v22  ;;  %v27108_v41 = vand.u32 4294901760, %v626_v40  ;;  %v27116_v44 = vand.u32 4294901760, %v625_v42  ;;  %v21_v8 = vld [vmem:[%s30370_s1 + $0x18] sm:$0xff]  ;;  %v20_v12 = vld [vmem:[%s30370_s1 + $0x10] sm:$0xff]  ;;  %s27012_s11 = smov 64  }
   0x8   :  { %v104_v23 = vand.u32 4294901760, %v103_v17  ;;  %v174_v25 = vsub.f32 %v172_v13, %v173_v19  ;;  %v114_v26 = vand.u32 4294901760, %v113_v20  ;;  %v181_v27 = vsub.f32 %v179_v15, %v180_v21  ;;  %24654 = vmatprep.subr.mxu0 %v172_v13  ;;  %s27013_s12 = smov 120   ;;  %s27014_s13 = smov 88  }
   0x9   :  { %v134_v30 = vand.u32 4294901760, %v133_v24  ;;  %v125_v34 = vsub.f32 %v123_v22, %v124_v28  ;;  %v27114_v43 = vsub.f32 %v626_v40, %v27108_v41  ;;  %v27127_v47 = vsub.f32 %v625_v42, %v27116_v44  ;;  %s27015_s14 = smov 56   ;;  %s27016_s15 = smov 112  }
   0xa   :  { %v105_v29 = vsub.f32 %v103_v17, %v104_v23  ;;  %v175_v31 = vand.u32 4294901760, %v174_v25  ;;  %v115_v32 = vsub.f32 %v113_v20, %v114_v26  ;;  %v182_v33 = vand.u32 4294901760, %v181_v27  ;;  %s27017_s16 = smov 80   ;;  %s27018_s17 = smov 48  }
   0xb   :  { %v135_v36 = vsub.f32 %v133_v24, %v134_v30  ;;  %v126_v38 = vand.u32 4294901760, %v125_v34  ;;  %v27124_v46 = vand.u32 4294901760, %v27114_v43  ;;  %v27129_v48 = vand.u32 4294901760, %v624_v45  ;;  %s27019_s18 = smov 72   ;;  %s27020_s19 = smov 104  }
   0xc   :  { %v106_v35 = vand.u32 4294901760, %v105_v29  ;;  %24644 = vmatprep.subr.mxu1 %v175_v31  ;;  %v116_v37 = vand.u32 4294901760, %v115_v32  ;;  %v27139_v51 = vand.u32 4294901760, %v27127_v47  ;;  %v27144_v53 = vand.u32 4294901760, %v623_v49  ;;  %s27021_s20 = smov 40   ;;  %s27022_s0 = smov 8  }
   0xd   :  { %24645 = vmatpush3.msra.mxu1 %v175_v31  ;;  %v136_v39 = vand.u32 4294901760, %v135_v36  ;;  %v782_v50 = vsub.f32 %v27114_v43, %v27124_v46  ;;  %v27142_v52 = vsub.f32 %v624_v45, %v27129_v48  ;;  %vm1259_vm2 = vcmask 785408   ;;  %s27023_s21 = smov 16   ;;  %s27024_s22 = smov 24  }
   0xe   :  { %24638 = vmatprep.mubr.f32.mxu0 %v106_v35  ;;  %24646 = vmatprep.subr.mxu1 %v182_v33  ;;  %v789_v55 = vsub.f32 %v27127_v47, %v27139_v51  ;;  %v27154_v57 = vsub.f32 %v623_v49, %v27144_v53  ;;  %vm1272_vm3 = vcmask 64512   ;;  %vm3403_vm4 = vcmask 130112  }
   0xf   :  { %24639 = vmatmul.mubr.f32.vlgmr.msra.gmra.mxu0 %v116_v37  ;;  %24647 = vmatpush3.msra.mxu1 %v182_v33  ;;  %v783_v54 = vand.u32 4294901760, %v782_v50  ;;  %v27151_v56 = vand.u32 4294901760, %v27142_v52  ;;  %vm4480_vm5 = vcmask 195712   ;;  %vm5557_vm6 = vcmask 261312  }
  0x10   :  { %24655 = vmatpush3.msra.mxu0 %v172_v13  ;;  %24649 = vmatmul.mubr.f32.vlgmr.msra.gmra.mxu1 %v27071_v14  ;;  %v790_v58 = vand.u32 4294901760, %v789_v55  ;;  %v27161_v60 = vand.u32 4294901760, %v27154_v57  ;;  %vm11226_vm7 = vcmask 523264   ;;  %vm23364_vm8 = vcmask 1040384  }
  0x11   :  { %24664 = vmatprep.subr.mxu1 %v27050_v3  ;;  %24641 = vmatprep.mubr.f32.mxu0 %v126_v38  ;;  %v796_v59 = vsub.f32 %v27142_v52, %v27151_v56  ;;  %vm23366_vm9 = vcmask 254976  }
  0x12   :  { %24665 = vmatpush3.msra.mxu1 %v27050_v3  ;;  %24656 = vmatprep.subr.mxu0 %v179_v15  ;;  %v803_v62 = vsub.f32 %v27154_v57, %v27161_v60 }
  0x13   :  { %24642 = vmatmul.mubr.f32.gmra.mxu0 %v136_v39  ;;  %24651 = vmatprep.mubr.f32.mxu1 %v27074_v16  ;;  %v797_v61 = vand.u32 4294901760, %v796_v59 }
  0x14   :  { %24657 = vmatpush3.msra.mxu0 %v179_v15  ;;  %24652 = vmatmul.mubr.f32.gmra.mxu1 %v27079_v18  ;;  %v804_v63 = vand.u32 4294901760, %v803_v62 }
  0x15   :  { %24666 = vmatprep.subr.mxu1 %v27052_v4  ;;  %24658 = vmatprep.mubr.f32.mxu0 %v103_v17 }
  0x16   :  { %24667 = vmatpush3.msra.mxu1 %v27052_v4  ;;  %24674 = vmatprep.subr.mxu0 %v173_v19 }
  0x17   :  { %24659 = vmatmul.mubr.f32.vlgmr.msra.gmra.mxu0 %v113_v20  ;;  %24668 = vmatprep.mubr.f32.mxu1 %v104_v23 }
  0x18   :  { %24675 = vmatpush3.msra.mxu0 %v173_v19  ;;  %24669 = vmatmul.mubr.f32.vlgmr.msra.gmra.mxu1 %v114_v26 }
  0x19   :  { %24684 = vmatprep.subr.mxu1 %v27050_v3  ;;  %24661 = vmatprep.mubr.f32.mxu0 %v123_v22 }
  0x1a   :  { %24685 = vmatpush3.msra.mxu1 %v27050_v3  ;;  %24676 = vmatprep.subr.mxu0 %v180_v21 }
  0x1b   :  { %24662 = vmatmul.mubr.f32.gmra.mxu0 %v133_v24  ;;  %24671 = vmatprep.mubr.f32.mxu1 %v124_v28 }
  0x1c   :  { %24677 = vmatpush3.msra.mxu0 %v180_v21  ;;  %24672 = vmatmul.mubr.f32.gmra.mxu1 %v134_v30 }
  0x1d   :  { %24686 = vmatprep.subr.mxu1 %v27052_v4  ;;  %24678 = vmatprep.mubr.f32.mxu0 %v27064_v9 }
  0x1e   :  { %24687 = vmatpush3.msra.mxu1 %v27052_v4  ;;  %24688 = vmatprep.mubr.f32.mxu1 %v27064_v9  ;;  %v18_v4 = vld [vmem:[%s30370_s1] sm:$0xff] }
  0x1f   :  { %24679 = vmatmul.mubr.f32.vlgmr.msra.gmra.mxu0 %v27071_v14  ;;  %24694 = vmatprep.subr.mxu0 %v27108_v41 }
  0x20   :  { %24681 = vmatprep.mubr.f32.mxu0 %v27074_v16  ;;  %24689 = vmatmul.mubr.f32.vlgmr.msra.gmra.mxu1 %v27071_v14 }
  0x21   :  { %24691 = vmatprep.mubr.f32.mxu1 %v27074_v16  ;;  %24695 = vmatpush3.msra.mxu0 %v27108_v41 }
  0x22   :  { %24696 = vmatprep.subr.mxu0 %v27116_v44  ;;  %24708 = vmatprep.subr.mxu1 %v783_v54 }
  0x23   :  { %24682 = vmatmul.mubr.f32.gmra.mxu0 %v27079_v18  ;;  %24709 = vmatpush3.msra.mxu1 %v783_v54 }
  0x24   :  { %24692 = vmatmul.mubr.f32.gmra.mxu1 %v27079_v18  ;;  %24697 = vmatpush3.msra.mxu0 %v27116_v44 }
  0x25   :  { %24698 = vmatprep.subr.mxu0 %v27129_v48  ;;  %24710 = vmatprep.subr.mxu1 %v790_v58 }
  0x26   :  { %24699 = vmatpush3.msra.mxu0 %v27129_v48  ;;  %24711 = vmatpush3.msra.mxu1 %v790_v58 }
  0x27   :  { %24700 = vmatprep.subr.mxu0 %v27144_v53  ;;  %24712 = vmatprep.subr.mxu1 %v797_v61 }
  0x28   :  { %24701 = vmatpush3.msra.mxu0 %v27144_v53  ;;  %24713 = vmatpush3.msra.mxu1 %v797_v61 }
  0x29   :  { %24722 = vmatprep.subr.mxu0 %v27114_v43  ;;  %24714 = vmatprep.subr.mxu1 %v804_v63 }
  0x2a   :  { %24715 = vmatpush3.msra.mxu1 %v804_v63 }
  0x2b   :  { %24736 = vmatprep.subr.mxu1 %v27108_v41 }
  0xcf   :  { %v24640_v0 = vpop.f32.mrf.mxu0 }
  0xd0   :  { %v24650_v3 = vpop.f32.mrf.mxu1  ;;  %v119_v7 = vadd.f32 %v24640_v0, %v19_v1 }
  0xd1   :  { %v108_v2 = vpop.f32.mrf.mxu0 }
  0xd2   :  { %v219_v6 = vpop.f32.mrf.mxu1  ;;  %v109_v11 = vadd.f32 %v108_v2, %v18_v4  ;;  %v226_v15 = vadd.f32 %v24650_v3, %v119_v7 }
  0xd3   :  { %v24643_v5 = vpop.f32.mrf.mxu0 }
  0xd4   :  { %v24653_v10 = vpop.f32.mrf.mxu1  ;;  %v139_v16 = vadd.f32 %v24643_v5, %v21_v8  ;;  %v220_v19 = vadd.f32 %v219_v6, %v109_v11 }
  0xd5   :  { %v128_v9 = vpop.f32.mrf.mxu0 }
  0xd6   :  { %v231_v13 = vpop.f32.mrf.mxu1  ;;  %v129_v20 = vadd.f32 %v128_v9, %v20_v12  ;;  %v238_v24 = vadd.f32 %v24653_v10, %v139_v16 }
  0xd7   :  { %v24660_v14 = vpop.f32.mrf.mxu0 }
  0xd8   :  { %v24670_v18 = vpop.f32.mrf.mxu1  ;;  %v321_v21 = vadd.f32 %v24660_v14, %v226_v15  ;;  %v232_v28 = vadd.f32 %v231_v13, %v129_v20 }
  0xd9   :  { %v313_v17 = vpop.f32.mrf.mxu0 }
  0xda   :  { %v409_v23 = vpop.f32.mrf.mxu1  ;;  %v314_v25 = vadd.f32 %v313_v17, %v220_v19  ;;  %v418_v29 = vadd.f32 %v24670_v18, %v321_v21 }
  0xdb   :  { %v24663_v22 = vpop.f32.mrf.mxu0 }
  0xdc   :  { %v24673_v27 = vpop.f32.mrf.mxu1  ;;  %v335_v30 = vadd.f32 %v24663_v22, %v238_v24  ;;  %v410_v33 = vadd.f32 %v409_v23, %v314_v25 }
  0xdd   :  { %v327_v26 = vpop.f32.mrf.mxu0 }
  0xde   :  { %v425_v31 = vpop.f32.mrf.mxu1  ;;  %v328_v34 = vadd.f32 %v327_v26, %v232_v28  ;;  %v434_v38 = vadd.f32 %v24673_v27, %v335_v30 }
  0xdf   :  { %v24680_v32 = vpop.f32.mrf.mxu0 }
  0xe0   :  { %v517_v35 = vadd.f32 %v24680_v32, %v418_v29  ;;  %v24690_v37 = vpop.f32.mrf.mxu1  ;;  %v426_v49 = vadd.f32 %v425_v31, %v328_v34 }
  0xe1   :  { %v510_v36 = vpop.f32.mrf.mxu0 }
  0xe2   :  { %v511_v39 = vadd.f32 %v510_v36, %v410_v33  ;;  %v27179_v40 = vadd.f32 %v24690_v37, %v517_v35  ;;  %v601_v45 = vpop.f32.mrf.mxu1 }
  0xe3   :  { %v24683_v42 = vpop.f32.mrf.mxu0 }
  0xe4   :  { %30376 = vst [vmem:[#allocation7_spill] sm:$0xff] %v27179_v40  ;;  %v637_v50 = vsel %vm632_vm1, %v27179_v40, 0  ;;  %v529_v54 = vadd.f32 %v24683_v42, %v434_v38  ;;  %v27183_v55 = vadd.f32 %v601_v45, %v511_v39  ;;  %v24693_v61 = vpop.f32.mrf.mxu1 }
  0xe5   :  { %v27185_v58 = vand.u32 4294901760, %v637_v50  ;;  %v522_v59 = vpop.f32.mrf.mxu0 }
  0xe6   :  { %30377 = vst [vmem:[#allocation8_spill] sm:$0xff] %v27183_v55  ;;  %v634_v62 = vsel %vm632_vm1, %v27183_v55, 0  ;;  %v523_v63 = vadd.f32 %v522_v59, %v426_v49  ;;  %v27189_v0 = vadd.f32 %v24693_v61, %v529_v54  ;;  %v613_v3 = vpop.f32.mrf.mxu1 }
  0xe7   :  { %v725_v1 = vsub.f32 %v637_v50, %v27185_v58  ;;  %v27192_v2 = vand.u32 4294901760, %v634_v62 }
  0xe8   :  { %30378 = vst [vmem:[#allocation9_spill] sm:$0xff] %v27189_v0  ;;  %v643_v4 = vsel %vm632_vm1, %v27189_v0, 0  ;;  %v27196_v5 = vadd.f32 %v613_v3, %v523_v63 }
  0xe9   :  { %v726_v6 = vand.u32 4294901760, %v725_v1  ;;  %v715_v7 = vsub.f32 %v634_v62, %v27192_v2  ;;  %v27199_v8 = vand.u32 4294901760, %v643_v4  ;;  %24716 = vmatprep.mubr.f32.mxu1 %v27192_v2 }
  0xea   :  { %30379 = vst [vmem:[#allocation10_spill] sm:$0xff] %v27196_v5  ;;  %v640_v9 = vsel %vm632_vm1, %v27196_v5, 0  ;;  %24717 = vmatmul.mubr.f32.vlgmr.msra.gmra.mxu1 %v27185_v58 }
  0xeb   :  { %v745_v10 = vsub.f32 %v643_v4, %v27199_v8  ;;  %v734_v11 = vand.u32 4294901760, %v640_v9  ;;  %24737 = vmatpush3.msra.mxu1 %v27108_v41  ;;  %v716_v12 = vand.u32 4294901760, %v715_v7  ;;  %v727_v13 = vsub.f32 %v725_v1, %v726_v6 }
  0xec   :  { %24738 = vmatprep.subr.mxu1 %v27116_v44 }
  0xed   :  { %v735_v14 = vsub.f32 %v640_v9, %v734_v11  ;;  %24719 = vmatprep.mubr.f32.mxu1 %v734_v11  ;;  %24739 = vmatpush3.msra.mxu1 %v27116_v44  ;;  %v717_v15 = vsub.f32 %v715_v7, %v716_v12  ;;  %v746_v16 = vand.u32 4294901760, %v745_v10  ;;  %v728_v19 = vand.u32 4294901760, %v727_v13 }
  0xee   :  { %24720 = vmatmul.mubr.f32.gmra.mxu1 %v27199_v8  ;;  %24740 = vmatprep.subr.mxu1 %v27129_v48 }
  0xef   :  { %24741 = vmatpush3.msra.mxu1 %v27129_v48  ;;  %24744 = vmatprep.mubr.f32.mxu1 %v716_v12  ;;  %v718_v17 = vand.u32 4294901760, %v717_v15  ;;  %v736_v18 = vand.u32 4294901760, %v735_v14  ;;  %v747_v21 = vsub.f32 %v745_v10, %v746_v16 }
  0xf0   :  { %24742 = vmatprep.subr.mxu1 %v27144_v53 }
  0xf1   :  { %24702 = vmatprep.mubr.f32.mxu0 %v718_v17  ;;  %24743 = vmatpush3.msra.mxu1 %v27144_v53  ;;  %v737_v20 = vsub.f32 %v735_v14, %v736_v18  ;;  %v748_v23 = vand.u32 4294901760, %v747_v21 }
  0xf2   :  { %24703 = vmatmul.mubr.f32.vlgmr.msra.gmra.mxu0 %v728_v19  ;;  %24745 = vmatmul.mubr.f32.vlgmr.msra.gmra.mxu1 %v726_v6 }
  0xf3   :  { %24764 = vmatprep.subr.mxu1 %v27108_v41  ;;  %24723 = vmatpush3.msra.mxu0 %v27114_v43  ;;  %v738_v22 = vand.u32 4294901760, %v737_v20 }
  0xf4   :  { %24747 = vmatprep.mubr.f32.mxu1 %v736_v18  ;;  %24765 = vmatpush3.msra.mxu1 %v27108_v41 }
  0xf5   :  { %24724 = vmatprep.subr.mxu0 %v27127_v47  ;;  %24766 = vmatprep.subr.mxu1 %v27116_v44 }
  0xf6   :  { %24705 = vmatprep.mubr.f32.mxu0 %v738_v22  ;;  %24725 = vmatpush3.msra.mxu0 %v27127_v47 }
  0xf7   :  { %24767 = vmatpush3.msra.mxu1 %v27116_v44  ;;  %24706 = vmatmul.mubr.f32.gmra.mxu0 %v748_v23 }
  0xf8   :  { %24726 = vmatprep.subr.mxu0 %v27142_v52  ;;  %24748 = vmatmul.mubr.f32.gmra.mxu1 %v746_v16 }
  0xf9   :  { %24768 = vmatprep.subr.mxu1 %v27129_v48  ;;  %24727 = vmatpush3.msra.mxu0 %v27142_v52 }
  0xfa   :  { %24730 = vmatprep.mubr.f32.mxu0 %v715_v7  ;;  %24769 = vmatpush3.msra.mxu1 %v27129_v48 }
  0xfb   :  { %24772 = vmatprep.mubr.f32.mxu1 %v27192_v2  ;;  %24728 = vmatprep.subr.mxu0 %v27154_v57 }
  0xfc   :  { %24770 = vmatprep.subr.mxu1 %v27144_v53  ;;  %24729 = vmatpush3.msra.mxu0 %v27154_v57 }
  0xfd   :  { %24771 = vmatpush3.msra.mxu1 %v27144_v53  ;;  %24731 = vmatmul.mubr.f32.vlgmr.msra.gmra.mxu0 %v725_v1 }
  0xfe   :  { %24750 = vmatprep.subr.mxu0 %v27124_v46  ;;  %24773 = vmatmul.mubr.f32.vlgmr.msra.gmra.mxu1 %v27185_v58 }
  0xff   :  { %24733 = vmatprep.mubr.f32.mxu0 %v735_v14  ;;  %24751 = vmatpush3.msra.mxu0 %v27124_v46 }
 0x100   :  { %24775 = vmatprep.mubr.f32.mxu1 %v734_v11  ;;  %24752 = vmatprep.subr.mxu0 %v27139_v51 }
 0x101   :  { %24753 = vmatpush3.msra.mxu0 %v27139_v51 }
 0x102   :  { %24734 = vmatmul.mubr.f32.gmra.mxu0 %v745_v10  ;;  %24754 = vmatprep.subr.mxu0 %v27151_v56 }
 0x103   :  { %24776 = vmatmul.mubr.f32.gmra.mxu1 %v27199_v8  ;;  %24755 = vmatpush3.msra.mxu0 %v27151_v56  ;;  %v23382_v56 = vld [vmem:[%s30370_s1 + $0xd0] ss:$0 sm:$0xff] }
 0x104   :  { %24758 = vmatprep.mubr.f32.mxu0 %v27192_v2  ;;  %24756 = vmatprep.subr.mxu0 %v27161_v60 }
 0x105   :  { %24757 = vmatpush3.msra.mxu0 %v27161_v60 }
 0x106   :  { %24759 = vmatmul.mubr.f32.vlgmr.msra.gmra.mxu0 %v27185_v58 }
 0x107   :  { %24761 = vmatprep.mubr.f32.mxu0 %v734_v11 }
 0x10a   :  { %24762 = vmatmul.mubr.f32.gmra.mxu0 %v27199_v8 }
 0x1aa   :  { %v24718_v41 = vpop.f32.mrf.mxu1 }
 0x1ac   :  { %v841_v43 = vpop.f32.mrf.mxu1 }
 0x1ae   :  { %v24721_v44 = vpop.f32.mrf.mxu1 }
 0x1b0   :  { %v853_v46 = vpop.f32.mrf.mxu1 }
 0x1b2   :  { %v24704_v47 = vpop.f32.mrf.mxu0  ;;  %v24746_v48 = vpop.f32.mrf.mxu1 }
 0x1b3   :  { %v731_v24 = vadd.f32 %v24704_v47, %v23382_v56 }
 0x1b4   :  { %v720_v51 = vpop.f32.mrf.mxu0  ;;  %v1037_v52 = vpop.f32.mrf.mxu1 }
 0x1b5   :  { %v721_v25 = vadd.f32 %v23382_v56, %v720_v51  ;;  %v848_v29 = vadd.f32 %v24718_v41, %v731_v24 }
 0x1b7   :  { %v24707_v53 = vpop.f32.mrf.mxu0  ;;  %v842_v33 = vadd.f32 %v841_v43, %v721_v25 }
 0x1b8   :  { %v24749_v60 = vpop.f32.mrf.mxu1  ;;  %v751_v28 = vadd.f32 %v24707_v53, %v23382_v56 }
 0x1b9   :  { %v740_v57 = vpop.f32.mrf.mxu0 }
 0x1ba   :  { %v1053_v27 = vpop.f32.mrf.mxu1  ;;  %v741_v31 = vadd.f32 %v23382_v56, %v740_v57  ;;  %v860_v37 = vadd.f32 %v24721_v44, %v751_v28 }
 0x1bc   :  { %v854_v42 = vadd.f32 %v853_v46, %v741_v31 }
 0x1bd   :  { %v24732_v26 = vpop.f32.mrf.mxu0 }
 0x1be   :  { %v947_v32 = vadd.f32 %v24732_v26, %v848_v29  ;;  %v24774_v34 = vpop.f32.mrf.mxu1 }
 0x1bf   :  { %v939_v30 = vpop.f32.mrf.mxu0 }
 0x1c0   :  { %v940_v36 = vadd.f32 %v939_v30, %v842_v33  ;;  %v1046_v45 = vadd.f32 %v24746_v48, %v947_v32  ;;  %v1237_v49 = vpop.f32.mrf.mxu1 }
 0x1c2   :  { %v24735_v35 = vpop.f32.mrf.mxu0  ;;  %v1038_v59 = vadd.f32 %v1037_v52, %v940_v36 }
 0x1c3   :  { %v961_v39 = vadd.f32 %v24735_v35, %v860_v37  ;;  %v24777_v2 = vpop.f32.mrf.mxu1 }
 0x1c4   :  { %v953_v38 = vpop.f32.mrf.mxu0 }
 0x1c5   :  { %v954_v54 = vadd.f32 %v953_v38, %v854_v42  ;;  %v1062_v1 = vadd.f32 %v24749_v60, %v961_v39  ;;  %v1249_v11 = vpop.f32.mrf.mxu1 }
 0x1c6   :  { %v24760_v50 = vpop.f32.mrf.mxu0 }
 0x1c7   :  { %v1151_v58 = vadd.f32 %v24760_v50, %v1046_v45  ;;  %v1054_v7 = vadd.f32 %v1053_v27, %v954_v54 }
 0x1c8   :  { %v1144_v61 = vpop.f32.mrf.mxu0 }
 0x1c9   :  { %v1244_v62 = vadd.f32 %v24774_v34, %v1151_v58  ;;  %v1145_v63 = vadd.f32 %v1144_v61, %v1038_v59 }
 0x1ca   :  { %v24763_v3 = vpop.f32.mrf.mxu0 }
 0x1cb   :  { %1261 = vst.msk [vmem:[#allocation2 + $0x8] sm:$0xff] %vm1259_vm2, %v1244_v62  ;;  %v1238_v4 = vadd.f32 %v1237_v49, %v1145_v63  ;;  %v1163_v6 = vadd.f32 %v24763_v3, %v1062_v1 }
 0x1cc   :  { %v1156_v8 = vpop.f32.mrf.mxu0 }
 0x1cd   :  { %1260 = vst.msk [vmem:[#allocation2] sm:$0xff] %vm1259_vm2, %v1238_v4  ;;  %v1256_v9 = vadd.f32 %v24777_v2, %v1163_v6  ;;  %v1157_v10 = vadd.f32 %v1156_v8, %v1054_v7 }
 0x1cf   :  { %1263 = vst.msk [vmem:[#allocation2 + $0x18] sm:$0xff] %vm1259_vm2, %v1256_v9  ;;  %v1250_v12 = vadd.f32 %v1249_v11, %v1157_v10 }
 0x1d1   :  { %1262 = vst.msk [vmem:[#allocation2 + $0x10] sm:$0xff] %vm1259_vm2, %v1250_v12 }
 0x1d2   :  { %v27250_v13 = vld [vmem:[#allocation2 + $0x8] sm:$0xff] }
 0x1d3   :  { %1270 = vrot.lane.b32.xlu0 %v27250_v13, %s27011_s10  ;;  %v1275_v21 = vsel %vm1272_vm3, %v27250_v13, 0 }
 0x1d4   :  { %v27254_v14 = vld [vmem:[#allocation2] sm:$0xff]  ;;  %v1358_v22 = vand.u32 4294901760, %v1275_v21 }
 0x1d5   :  { %v1273_v15 = vsel %vm1272_vm3, %v27254_v14, 0 }
 0x1d6   :  { %v1348_v16 = vand.u32 4294901760, %v1273_v15  ;;  %v1359_v23 = vsub.f32 %v1275_v21, %v1358_v22 }
 0x1d7   :  { %1268 = vrot.lane.b32.xlu0 %v27254_v14, %s27011_s10 }
 0x1d8   :  { %24789 = vmatprep.mubr.f32.mxu1 %v1348_v16  ;;  %v1349_v17 = vsub.f32 %v1273_v15, %v1348_v16  ;;  %v1360_v44 = vand.u32 4294901760, %v1359_v23 }
 0x1da   :  { %v1350_v18 = vand.u32 4294901760, %v1349_v17  ;;  %v1361_v53 = vsub.f32 %v1359_v23, %v1360_v44 }
 0x1dc   :  { %v1351_v19 = vsub.f32 %v1349_v17, %v1350_v18  ;;  %v1362_v24 = vand.u32 4294901760, %v1361_v53 }
 0x1de   :  { %v1352_v20 = vand.u32 4294901760, %v1351_v19 }
 0x1e0   :  { %24782 = vmatprep.mubr.f32.mxu0 %v1352_v20 }
 0x245   :  { %v1271_v41 = vpop.permute.xlu0 %1270 }
 0x246   :  { %v1279_v43 = vsel %vm1272_vm3, %v1271_v41, 0 }
 0x247   :  { %v1310_v46 = vand.u32 4294901760, %v1279_v43 }
 0x249   :  { %v1398_v47 = vsub.f32 %v1279_v43, %v1310_v46  ;;  %24778 = vmatprep.subr.mxu0 %v1310_v46  ;;  %v1269_v48 = vpop.permute.xlu0 %1268 }
 0x24a   :  { %v1277_v51 = vsel %vm1272_vm3, %v1269_v48, 0  ;;  %24779 = vmatpush3.xpose.msra.mxu0 %v1310_v46 }
 0x24b   :  { %v1313_v52 = vand.u32 4294901760, %v1277_v51  ;;  %v1399_v56 = vand.u32 4294901760, %v1398_v47 }
 0x24d   :  { %v1405_v57 = vsub.f32 %v1277_v51, %v1313_v52  ;;  %24780 = vmatprep.subr.mxu0 %v1313_v52  ;;  %v1400_v60 = vsub.f32 %v1398_v47, %v1399_v56 }
 0x24e   :  { %24781 = vmatpush3.xpose.msra.mxu0 %v1313_v52 }
 0x24f   :  { %24792 = vmatprep.subr.mxu0 %v1398_v47  ;;  %v1401_v25 = vand.u32 4294901760, %v1400_v60  ;;  %v1406_v26 = vand.u32 4294901760, %v1405_v57 }
 0x251   :  { %24783 = vmatmul.mubr.f32.vlgmr.msra.gmra.mxu0 %v1362_v24  ;;  %24785 = vmatprep.subr.mxu1 %v1401_v25  ;;  %v1407_v27 = vsub.f32 %v1405_v57, %v1406_v26 }
 0x252   :  { %24786 = vmatpush3.xpose.msra.mxu1 %v1401_v25  ;;  %24793 = vmatpush3.xpose.msra.mxu0 %v1398_v47 }
 0x253   :  { %24796 = vmatprep.mubr.f32.mxu0 %v1349_v17  ;;  %24794 = vmatprep.subr.mxu0 %v1405_v57  ;;  %v1408_v28 = vand.u32 4294901760, %v1407_v27 }
 0x255   :  { %24787 = vmatprep.subr.mxu1 %v1408_v28 }
 0x256   :  { %24788 = vmatpush3.xpose.msra.mxu1 %v1408_v28  ;;  %24795 = vmatpush3.xpose.msra.mxu0 %v1405_v57 }
 0x257   :  { %24799 = vmatprep.subr.mxu1 %v1310_v46  ;;  %24806 = vmatprep.subr.mxu0 %v1399_v56 }
 0x259   :  { %24790 = vmatmul.mubr.f32.vlgmr.msra.gmra.mxu1 %v1358_v22  ;;  %24797 = vmatmul.mubr.f32.vlgmr.msra.gmra.mxu0 %v1359_v23 }
 0x25a   :  { %24800 = vmatpush3.xpose.msra.mxu1 %v1310_v46  ;;  %24803 = vmatprep.mubr.f32.mxu1 %v1350_v18 }
 0x25b   :  { %24807 = vmatpush3.xpose.msra.mxu0 %v1399_v56  ;;  %24810 = vmatprep.mubr.f32.mxu0 %v1348_v16 }
 0x25c   :  { %24801 = vmatprep.subr.mxu1 %v1313_v52  ;;  %24808 = vmatprep.subr.mxu0 %v1406_v26 }
 0x25e   :  { %24802 = vmatpush3.xpose.msra.mxu1 %v1313_v52 }
 0x25f   :  { %24809 = vmatpush3.xpose.msra.mxu0 %v1406_v26  ;;  %24813 = vmatprep.subr.mxu1 %v1310_v46 }
 0x261   :  { %24804 = vmatmul.mubr.f32.vlgmr.msra.gmra.mxu1 %v1360_v44 }
 0x262   :  { %24811 = vmatmul.mubr.f32.vlgmr.msra.gmra.mxu0 %v1358_v22  ;;  %24814 = vmatpush3.xpose.msra.mxu1 %v1310_v46 }
 0x263   :  { %24817 = vmatprep.mubr.f32.mxu1 %v1348_v16  ;;  %24815 = vmatprep.subr.mxu1 %v1313_v52 }
 0x266   :  { %24816 = vmatpush3.xpose.msra.mxu1 %v1313_v52 }
 0x269   :  { %24818 = vmatmul.mubr.f32.vlgmr.msra.gmra.mxu1 %v1358_v22 }
 0x311   :  { %v24784_v29 = vpop.f32.mrf.mxu0 }
 0x313   :  { %v1354_v31 = vpop.f32.mrf.mxu0 }
 0x319   :  { %v24791_v30 = vpop.f32.mrf.mxu1  ;;  %v24798_v33 = vpop.f32.mrf.mxu0 }
 0x31a   :  { %v1452_v34 = vadd.f32 %v24791_v30, %v24784_v29 }
 0x31b   :  { %v1445_v32 = vpop.f32.mrf.mxu1  ;;  %v1527_v37 = vpop.f32.mrf.mxu0 }
 0x31c   :  { %v1446_v35 = vadd.f32 %v1445_v32, %v1354_v31  ;;  %v1535_v39 = vadd.f32 %v24798_v33, %v1452_v34 }
 0x31e   :  { %v1528_v42 = vadd.f32 %v1527_v37, %v1446_v35 }
 0x321   :  { %v24805_v36 = vpop.f32.mrf.mxu1 }
 0x322   :  { %v24812_v45 = vpop.f32.mrf.mxu0  ;;  %v1618_v49 = vadd.f32 %v24805_v36, %v1535_v39 }
 0x323   :  { %v1609_v38 = vpop.f32.mrf.mxu1 }
 0x324   :  { %v1610_v50 = vadd.f32 %v1609_v38, %v1528_v42  ;;  %v1694_v54 = vpop.f32.mrf.mxu0  ;;  %v1701_v59 = vadd.f32 %v24812_v45, %v1618_v49 }
 0x326   :  { %v1695_v61 = vadd.f32 %v1694_v54, %v1610_v50 }
 0x329   :  { %v24819_v58 = vpop.f32.mrf.mxu1 }
 0x32a   :  { %v1780_v63 = vadd.f32 %v24819_v58, %v1701_v59 }
 0x32b   :  { %v1773_v62 = vpop.f32.mrf.mxu1 }
 0x32c   :  { %v1774_v1 = vadd.f32 %v1773_v62, %v1695_v61  ;;  %v1784_v3 = vmul.f32 0.35355338, %v1780_v63 }
 0x32e   :  { %v1783_v2 = vmul.f32 0.35355338, %v1774_v1  ;;  %v1788_v6 = vsel %vm22_vm0, %v1784_v3, -inf }
 0x330   :  { %v1785_v4 = vsel %vm22_vm0, %v1783_v2, -inf }
 0x331   :  { %1786 = vmax.xlane.f32.xlu1 %v1785_v4 }
 0x335   :  { %1789 = vmax.xlane.f32.xlu1 %v1788_v6 }
 0x3ba   :  { %v1787_v7 = vpop.xlane.xlu1 %1786 }
 0x3bb   :  { %v1791_v8 = vsub.f32 %v1783_v2, %v1787_v7 }
 0x3bd   :  { %v1793_v9 = vmul.f32 1.442695, %v1791_v8 }
 0x3be   :  { %v1790_v10 = vpop.xlane.xlu1 %1789 }
 0x3bf   :  { %26821 = vpow2.f32 %v1793_v9  ;;  %v1792_v11 = vsub.f32 %v1784_v3, %v1790_v10 }
 0x3c1   :  { %v1795_v12 = vmul.f32 1.442695, %v1792_v11 }
 0x3c3   :  { %26823 = vpow2.f32 %v1795_v12 }
 0x3cc   :  { %v26822_v15 = vpop.eup %26821 }
 0x3cd   :  { %v1797_v16 = vsel %vm22_vm0, %v26822_v15, 0.0 }
 0x3ce   :  { %1798 = vadd.xlane.f32.xlu0 %v1797_v16 }
 0x3d0   :  { %v26824_v17 = vpop.eup %26823 }
 0x3d1   :  { %v1800_v18 = vsel %vm22_vm0, %v26824_v17, 0.0 }
 0x3d2   :  { %1801 = vadd.xlane.f32.xlu1 %v1800_v18 }
 0x3e3   :  { %1815 = vrot.lane.b32.xlu1 %v27250_v13, %s27012_s11 }
 0x3e4   :  { %2333 = vrot.lane.b32.xlu0 %v27254_v14, %s27013_s12 }
 0x3e7   :  { %1813 = vrot.lane.b32.xlu1 %v27254_v14, %s27012_s11 }
 0x3eb   :  { %2339 = vrot.lane.b32.xlu1 %v27250_v13, %s27014_s13 }
 0x3ef   :  { %2337 = vrot.lane.b32.xlu1 %v27254_v14, %s27014_s13 }
 0x3f3   :  { %2335 = vrot.lane.b32.xlu1 %v27250_v13, %s27013_s12 }
 0x457   :  { %v1799_v19 = vpop.xlane.xlu0 %1798 }
 0x458   :  { %26825 = vrcp.f32 %v1799_v19 }
 0x45b   :  { %v1802_v20 = vpop.xlane.xlu1 %1801  ;;  %v2334_v45 = vpop.permute.xlu0 %2333 }
 0x45c   :  { %26827 = vrcp.f32 %v1802_v20  ;;  %v2341_v61 = vsel %vm1272_vm3, %v2334_v45, 0 }
 0x45d   :  { %v27329_v4 = vand.u32 4294901760, %v2341_v61 }
 0x45f   :  { %v1816_v21 = vpop.permute.xlu1 %1815  ;;  %v2417_v12 = vsub.f32 %v2341_v61, %v27329_v4 }
 0x460   :  { %v27280_v22 = vand.u32 4294901760, %v1816_v21 }
 0x461   :  { %v2418_v18 = vand.u32 4294901760, %v2417_v12 }
 0x462   :  { %v27283_v23 = vsub.f32 %v1816_v21, %v27280_v22  ;;  %24820 = vmatprep.subr.mxu0 %v27280_v22 }
 0x463   :  { %24821 = vmatpush3.msra.mxu0 %v27280_v22  ;;  %v1814_v41 = vpop.permute.xlu1 %1813 }
 0x464   :  { %v27287_v43 = vand.u32 4294901760, %v1814_v41  ;;  %v27290_v44 = vand.u32 4294901760, %v27283_v23 }
 0x465   :  { %v26826_v46 = vpop.eup %26825 }
 0x466   :  { %v1805_v47 = vmul.f32 %v26826_v46, %v1799_v19  ;;  %v27293_v48 = vsub.f32 %v1814_v41, %v27287_v43  ;;  %24822 = vmatprep.subr.mxu0 %v27287_v43  ;;  %v1944_v51 = vsub.f32 %v27283_v23, %v27290_v44 }
 0x467   :  { %24823 = vmatpush3.msra.mxu0 %v27287_v43  ;;  %v2340_v52 = vpop.permute.xlu1 %2339 }
 0x468   :  { %v1807_v53 = vsub.f32 2.0, %v1805_v47  ;;  %v2347_v56 = vsel %vm1272_vm3, %v2340_v52, 0  ;;  %24834 = vmatprep.subr.mxu0 %v27283_v23  ;;  %v1945_v57 = vand.u32 4294901760, %v1944_v51  ;;  %v27302_v60 = vand.u32 4294901760, %v27293_v48 }
 0x469   :  { %v26828_v24 = vpop.eup %26827  ;;  %v27306_v28 = vand.u32 4294901760, %v2347_v56 }
 0x46a   :  { %v1809_v25 = vmul.f32 %v26826_v46, %v1807_v53  ;;  %v1806_v26 = vmul.f32 %v26828_v24, %v1802_v20  ;;  %24827 = vmatprep.subr.mxu1 %v1945_v57  ;;  %v1951_v27 = vsub.f32 %v27293_v48, %v27302_v60  ;;  %v2419_v20 = vsub.f32 %v2417_v12, %v2418_v18 }
 0x46b   :  { %24828 = vmatpush3.msra.mxu1 %v1945_v57  ;;  %v2338_v29 = vpop.permute.xlu1 %2337  ;;  %v27313_v39 = vsub.f32 %v2347_v56, %v27306_v28 }
 0x46c   :  { %v1811_v30 = vmul.f32 %v26822_v15, %v1809_v25  ;;  %v1808_v31 = vsub.f32 2.0, %v1806_v26  ;;  %v2345_v32 = vsel %vm1272_vm3, %v2338_v29, 0  ;;  %v1952_v33 = vand.u32 4294901760, %v1951_v27 }
 0x46d   :  { %v27310_v36 = vand.u32 4294901760, %v2345_v32  ;;  %v27321_v59 = vand.u32 4294901760, %v27313_v39 }
 0x46e   :  { %v1810_v34 = vmul.f32 %v26828_v24, %v1808_v31  ;;  %24829 = vmatprep.subr.mxu1 %v1952_v33  ;;  %v1820_v35 = vsel %vm22_vm0, %v1811_v30, 0 }
 0x46f   :  { %24830 = vmatpush3.msra.mxu1 %v1952_v33  ;;  %v1892_v37 = vand.u32 4294901760, %v1820_v35  ;;  %v27318_v50 = vsub.f32 %v2345_v32, %v27310_v36  ;;  %v2336_v6 = vpop.permute.xlu1 %2335  ;;  %v2468_v7 = vsub.f32 %v27313_v39, %v27321_v59 }
 0x470   :  { %v1812_v38 = vmul.f32 %v26824_v17, %v1810_v34  ;;  %24841 = vmatprep.subr.mxu1 %v27280_v22  ;;  %v2343_v9 = vsel %vm1272_vm3, %v2336_v6, 0 }
 0x471   :  { %24831 = vmatprep.mubr.f32.mxu1 %v1892_v37  ;;  %v1893_v42 = vsub.f32 %v1820_v35, %v1892_v37  ;;  %v27327_v3 = vand.u32 4294901760, %v27318_v50  ;;  %v2469_v15 = vand.u32 4294901760, %v2468_v7  ;;  %v2426_v16 = vand.u32 4294901760, %v2343_v9 }
 0x472   :  { %v1823_v49 = vsel %vm22_vm0, %v1812_v38, 0 }
 0x473   :  { %v1902_v54 = vand.u32 4294901760, %v1823_v49  ;;  %v1894_v58 = vand.u32 4294901760, %v1893_v42  ;;  %v2475_v11 = vsub.f32 %v27318_v50, %v27327_v3  ;;  %v2427_v19 = vsub.f32 %v2343_v9, %v2426_v16 }
 0x475   :  { %v1903_v62 = vsub.f32 %v1823_v49, %v1902_v54  ;;  %24832 = vmatmul.mubr.f32.vlgmr.msra.gmra.mxu1 %v1902_v54  ;;  %v1895_v63 = vsub.f32 %v1893_v42, %v1894_v58  ;;  %v2476_v17 = vand.u32 4294901760, %v2475_v11  ;;  %v2428_v21 = vand.u32 4294901760, %v2427_v19 }
 0x476   :  { %24842 = vmatpush3.msra.mxu1 %v27280_v22  ;;  %24845 = vmatprep.mubr.f32.mxu1 %v1894_v58 }
 0x477   :  { %24843 = vmatprep.subr.mxu1 %v27287_v43  ;;  %v1896_v1 = vand.u32 4294901760, %v1895_v63  ;;  %v1904_v2 = vand.u32 4294901760, %v1903_v62 }
 0x478   :  { %24844 = vmatpush3.msra.mxu1 %v27287_v43 }
 0x479   :  { %24855 = vmatprep.subr.mxu1 %v27280_v22  ;;  %24824 = vmatprep.mubr.f32.mxu0 %v1896_v1  ;;  %v1905_v8 = vsub.f32 %v1903_v62, %v1904_v2 }
 0x47a   :  { %24846 = vmatmul.mubr.f32.vlgmr.msra.gmra.mxu1 %v1904_v2 }
 0x47b   :  { %24856 = vmatpush3.msra.mxu1 %v27280_v22  ;;  %24859 = vmatprep.mubr.f32.mxu1 %v1892_v37  ;;  %v1906_v10 = vand.u32 4294901760, %v1905_v8  ;;  %v2420_v22 = vand.u32 4294901760, %v2419_v20 }
 0x47c   :  { %24857 = vmatprep.subr.mxu1 %v27287_v43 }
 0x47d   :  { %24858 = vmatpush3.msra.mxu1 %v27287_v43  ;;  %24825 = vmatmul.mubr.f32.vlgmr.msra.gmra.mxu0 %v1906_v10 }
 0x47e   :  { %24869 = vmatprep.subr.mxu1 %v2469_v15  ;;  %24835 = vmatpush3.msra.mxu0 %v27283_v23  ;;  %v2429_v23 = vsub.f32 %v2427_v19, %v2428_v21 }
 0x47f   :  { %24860 = vmatmul.mubr.f32.vlgmr.msra.gmra.mxu1 %v1902_v54  ;;  %24836 = vmatprep.subr.mxu0 %v27293_v48 }
 0x480   :  { %24870 = vmatpush3.xpose.msra.mxu1 %v2469_v15  ;;  %24838 = vmatprep.mubr.f32.mxu0 %v1893_v42  ;;  %v2430_v41 = vand.u32 4294901760, %v2429_v23 }
 0x481   :  { %24871 = vmatprep.subr.mxu1 %v2476_v17  ;;  %24873 = vmatprep.mubr.f32.mxu1 %v27329_v4 }
 0x482   :  { %24837 = vmatpush3.msra.mxu0 %v27293_v48 }
 0x483   :  { %24848 = vmatprep.subr.mxu0 %v27290_v44  ;;  %24839 = vmatmul.mubr.f32.vlgmr.msra.gmra.mxu0 %v1903_v62 }
 0x484   :  { %24849 = vmatpush3.msra.mxu0 %v27290_v44  ;;  %24872 = vmatpush3.xpose.msra.mxu1 %v2476_v17 }
 0x485   :  { %24850 = vmatprep.subr.mxu0 %v27302_v60  ;;  %24852 = vmatprep.mubr.f32.mxu0 %v1892_v37 }
 0x486   :  { %24883 = vmatprep.subr.mxu1 %v27306_v28  ;;  %24851 = vmatpush3.msra.mxu0 %v27302_v60 }
 0x487   :  { %24862 = vmatprep.subr.mxu0 %v27306_v28  ;;  %24874 = vmatmul.mubr.f32.vlgmr.msra.gmra.mxu1 %v2426_v16 }
 0x488   :  { %24853 = vmatmul.mubr.f32.vlgmr.msra.gmra.mxu0 %v1902_v54  ;;  %24884 = vmatpush3.xpose.msra.mxu1 %v27306_v28 }
 0x489   :  { %24863 = vmatpush3.xpose.msra.mxu0 %v27306_v28  ;;  %24887 = vmatprep.mubr.f32.mxu1 %v2418_v18 }
 0x48a   :  { %24864 = vmatprep.subr.mxu0 %v27310_v36  ;;  %24866 = vmatprep.mubr.f32.mxu0 %v2420_v22 }
 0x48b   :  { %24885 = vmatprep.subr.mxu1 %v27310_v36 }
 0x48c   :  { %24886 = vmatpush3.xpose.msra.mxu1 %v27310_v36 }
 0x48d   :  { %24865 = vmatpush3.xpose.msra.mxu0 %v27310_v36  ;;  %24897 = vmatprep.subr.mxu1 %v27306_v28 }
 0x48e   :  { %24876 = vmatprep.subr.mxu0 %v27313_v39 }
 0x48f   :  { %24888 = vmatmul.mubr.f32.vlgmr.msra.gmra.mxu1 %v2428_v21 }
 0x490   :  { %24867 = vmatmul.mubr.f32.vlgmr.msra.gmra.mxu0 %v2430_v41  ;;  %24898 = vmatpush3.xpose.msra.mxu1 %v27306_v28 }
 0x491   :  { %24877 = vmatpush3.xpose.msra.mxu0 %v27313_v39  ;;  %24880 = vmatprep.mubr.f32.mxu0 %v2417_v12 }
 0x492   :  { %24901 = vmatprep.mubr.f32.mxu1 %v27329_v4  ;;  %24878 = vmatprep.subr.mxu0 %v27318_v50 }
 0x493   :  { %24899 = vmatprep.subr.mxu1 %v27310_v36 }
 0x494   :  { %24900 = vmatpush3.xpose.msra.mxu1 %v27310_v36 }
 0x495   :  { %24879 = vmatpush3.xpose.msra.mxu0 %v27318_v50 }
 0x496   :  { %24890 = vmatprep.subr.mxu0 %v27321_v59 }
 0x497   :  { %24902 = vmatmul.mubr.f32.vlgmr.msra.gmra.mxu1 %v2426_v16 }
 0x498   :  { %24881 = vmatmul.mubr.f32.vlgmr.msra.gmra.mxu0 %v2427_v19 }
 0x499   :  { %24891 = vmatpush3.xpose.msra.mxu0 %v27321_v59  ;;  %24894 = vmatprep.mubr.f32.mxu0 %v27329_v4 }
 0x49a   :  { %24892 = vmatprep.subr.mxu0 %v27327_v3 }
 0x49d   :  { %24893 = vmatpush3.xpose.msra.mxu0 %v27327_v3 }
 0x4a0   :  { %24895 = vmatmul.mubr.f32.vlgmr.msra.gmra.mxu0 %v2426_v16 }
 0x535   :  { %v24833_v43 = vpop.f32.mrf.mxu1 }
 0x537   :  { %v1989_v44 = vpop.f32.mrf.mxu1 }
 0x53a   :  { %v24847_v48 = vpop.f32.mrf.mxu1 }
 0x53c   :  { %v2153_v53 = vpop.f32.mrf.mxu1 }
 0x53d   :  { %v24826_v46 = vpop.f32.mrf.mxu0 }
 0x53e   :  { %v1996_v51 = vadd.f32 %v24833_v43, %v24826_v46 }
 0x53f   :  { %v1898_v47 = vpop.f32.mrf.mxu0  ;;  %v24861_v26 = vpop.f32.mrf.mxu1 }
 0x540   :  { %v1990_v56 = vadd.f32 %v1989_v44, %v1898_v47 }
 0x541   :  { %v2317_v33 = vpop.f32.mrf.mxu1 }
 0x543   :  { %v24840_v52 = vpop.f32.mrf.mxu0 }
 0x544   :  { %v2079_v57 = vadd.f32 %v24840_v52, %v1996_v51 }
 0x545   :  { %v2071_v60 = vpop.f32.mrf.mxu0 }
 0x546   :  { %v2072_v24 = vadd.f32 %v2071_v60, %v1990_v56  ;;  %v2162_v25 = vadd.f32 %v24847_v48, %v2079_v57 }
 0x547   :  { %v24875_v36 = vpop.f32.mrf.mxu1 }
 0x548   :  { %v24854_v27 = vpop.f32.mrf.mxu0  ;;  %v2154_v28 = vadd.f32 %v2153_v53, %v2072_v24 }
 0x549   :  { %v2245_v29 = vadd.f32 %v24854_v27, %v2162_v25  ;;  %v2513_v38 = vpop.f32.mrf.mxu1 }
 0x54a   :  { %v2238_v30 = vpop.f32.mrf.mxu0 }
 0x54b   :  { %v2324_v31 = vadd.f32 %v24861_v26, %v2245_v29  ;;  %v2239_v32 = vadd.f32 %v2238_v30, %v2154_v28 }
 0x54d   :  { %2328 = vst.msk [vmem:[#allocation3 + $0x8] sm:$0xff] %vm1272_vm3, %v2324_v31  ;;  %v2318_v34 = vadd.f32 %v2317_v33, %v2239_v32 }
 0x54f   :  { %2327 = vst.msk [vmem:[#allocation3] sm:$0xff] %vm1272_vm3, %v2318_v34  ;;  %v24889_v45 = vpop.f32.mrf.mxu1 }
 0x550   :  { %v24868_v35 = vpop.f32.mrf.mxu0 }
 0x551   :  { %v2520_v42 = vadd.f32 %v24875_v36, %v24868_v35  ;;  %v2677_v59 = vpop.f32.mrf.mxu1 }
 0x552   :  { %v2422_v37 = vpop.f32.mrf.mxu0 }
 0x553   :  { %v2514_v50 = vadd.f32 %v2513_v38, %v2422_v37 }
 0x557   :  { %v24903_v62 = vpop.f32.mrf.mxu1 }
 0x558   :  { %v24882_v39 = vpop.f32.mrf.mxu0 }
 0x559   :  { %v2603_v54 = vadd.f32 %v24882_v39, %v2520_v42  ;;  %v2841_v7 = vpop.f32.mrf.mxu1 }
 0x55a   :  { %v2595_v49 = vpop.f32.mrf.mxu0 }
 0x55b   :  { %v2596_v58 = vadd.f32 %v2595_v49, %v2514_v50  ;;  %v2686_v61 = vadd.f32 %v24889_v45, %v2603_v54 }
 0x55d   :  { %v2678_v2 = vadd.f32 %v2677_v59, %v2596_v58 }
 0x560   :  { %v24896_v63 = vpop.f32.mrf.mxu0 }
 0x561   :  { %v2769_v1 = vadd.f32 %v24896_v63, %v2686_v61 }
 0x562   :  { %v2762_v3 = vpop.f32.mrf.mxu0 }
 0x563   :  { %v2848_v4 = vadd.f32 %v24903_v62, %v2769_v1  ;;  %v2763_v6 = vadd.f32 %v2762_v3, %v2678_v2 }
 0x565   :  { %v2852_v8 = vmul.f32 0.35355338, %v2848_v4  ;;  %v2842_v9 = vadd.f32 %v2841_v7, %v2763_v6 }
 0x567   :  { %v2856_v10 = vsel %vm22_vm0, %v2852_v8, -inf  ;;  %v2851_v11 = vmul.f32 0.35355338, %v2842_v9 }
 0x568   :  { %2857 = vmax.xlane.f32.xlu0 %v2856_v10 }
 0x569   :  { %v2853_v12 = vsel %vm22_vm0, %v2851_v11, -inf }
 0x56a   :  { %2854 = vmax.xlane.f32.xlu1 %v2853_v12 }
 0x57e   :  { %2881 = vrot.lane.b32.xlu0 %v27254_v14, %s27015_s14 }
 0x582   :  { %3410 = vrot.lane.b32.xlu0 %v27254_v14, %s27016_s15 }
 0x5f1   :  { %v2858_v15 = vpop.xlane.xlu0 %2857 }
 0x5f2   :  { %v2860_v16 = vsub.f32 %v2852_v8, %v2858_v15 }
 0x5f3   :  { %v2855_v17 = vpop.xlane.xlu1 %2854 }
 0x5f4   :  { %v2863_v18 = vmul.f32 1.442695, %v2860_v16  ;;  %v2859_v19 = vsub.f32 %v2851_v11, %v2855_v17 }
 0x5f5   :  { %v2882_v43 = vpop.permute.xlu0 %2881 }
 0x5f6   :  { %26829 = vpow2.f32 %v2863_v18  ;;  %v2861_v20 = vmul.f32 1.442695, %v2859_v19  ;;  %v27390_v46 = vand.u32 4294901760, %v2882_v43 }
 0x5f8   :  { %26831 = vpow2.f32 %v2861_v20  ;;  %v27393_v48 = vsub.f32 %v2882_v43, %v27390_v46 }
 0x5f9   :  { %v3411_v58 = vpop.permute.xlu0 %3410 }
 0x5fa   :  { %v3418_v2 = vsel %vm1272_vm3, %v3411_v58, 0 }
 0x5fb   :  { %v27435_v7 = vand.u32 4294901760, %v3418_v2 }
 0x5fd   :  { %v3494_v17 = vsub.f32 %v3418_v2, %v27435_v7 }
 0x603   :  { %v26830_v21 = vpop.eup %26829 }
 0x604   :  { %v2868_v22 = vsel %vm22_vm0, %v26830_v21, 0.0 }
 0x605   :  { %v26832_v23 = vpop.eup %26831  ;;  %2869 = vadd.xlane.f32.xlu1 %v2868_v22  ;;  %v3495_v22 = vand.u32 4294901760, %v3494_v17 }
 0x606   :  { %v2865_v41 = vsel %vm22_vm0, %v26832_v23, 0.0 }
 0x609   :  { %2866 = vadd.xlane.f32.xlu1 %v2865_v41  ;;  %v3496_v41 = vsub.f32 %v3494_v17, %v3495_v22 }
 0x61a   :  { %2883 = vrot.lane.b32.xlu1 %v27250_v13, %s27015_s14 }
 0x61e   :  { %3416 = vrot.lane.b32.xlu1 %v27250_v13, %s27017_s16 }
 0x622   :  { %3414 = vrot.lane.b32.xlu1 %v27254_v14, %s27017_s16  ;;  %v27398_v14 = vand.u32 4294901760, %v27393_v48 }
 0x624   :  { %v3019_v25 = vsub.f32 %v27393_v48, %v27398_v14 }
 0x626   :  { %3412 = vrot.lane.b32.xlu1 %v27250_v13, %s27016_s15  ;;  %v3020_v33 = vand.u32 4294901760, %v3019_v25 }
 0x68e   :  { %v2870_v44 = vpop.xlane.xlu1 %2869 }
 0x68f   :  { %26833 = vrcp.f32 %v2870_v44 }
 0x692   :  { %v2867_v47 = vpop.xlane.xlu1 %2866 }
 0x693   :  { %26835 = vrcp.f32 %v2867_v47 }
 0x696   :  { %v2884_v51 = vpop.permute.xlu1 %2883 }
 0x697   :  { %v2922_v52 = vand.u32 4294901760, %v2884_v51 }
 0x699   :  { %v27395_v53 = vsub.f32 %v2884_v51, %v2922_v52  ;;  %24904 = vmatprep.subr.mxu0 %v2922_v52 }
 0x69a   :  { %24905 = vmatpush3.msra.mxu0 %v2922_v52  ;;  %v3417_v13 = vpop.permute.xlu1 %3416 }
 0x69b   :  { %24906 = vmatprep.subr.mxu0 %v27390_v46  ;;  %v27402_v56 = vand.u32 4294901760, %v27395_v53  ;;  %v3424_v29 = vsel %vm1272_vm3, %v3417_v13, 0 }
 0x69c   :  { %v26834_v57 = vpop.eup %26833  ;;  %24907 = vmatpush3.msra.mxu0 %v27390_v46  ;;  %v27411_v36 = vand.u32 4294901760, %v3424_v29 }
 0x69d   :  { %v2874_v60 = vmul.f32 %v26834_v57, %v2870_v44  ;;  %24918 = vmatprep.subr.mxu0 %v27395_v53  ;;  %v3012_v24 = vsub.f32 %v27395_v53, %v27402_v56  ;;  %v3497_v44 = vand.u32 4294901760, %v3496_v41 }
 0x69e   :  { %v3415_v30 = vpop.permute.xlu1 %3414  ;;  %v27420_v50 = vsub.f32 %v3424_v29, %v27411_v36 }
 0x69f   :  { %v2876_v26 = vsub.f32 2.0, %v2874_v60  ;;  %v3013_v27 = vand.u32 4294901760, %v3012_v24  ;;  %v3422_v37 = vsel %vm1272_vm3, %v3415_v30, 0 }
 0x6a0   :  { %v26836_v28 = vpop.eup %26835  ;;  %v27415_v42 = vand.u32 4294901760, %v3422_v37  ;;  %v27428_v1 = vand.u32 4294901760, %v27420_v50 }
 0x6a1   :  { %v2878_v31 = vmul.f32 %v26834_v57, %v2876_v26  ;;  %v2873_v32 = vmul.f32 %v26836_v28, %v2867_v47  ;;  %24911 = vmatprep.subr.mxu1 %v3013_v27 }
 0x6a2   :  { %24912 = vmatpush3.msra.mxu1 %v3013_v27  ;;  %v27425_v61 = vsub.f32 %v3422_v37, %v27415_v42  ;;  %v3413_v8 = vpop.permute.xlu1 %3412  ;;  %v3545_v9 = vsub.f32 %v27420_v50, %v27428_v1 }
 0x6a3   :  { %v2880_v34 = vmul.f32 %v26830_v21, %v2878_v31  ;;  %v2875_v35 = vsub.f32 2.0, %v2873_v32  ;;  %24913 = vmatprep.subr.mxu1 %v3020_v33  ;;  %v3420_v12 = vsel %vm1272_vm3, %v3413_v8, 0 }
 0x6a4   :  { %24914 = vmatpush3.msra.mxu1 %v3020_v33  ;;  %v27433_v6 = vand.u32 4294901760, %v27425_v61  ;;  %v3546_v18 = vand.u32 4294901760, %v3545_v9  ;;  %v3503_v20 = vand.u32 4294901760, %v3420_v12 }
 0x6a5   :  { %v2877_v38 = vmul.f32 %v26836_v28, %v2875_v35  ;;  %24925 = vmatprep.subr.mxu1 %v2922_v52  ;;  %v2891_v39 = vsel %vm22_vm0, %v2880_v34, 0 }
 0x6a6   :  { %v27417_v45 = vand.u32 4294901760, %v2891_v39  ;;  %v3552_v16 = vsub.f32 %v27425_v61, %v27433_v6 }
 0x6a7   :  { %v2879_v49 = vmul.f32 %v26832_v23, %v2877_v38  ;;  %v3504_v23 = vsub.f32 %v3420_v12, %v3503_v20  ;;  %v27500_v12 = vld [vmem:[#allocation2] sm:$0xff] }
 0x6a8   :  { %v2971_v54 = vsub.f32 %v2891_v39, %v27417_v45  ;;  %v3553_v21 = vand.u32 4294901760, %v3552_v16 }
 0x6a9   :  { %v2888_v59 = vsel %vm22_vm0, %v2879_v49, 0  ;;  %v3505_v43 = vand.u32 4294901760, %v3504_v23 }
 0x6aa   :  { %v2960_v62 = vand.u32 4294901760, %v2888_v59  ;;  %v2972_v63 = vand.u32 4294901760, %v2971_v54 }
 0x6ac   :  { %24915 = vmatprep.mubr.f32.mxu1 %v2960_v62  ;;  %v2961_v3 = vsub.f32 %v2888_v59, %v2960_v62  ;;  %v2973_v10 = vsub.f32 %v2971_v54, %v2972_v63 }
 0x6ad   :  { %24916 = vmatmul.mubr.f32.vlgmr.msra.gmra.mxu1 %v27417_v45 }
 0x6ae   :  { %24926 = vmatpush3.msra.mxu1 %v2922_v52  ;;  %v2962_v4 = vand.u32 4294901760, %v2961_v3  ;;  %v2974_v19 = vand.u32 4294901760, %v2973_v10  ;;  %v26981_v10 = vld [vmem:[#allocation2 + $0x8] sm:$0xff] }
 0x6af   :  { %24927 = vmatprep.subr.mxu1 %v27390_v46 }
 0x6b0   :  { %24928 = vmatpush3.msra.mxu1 %v27390_v46  ;;  %24929 = vmatprep.mubr.f32.mxu1 %v2962_v4  ;;  %v2963_v11 = vsub.f32 %v2961_v3, %v2962_v4 }
 0x6b1   :  { %24939 = vmatprep.subr.mxu1 %v2922_v52  ;;  %24930 = vmatmul.mubr.f32.vlgmr.msra.gmra.mxu1 %v2972_v63 }
 0x6b2   :  { %24940 = vmatpush3.msra.mxu1 %v2922_v52  ;;  %24943 = vmatprep.mubr.f32.mxu1 %v2960_v62  ;;  %v2964_v15 = vand.u32 4294901760, %v2963_v11  ;;  %v27496_v11 = vld [vmem:[#allocation2 + $0x8] sm:$0xff] }
 0x6b3   :  { %24941 = vmatprep.subr.mxu1 %v27390_v46 }
 0x6b4   :  { %24942 = vmatpush3.msra.mxu1 %v27390_v46  ;;  %24908 = vmatprep.mubr.f32.mxu0 %v2964_v15  ;;  %v3506_v46 = vsub.f32 %v3504_v23, %v3505_v43 }
 0x6b5   :  { %24953 = vmatprep.subr.mxu1 %v3546_v18  ;;  %24909 = vmatmul.mubr.f32.vlgmr.msra.gmra.mxu0 %v2974_v19 }
 0x6b6   :  { %24919 = vmatpush3.msra.mxu0 %v27395_v53  ;;  %24944 = vmatmul.mubr.f32.vlgmr.msra.gmra.mxu1 %v27417_v45  ;;  %v3507_v47 = vand.u32 4294901760, %v3506_v46 }
 0x6b7   :  { %24954 = vmatpush3.xpose.msra.mxu1 %v3546_v18  ;;  %24920 = vmatprep.subr.mxu0 %v27393_v48 }
 0x6b8   :  { %24922 = vmatprep.mubr.f32.mxu0 %v2961_v3  ;;  %24955 = vmatprep.subr.mxu1 %v3553_v21 }
 0x6b9   :  { %24957 = vmatprep.mubr.f32.mxu1 %v27435_v7  ;;  %24921 = vmatpush3.msra.mxu0 %v27393_v48 }
 0x6ba   :  { %24932 = vmatprep.subr.mxu0 %v27402_v56  ;;  %24923 = vmatmul.mubr.f32.vlgmr.msra.gmra.mxu0 %v2971_v54 }
 0x6bb   :  { %24933 = vmatpush3.msra.mxu0 %v27402_v56  ;;  %24956 = vmatpush3.xpose.msra.mxu1 %v3553_v21 }
 0x6bc   :  { %24934 = vmatprep.subr.mxu0 %v27398_v14  ;;  %24936 = vmatprep.mubr.f32.mxu0 %v2960_v62 }
 0x6bd   :  { %24967 = vmatprep.subr.mxu1 %v27411_v36  ;;  %24935 = vmatpush3.msra.mxu0 %v27398_v14 }
 0x6be   :  { %24946 = vmatprep.subr.mxu0 %v27411_v36  ;;  %24958 = vmatmul.mubr.f32.vlgmr.msra.gmra.mxu1 %v3503_v20 }
 0x6bf   :  { %24937 = vmatmul.mubr.f32.vlgmr.msra.gmra.mxu0 %v27417_v45  ;;  %24968 = vmatpush3.xpose.msra.mxu1 %v27411_v36 }
 0x6c0   :  { %24947 = vmatpush3.xpose.msra.mxu0 %v27411_v36  ;;  %24971 = vmatprep.mubr.f32.mxu1 %v3495_v22 }
 0x6c1   :  { %24948 = vmatprep.subr.mxu0 %v27415_v42  ;;  %24950 = vmatprep.mubr.f32.mxu0 %v3497_v44 }
 0x6c2   :  { %24969 = vmatprep.subr.mxu1 %v27415_v42 }
 0x6c3   :  { %24970 = vmatpush3.xpose.msra.mxu1 %v27415_v42 }
 0x6c4   :  { %24949 = vmatpush3.xpose.msra.mxu0 %v27415_v42  ;;  %24981 = vmatprep.subr.mxu1 %v27411_v36 }
 0x6c5   :  { %24960 = vmatprep.subr.mxu0 %v27420_v50 }
 0x6c6   :  { %24972 = vmatmul.mubr.f32.vlgmr.msra.gmra.mxu1 %v3505_v43 }
 0x6c7   :  { %24951 = vmatmul.mubr.f32.vlgmr.msra.gmra.mxu0 %v3507_v47  ;;  %24982 = vmatpush3.xpose.msra.mxu1 %v27411_v36 }
 0x6c8   :  { %24961 = vmatpush3.xpose.msra.mxu0 %v27420_v50  ;;  %24964 = vmatprep.mubr.f32.mxu0 %v3494_v17 }
 0x6c9   :  { %24985 = vmatprep.mubr.f32.mxu1 %v27435_v7  ;;  %24962 = vmatprep.subr.mxu0 %v27425_v61 }
 0x6ca   :  { %24983 = vmatprep.subr.mxu1 %v27415_v42 }
 0x6cb   :  { %24984 = vmatpush3.xpose.msra.mxu1 %v27415_v42 }
 0x6cc   :  { %24963 = vmatpush3.xpose.msra.mxu0 %v27425_v61 }
 0x6cd   :  { %24974 = vmatprep.subr.mxu0 %v27428_v1 }
 0x6ce   :  { %24986 = vmatmul.mubr.f32.vlgmr.msra.gmra.mxu1 %v3503_v20 }
 0x6cf   :  { %24965 = vmatmul.mubr.f32.vlgmr.msra.gmra.mxu0 %v3504_v23 }
 0x6d0   :  { %24975 = vmatpush3.xpose.msra.mxu0 %v27428_v1  ;;  %24978 = vmatprep.mubr.f32.mxu0 %v27435_v7 }
 0x6d1   :  { %24976 = vmatprep.subr.mxu0 %v27433_v6 }
 0x6d4   :  { %24977 = vmatpush3.xpose.msra.mxu0 %v27433_v6 }
 0x6d7   :  { %24979 = vmatmul.mubr.f32.vlgmr.msra.gmra.mxu0 %v3503_v20 }
 0x76d   :  { %v24917_v48 = vpop.f32.mrf.mxu1 }
 0x76f   :  { %v27479_v51 = vpop.f32.mrf.mxu1 }
 0x771   :  { %v24931_v13 = vpop.f32.mrf.mxu1 }
 0x773   :  { %v27485_v24 = vpop.f32.mrf.mxu1 }
 0x775   :  { %v24910_v52 = vpop.f32.mrf.mxu0 }
 0x776   :  { %v3064_v53 = vadd.f32 %v24917_v48, %v24910_v52  ;;  %v24945_v28 = vpop.f32.mrf.mxu1 }
 0x777   :  { %v27481_v14 = vpop.f32.mrf.mxu0 }
 0x778   :  { %v27491_v31 = vpop.f32.mrf.mxu1 }
 0x77a   :  { %v24924_v56 = vpop.f32.mrf.mxu0 }
 0x77b   :  { %v3147_v57 = vadd.f32 %v24924_v56, %v3064_v53  ;;  %v26982_v53 = vld [vmem:[#allocation2] sm:$0xff] }
 0x77c   :  { %v27483_v60 = vpop.f32.mrf.mxu0 }
 0x77d   :  { %v3230_v25 = vadd.f32 %v24931_v13, %v3147_v57 }
 0x77e   :  { %v24959_v33 = vpop.f32.mrf.mxu1 }
 0x77f   :  { %v24938_v26 = vpop.f32.mrf.mxu0 }
 0x780   :  { %v3313_v27 = vadd.f32 %v24938_v26, %v3230_v25  ;;  %v3590_v35 = vpop.f32.mrf.mxu1 }
 0x781   :  { %v27489_v30 = vpop.f32.mrf.mxu0 }
 0x782   :  { %v27487_v29 = vadd.f32 %v24945_v28, %v3313_v27 }
 0x786   :  { %v24973_v38 = vpop.f32.mrf.mxu1 }
 0x787   :  { %v24952_v32 = vpop.f32.mrf.mxu0 }
 0x788   :  { %v3597_v37 = vadd.f32 %v24959_v33, %v24952_v32  ;;  %v3754_v50 = vpop.f32.mrf.mxu1 }
 0x789   :  { %v3499_v34 = vpop.f32.mrf.mxu0 }
 0x78a   :  { %v3591_v42 = vadd.f32 %v3590_v35, %v3499_v34 }
 0x78e   :  { %v24987_v58 = vpop.f32.mrf.mxu1 }
 0x78f   :  { %v24966_v36 = vpop.f32.mrf.mxu0 }
 0x790   :  { %v3680_v45 = vadd.f32 %v24966_v36, %v3597_v37  ;;  %v3918_v3 = vpop.f32.mrf.mxu1 }
 0x791   :  { %v3672_v39 = vpop.f32.mrf.mxu0 }
 0x792   :  { %v3673_v49 = vadd.f32 %v3672_v39, %v3591_v42  ;;  %v3763_v54 = vadd.f32 %v24973_v38, %v3680_v45 }
 0x794   :  { %v3755_v62 = vadd.f32 %v3754_v50, %v3673_v49 }
 0x797   :  { %v24980_v59 = vpop.f32.mrf.mxu0 }
 0x798   :  { %v3846_v61 = vadd.f32 %v24980_v59, %v3763_v54 }
 0x799   :  { %v3839_v63 = vpop.f32.mrf.mxu0 }
 0x79a   :  { %v3925_v1 = vadd.f32 %v24987_v58, %v3846_v61  ;;  %v3840_v2 = vadd.f32 %v3839_v63, %v3755_v62 }
 0x79c   :  { %v3929_v4 = vmul.f32 0.35355338, %v3925_v1  ;;  %v3919_v6 = vadd.f32 %v3918_v3, %v3840_v2 }
 0x79e   :  { %v3933_v7 = vsel %vm22_vm0, %v3929_v4, -inf  ;;  %v3928_v8 = vmul.f32 0.35355338, %v3919_v6 }
 0x79f   :  { %3934 = vmax.xlane.f32.xlu1 %v3933_v7 }
 0x7a0   :  { %v3930_v9 = vsel %vm22_vm0, %v3928_v8, -inf }
 0x7a1   :  { %3931 = vmax.xlane.f32.xlu0 %v3930_v9 }
 0x7b0   :  { %3960 = vrot.lane.b32.xlu1 %v26981_v10, %s27018_s17 }
 0x7b4   :  { %4493 = vrot.lane.b32.xlu1 %v27496_v11, %s27019_s18 }
 0x7b8   :  { %4491 = vrot.lane.b32.xlu1 %v27500_v12, %s27019_s18 }
 0x7bc   :  { %4489 = vrot.lane.b32.xlu1 %v27496_v11, %s27020_s19 }
 0x828   :  { %v3935_v15 = vpop.xlane.xlu1 %3934 }
 0x829   :  { %v3937_v16 = vsub.f32 %v3929_v4, %v3935_v15 }
 0x82a   :  { %v3932_v17 = vpop.xlane.xlu0 %3931 }
 0x82b   :  { %v3936_v18 = vsub.f32 %v3928_v8, %v3932_v17  ;;  %v3940_v20 = vmul.f32 1.442695, %v3937_v16 }
 0x82c   :  { %v3961_v19 = vpop.permute.xlu1 %3960 }
 0x82d   :  { %v3938_v21 = vmul.f32 1.442695, %v3936_v18  ;;  %v27506_v22 = vand.u32 4294901760, %v3961_v19 }
 0x82f   :  { %26837 = vpow2.f32 %v3938_v21  ;;  %v27509_v23 = vsub.f32 %v3961_v19, %v27506_v22  ;;  %24988 = vmatprep.subr.mxu0 %v27506_v22 }
 0x830   :  { %24989 = vmatpush3.msra.mxu0 %v27506_v22  ;;  %26839 = vpow2.f32 %v3940_v20  ;;  %v4494_v27 = vpop.permute.xlu1 %4493 }
 0x831   :  { %v27514_v41 = vand.u32 4294901760, %v27509_v23  ;;  %v4501_v38 = vsel %vm1272_vm3, %v4494_v27, 0 }
 0x832   :  { %v27537_v49 = vand.u32 4294901760, %v4501_v38 }
 0x833   :  { %v4089_v43 = vsub.f32 %v27509_v23, %v27514_v41 }
 0x834   :  { %v4492_v39 = vpop.permute.xlu1 %4491  ;;  %v27545_v1 = vsub.f32 %v4501_v38, %v27537_v49 }
 0x835   :  { %v4090_v44 = vand.u32 4294901760, %v4089_v43  ;;  %v4499_v50 = vsel %vm1272_vm3, %v4492_v39, 0 }
 0x836   :  { %v27542_v62 = vand.u32 4294901760, %v4499_v50  ;;  %v27552_v10 = vand.u32 4294901760, %v27545_v1 }
 0x837   :  { %24995 = vmatprep.subr.mxu1 %v4090_v44 }
 0x838   :  { %24996 = vmatpush3.msra.mxu1 %v4090_v44  ;;  %v27549_v7 = vsub.f32 %v4499_v50, %v27542_v62  ;;  %v4490_v21 = vpop.permute.xlu1 %4489  ;;  %v4622_v44 = vsub.f32 %v27545_v1, %v27552_v10 }
 0x83a   :  { %v27558_v20 = vand.u32 4294901760, %v27549_v7 }
 0x83c   :  { %v26838_v46 = vpop.eup %26837 }
 0x83d   :  { %v3942_v47 = vsel %vm22_vm0, %v26838_v46, 0.0  ;;  %v26840_v48 = vpop.eup %26839 }
 0x83e   :  { %3943 = vadd.xlane.f32.xlu0 %v3942_v47  ;;  %v3945_v52 = vsel %vm22_vm0, %v26840_v48, 0.0  ;;  %v4497_v47 = vsel %vm1272_vm3, %v4490_v21, 0 }
 0x842   :  { %3946 = vadd.xlane.f32.xlu0 %v3945_v52  ;;  %v4629_v52 = vsub.f32 %v27549_v7, %v27558_v20 }
 0x858   :  { %3958 = vrot.lane.b32.xlu0 %v26982_v53, %s27018_s17 }
 0x85c   :  { %4487 = vrot.lane.b32.xlu0 %v27500_v12, %s27020_s19 }
 0x8c7   :  { %v3944_v13 = vpop.xlane.xlu0 %3943 }
 0x8c8   :  { %26841 = vrcp.f32 %v3944_v13 }
 0x8cb   :  { %v3947_v56 = vpop.xlane.xlu0 %3946 }
 0x8cc   :  { %26843 = vrcp.f32 %v3947_v56 }
 0x8cf   :  { %v3959_v57 = vpop.permute.xlu0 %3958 }
 0x8d0   :  { %v27523_v25 = vand.u32 4294901760, %v3959_v57 }
 0x8d2   :  { %v27526_v26 = vsub.f32 %v3959_v57, %v27523_v25  ;;  %24990 = vmatprep.subr.mxu0 %v27523_v25 }
 0x8d3   :  { %24991 = vmatpush3.msra.mxu0 %v27523_v25  ;;  %v4488_v4 = vpop.permute.xlu0 %4487 }
 0x8d4   :  { %25002 = vmatprep.subr.mxu0 %v27509_v23  ;;  %v27532_v28 = vand.u32 4294901760, %v27526_v26  ;;  %v4495_v15 = vsel %vm1272_vm3, %v4488_v4, 0 }
 0x8d5   :  { %v26842_v32 = vpop.eup %26841  ;;  %v27560_v43 = vand.u32 4294901760, %v4495_v15 }
 0x8d6   :  { %v3950_v33 = vmul.f32 %v26842_v32, %v3944_v13  ;;  %v4096_v34 = vsub.f32 %v27526_v26, %v27532_v28  ;;  %v4623_v13 = vand.u32 4294901760, %v4622_v44 }
 0x8d7   :  { %v4571_v53 = vsub.f32 %v4495_v15, %v27560_v43 }
 0x8d8   :  { %v3952_v35 = vsub.f32 2.0, %v3950_v33  ;;  %v4097_v36 = vand.u32 4294901760, %v4096_v34 }
 0x8d9   :  { %v26844_v37 = vpop.eup %26843  ;;  %v4572_v57 = vand.u32 4294901760, %v4571_v53 }
 0x8da   :  { %v3954_v42 = vmul.f32 %v26842_v32, %v3952_v35  ;;  %v3951_v45 = vmul.f32 %v26844_v37, %v3947_v56  ;;  %24997 = vmatprep.subr.mxu1 %v4097_v36  ;;  %v4580_v56 = vand.u32 4294901760, %v4497_v47 }
 0x8db   :  { %24998 = vmatpush3.msra.mxu1 %v4097_v36 }
 0x8dc   :  { %v3956_v54 = vmul.f32 %v26838_v46, %v3954_v42  ;;  %v3953_v58 = vsub.f32 2.0, %v3951_v45  ;;  %25009 = vmatprep.subr.mxu1 %v27506_v22  ;;  %v4581_v27 = vsub.f32 %v4497_v47, %v4580_v56 }
 0x8de   :  { %v3955_v59 = vmul.f32 %v26844_v37, %v3953_v58  ;;  %v3965_v61 = vsel %vm22_vm0, %v3956_v54, 0 }
 0x8df   :  { %v4037_v63 = vand.u32 4294901760, %v3965_v61 }
 0x8e0   :  { %v3957_v2 = vmul.f32 %v26840_v48, %v3955_v59 }
 0x8e1   :  { %24999 = vmatprep.mubr.f32.mxu1 %v4037_v63  ;;  %v4038_v3 = vsub.f32 %v3965_v61, %v4037_v63 }
 0x8e2   :  { %v3968_v6 = vsel %vm22_vm0, %v3957_v2, 0 }
 0x8e3   :  { %v4047_v8 = vand.u32 4294901760, %v3968_v6  ;;  %v4039_v9 = vand.u32 4294901760, %v4038_v3 }
 0x8e5   :  { %v4048_v16 = vsub.f32 %v3968_v6, %v4047_v8  ;;  %25000 = vmatmul.mubr.f32.vlgmr.msra.gmra.mxu1 %v4047_v8  ;;  %v4040_v17 = vsub.f32 %v4038_v3, %v4039_v9 }
 0x8e6   :  { %25010 = vmatpush3.msra.mxu1 %v27506_v22  ;;  %25013 = vmatprep.mubr.f32.mxu1 %v4039_v9 }
 0x8e7   :  { %25011 = vmatprep.subr.mxu1 %v27523_v25  ;;  %v4041_v18 = vand.u32 4294901760, %v4040_v17  ;;  %v4049_v19 = vand.u32 4294901760, %v4048_v16 }
 0x8e8   :  { %25012 = vmatpush3.msra.mxu1 %v27523_v25 }
 0x8e9   :  { %25023 = vmatprep.subr.mxu1 %v27506_v22  ;;  %24992 = vmatprep.mubr.f32.mxu0 %v4041_v18  ;;  %v4050_v46 = vsub.f32 %v4048_v16, %v4049_v19 }
 0x8ea   :  { %25014 = vmatmul.mubr.f32.vlgmr.msra.gmra.mxu1 %v4049_v19 }
 0x8eb   :  { %25024 = vmatpush3.msra.mxu1 %v27506_v22  ;;  %25027 = vmatprep.mubr.f32.mxu1 %v4037_v63  ;;  %v4051_v48 = vand.u32 4294901760, %v4050_v46  ;;  %v4630_v22 = vand.u32 4294901760, %v4629_v52 }
 0x8ec   :  { %25025 = vmatprep.subr.mxu1 %v27523_v25 }
 0x8ed   :  { %25026 = vmatpush3.msra.mxu1 %v27523_v25  ;;  %24993 = vmatmul.mubr.f32.vlgmr.msra.gmra.mxu0 %v4051_v48  ;;  %v4582_v25 = vand.u32 4294901760, %v4581_v27 }
 0x8ee   :  { %25037 = vmatprep.subr.mxu1 %v4623_v13  ;;  %25003 = vmatpush3.msra.mxu0 %v27509_v23  ;;  %v4573_v23 = vsub.f32 %v4571_v53, %v4572_v57 }
 0x8ef   :  { %25028 = vmatmul.mubr.f32.vlgmr.msra.gmra.mxu1 %v4047_v8  ;;  %25004 = vmatprep.subr.mxu0 %v27526_v26 }
 0x8f0   :  { %25038 = vmatpush3.xpose.msra.mxu1 %v4623_v13  ;;  %25006 = vmatprep.mubr.f32.mxu0 %v4038_v3 }
 0x8f1   :  { %25039 = vmatprep.subr.mxu1 %v4630_v22  ;;  %25041 = vmatprep.mubr.f32.mxu1 %v27560_v43 }
 0x8f2   :  { %25005 = vmatpush3.msra.mxu0 %v27526_v26  ;;  %v4574_v26 = vand.u32 4294901760, %v4573_v23 }
 0x8f3   :  { %25016 = vmatprep.subr.mxu0 %v27514_v41  ;;  %25007 = vmatmul.mubr.f32.vlgmr.msra.gmra.mxu0 %v4048_v16 }
 0x8f4   :  { %25017 = vmatpush3.msra.mxu0 %v27514_v41  ;;  %25040 = vmatpush3.xpose.msra.mxu1 %v4630_v22  ;;  %v4583_v41 = vsub.f32 %v4581_v27, %v4582_v25  ;;  %v27621_v22 = vld [vmem:[#allocation2 + $0x18] sm:$0xff] }
 0x8f5   :  { %25018 = vmatprep.subr.mxu0 %v27532_v28  ;;  %25020 = vmatprep.mubr.f32.mxu0 %v4037_v63 }
 0x8f6   :  { %25051 = vmatprep.subr.mxu1 %v27537_v49  ;;  %25019 = vmatpush3.msra.mxu0 %v27532_v28  ;;  %v4584_v28 = vand.u32 4294901760, %v4583_v41 }
 0x8f7   :  { %25030 = vmatprep.subr.mxu0 %v27537_v49  ;;  %25042 = vmatmul.mubr.f32.vlgmr.msra.gmra.mxu1 %v4580_v56 }
 0x8f8   :  { %25021 = vmatmul.mubr.f32.vlgmr.msra.gmra.mxu0 %v4047_v8  ;;  %25052 = vmatpush3.xpose.msra.mxu1 %v27537_v49 }
 0x8f9   :  { %25031 = vmatpush3.xpose.msra.mxu0 %v27537_v49  ;;  %25055 = vmatprep.mubr.f32.mxu1 %v4572_v57  ;;  %v27625_v57 = vld [vmem:[#allocation2 + $0x10] sm:$0xff] }
 0x8fa   :  { %25032 = vmatprep.subr.mxu0 %v27542_v62  ;;  %25034 = vmatprep.mubr.f32.mxu0 %v4574_v26 }
 0x8fb   :  { %25053 = vmatprep.subr.mxu1 %v27542_v62 }
 0x8fc   :  { %25054 = vmatpush3.xpose.msra.mxu1 %v27542_v62 }
 0x8fd   :  { %25033 = vmatpush3.xpose.msra.mxu0 %v27542_v62  ;;  %25065 = vmatprep.subr.mxu1 %v27537_v49 }
 0x8fe   :  { %25044 = vmatprep.subr.mxu0 %v27545_v1 }
 0x8ff   :  { %25056 = vmatmul.mubr.f32.vlgmr.msra.gmra.mxu1 %v4582_v25 }
 0x900   :  { %25035 = vmatmul.mubr.f32.vlgmr.msra.gmra.mxu0 %v4584_v28  ;;  %25066 = vmatpush3.xpose.msra.mxu1 %v27537_v49 }
 0x901   :  { %25045 = vmatpush3.xpose.msra.mxu0 %v27545_v1  ;;  %25048 = vmatprep.mubr.f32.mxu0 %v4571_v53 }
 0x902   :  { %25069 = vmatprep.mubr.f32.mxu1 %v27560_v43  ;;  %25046 = vmatprep.subr.mxu0 %v27549_v7 }
 0x903   :  { %25067 = vmatprep.subr.mxu1 %v27542_v62 }
 0x904   :  { %25068 = vmatpush3.xpose.msra.mxu1 %v27542_v62 }
 0x905   :  { %25047 = vmatpush3.xpose.msra.mxu0 %v27549_v7 }
 0x906   :  { %25058 = vmatprep.subr.mxu0 %v27552_v10 }
 0x907   :  { %25070 = vmatmul.mubr.f32.vlgmr.msra.gmra.mxu1 %v4580_v56 }
 0x908   :  { %25049 = vmatmul.mubr.f32.vlgmr.msra.gmra.mxu0 %v4581_v27 }
 0x909   :  { %25059 = vmatpush3.xpose.msra.mxu0 %v27552_v10  ;;  %25062 = vmatprep.mubr.f32.mxu0 %v27560_v43 }
 0x90a   :  { %25060 = vmatprep.subr.mxu0 %v27558_v20 }
 0x90d   :  { %25061 = vmatpush3.xpose.msra.mxu0 %v27558_v20 }
 0x910   :  { %25063 = vmatmul.mubr.f32.vlgmr.msra.gmra.mxu0 %v4580_v56 }
 0x9a5   :  { %v25001_v32 = vpop.f32.mrf.mxu1 }
 0x9a7   :  { %v27603_v34 = vpop.f32.mrf.mxu1 }
 0x9aa   :  { %v25015_v37 = vpop.f32.mrf.mxu1 }
 0x9ac   :  { %v27609_v45 = vpop.f32.mrf.mxu1 }
 0x9ad   :  { %v24994_v33 = vpop.f32.mrf.mxu0 }
 0x9ae   :  { %v4141_v35 = vadd.f32 %v25001_v32, %v24994_v33 }
 0x9af   :  { %v27605_v36 = vpop.f32.mrf.mxu0  ;;  %v25029_v58 = vpop.f32.mrf.mxu1 }
 0x9b1   :  { %v27615_v62 = vpop.f32.mrf.mxu1 }
 0x9b3   :  { %v25008_v38 = vpop.f32.mrf.mxu0 }
 0x9b4   :  { %v4224_v39 = vadd.f32 %v25008_v38, %v4141_v35 }
 0x9b5   :  { %v27607_v42 = vpop.f32.mrf.mxu0 }
 0x9b6   :  { %v4307_v49 = vadd.f32 %v25015_v37, %v4224_v39 }
 0x9b7   :  { %v25043_v1 = vpop.f32.mrf.mxu1 }
 0x9b8   :  { %v25022_v50 = vpop.f32.mrf.mxu0 }
 0x9b9   :  { %v4390_v54 = vadd.f32 %v25022_v50, %v4307_v49  ;;  %v4667_v3 = vpop.f32.mrf.mxu1 }
 0x9ba   :  { %v27613_v61 = vpop.f32.mrf.mxu0 }
 0x9bb   :  { %v27611_v59 = vadd.f32 %v25029_v58, %v4390_v54 }
 0x9bf   :  { %v25057_v7 = vpop.f32.mrf.mxu1 }
 0x9c0   :  { %v25036_v63 = vpop.f32.mrf.mxu0 }
 0x9c1   :  { %v4674_v6 = vadd.f32 %v25043_v1, %v25036_v63  ;;  %v4831_v16 = vpop.f32.mrf.mxu1 }
 0x9c2   :  { %v4576_v2 = vpop.f32.mrf.mxu0 }
 0x9c3   :  { %v4668_v9 = vadd.f32 %v4667_v3, %v4576_v2 }
 0x9c7   :  { %v25071_v18 = vpop.f32.mrf.mxu1 }
 0x9c8   :  { %v25050_v4 = vpop.f32.mrf.mxu0 }
 0x9c9   :  { %v4757_v10 = vadd.f32 %v25050_v4, %v4674_v6  ;;  %v4995_v47 = vpop.f32.mrf.mxu1 }
 0x9ca   :  { %v4749_v8 = vpop.f32.mrf.mxu0 }
 0x9cb   :  { %v4750_v15 = vadd.f32 %v4749_v8, %v4668_v9  ;;  %v4840_v17 = vadd.f32 %v25057_v7, %v4757_v10 }
 0x9cd   :  { %v4832_v21 = vadd.f32 %v4831_v16, %v4750_v15 }
 0x9d0   :  { %v25064_v19 = vpop.f32.mrf.mxu0 }
 0x9d1   :  { %v4923_v20 = vadd.f32 %v25064_v19, %v4840_v17 }
 0x9d2   :  { %v4916_v43 = vpop.f32.mrf.mxu0 }
 0x9d3   :  { %v5002_v44 = vadd.f32 %v25071_v18, %v4923_v20  ;;  %v4917_v46 = vadd.f32 %v4916_v43, %v4832_v21 }
 0x9d5   :  { %v5006_v48 = vmul.f32 0.35355338, %v5002_v44  ;;  %v4996_v52 = vadd.f32 %v4995_v47, %v4917_v46 }
 0x9d7   :  { %v5010_v53 = vsel %vm22_vm0, %v5006_v48, -inf  ;;  %v5005_v13 = vmul.f32 0.35355338, %v4996_v52 }
 0x9d8   :  { %5011 = vmax.xlane.f32.xlu1 %v5010_v53 }
 0x9d9   :  { %v5007_v56 = vsel %vm22_vm0, %v5005_v13, -inf }
 0x9da   :  { %5008 = vmax.xlane.f32.xlu0 %v5007_v56 }
 0x9e9   :  { %5037 = vrot.lane.b32.xlu1 %v27496_v11, %s27021_s20 }
 0x9ed   :  { %5566 = vrot.lane.b32.xlu1 %v27621_v22, %s27011_s10 }
 0x9f1   :  { %5564 = vrot.lane.b32.xlu1 %v27625_v57, %s27011_s10 }
 0xa61   :  { %v5012_v27 = vpop.xlane.xlu1 %5011 }
 0xa62   :  { %v5014_v23 = vsub.f32 %v5006_v48, %v5012_v27 }
 0xa63   :  { %v5009_v25 = vpop.xlane.xlu0 %5008 }
 0xa64   :  { %v5013_v26 = vsub.f32 %v5005_v13, %v5009_v25  ;;  %v5017_v28 = vmul.f32 1.442695, %v5014_v23 }
 0xa65   :  { %v5038_v41 = vpop.permute.xlu1 %5037 }
 0xa66   :  { %v5015_v32 = vmul.f32 1.442695, %v5013_v26  ;;  %v27629_v33 = vand.u32 4294901760, %v5038_v41 }
 0xa68   :  { %26845 = vpow2.f32 %v5015_v32  ;;  %v27632_v11 = vsub.f32 %v5038_v41, %v27629_v33  ;;  %25072 = vmatprep.subr.mxu0 %v27629_v33 }
 0xa69   :  { %25073 = vmatpush3.msra.mxu0 %v27629_v33  ;;  %26847 = vpow2.f32 %v5017_v28  ;;  %v5567_v4 = vpop.permute.xlu1 %5566  ;;  %v5568_v28 = vsel %vm1272_vm3, %v27625_v57, 0 }
 0xa6a   :  { %v27637_v35 = vand.u32 4294901760, %v27632_v11  ;;  %v5574_v16 = vsel %vm1272_vm3, %v5567_v4, 0 }
 0xa6b   :  { %v27654_v20 = vand.u32 4294901760, %v5574_v16 }
 0xa6c   :  { %v5166_v37 = vsub.f32 %v27632_v11, %v27637_v35 }
 0xa6d   :  { %v5565_v17 = vpop.permute.xlu1 %5564  ;;  %v27662_v53 = vsub.f32 %v5574_v16, %v27654_v20 }
 0xa6e   :  { %v5167_v38 = vand.u32 4294901760, %v5166_v37  ;;  %v5572_v21 = vsel %vm1272_vm3, %v5565_v17, 0 }
 0xa6f   :  { %v27659_v48 = vand.u32 4294901760, %v5572_v21  ;;  %v27669_v41 = vand.u32 4294901760, %v27662_v53 }
 0xa70   :  { %25079 = vmatprep.subr.mxu1 %v5167_v38 }
 0xa71   :  { %25080 = vmatpush3.msra.mxu1 %v5167_v38  ;;  %v27666_v23 = vsub.f32 %v5572_v21, %v27659_v48 }
 0xa75   :  { %v26846_v39 = vpop.eup %26845 }
 0xa76   :  { %v5019_v49 = vsel %vm22_vm0, %v26846_v39, 0.0  ;;  %v26848_v50 = vpop.eup %26847 }
 0xa77   :  { %5020 = vadd.xlane.f32.xlu0 %v5019_v49  ;;  %v5022_v54 = vsel %vm22_vm0, %v26848_v50, 0.0  ;;  %v27675_v49 = vand.u32 4294901760, %v27666_v23 }
 0xa79   :  { %v5702_v4 = vsub.f32 %v27666_v23, %v27675_v49 }
 0xa7b   :  { %5023 = vadd.xlane.f32.xlu0 %v5022_v54  ;;  %v27679_v54 = vand.u32 4294901760, %v5568_v28 }
 0xa91   :  { %5035 = vrot.lane.b32.xlu0 %v27500_v12, %s27021_s20 }
 0xb00   :  { %v5021_v58 = vpop.xlane.xlu0 %5020 }
 0xb01   :  { %26849 = vrcp.f32 %v5021_v58 }
 0xb04   :  { %v5024_v63 = vpop.xlane.xlu0 %5023 }
 0xb05   :  { %26851 = vrcp.f32 %v5024_v63 }
 0xb08   :  { %v5036_v1 = vpop.permute.xlu0 %5035 }
 0xb09   :  { %v5079_v2 = vand.u32 4294901760, %v5036_v1 }
 0xb0b   :  { %v27645_v3 = vsub.f32 %v5036_v1, %v5079_v2  ;;  %25074 = vmatprep.subr.mxu0 %v5079_v2 }
 0xb0c   :  { %25075 = vmatpush3.msra.mxu0 %v5079_v2 }
 0xb0d   :  { %25086 = vmatprep.subr.mxu0 %v27632_v11  ;;  %v27649_v6 = vand.u32 4294901760, %v27645_v3 }
 0xb0e   :  { %v26850_v7 = vpop.eup %26849 }
 0xb0f   :  { %v5027_v8 = vmul.f32 %v26850_v7, %v5021_v58  ;;  %v5173_v12 = vsub.f32 %v27645_v3, %v27649_v6 }
 0xb11   :  { %v5029_v9 = vsub.f32 2.0, %v5027_v8  ;;  %v5174_v10 = vand.u32 4294901760, %v5173_v12  ;;  %v5644_v8 = vsub.f32 %v5568_v28, %v27679_v54 }
 0xb12   :  { %v26852_v15 = vpop.eup %26851 }
 0xb13   :  { %v5031_v18 = vmul.f32 %v26850_v7, %v5029_v9  ;;  %v5028_v19 = vmul.f32 %v26852_v15, %v5024_v63  ;;  %25081 = vmatprep.subr.mxu1 %v5174_v10  ;;  %v5570_v63 = vsel %vm1272_vm3, %v27621_v22, 0  ;;  %v5703_v9 = vand.u32 4294901760, %v5702_v4 }
 0xb14   :  { %25082 = vmatpush3.msra.mxu1 %v5174_v10  ;;  %v5653_v12 = vand.u32 4294901760, %v5570_v63 }
 0xb15   :  { %v5033_v43 = vmul.f32 %v26846_v39, %v5031_v18  ;;  %v5030_v44 = vsub.f32 2.0, %v5028_v19  ;;  %25093 = vmatprep.subr.mxu1 %v27629_v33 }
 0xb16   :  { %v5654_v10 = vsub.f32 %v5570_v63, %v5653_v12 }
 0xb17   :  { %v5032_v46 = vmul.f32 %v26852_v15, %v5030_v44  ;;  %v5042_v47 = vsel %vm22_vm0, %v5033_v43, 0 }
 0xb18   :  { %v5114_v52 = vand.u32 4294901760, %v5042_v47 }
 0xb19   :  { %v5034_v13 = vmul.f32 %v26848_v50, %v5032_v46  ;;  %v5695_v50 = vsub.f32 %v27662_v53, %v27669_v41 }
 0xb1a   :  { %25083 = vmatprep.mubr.f32.mxu1 %v5114_v52  ;;  %v5115_v56 = vsub.f32 %v5042_v47, %v5114_v52 }
 0xb1b   :  { %v5045_v27 = vsel %vm22_vm0, %v5034_v13, 0  ;;  %v5696_v7 = vand.u32 4294901760, %v5695_v50 }
 0xb1c   :  { %v5124_v25 = vand.u32 4294901760, %v5045_v27  ;;  %v5116_v26 = vand.u32 4294901760, %v5115_v56 }
 0xb1e   :  { %v5125_v32 = vsub.f32 %v5045_v27, %v5124_v25  ;;  %25084 = vmatmul.mubr.f32.vlgmr.msra.gmra.mxu1 %v5124_v25  ;;  %v5117_v37 = vsub.f32 %v5115_v56, %v5116_v26 }
 0xb1f   :  { %25094 = vmatpush3.msra.mxu1 %v27629_v33  ;;  %25097 = vmatprep.mubr.f32.mxu1 %v5116_v26 }
 0xb20   :  { %25095 = vmatprep.subr.mxu1 %v5079_v2  ;;  %v5118_v38 = vand.u32 4294901760, %v5117_v37  ;;  %v5126_v39 = vand.u32 4294901760, %v5125_v32 }
 0xb21   :  { %25096 = vmatpush3.msra.mxu1 %v5079_v2 }
 0xb22   :  { %25107 = vmatprep.subr.mxu1 %v27629_v33  ;;  %25076 = vmatprep.mubr.f32.mxu0 %v5118_v38  ;;  %v5127_v58 = vsub.f32 %v5125_v32, %v5126_v39 }
 0xb23   :  { %25098 = vmatmul.mubr.f32.vlgmr.msra.gmra.mxu1 %v5126_v39 }
 0xb24   :  { %25108 = vmatpush3.msra.mxu1 %v27629_v33  ;;  %25111 = vmatprep.mubr.f32.mxu1 %v5114_v52  ;;  %v5128_v1 = vand.u32 4294901760, %v5127_v58  ;;  %v5645_v33 = vand.u32 4294901760, %v5644_v8 }
 0xb25   :  { %25109 = vmatprep.subr.mxu1 %v5079_v2 }
 0xb26   :  { %25110 = vmatpush3.msra.mxu1 %v5079_v2  ;;  %25077 = vmatmul.mubr.f32.vlgmr.msra.gmra.mxu0 %v5128_v1  ;;  %v5655_v2 = vand.u32 4294901760, %v5654_v10 }
 0xb27   :  { %25121 = vmatprep.subr.mxu1 %v5696_v7  ;;  %25087 = vmatpush3.msra.mxu0 %v27632_v11  ;;  %v5646_v11 = vsub.f32 %v5644_v8, %v5645_v33 }
 0xb28   :  { %25112 = vmatmul.mubr.f32.vlgmr.msra.gmra.mxu1 %v5124_v25  ;;  %25088 = vmatprep.subr.mxu0 %v27645_v3 }
 0xb29   :  { %25122 = vmatpush3.xpose.msra.mxu1 %v5696_v7  ;;  %25090 = vmatprep.mubr.f32.mxu0 %v5115_v56 }
 0xb2a   :  { %25123 = vmatprep.subr.mxu1 %v5703_v9  ;;  %25125 = vmatprep.mubr.f32.mxu1 %v27679_v54 }
 0xb2b   :  { %25089 = vmatpush3.msra.mxu0 %v27645_v3  ;;  %v5647_v3 = vand.u32 4294901760, %v5646_v11 }
 0xb2c   :  { %25100 = vmatprep.subr.mxu0 %v27637_v35  ;;  %25091 = vmatmul.mubr.f32.vlgmr.msra.gmra.mxu0 %v5125_v32 }
 0xb2d   :  { %25101 = vmatpush3.msra.mxu0 %v27637_v35  ;;  %25124 = vmatpush3.xpose.msra.mxu1 %v5703_v9  ;;  %v5656_v35 = vsub.f32 %v5654_v10, %v5655_v2 }
 0xb2e   :  { %25102 = vmatprep.subr.mxu0 %v27649_v6  ;;  %25104 = vmatprep.mubr.f32.mxu0 %v5114_v52 }
 0xb2f   :  { %25135 = vmatprep.subr.mxu1 %v27654_v20  ;;  %25103 = vmatpush3.msra.mxu0 %v27649_v6  ;;  %v5657_v6 = vand.u32 4294901760, %v5656_v35 }
 0xb30   :  { %25114 = vmatprep.subr.mxu0 %v27654_v20  ;;  %25126 = vmatmul.mubr.f32.vlgmr.msra.gmra.mxu1 %v5653_v12 }
 0xb31   :  { %25105 = vmatmul.mubr.f32.vlgmr.msra.gmra.mxu0 %v5124_v25  ;;  %25136 = vmatpush3.xpose.msra.mxu1 %v27654_v20 }
 0xb32   :  { %25115 = vmatpush3.xpose.msra.mxu0 %v27654_v20  ;;  %25139 = vmatprep.mubr.f32.mxu1 %v5645_v33 }
 0xb33   :  { %25116 = vmatprep.subr.mxu0 %v27659_v48  ;;  %25118 = vmatprep.mubr.f32.mxu0 %v5647_v3 }
 0xb34   :  { %25137 = vmatprep.subr.mxu1 %v27659_v48 }
 0xb35   :  { %25138 = vmatpush3.xpose.msra.mxu1 %v27659_v48 }
 0xb36   :  { %25117 = vmatpush3.xpose.msra.mxu0 %v27659_v48  ;;  %25149 = vmatprep.subr.mxu1 %v27654_v20 }
 0xb37   :  { %25128 = vmatprep.subr.mxu0 %v27662_v53 }
 0xb38   :  { %25140 = vmatmul.mubr.f32.vlgmr.msra.gmra.mxu1 %v5655_v2 }
 0xb39   :  { %25119 = vmatmul.mubr.f32.vlgmr.msra.gmra.mxu0 %v5657_v6  ;;  %25150 = vmatpush3.xpose.msra.mxu1 %v27654_v20 }
 0xb3a   :  { %25129 = vmatpush3.xpose.msra.mxu0 %v27662_v53  ;;  %25132 = vmatprep.mubr.f32.mxu0 %v5644_v8 }
 0xb3b   :  { %25153 = vmatprep.mubr.f32.mxu1 %v27679_v54  ;;  %25130 = vmatprep.subr.mxu0 %v27666_v23 }
 0xb3c   :  { %25151 = vmatprep.subr.mxu1 %v27659_v48 }
 0xb3d   :  { %25152 = vmatpush3.xpose.msra.mxu1 %v27659_v48 }
 0xb3e   :  { %25131 = vmatpush3.xpose.msra.mxu0 %v27666_v23 }
 0xb3f   :  { %25142 = vmatprep.subr.mxu0 %v27669_v41 }
 0xb40   :  { %25154 = vmatmul.mubr.f32.vlgmr.msra.gmra.mxu1 %v5653_v12 }
 0xb41   :  { %25133 = vmatmul.mubr.f32.vlgmr.msra.gmra.mxu0 %v5654_v10 }
 0xb42   :  { %25143 = vmatpush3.xpose.msra.mxu0 %v27669_v41  ;;  %25146 = vmatprep.mubr.f32.mxu0 %v27679_v54 }
 0xb43   :  { %25144 = vmatprep.subr.mxu0 %v27675_v49 }
 0xb46   :  { %25145 = vmatpush3.xpose.msra.mxu0 %v27675_v49 }
 0xb49   :  { %25147 = vmatmul.mubr.f32.vlgmr.msra.gmra.mxu0 %v5653_v12 }
 0xbde   :  { %v25085_v15 = vpop.f32.mrf.mxu1 }
 0xbe0   :  { %v27718_v17 = vpop.f32.mrf.mxu1 }
 0xbe3   :  { %v25099_v20 = vpop.f32.mrf.mxu1 }
 0xbe5   :  { %v27724_v46 = vpop.f32.mrf.mxu1 }
 0xbe6   :  { %v25078_v16 = vpop.f32.mrf.mxu0 }
 0xbe7   :  { %v5218_v18 = vadd.f32 %v25085_v15, %v25078_v16 }
 0xbe8   :  { %v27720_v19 = vpop.f32.mrf.mxu0  ;;  %v25113_v53 = vpop.f32.mrf.mxu1 }
 0xbea   :  { %v27730_v27 = vpop.f32.mrf.mxu1 }
 0xbec   :  { %v25092_v21 = vpop.f32.mrf.mxu0 }
 0xbed   :  { %v5301_v43 = vadd.f32 %v25092_v21, %v5218_v18 }
 0xbee   :  { %v27722_v44 = vpop.f32.mrf.mxu0 }
 0xbef   :  { %v5384_v47 = vadd.f32 %v25099_v20, %v5301_v43 }
 0xbf0   :  { %v25127_v25 = vpop.f32.mrf.mxu1 }
 0xbf1   :  { %v25106_v48 = vpop.f32.mrf.mxu0 }
 0xbf2   :  { %v5467_v52 = vadd.f32 %v25106_v48, %v5384_v47  ;;  %v5740_v41 = vpop.f32.mrf.mxu1 }
 0xbf3   :  { %v27728_v56 = vpop.f32.mrf.mxu0 }
 0xbf4   :  { %v27726_v13 = vadd.f32 %v25113_v53, %v5467_v52 }
 0xbf8   :  { %v25141_v37 = vpop.f32.mrf.mxu1 }
 0xbf9   :  { %v25120_v23 = vpop.f32.mrf.mxu0 }
 0xbfa   :  { %v5747_v32 = vadd.f32 %v25127_v25, %v25120_v23  ;;  %v5904_v54 = vpop.f32.mrf.mxu1 }
 0xbfb   :  { %v5649_v26 = vpop.f32.mrf.mxu0 }
 0xbfc   :  { %v5741_v39 = vadd.f32 %v5740_v41, %v5649_v26 }
 0xc00   :  { %v25155_v63 = vpop.f32.mrf.mxu1 }
 0xc01   :  { %v25134_v28 = vpop.f32.mrf.mxu0 }
 0xc02   :  { %v5830_v49 = vadd.f32 %v25134_v28, %v5747_v32  ;;  %v6068_v33 = vpop.f32.mrf.mxu1 }
 0xc03   :  { %v5822_v38 = vpop.f32.mrf.mxu0 }
 0xc04   :  { %v5823_v50 = vadd.f32 %v5822_v38, %v5741_v39  ;;  %v5913_v58 = vadd.f32 %v25141_v37, %v5830_v49 }
 0xc06   :  { %v5905_v7 = vadd.f32 %v5904_v54, %v5823_v50 }
 0xc09   :  { %v25148_v1 = vpop.f32.mrf.mxu0 }
 0xc0a   :  { %v5996_v4 = vadd.f32 %v25148_v1, %v5913_v58 }
 0xc0b   :  { %v5989_v8 = vpop.f32.mrf.mxu0 }
 0xc0c   :  { %v6075_v12 = vadd.f32 %v25155_v63, %v5996_v4  ;;  %v5990_v9 = vadd.f32 %v5989_v8, %v5905_v7 }
 0xc0e   :  { %v6079_v10 = vmul.f32 0.35355338, %v6075_v12  ;;  %v6069_v11 = vadd.f32 %v6068_v33, %v5990_v9 }
 0xc10   :  { %v6083_v2 = vsel %vm22_vm0, %v6079_v10, -inf  ;;  %v6078_v3 = vmul.f32 0.35355338, %v6069_v11 }
 0xc11   :  { %6084 = vmax.xlane.f32.xlu1 %v6083_v2 }
 0xc12   :  { %v6080_v35 = vsel %vm22_vm0, %v6078_v3, -inf }
 0xc13   :  { %6081 = vmax.xlane.f32.xlu0 %v6080_v35 }
 0xc22   :  { %6110 = vrot.lane.b32.xlu1 %v27621_v22, %s27012_s11 }
 0xc26   :  { %6634 = vrot.lane.b32.xlu1 %v27621_v22, %s27014_s13 }
 0xc2a   :  { %6632 = vrot.lane.b32.xlu1 %v27625_v57, %s27014_s13 }
 0xc2e   :  { %6630 = vrot.lane.b32.xlu1 %v27621_v22, %s27013_s12 }
 0xc9a   :  { %v6085_v6 = vpop.xlane.xlu1 %6084 }
 0xc9b   :  { %v6087_v15 = vsub.f32 %v6079_v10, %v6085_v6 }
 0xc9c   :  { %v6082_v16 = vpop.xlane.xlu0 %6081 }
 0xc9d   :  { %v6086_v18 = vsub.f32 %v6078_v3, %v6082_v16  ;;  %v6090_v21 = vmul.f32 1.442695, %v6087_v15 }
 0xc9e   :  { %v6111_v20 = vpop.permute.xlu1 %6110 }
 0xc9f   :  { %v6088_v43 = vmul.f32 1.442695, %v6086_v18  ;;  %v27742_v47 = vand.u32 4294901760, %v6111_v20 }
 0xca1   :  { %26853 = vpow2.f32 %v6088_v43  ;;  %v27745_v48 = vsub.f32 %v6111_v20, %v27742_v47  ;;  %25156 = vmatprep.subr.mxu0 %v27742_v47 }
 0xca2   :  { %25157 = vmatpush3.msra.mxu0 %v27742_v47  ;;  %26855 = vpow2.f32 %v6090_v21  ;;  %v6635_v50 = vpop.permute.xlu1 %6634 }
 0xca3   :  { %v27750_v52 = vand.u32 4294901760, %v27745_v48  ;;  %v6642_v12 = vsel %vm1272_vm3, %v6635_v50, 0 }
 0xca4   :  { %v27774_v11 = vand.u32 4294901760, %v6642_v12 }
 0xca5   :  { %v6239_v53 = vsub.f32 %v27745_v48, %v27750_v52 }
 0xca6   :  { %v6633_v9 = vpop.permute.xlu1 %6632  ;;  %v27782_v20 = vsub.f32 %v6642_v12, %v27774_v11 }
 0xca7   :  { %v6240_v23 = vand.u32 4294901760, %v6239_v53  ;;  %v6640_v2 = vsel %vm1272_vm3, %v6633_v9, 0 }
 0xca8   :  { %v27779_v16 = vand.u32 4294901760, %v6640_v2 }
 0xca9   :  { %25163 = vmatprep.subr.mxu1 %v6240_v23 }
 0xcaa   :  { %25164 = vmatpush3.msra.mxu1 %v6240_v23 }
 0xcae   :  { %v26854_v25 = vpop.eup %26853 }
 0xcaf   :  { %v6092_v26 = vsel %vm22_vm0, %v26854_v25, 0.0  ;;  %v26856_v41 = vpop.eup %26855 }
 0xcb0   :  { %6093 = vadd.xlane.f32.xlu0 %v6092_v26  ;;  %v6095_v28 = vsel %vm22_vm0, %v26856_v41, 0.0 }
 0xcb4   :  { %6096 = vadd.xlane.f32.xlu0 %v6095_v28 }
 0xcca   :  { %6108 = vrot.lane.b32.xlu0 %v27625_v57, %s27012_s11 }
 0xcce   :  { %6628 = vrot.lane.b32.xlu0 %v27625_v57, %s27013_s12 }
 0xd39   :  { %v6094_v32 = vpop.xlane.xlu0 %6093 }
 0xd3a   :  { %26857 = vrcp.f32 %v6094_v32 }
 0xd3d   :  { %v6097_v37 = vpop.xlane.xlu0 %6096 }
 0xd3e   :  { %26859 = vrcp.f32 %v6097_v37 }
 0xd41   :  { %v6109_v38 = vpop.permute.xlu0 %6108 }
 0xd42   :  { %v27760_v39 = vand.u32 4294901760, %v6109_v38 }
 0xd44   :  { %v27763_v49 = vsub.f32 %v6109_v38, %v27760_v39  ;;  %25158 = vmatprep.subr.mxu0 %v27760_v39 }
 0xd45   :  { %25159 = vmatpush3.msra.mxu0 %v27760_v39  ;;  %v6629_v53 = vpop.permute.xlu0 %6628 }
 0xd46   :  { %25170 = vmatprep.subr.mxu0 %v27745_v48  ;;  %v27769_v54 = vand.u32 4294901760, %v27763_v49 }
 0xd47   :  { %v26858_v58 = vpop.eup %26857 }
 0xd48   :  { %v6100_v63 = vmul.f32 %v26858_v58, %v6094_v32  ;;  %v6246_v1 = vsub.f32 %v27763_v49, %v27769_v54  ;;  %v27789_v32 = vand.u32 4294901760, %v27782_v20 }
 0xd4a   :  { %v6102_v4 = vsub.f32 2.0, %v6100_v63  ;;  %v6247_v7 = vand.u32 4294901760, %v6246_v1  ;;  %v6631_v1 = vpop.permute.xlu1 %6630 }
 0xd4b   :  { %v26860_v8 = vpop.eup %26859  ;;  %v6638_v12 = vsel %vm1272_vm3, %v6631_v1, 0 }
 0xd4c   :  { %v6104_v33 = vmul.f32 %v26858_v58, %v6102_v4  ;;  %v6101_v10 = vmul.f32 %v26860_v8, %v6097_v37  ;;  %25165 = vmatprep.subr.mxu1 %v6247_v7  ;;  %v6636_v37 = vsel %vm1272_vm3, %v6629_v53, 0 }
 0xd4d   :  { %25166 = vmatpush3.msra.mxu1 %v6247_v7  ;;  %v27797_v4 = vand.u32 4294901760, %v6636_v37  ;;  %v6763_v7 = vsub.f32 %v27782_v20, %v27789_v32 }
 0xd4e   :  { %v6106_v3 = vmul.f32 %v26854_v25, %v6104_v33  ;;  %v6103_v35 = vsub.f32 2.0, %v6101_v10  ;;  %25177 = vmatprep.subr.mxu1 %v27742_v47  ;;  %v27786_v25 = vsub.f32 %v6640_v2, %v27779_v16 }
 0xd4f   :  { %v6712_v10 = vsub.f32 %v6636_v37, %v27797_v4  ;;  %v6764_v2 = vand.u32 4294901760, %v6763_v7 }
 0xd50   :  { %v6105_v6 = vmul.f32 %v26860_v8, %v6103_v35  ;;  %v6115_v15 = vsel %vm22_vm0, %v6106_v3, 0  ;;  %v27795_v63 = vand.u32 4294901760, %v27786_v25  ;;  %v6721_v3 = vand.u32 4294901760, %v6638_v12 }
 0xd51   :  { %v6187_v18 = vand.u32 4294901760, %v6115_v15  ;;  %v6713_v35 = vand.u32 4294901760, %v6712_v10 }
 0xd52   :  { %v6107_v21 = vmul.f32 %v26856_v41, %v6105_v6  ;;  %v6770_v33 = vsub.f32 %v27786_v25, %v27795_v63  ;;  %v6722_v6 = vsub.f32 %v6638_v12, %v6721_v3 }
 0xd53   :  { %25167 = vmatprep.mubr.f32.mxu1 %v6187_v18  ;;  %v6188_v43 = vsub.f32 %v6115_v15, %v6187_v18 }
 0xd54   :  { %v6118_v23 = vsel %vm22_vm0, %v6107_v21, 0 }
 0xd55   :  { %v6197_v26 = vand.u32 4294901760, %v6118_v23  ;;  %v6189_v28 = vand.u32 4294901760, %v6188_v43 }
 0xd57   :  { %v6198_v38 = vsub.f32 %v6118_v23, %v6197_v26  ;;  %25168 = vmatmul.mubr.f32.vlgmr.msra.gmra.mxu1 %v6197_v26  ;;  %v6190_v50 = vsub.f32 %v6188_v43, %v6189_v28 }
 0xd58   :  { %25178 = vmatpush3.msra.mxu1 %v27742_v47  ;;  %25181 = vmatprep.mubr.f32.mxu1 %v6189_v28 }
 0xd59   :  { %25179 = vmatprep.subr.mxu1 %v27760_v39  ;;  %v6191_v41 = vand.u32 4294901760, %v6190_v50  ;;  %v6199_v58 = vand.u32 4294901760, %v6198_v38 }
 0xd5a   :  { %25180 = vmatpush3.msra.mxu1 %v27760_v39 }
 0xd5b   :  { %25191 = vmatprep.subr.mxu1 %v27742_v47  ;;  %25160 = vmatprep.mubr.f32.mxu0 %v6191_v41  ;;  %v6200_v8 = vsub.f32 %v6198_v38, %v6199_v58 }
 0xd5c   :  { %25182 = vmatmul.mubr.f32.vlgmr.msra.gmra.mxu1 %v6199_v58 }
 0xd5d   :  { %25192 = vmatpush3.msra.mxu1 %v27742_v47  ;;  %25195 = vmatprep.mubr.f32.mxu1 %v6187_v18  ;;  %v6201_v9 = vand.u32 4294901760, %v6200_v8  ;;  %v6771_v47 = vand.u32 4294901760, %v6770_v33 }
 0xd5e   :  { %25193 = vmatprep.subr.mxu1 %v27760_v39 }
 0xd5f   :  { %25194 = vmatpush3.msra.mxu1 %v27760_v39  ;;  %25161 = vmatmul.mubr.f32.vlgmr.msra.gmra.mxu0 %v6201_v9  ;;  %v6723_v39 = vand.u32 4294901760, %v6722_v6 }
 0xd60   :  { %25205 = vmatprep.subr.mxu1 %v6764_v2  ;;  %25171 = vmatpush3.msra.mxu0 %v27745_v48  ;;  %v6714_v48 = vsub.f32 %v6712_v10, %v6713_v35 }
 0xd61   :  { %25196 = vmatmul.mubr.f32.vlgmr.msra.gmra.mxu1 %v6197_v26  ;;  %25172 = vmatprep.subr.mxu0 %v27763_v49 }
 0xd62   :  { %25206 = vmatpush3.xpose.msra.mxu1 %v6764_v2  ;;  %25174 = vmatprep.mubr.f32.mxu0 %v6188_v43 }
 0xd63   :  { %25207 = vmatprep.subr.mxu1 %v6771_v47  ;;  %25209 = vmatprep.mubr.f32.mxu1 %v27797_v4 }
 0xd64   :  { %25173 = vmatpush3.msra.mxu0 %v27763_v49  ;;  %v6715_v49 = vand.u32 4294901760, %v6714_v48 }
 0xd65   :  { %25184 = vmatprep.subr.mxu0 %v27750_v52  ;;  %25175 = vmatmul.mubr.f32.vlgmr.msra.gmra.mxu0 %v6198_v38 }
 0xd66   :  { %25185 = vmatpush3.msra.mxu0 %v27750_v52  ;;  %25208 = vmatpush3.xpose.msra.mxu1 %v6771_v47  ;;  %v6724_v52 = vsub.f32 %v6722_v6, %v6723_v39 }
 0xd67   :  { %25186 = vmatprep.subr.mxu0 %v27769_v54  ;;  %25188 = vmatprep.mubr.f32.mxu0 %v6187_v18 }
 0xd68   :  { %25219 = vmatprep.subr.mxu1 %v27774_v11  ;;  %25187 = vmatpush3.msra.mxu0 %v27769_v54  ;;  %v6725_v54 = vand.u32 4294901760, %v6724_v52 }
 0xd69   :  { %25198 = vmatprep.subr.mxu0 %v27774_v11  ;;  %25210 = vmatmul.mubr.f32.vlgmr.msra.gmra.mxu1 %v6721_v3 }
 0xd6a   :  { %25189 = vmatmul.mubr.f32.vlgmr.msra.gmra.mxu0 %v6197_v26  ;;  %25220 = vmatpush3.xpose.msra.mxu1 %v27774_v11 }
 0xd6b   :  { %25199 = vmatpush3.xpose.msra.mxu0 %v27774_v11  ;;  %25223 = vmatprep.mubr.f32.mxu1 %v6713_v35 }
 0xd6c   :  { %25200 = vmatprep.subr.mxu0 %v27779_v16  ;;  %25202 = vmatprep.mubr.f32.mxu0 %v6715_v49 }
 0xd6d   :  { %25221 = vmatprep.subr.mxu1 %v27779_v16 }
 0xd6e   :  { %25222 = vmatpush3.xpose.msra.mxu1 %v27779_v16 }
 0xd6f   :  { %25201 = vmatpush3.xpose.msra.mxu0 %v27779_v16  ;;  %25233 = vmatprep.subr.mxu1 %v27774_v11 }
 0xd70   :  { %25212 = vmatprep.subr.mxu0 %v27782_v20 }
 0xd71   :  { %25224 = vmatmul.mubr.f32.vlgmr.msra.gmra.mxu1 %v6723_v39 }
 0xd72   :  { %25203 = vmatmul.mubr.f32.vlgmr.msra.gmra.mxu0 %v6725_v54  ;;  %25234 = vmatpush3.xpose.msra.mxu1 %v27774_v11 }
 0xd73   :  { %25213 = vmatpush3.xpose.msra.mxu0 %v27782_v20  ;;  %25216 = vmatprep.mubr.f32.mxu0 %v6712_v10 }
 0xd74   :  { %25237 = vmatprep.mubr.f32.mxu1 %v27797_v4  ;;  %25214 = vmatprep.subr.mxu0 %v27786_v25 }
 0xd75   :  { %25235 = vmatprep.subr.mxu1 %v27779_v16 }
 0xd76   :  { %25236 = vmatpush3.xpose.msra.mxu1 %v27779_v16 }
 0xd77   :  { %25215 = vmatpush3.xpose.msra.mxu0 %v27786_v25 }
 0xd78   :  { %25226 = vmatprep.subr.mxu0 %v27789_v32 }
 0xd79   :  { %25238 = vmatmul.mubr.f32.vlgmr.msra.gmra.mxu1 %v6721_v3 }
 0xd7a   :  { %25217 = vmatmul.mubr.f32.vlgmr.msra.gmra.mxu0 %v6722_v6 }
 0xd7b   :  { %25227 = vmatpush3.xpose.msra.mxu0 %v27789_v32  ;;  %25230 = vmatprep.mubr.f32.mxu0 %v27797_v4 }
 0xd7c   :  { %25228 = vmatprep.subr.mxu0 %v27795_v63 }
 0xd7f   :  { %25229 = vmatpush3.xpose.msra.mxu0 %v27795_v63 }
 0xd82   :  { %25231 = vmatmul.mubr.f32.vlgmr.msra.gmra.mxu0 %v6721_v3 }
 0xe17   :  { %v25169_v11 = vpop.f32.mrf.mxu1 }
 0xe19   :  { %v6284_v15 = vpop.f32.mrf.mxu1 }
 0xe1c   :  { %v25183_v16 = vpop.f32.mrf.mxu1 }
 0xe1e   :  { %v6448_v53 = vpop.f32.mrf.mxu1 }
 0xe1f   :  { %v25162_v18 = vpop.f32.mrf.mxu0 }
 0xe20   :  { %v6291_v21 = vadd.f32 %v25169_v11, %v25162_v18 }
 0xe21   :  { %v6193_v20 = vpop.f32.mrf.mxu0  ;;  %v25197_v37 = vpop.f32.mrf.mxu1 }
 0xe22   :  { %v6285_v23 = vadd.f32 %v6284_v15, %v6193_v20 }
 0xe23   :  { %v6612_v4 = vpop.f32.mrf.mxu1 }
 0xe25   :  { %v25176_v43 = vpop.f32.mrf.mxu0 }
 0xe26   :  { %v6374_v25 = vadd.f32 %v25176_v43, %v6291_v21 }
 0xe27   :  { %v6366_v26 = vpop.f32.mrf.mxu0 }
 0xe28   :  { %v6367_v28 = vadd.f32 %v6366_v26, %v6285_v23  ;;  %v6457_v32 = vadd.f32 %v25183_v16, %v6374_v25 }
 0xe29   :  { %v25211_v12 = vpop.f32.mrf.mxu1 }
 0xe2a   :  { %v25190_v38 = vpop.f32.mrf.mxu0  ;;  %v6449_v50 = vadd.f32 %v6448_v53, %v6367_v28 }
 0xe2b   :  { %v6540_v41 = vadd.f32 %v25190_v38, %v6457_v32  ;;  %v6808_v33 = vpop.f32.mrf.mxu1 }
 0xe2c   :  { %v6533_v58 = vpop.f32.mrf.mxu0 }
 0xe2d   :  { %v6619_v63 = vadd.f32 %v25197_v37, %v6540_v41  ;;  %v6534_v1 = vadd.f32 %v6533_v58, %v6449_v50 }
 0xe2f   :  { %6623 = vst.msk [vmem:[#allocation3 + $0x18] sm:$0xff] %vm1272_vm3, %v6619_v63  ;;  %v6613_v7 = vadd.f32 %v6612_v4, %v6534_v1 }
 0xe31   :  { %6622 = vst.msk [vmem:[#allocation3 + $0x10] sm:$0xff] %vm1272_vm3, %v6613_v7  ;;  %v25225_v3 = vpop.f32.mrf.mxu1 }
 0xe32   :  { %v25204_v8 = vpop.f32.mrf.mxu0 }
 0xe33   :  { %v6815_v2 = vadd.f32 %v25211_v12, %v25204_v8  ;;  %v6972_v39 = vpop.f32.mrf.mxu1 }
 0xe34   :  { %v6717_v9 = vpop.f32.mrf.mxu0 }
 0xe35   :  { %v6809_v35 = vadd.f32 %v6808_v33, %v6717_v9 }
 0xe39   :  { %v25239_v52 = vpop.f32.mrf.mxu1 }
 0xe3a   :  { %v25218_v10 = vpop.f32.mrf.mxu0 }
 0xe3b   :  { %v6898_v6 = vadd.f32 %v25218_v10, %v6815_v2  ;;  %v7136_v21 = vpop.f32.mrf.mxu1 }
 0xe3c   :  { %v6890_v47 = vpop.f32.mrf.mxu0 }
 0xe3d   :  { %v6891_v48 = vadd.f32 %v6890_v47, %v6809_v35  ;;  %v6981_v49 = vadd.f32 %v25225_v3, %v6898_v6 }
 0xe3f   :  { %v6973_v15 = vadd.f32 %v6972_v39, %v6891_v48 }
 0xe42   :  { %v25232_v54 = vpop.f32.mrf.mxu0 }
 0xe43   :  { %v7064_v11 = vadd.f32 %v25232_v54, %v6981_v49 }
 0xe44   :  { %v7057_v18 = vpop.f32.mrf.mxu0 }
 0xe45   :  { %v7143_v20 = vadd.f32 %v25239_v52, %v7064_v11  ;;  %v7058_v16 = vadd.f32 %v7057_v18, %v6973_v15 }
 0xe47   :  { %v7147_v43 = vmul.f32 0.35355338, %v7143_v20  ;;  %v7137_v53 = vadd.f32 %v7136_v21, %v7058_v16 }
 0xe49   :  { %v7151_v23 = vsel %vm22_vm0, %v7147_v43, -inf  ;;  %v7146_v25 = vmul.f32 0.35355338, %v7137_v53 }
 0xe4a   :  { %7152 = vmax.xlane.f32.xlu1 %v7151_v23 }
 0xe4b   :  { %v7148_v26 = vsel %vm22_vm0, %v7146_v25, -inf }
 0xe4c   :  { %7149 = vmax.xlane.f32.xlu0 %v7148_v26 }
 0xe5b   :  { %7178 = vrot.lane.b32.xlu1 %v27621_v22, %s27015_s14 }
 0xe5f   :  { %7710 = vrot.lane.b32.xlu1 %v27621_v22, %s27017_s16 }
 0xe63   :  { %7708 = vrot.lane.b32.xlu1 %v27625_v57, %s27017_s16 }
 0xe67   :  { %7706 = vrot.lane.b32.xlu1 %v27621_v22, %s27016_s15 }
 0xed3   :  { %v7153_v28 = vpop.xlane.xlu1 %7152 }
 0xed4   :  { %v7155_v32 = vsub.f32 %v7147_v43, %v7153_v28 }
 0xed5   :  { %v7150_v37 = vpop.xlane.xlu0 %7149 }
 0xed6   :  { %v7154_v38 = vsub.f32 %v7146_v25, %v7150_v37  ;;  %v7158_v41 = vmul.f32 1.442695, %v7155_v32 }
 0xed7   :  { %v7179_v50 = vpop.permute.xlu1 %7178 }
 0xed8   :  { %v7156_v58 = vmul.f32 1.442695, %v7154_v38  ;;  %v27852_v63 = vand.u32 4294901760, %v7179_v50 }
 0xeda   :  { %26861 = vpow2.f32 %v7156_v58  ;;  %v27855_v1 = vsub.f32 %v7179_v50, %v27852_v63  ;;  %25240 = vmatprep.subr.mxu0 %v27852_v63 }
 0xedb   :  { %25241 = vmatpush3.msra.mxu0 %v27852_v63  ;;  %26863 = vpow2.f32 %v7158_v41  ;;  %v7711_v6 = vpop.permute.xlu1 %7710 }
 0xedc   :  { %v27860_v22 = vand.u32 4294901760, %v27855_v1  ;;  %v7718_v15 = vsel %vm1272_vm3, %v7711_v6, 0 }
 0xedd   :  { %v27884_v21 = vand.u32 4294901760, %v7718_v15 }
 0xede   :  { %v7307_v4 = vsub.f32 %v27855_v1, %v27860_v22 }
 0xedf   :  { %v7709_v18 = vpop.permute.xlu1 %7708  ;;  %v27892_v37 = vsub.f32 %v7718_v15, %v27884_v21 }
 0xee0   :  { %v7308_v7 = vand.u32 4294901760, %v7307_v4  ;;  %v7716_v43 = vsel %vm1272_vm3, %v7709_v18, 0 }
 0xee1   :  { %v27889_v28 = vand.u32 4294901760, %v7716_v43 }
 0xee2   :  { %25247 = vmatprep.subr.mxu1 %v7308_v7 }
 0xee3   :  { %25248 = vmatpush3.msra.mxu1 %v7308_v7  ;;  %v27896_v4 = vsub.f32 %v7716_v43, %v27889_v28 }
 0xee5   :  { %v27905_v6 = vand.u32 4294901760, %v27896_v4 }
 0xee7   :  { %v26862_v8 = vpop.eup %26861  ;;  %v7846_v15 = vsub.f32 %v27896_v4, %v27905_v6 }
 0xee8   :  { %v7160_v12 = vsel %vm22_vm0, %v26862_v8, 0.0  ;;  %v26864_v9 = vpop.eup %26863 }
 0xee9   :  { %7161 = vadd.xlane.f32.xlu0 %v7160_v12  ;;  %v7163_v33 = vsel %vm22_vm0, %v26864_v9, 0.0  ;;  %v27899_v12 = vand.u32 4294901760, %v27892_v37 }
 0xeed   :  { %7164 = vadd.xlane.f32.xlu0 %v7163_v33 }
 0xf03   :  { %7176 = vrot.lane.b32.xlu0 %v27625_v57, %s27015_s14 }
 0xf07   :  { %7704 = vrot.lane.b32.xlu0 %v27625_v57, %s27016_s15 }
 0xf72   :  { %v7162_v10 = vpop.xlane.xlu0 %7161 }
 0xf73   :  { %26865 = vrcp.f32 %v7162_v10 }
 0xf76   :  { %v7165_v2 = vpop.xlane.xlu0 %7164 }
 0xf77   :  { %26867 = vrcp.f32 %v7165_v2 }
 0xf7a   :  { %v7177_v3 = vpop.permute.xlu0 %7176 }
 0xf7b   :  { %v27870_v47 = vand.u32 4294901760, %v7177_v3 }
 0xf7d   :  { %v27873_v35 = vsub.f32 %v7177_v3, %v27870_v47  ;;  %25242 = vmatprep.subr.mxu0 %v27870_v47 }
 0xf7e   :  { %25243 = vmatpush3.msra.mxu0 %v27870_v47  ;;  %v7705_v41 = vpop.permute.xlu0 %7704 }
 0xf7f   :  { %25254 = vmatprep.subr.mxu0 %v27855_v1  ;;  %v27879_v48 = vand.u32 4294901760, %v27873_v35  ;;  %v7712_v33 = vsel %vm1272_vm3, %v7705_v41, 0 }
 0xf80   :  { %v26866_v57 = vpop.eup %26865 }
 0xf81   :  { %v7168_v39 = vmul.f32 %v26866_v57, %v7162_v10  ;;  %v7314_v49 = vsub.f32 %v27873_v35, %v27879_v48 }
 0xf83   :  { %v7170_v52 = vsub.f32 2.0, %v7168_v39  ;;  %v7315_v54 = vand.u32 4294901760, %v7314_v49  ;;  %v27907_v39 = vand.u32 4294901760, %v7712_v33  ;;  %v7839_v49 = vsub.f32 %v27892_v37, %v27899_v12 }
 0xf84   :  { %v26868_v11 = vpop.eup %26867 }
 0xf85   :  { %v7172_v20 = vmul.f32 %v26866_v57, %v7170_v52  ;;  %v7169_v16 = vmul.f32 %v26868_v11, %v7165_v2  ;;  %25249 = vmatprep.subr.mxu1 %v7315_v54  ;;  %v7707_v57 = vpop.permute.xlu1 %7706  ;;  %v7788_v18 = vsub.f32 %v7712_v33, %v27907_v39 }
 0xf86   :  { %25250 = vmatpush3.msra.mxu1 %v7315_v54  ;;  %v7714_v54 = vsel %vm1272_vm3, %v7707_v57, 0 }
 0xf87   :  { %v7174_v53 = vmul.f32 %v26862_v8, %v7172_v20  ;;  %v7171_v23 = vsub.f32 2.0, %v7169_v16  ;;  %25261 = vmatprep.subr.mxu1 %v27852_v63  ;;  %v7840_v20 = vand.u32 4294901760, %v7839_v49  ;;  %v7797_v16 = vand.u32 4294901760, %v7714_v54 }
 0xf88   :  { %v7789_v43 = vand.u32 4294901760, %v7788_v18 }
 0xf89   :  { %v7173_v25 = vmul.f32 %v26868_v11, %v7171_v23  ;;  %v7183_v26 = vsel %vm22_vm0, %v7174_v53, 0  ;;  %v7798_v53 = vsub.f32 %v7714_v54, %v7797_v16 }
 0xf8a   :  { %v7255_v32 = vand.u32 4294901760, %v7183_v26 }
 0xf8b   :  { %v7175_v38 = vmul.f32 %v26864_v9, %v7173_v25 }
 0xf8c   :  { %25251 = vmatprep.mubr.f32.mxu1 %v7255_v32  ;;  %v7256_v50 = vsub.f32 %v7183_v26, %v7255_v32 }
 0xf8d   :  { %v7186_v58 = vsel %vm22_vm0, %v7175_v38, 0 }
 0xf8e   :  { %v7265_v7 = vand.u32 4294901760, %v7186_v58  ;;  %v7257_v8 = vand.u32 4294901760, %v7256_v50 }
 0xf90   :  { %v7266_v10 = vsub.f32 %v7186_v58, %v7265_v7  ;;  %25252 = vmatmul.mubr.f32.vlgmr.msra.gmra.mxu1 %v7265_v7  ;;  %v7258_v2 = vsub.f32 %v7256_v50, %v7257_v8 }
 0xf91   :  { %25262 = vmatpush3.msra.mxu1 %v27852_v63  ;;  %25265 = vmatprep.mubr.f32.mxu1 %v7257_v8 }
 0xf92   :  { %25263 = vmatprep.subr.mxu1 %v27870_v47  ;;  %v7259_v9 = vand.u32 4294901760, %v7258_v2  ;;  %v7267_v3 = vand.u32 4294901760, %v7266_v10 }
 0xf93   :  { %25264 = vmatpush3.msra.mxu1 %v27870_v47 }
 0xf94   :  { %25275 = vmatprep.subr.mxu1 %v27852_v63  ;;  %25244 = vmatprep.mubr.f32.mxu0 %v7259_v9  ;;  %v7268_v52 = vsub.f32 %v7266_v10, %v7267_v3 }
 0xf95   :  { %25266 = vmatmul.mubr.f32.vlgmr.msra.gmra.mxu1 %v7267_v3 }
 0xf96   :  { %25276 = vmatpush3.msra.mxu1 %v27852_v63  ;;  %25279 = vmatprep.mubr.f32.mxu1 %v7255_v32  ;;  %v7269_v11 = vand.u32 4294901760, %v7268_v52  ;;  %v7847_v63 = vand.u32 4294901760, %v7846_v15 }
 0xf97   :  { %25277 = vmatprep.subr.mxu1 %v27870_v47 }
 0xf98   :  { %25278 = vmatpush3.msra.mxu1 %v27870_v47  ;;  %25245 = vmatmul.mubr.f32.vlgmr.msra.gmra.mxu0 %v7269_v11  ;;  %v7799_v47 = vand.u32 4294901760, %v7798_v53 }
 0xf99   :  { %25289 = vmatprep.subr.mxu1 %v7840_v20  ;;  %25255 = vmatpush3.msra.mxu0 %v27855_v1  ;;  %v7790_v1 = vsub.f32 %v7788_v18, %v7789_v43 }
 0xf9a   :  { %25280 = vmatmul.mubr.f32.vlgmr.msra.gmra.mxu1 %v7265_v7  ;;  %25256 = vmatprep.subr.mxu0 %v27873_v35 }
 0xf9b   :  { %25290 = vmatpush3.xpose.msra.mxu1 %v7840_v20  ;;  %25258 = vmatprep.mubr.f32.mxu0 %v7256_v50 }
 0xf9c   :  { %25291 = vmatprep.subr.mxu1 %v7847_v63  ;;  %25293 = vmatprep.mubr.f32.mxu1 %v27907_v39 }
 0xf9d   :  { %25257 = vmatpush3.msra.mxu0 %v27873_v35  ;;  %v7791_v35 = vand.u32 4294901760, %v7790_v1 }
 0xf9e   :  { %25268 = vmatprep.subr.mxu0 %v27860_v22  ;;  %25259 = vmatmul.mubr.f32.vlgmr.msra.gmra.mxu0 %v7266_v10 }
 0xf9f   :  { %25269 = vmatpush3.msra.mxu0 %v27860_v22  ;;  %25292 = vmatpush3.xpose.msra.mxu1 %v7847_v63  ;;  %v7800_v22 = vsub.f32 %v7798_v53, %v7799_v47 }
 0xfa0   :  { %25270 = vmatprep.subr.mxu0 %v27879_v48  ;;  %25272 = vmatprep.mubr.f32.mxu0 %v7255_v32 }
 0xfa1   :  { %25303 = vmatprep.subr.mxu1 %v27884_v21  ;;  %25271 = vmatpush3.msra.mxu0 %v27879_v48  ;;  %v7801_v48 = vand.u32 4294901760, %v7800_v22 }
 0xfa2   :  { %25282 = vmatprep.subr.mxu0 %v27884_v21  ;;  %25294 = vmatmul.mubr.f32.vlgmr.msra.gmra.mxu1 %v7797_v16 }
 0xfa3   :  { %25273 = vmatmul.mubr.f32.vlgmr.msra.gmra.mxu0 %v7265_v7  ;;  %25304 = vmatpush3.xpose.msra.mxu1 %v27884_v21 }
 0xfa4   :  { %25283 = vmatpush3.xpose.msra.mxu0 %v27884_v21  ;;  %25307 = vmatprep.mubr.f32.mxu1 %v7789_v43 }
 0xfa5   :  { %25284 = vmatprep.subr.mxu0 %v27889_v28  ;;  %25286 = vmatprep.mubr.f32.mxu0 %v7791_v35 }
 0xfa6   :  { %25305 = vmatprep.subr.mxu1 %v27889_v28 }
 0xfa7   :  { %25306 = vmatpush3.xpose.msra.mxu1 %v27889_v28 }
 0xfa8   :  { %25285 = vmatpush3.xpose.msra.mxu0 %v27889_v28  ;;  %25317 = vmatprep.subr.mxu1 %v27884_v21 }
 0xfa9   :  { %25296 = vmatprep.subr.mxu0 %v27892_v37 }
 0xfaa   :  { %25308 = vmatmul.mubr.f32.vlgmr.msra.gmra.mxu1 %v7799_v47 }
 0xfab   :  { %25287 = vmatmul.mubr.f32.vlgmr.msra.gmra.mxu0 %v7801_v48  ;;  %25318 = vmatpush3.xpose.msra.mxu1 %v27884_v21 }
 0xfac   :  { %25297 = vmatpush3.xpose.msra.mxu0 %v27892_v37  ;;  %25300 = vmatprep.mubr.f32.mxu0 %v7788_v18 }
 0xfad   :  { %25321 = vmatprep.mubr.f32.mxu1 %v27907_v39  ;;  %25298 = vmatprep.subr.mxu0 %v27896_v4 }
 0xfae   :  { %25319 = vmatprep.subr.mxu1 %v27889_v28 }
 0xfaf   :  { %25320 = vmatpush3.xpose.msra.mxu1 %v27889_v28 }
 0xfb0   :  { %25299 = vmatpush3.xpose.msra.mxu0 %v27896_v4 }
 0xfb1   :  { %25310 = vmatprep.subr.mxu0 %v27899_v12 }
 0xfb2   :  { %25322 = vmatmul.mubr.f32.vlgmr.msra.gmra.mxu1 %v7797_v16 }
 0xfb3   :  { %25301 = vmatmul.mubr.f32.vlgmr.msra.gmra.mxu0 %v7798_v53 }
 0xfb4   :  { %25311 = vmatpush3.xpose.msra.mxu0 %v27899_v12  ;;  %25314 = vmatprep.mubr.f32.mxu0 %v27907_v39 }
 0xfb5   :  { %25312 = vmatprep.subr.mxu0 %v27905_v6 }
 0xfb8   :  { %25313 = vmatpush3.xpose.msra.mxu0 %v27905_v6 }
 0xfbb   :  { %25315 = vmatmul.mubr.f32.vlgmr.msra.gmra.mxu0 %v7797_v16 }
0x1050   :  { %v25253_v21 = vpop.f32.mrf.mxu1 }
0x1052   :  { %v27950_v25 = vpop.f32.mrf.mxu1 }
0x1055   :  { %v25267_v32 = vpop.f32.mrf.mxu1 }
0x1057   :  { %v27956_v41 = vpop.f32.mrf.mxu1 }
0x1058   :  { %v25246_v23 = vpop.f32.mrf.mxu0 }
0x1059   :  { %v7359_v26 = vadd.f32 %v25253_v21, %v25246_v23 }
0x105a   :  { %v27952_v28 = vpop.f32.mrf.mxu0  ;;  %v25281_v8 = vpop.f32.mrf.mxu1 }
0x105c   :  { %v27962_v10 = vpop.f32.mrf.mxu1 }
0x105e   :  { %v25260_v37 = vpop.f32.mrf.mxu0 }
0x105f   :  { %v7442_v38 = vadd.f32 %v25260_v37, %v7359_v26  ;;  %v26983_v37 = vld [vmem:[#allocation2 + $0x18] sm:$0xff] }
0x1060   :  { %v27954_v50 = vpop.f32.mrf.mxu0 }
0x1061   :  { %v7525_v58 = vadd.f32 %v25267_v32, %v7442_v38  ;;  %v27967_v38 = vld [vmem:[#allocation2 + $0x18] sm:$0xff] }
0x1062   :  { %v25295_v9 = vpop.f32.mrf.mxu1 }
0x1063   :  { %v25274_v4 = vpop.f32.mrf.mxu0 }
0x1064   :  { %v7608_v7 = vadd.f32 %v25274_v4, %v7525_v58  ;;  %v7884_v6 = vpop.f32.mrf.mxu1  ;;  %v27971_v58 = vld [vmem:[#allocation2 + $0x10] sm:$0xff] }
0x1065   :  { %v27960_v33 = vpop.f32.mrf.mxu0 }
0x1066   :  { %v27958_v12 = vadd.f32 %v25281_v8, %v7608_v7 }
0x106a   :  { %v25309_v49 = vpop.f32.mrf.mxu1 }
0x106b   :  { %v25288_v2 = vpop.f32.mrf.mxu0 }
0x106c   :  { %v7891_v39 = vadd.f32 %v25295_v9, %v25288_v2  ;;  %v8048_v18 = vpop.f32.mrf.mxu1 }
0x106d   :  { %v7793_v3 = vpop.f32.mrf.mxu0 }
0x106e   :  { %v7885_v54 = vadd.f32 %v7884_v6, %v7793_v3 }
0x1072   :  { %v25323_v16 = vpop.f32.mrf.mxu1 }
0x1073   :  { %v25302_v57 = vpop.f32.mrf.mxu0 }
0x1074   :  { %v7974_v11 = vadd.f32 %v25302_v57, %v7891_v39  ;;  %v8212_v22 = vpop.f32.mrf.mxu1 }
0x1075   :  { %v7966_v52 = vpop.f32.mrf.mxu0 }
0x1076   :  { %v7967_v15 = vadd.f32 %v7966_v52, %v7885_v54  ;;  %v8057_v20 = vadd.f32 %v25309_v49, %v7974_v11 }
0x1078   :  { %v8049_v53 = vadd.f32 %v8048_v18, %v7967_v15 }
0x107b   :  { %v25316_v63 = vpop.f32.mrf.mxu0 }
0x107c   :  { %v8140_v43 = vadd.f32 %v25316_v63, %v8057_v20 }
0x107d   :  { %v8133_v1 = vpop.f32.mrf.mxu0 }
0x107e   :  { %v8219_v47 = vadd.f32 %v25323_v16, %v8140_v43  ;;  %v8134_v35 = vadd.f32 %v8133_v1, %v8049_v53  ;;  %v26984_v16 = vld [vmem:[#allocation2 + $0x10] sm:$0xff] }
0x1080   :  { %v8223_v48 = vmul.f32 0.35355338, %v8219_v47  ;;  %v8213_v21 = vadd.f32 %v8212_v22, %v8134_v35 }
0x1082   :  { %v8227_v23 = vsel %vm22_vm0, %v8223_v48, -inf  ;;  %v8222_v26 = vmul.f32 0.35355338, %v8213_v21 }
0x1083   :  { %8228 = vmax.xlane.f32.xlu1 %v8227_v23 }
0x1084   :  { %v8224_v32 = vsel %vm22_vm0, %v8222_v26, -inf }
0x1085   :  { %8225 = vmax.xlane.f32.xlu0 %v8224_v32 }
0x1094   :  { %8254 = vrot.lane.b32.xlu1 %v26983_v37, %s27018_s17 }
0x1098   :  { %8786 = vrot.lane.b32.xlu1 %v27967_v38, %s27019_s18 }
0x109c   :  { %8784 = vrot.lane.b32.xlu1 %v27971_v58, %s27019_s18 }
0x10a0   :  { %8782 = vrot.lane.b32.xlu1 %v27967_v38, %s27020_s19 }
0x110c   :  { %v8229_v4 = vpop.xlane.xlu1 %8228 }
0x110d   :  { %v8231_v7 = vsub.f32 %v8223_v48, %v8229_v4 }
0x110e   :  { %v8226_v8 = vpop.xlane.xlu0 %8225 }
0x110f   :  { %v8230_v2 = vsub.f32 %v8222_v26, %v8226_v8  ;;  %v8234_v3 = vmul.f32 1.442695, %v8231_v7 }
0x1110   :  { %v8255_v9 = vpop.permute.xlu1 %8254 }
0x1111   :  { %v8232_v6 = vmul.f32 1.442695, %v8230_v2  ;;  %v27977_v57 = vand.u32 4294901760, %v8255_v9 }
0x1113   :  { %26869 = vpow2.f32 %v8232_v6  ;;  %v27980_v39 = vsub.f32 %v8255_v9, %v27977_v57  ;;  %25324 = vmatprep.subr.mxu0 %v27977_v57 }
0x1114   :  { %25325 = vmatpush3.msra.mxu0 %v27977_v57  ;;  %26871 = vpow2.f32 %v8234_v3  ;;  %v8787_v35 = vpop.permute.xlu1 %8786 }
0x1115   :  { %v27985_v49 = vand.u32 4294901760, %v27980_v39  ;;  %v8794_v4 = vsel %vm1272_vm3, %v8787_v35, 0 }
0x1116   :  { %v28008_v9 = vand.u32 4294901760, %v8794_v4 }
0x1117   :  { %v8383_v52 = vsub.f32 %v27980_v39, %v27985_v49 }
0x1118   :  { %v8785_v7 = vpop.permute.xlu1 %8784 }
0x1119   :  { %v8384_v54 = vand.u32 4294901760, %v8383_v52  ;;  %v8792_v3 = vsel %vm1272_vm3, %v8785_v7, 0 }
0x111b   :  { %25331 = vmatprep.subr.mxu1 %v8384_v54 }
0x111c   :  { %25332 = vmatpush3.msra.mxu1 %v8384_v54 }
0x1120   :  { %v26870_v11 = vpop.eup %26869 }
0x1121   :  { %v8236_v15 = vsel %vm22_vm0, %v26870_v11, 0.0  ;;  %v26872_v18 = vpop.eup %26871 }
0x1122   :  { %8237 = vadd.xlane.f32.xlu0 %v8236_v15  ;;  %v8239_v20 = vsel %vm22_vm0, %v26872_v18, 0.0 }
0x1126   :  { %8240 = vadd.xlane.f32.xlu0 %v8239_v20  ;;  %v28013_v20 = vand.u32 4294901760, %v8792_v3 }
0x113c   :  { %8252 = vrot.lane.b32.xlu0 %v26984_v16, %s27018_s17 }
0x1140   :  { %8780 = vrot.lane.b32.xlu0 %v27971_v58, %s27020_s19 }
0x11ab   :  { %v8238_v63 = vpop.xlane.xlu0 %8237 }
0x11ac   :  { %26873 = vrcp.f32 %v8238_v63 }
0x11af   :  { %v8241_v43 = vpop.xlane.xlu0 %8240 }
0x11b0   :  { %26875 = vrcp.f32 %v8241_v43 }
0x11b3   :  { %v8253_v53 = vpop.permute.xlu0 %8252 }
0x11b4   :  { %v27994_v1 = vand.u32 4294901760, %v8253_v53 }
0x11b6   :  { %v27997_v47 = vsub.f32 %v8253_v53, %v27994_v1  ;;  %25326 = vmatprep.subr.mxu0 %v27994_v1 }
0x11b7   :  { %25327 = vmatpush3.msra.mxu0 %v27994_v1  ;;  %v8781_v35 = vpop.permute.xlu0 %8780 }
0x11b8   :  { %25338 = vmatprep.subr.mxu0 %v27980_v39  ;;  %v28003_v22 = vand.u32 4294901760, %v27997_v47 }
0x11b9   :  { %v26874_v48 = vpop.eup %26873 }
0x11ba   :  { %v8244_v21 = vmul.f32 %v26874_v48, %v8238_v63  ;;  %v8390_v23 = vsub.f32 %v27997_v47, %v28003_v22  ;;  %v28016_v63 = vsub.f32 %v8794_v4, %v28008_v9 }
0x11bc   :  { %v8246_v26 = vsub.f32 2.0, %v8244_v21  ;;  %v8391_v32 = vand.u32 4294901760, %v8390_v23 }
0x11bd   :  { %v26876_v37 = vpop.eup %26875 }
0x11be   :  { %v8248_v8 = vmul.f32 %v26874_v48, %v8246_v26  ;;  %v8245_v2 = vmul.f32 %v26876_v37, %v8241_v43  ;;  %25333 = vmatprep.subr.mxu1 %v8391_v32  ;;  %v28023_v26 = vand.u32 4294901760, %v28016_v63 }
0x11bf   :  { %25334 = vmatpush3.msra.mxu1 %v8391_v32  ;;  %v8788_v32 = vsel %vm1272_vm3, %v8781_v35, 0 }
0x11c0   :  { %v8250_v6 = vmul.f32 %v26870_v11, %v8248_v8  ;;  %v8247_v52 = vsub.f32 2.0, %v8245_v2  ;;  %25345 = vmatprep.subr.mxu1 %v27977_v57  ;;  %v28020_v11 = vsub.f32 %v8792_v3, %v28013_v20  ;;  %v8783_v2 = vpop.permute.xlu1 %8782  ;;  %v28031_v3 = vand.u32 4294901760, %v8788_v32 }
0x11c2   :  { %v8249_v54 = vmul.f32 %v26876_v37, %v8247_v52  ;;  %v8259_v15 = vsel %vm22_vm0, %v8250_v6, 0  ;;  %v28029_v8 = vand.u32 4294901760, %v28020_v11  ;;  %v8915_v6 = vsub.f32 %v28016_v63, %v28023_v26 }
0x11c3   :  { %v8331_v16 = vand.u32 4294901760, %v8259_v15  ;;  %v8864_v35 = vsub.f32 %v8788_v32, %v28031_v3 }
0x11c4   :  { %v8251_v43 = vmul.f32 %v26872_v18, %v8249_v54  ;;  %v8790_v54 = vsel %vm1272_vm3, %v8783_v2, 0 }
0x11c5   :  { %25335 = vmatprep.mubr.f32.mxu1 %v8331_v16  ;;  %v8332_v53 = vsub.f32 %v8259_v15, %v8331_v16 }
0x11c6   :  { %v8262_v48 = vsel %vm22_vm0, %v8251_v43, 0  ;;  %v8922_v43 = vsub.f32 %v28020_v11, %v28029_v8 }
0x11c7   :  { %v8341_v21 = vand.u32 4294901760, %v8262_v48  ;;  %v8333_v23 = vand.u32 4294901760, %v8332_v53 }
0x11c9   :  { %v8342_v37 = vsub.f32 %v8262_v48, %v8341_v21  ;;  %25336 = vmatmul.mubr.f32.vlgmr.msra.gmra.mxu1 %v8341_v21  ;;  %v8334_v4 = vsub.f32 %v8332_v53, %v8333_v23  ;;  %v8916_v48 = vand.u32 4294901760, %v8915_v6 }
0x11ca   :  { %25346 = vmatpush3.msra.mxu1 %v27977_v57  ;;  %25349 = vmatprep.mubr.f32.mxu1 %v8333_v23  ;;  %v8873_v23 = vand.u32 4294901760, %v8790_v54 }
0x11cb   :  { %25347 = vmatprep.subr.mxu1 %v27994_v1  ;;  %v8335_v18 = vand.u32 4294901760, %v8334_v4  ;;  %v8343_v7 = vand.u32 4294901760, %v8342_v37  ;;  %v8865_v4 = vand.u32 4294901760, %v8864_v35 }
0x11cc   :  { %25348 = vmatpush3.msra.mxu1 %v27994_v1  ;;  %v8874_v32 = vsub.f32 %v8790_v54, %v8873_v23 }
0x11cd   :  { %25359 = vmatprep.subr.mxu1 %v27977_v57  ;;  %25328 = vmatprep.mubr.f32.mxu0 %v8335_v18  ;;  %v8344_v52 = vsub.f32 %v8342_v37, %v8343_v7 }
0x11ce   :  { %25350 = vmatmul.mubr.f32.vlgmr.msra.gmra.mxu1 %v8343_v7 }
0x11cf   :  { %25360 = vmatpush3.msra.mxu1 %v27977_v57  ;;  %25363 = vmatprep.mubr.f32.mxu1 %v8331_v16  ;;  %v8345_v15 = vand.u32 4294901760, %v8344_v52  ;;  %v8923_v57 = vand.u32 4294901760, %v8922_v43 }
0x11d0   :  { %25361 = vmatprep.subr.mxu1 %v27994_v1 }
0x11d1   :  { %25362 = vmatpush3.msra.mxu1 %v27994_v1  ;;  %25329 = vmatmul.mubr.f32.vlgmr.msra.gmra.mxu0 %v8345_v15  ;;  %v8875_v1 = vand.u32 4294901760, %v8874_v32 }
0x11d2   :  { %25373 = vmatprep.subr.mxu1 %v8916_v48  ;;  %25339 = vmatpush3.msra.mxu0 %v27980_v39  ;;  %v8866_v39 = vsub.f32 %v8864_v35, %v8865_v4 }
0x11d3   :  { %25364 = vmatmul.mubr.f32.vlgmr.msra.gmra.mxu1 %v8341_v21  ;;  %25340 = vmatprep.subr.mxu0 %v27997_v47 }
0x11d4   :  { %25374 = vmatpush3.xpose.msra.mxu1 %v8916_v48  ;;  %25342 = vmatprep.mubr.f32.mxu0 %v8332_v53 }
0x11d5   :  { %25375 = vmatprep.subr.mxu1 %v8923_v57  ;;  %25377 = vmatprep.mubr.f32.mxu1 %v28031_v3 }
0x11d6   :  { %25341 = vmatpush3.msra.mxu0 %v27997_v47  ;;  %v8867_v47 = vand.u32 4294901760, %v8866_v39 }
0x11d7   :  { %25352 = vmatprep.subr.mxu0 %v27985_v49  ;;  %25343 = vmatmul.mubr.f32.vlgmr.msra.gmra.mxu0 %v8342_v37 }
0x11d8   :  { %25353 = vmatpush3.msra.mxu0 %v27985_v49  ;;  %25376 = vmatpush3.xpose.msra.mxu1 %v8923_v57  ;;  %v8876_v49 = vsub.f32 %v8874_v32, %v8875_v1 }
0x11d9   :  { %25354 = vmatprep.subr.mxu0 %v28003_v22  ;;  %25356 = vmatprep.mubr.f32.mxu0 %v8331_v16 }
0x11da   :  { %25387 = vmatprep.subr.mxu1 %v28008_v9  ;;  %25355 = vmatpush3.msra.mxu0 %v28003_v22  ;;  %v8877_v22 = vand.u32 4294901760, %v8876_v49 }
0x11db   :  { %25366 = vmatprep.subr.mxu0 %v28008_v9  ;;  %25378 = vmatmul.mubr.f32.vlgmr.msra.gmra.mxu1 %v8873_v23 }
0x11dc   :  { %25357 = vmatmul.mubr.f32.vlgmr.msra.gmra.mxu0 %v8341_v21  ;;  %25388 = vmatpush3.xpose.msra.mxu1 %v28008_v9 }
0x11dd   :  { %25367 = vmatpush3.xpose.msra.mxu0 %v28008_v9  ;;  %25391 = vmatprep.mubr.f32.mxu1 %v8865_v4 }
0x11de   :  { %25368 = vmatprep.subr.mxu0 %v28013_v20  ;;  %25370 = vmatprep.mubr.f32.mxu0 %v8867_v47 }
0x11df   :  { %25389 = vmatprep.subr.mxu1 %v28013_v20 }
0x11e0   :  { %25390 = vmatpush3.xpose.msra.mxu1 %v28013_v20 }
0x11e1   :  { %25369 = vmatpush3.xpose.msra.mxu0 %v28013_v20  ;;  %25401 = vmatprep.subr.mxu1 %v28008_v9 }
0x11e2   :  { %25380 = vmatprep.subr.mxu0 %v28016_v63 }
0x11e3   :  { %25392 = vmatmul.mubr.f32.vlgmr.msra.gmra.mxu1 %v8875_v1 }
0x11e4   :  { %25371 = vmatmul.mubr.f32.vlgmr.msra.gmra.mxu0 %v8877_v22  ;;  %25402 = vmatpush3.xpose.msra.mxu1 %v28008_v9 }
0x11e5   :  { %25381 = vmatpush3.xpose.msra.mxu0 %v28016_v63  ;;  %25384 = vmatprep.mubr.f32.mxu0 %v8864_v35 }
0x11e6   :  { %25405 = vmatprep.mubr.f32.mxu1 %v28031_v3  ;;  %25382 = vmatprep.subr.mxu0 %v28020_v11 }
0x11e7   :  { %25403 = vmatprep.subr.mxu1 %v28013_v20 }
0x11e8   :  { %25404 = vmatpush3.xpose.msra.mxu1 %v28013_v20 }
0x11e9   :  { %25383 = vmatpush3.xpose.msra.mxu0 %v28020_v11 }
0x11ea   :  { %25394 = vmatprep.subr.mxu0 %v28023_v26 }
0x11eb   :  { %25406 = vmatmul.mubr.f32.vlgmr.msra.gmra.mxu1 %v8873_v23 }
0x11ec   :  { %25385 = vmatmul.mubr.f32.vlgmr.msra.gmra.mxu0 %v8874_v32 }
0x11ed   :  { %25395 = vmatpush3.xpose.msra.mxu0 %v28023_v26  ;;  %25398 = vmatprep.mubr.f32.mxu0 %v28031_v3 }
0x11ee   :  { %25396 = vmatprep.subr.mxu0 %v28029_v8 }
0x11f1   :  { %25397 = vmatpush3.xpose.msra.mxu0 %v28029_v8 }
0x11f4   :  { %25399 = vmatmul.mubr.f32.vlgmr.msra.gmra.mxu0 %v8873_v23 }
0x1289   :  { %v25337_v16 = vpop.f32.mrf.mxu1 }
0x128b   :  { %v28076_v20 = vpop.f32.mrf.mxu1 }
0x128e   :  { %v25351_v11 = vpop.f32.mrf.mxu1 }
0x1290   :  { %v28080_v37 = vpop.f32.mrf.mxu1 }
0x1291   :  { %v25330_v9 = vpop.f32.mrf.mxu0 }
0x1293   :  { %v28074_v63 = vpop.f32.mrf.mxu0  ;;  %v25365_v18 = vpop.f32.mrf.mxu1 }
0x1295   :  { %v28084_v2 = vpop.f32.mrf.mxu1 }
0x1296   :  { %30381 = vst [vmem:[#allocation12_spill] sm:$0xff] %v28084_v2 }
0x1297   :  { %v25344_v53 = vpop.f32.mrf.mxu0 }
0x1299   :  { %v28078_v21 = vpop.f32.mrf.mxu0 }
0x129b   :  { %v25379_v3 = vpop.f32.mrf.mxu1 }
0x129c   :  { %v25358_v26 = vpop.f32.mrf.mxu0 }
0x129d   :  { %v8960_v52 = vpop.f32.mrf.mxu1 }
0x129e   :  { %v28082_v7 = vpop.f32.mrf.mxu0 }
0x129f   :  { %30380 = vst [vmem:[#allocation11_spill] sm:$0xff] %v28082_v7 }
0x12a3   :  { %v25393_v43 = vpop.f32.mrf.mxu1 }
0x12a4   :  { %v25372_v8 = vpop.f32.mrf.mxu0 }
0x12a5   :  { %v8967_v15 = vadd.f32 %v25379_v3, %v25372_v8  ;;  %v9124_v4 = vpop.f32.mrf.mxu1 }
0x12a6   :  { %v8869_v6 = vpop.f32.mrf.mxu0 }
0x12a7   :  { %v8961_v48 = vadd.f32 %v8960_v52, %v8869_v6  ;;  %v3058_v6 = vadd.f32 %v27479_v51, %v27481_v14 }
0x12a9   :  { %v3140_v52 = vadd.f32 %v27483_v60, %v3058_v6 }
0x12ab   :  { %v25407_v39 = vpop.f32.mrf.mxu1 }
0x12ac   :  { %v25386_v54 = vpop.f32.mrf.mxu0 }
0x12ad   :  { %v9050_v23 = vadd.f32 %v25386_v54, %v8967_v15  ;;  %v9288_v55 = vpop.f32.mrf.mxu1  ;;  %v3222_v54 = vadd.f32 %v27485_v24, %v3140_v52  ;;  %v9859_v52 = vld [vmem:[%s30370_s1 + $0x68] sm:$0xff] }
0x12ae   :  { %v9042_v35 = vpop.f32.mrf.mxu0 }
0x12af   :  { %v9043_v57 = vadd.f32 %v9042_v35, %v8961_v48  ;;  %v9133_v32 = vadd.f32 %v25393_v43, %v9050_v23  ;;  %v3307_v15 = vadd.f32 %v27489_v30, %v3222_v54 }
0x12b1   :  { %v9125_v49 = vadd.f32 %v9124_v4, %v9043_v57  ;;  %v4135_v4 = vadd.f32 %v27603_v34, %v27605_v36  ;;  %v8429_v34 = vadd.f32 %v28076_v20, %v28074_v63 }
0x12b4   :  { %v25400_v1 = vpop.f32.mrf.mxu0 }
0x12b5   :  { %v9216_v47 = vadd.f32 %v25400_v1, %v9133_v32  ;;  %v4217_v32 = vadd.f32 %v27607_v42, %v4135_v4 }
0x12b6   :  { %v9209_v22 = vpop.f32.mrf.mxu0 }
0x12b7   :  { %v9295_v0 = vadd.f32 %v25407_v39, %v9216_v47  ;;  %v9210_v5 = vadd.f32 %v9209_v22, %v9125_v49  ;;  %v5212_v39 = vadd.f32 %v27718_v17, %v27720_v19  ;;  %v4299_v1 = vadd.f32 %v27609_v45, %v4217_v32 }
0x12b8   :  { %v7353_v49 = vadd.f32 %v27950_v25, %v27952_v28  ;;  %v8511_v17 = vadd.f32 %v28078_v21, %v8429_v34  ;;  %v30382_v25 = vld [vmem:[#allocation11_spill] sm:$0xff] }
0x12b9   :  { %v9299_v40 = vmul.f32 0.35355338, %v9295_v0  ;;  %v9289_v2 = vadd.f32 %v9288_v55, %v9210_v5  ;;  %v3386_v55 = vadd.f32 %v27491_v31, %v3307_v15  ;;  %v8435_v0 = vadd.f32 %v25337_v16, %v25330_v9 }
0x12ba   :  { %v5294_v47 = vadd.f32 %v27722_v44, %v5212_v39  ;;  %v4384_v22 = vadd.f32 %v27613_v61, %v4299_v1  ;;  %v8593_v44 = vadd.f32 %v28080_v37, %v8511_v17 }
0x12bb   :  { %v9303_v7 = vsel %vm22_vm0, %v9299_v40, -inf  ;;  %v9298_v8 = vmul.f32 0.35355338, %v9289_v2  ;;  %v8518_v5 = vadd.f32 %v25344_v53, %v8435_v0 }
0x12bc   :  { %9304 = vmax.xlane.f32.xlu1 %v9303_v7  ;;  %v4463_v36 = vadd.f32 %v27615_v62, %v4384_v22  ;;  %v8678_v62 = vadd.f32 %v30382_v25, %v8593_v44 }
0x12bd   :  { %v9300_v3 = vsel %vm22_vm0, %v9298_v8, -inf  ;;  %v8601_v51 = vadd.f32 %v25351_v11, %v8518_v5 }
0x12be   :  { %9301 = vmax.xlane.f32.xlu0 %v9300_v3  ;;  %v7435_v3 = vadd.f32 %v27954_v50, %v7353_v49 }
0x12bf   :  { %v8684_v14 = vadd.f32 %v25358_v26, %v8601_v51  ;;  %v28180_v51 = vand.u32 4294901760, %v9859_v52 }
0x12c0   :  { %v7517_v45 = vadd.f32 %v27956_v41, %v7435_v3 }
0x12c1   :  { %v8763_v60 = vadd.f32 %v25365_v18, %v8684_v14  ;;  %v9858_v14 = vld [vmem:[%s30370_s1 + $0x60] sm:$0xff] }
0x12c2   :  { %v7602_v19 = vadd.f32 %v27960_v33, %v7517_v45 }
0x12cd   :  { %9330 = vrot.lane.b32.xlu1 %v27967_v38, %s27021_s20 }
0x12d1   :  { %3397 = vrot.lane.b32.xlu1 %v3386_v55, %s27022_s0 }
0x12d5   :  { %3399 = vrot.lane.b32.xlu1 %v27487_v29, %s27022_s0 }
0x12d9   :  { %4476 = vrot.lane.b32.xlu1 %v27611_v59, %s27023_s21 }
0x12dd   :  { %5553 = vrot.lane.b32.xlu1 %v27726_v13, %s27024_s22 }
0x12e1   :  { %7694 = vrot.lane.b32.xlu1 %v27958_v12, %s27022_s0 }
0x12e5   :  { %8770 = vrot.lane.b32.xlu1 %v8763_v60, %s27023_s21 }
0x1345   :  { %v9305_v24 = vpop.xlane.xlu1 %9304 }
0x1346   :  { %v9307_v30 = vsub.f32 %v9299_v40, %v9305_v24 }
0x1347   :  { %v9302_v29 = vpop.xlane.xlu0 %9301 }
0x1348   :  { %v9306_v31 = vsub.f32 %v9298_v8, %v9302_v29  ;;  %v9310_v9 = vmul.f32 1.442695, %v9307_v30  ;;  %v5376_v8 = vadd.f32 %v27724_v46, %v5294_v47  ;;  %v7681_v46 = vadd.f32 %v27962_v10, %v7602_v19  ;;  %v9857_v29 = vld [vmem:[%s30370_s1 + $0x58] sm:$0xff] }
0x1349   :  { %v9331_v38 = vpop.permute.xlu1 %9330 }
0x134a   :  { %v9308_v16 = vmul.f32 1.442695, %v9306_v31  ;;  %v28106_v59 = vand.u32 4294901760, %v9331_v38  ;;  %v5461_v42 = vadd.f32 %v27728_v56, %v5376_v8  ;;  %v30383_v56 = vld [vmem:[#allocation12_spill] sm:$0xff]  ;;  %v28191_v31 = vand.u32 4294901760, %v9858_v14 }
0x134b   :  { %v8757_v28 = vadd.f32 %v30383_v56, %v8678_v62 }
0x134c   :  { %26877 = vpow2.f32 %v9308_v16  ;;  %v28109_v13 = vsub.f32 %v9331_v38, %v28106_v59  ;;  %25408 = vmatprep.subr.mxu0 %v28106_v59  ;;  %v5540_v61 = vadd.f32 %v27730_v27, %v5461_v42  ;;  %v28195_v16 = vsub.f32 %v9859_v52, %v28180_v51 }
0x134d   :  { %25409 = vmatpush3.msra.mxu0 %v28106_v59  ;;  %v3398_v12 = vpop.permute.xlu1 %3397  ;;  %26879 = vpow2.f32 %v9310_v9 }
0x134e   :  { %3404 = vst.msk [vmem:[#allocation3] sm:$0xff] %vm3403_vm4, %v3398_v12  ;;  %v28115_v40 = vand.u32 4294901760, %v28109_v13 }
0x1350   :  { %v9459_v53 = vsub.f32 %v28109_v13, %v28115_v40 }
0x1351   :  { %v3400_v11 = vpop.permute.xlu1 %3399 }
0x1352   :  { %3405 = vst.msk [vmem:[#allocation3 + $0x8] sm:$0xff] %vm3403_vm4, %v3400_v11  ;;  %v9460_v26 = vand.u32 4294901760, %v9459_v53  ;;  %v28199_v11 = vand.u32 4294901760, %v9857_v29 }
0x1354   :  { %25415 = vmatprep.subr.mxu1 %v9460_v26  ;;  %v28220_v32 = vsub.f32 %v9857_v29, %v28199_v11 }
0x1355   :  { %25416 = vmatpush3.msra.mxu1 %v9460_v26  ;;  %v4477_v18 = vpop.permute.xlu1 %4476  ;;  %v9856_v26 = vld [vmem:[%s30370_s1 + $0x50] sm:$0xff] }
0x1356   :  { %4482 = vst.msk [vmem:[#allocation3 + $0x8] sm:$0xff] %vm4480_vm5, %v4477_v18 }
0x1359   :  { %v28121_v7 = vpop.eup %26877  ;;  %v5554_v2 = vpop.permute.xlu1 %5553 }
0x135a   :  { %5559 = vst.msk [vmem:[#allocation3 + $0x8] sm:$0xff] %vm5557_vm6, %v5554_v2  ;;  %v9312_v43 = vsel %vm22_vm0, %v28121_v7, 0.0  ;;  %v28126_v35 = vpop.eup %26879  ;;  %v28209_v2 = vsub.f32 %v9858_v14, %v28191_v31 }
0x135b   :  { %9313 = vadd.xlane.f32.xlu0 %v9312_v43  ;;  %v9315_v23 = vsel %vm22_vm0, %v28126_v35, 0.0 }
0x135c   :  { %v28225_v47 = vand.u32 4294901760, %v28209_v2 }
0x135d   :  { %v7695_v48 = vpop.permute.xlu1 %7694 }
0x135e   :  { %7699 = vst.msk [vmem:[#allocation3 + $0x18] sm:$0xff] %vm3403_vm4, %v7695_v48  ;;  %v28213_v48 = vand.u32 4294901760, %v28195_v16  ;;  %v10021_v17 = vsub.f32 %v28209_v2, %v28225_v47 }
0x135f   :  { %9316 = vadd.xlane.f32.xlu0 %v9315_v23 }
0x1360   :  { %v10014_v22 = vsub.f32 %v28195_v16, %v28213_v48 }
0x1361   :  { %v8771_v57 = vpop.permute.xlu1 %8770 }
0x1362   :  { %8775 = vst.msk [vmem:[#allocation3 + $0x18] sm:$0xff] %vm4480_vm5, %v8771_v57  ;;  %v28215_v57 = vand.u32 4294901760, %v9856_v26  ;;  %v10015_v19 = vand.u32 4294901760, %v10014_v22 }
0x1364   :  { %v28232_v8 = vsub.f32 %v9856_v26, %v28215_v57 }
0x1366   :  { %v28245_v44 = vand.u32 4294901760, %v28232_v8 }
0x1375   :  { %9328 = vrot.lane.b32.xlu0 %v27971_v58, %s27021_s20 }
0x1379   :  { %4474 = vrot.lane.b32.xlu0 %v4463_v36, %s27023_s21  ;;  %v28236_v36 = vand.u32 4294901760, %v28220_v32 }
0x137b   :  { %v10028_v25 = vsub.f32 %v28220_v32, %v28236_v36 }
0x137d   :  { %5551 = vrot.lane.b32.xlu0 %v5540_v61, %s27024_s22  ;;  %v9853_v61 = vld [vmem:[#allocation3 + $0x8] sm:$0xff] }
0x137e   :  { %v9869_v62 = vsel %vm632_vm1, %v9853_v61, 0 }
0x1381   :  { %7692 = vrot.lane.b32.xlu0 %v7681_v46, %s27022_s0 }
0x1385   :  { %8768 = vrot.lane.b32.xlu0 %v8757_v28, %s27023_s21  ;;  %v10022_v28 = vand.u32 4294901760, %v10021_v17 }
0x13e4   :  { %v9314_v50 = vpop.xlane.xlu0 %9313 }
0x13e5   :  { %26881 = vrcp.f32 %v9314_v50 }
0x13e8   :  { %v9317_v41 = vpop.xlane.xlu0 %9316 }
0x13e9   :  { %26883 = vrcp.f32 %v9317_v41 }
0x13ec   :  { %v9329_v27 = vpop.permute.xlu0 %9328 }
0x13ed   :  { %v28162_v33 = vand.u32 4294901760, %v9329_v27 }
0x13ef   :  { %v28165_v58 = vsub.f32 %v9329_v27, %v28162_v33  ;;  %25410 = vmatprep.subr.mxu0 %v28162_v33 }
0x13f0   :  { %25411 = vmatpush3.msra.mxu0 %v28162_v33  ;;  %v4475_v10 = vpop.permute.xlu0 %4474 }
0x13f1   :  { %4481 = vst.msk [vmem:[#allocation3] sm:$0xff] %vm4480_vm5, %v4475_v10  ;;  %25422 = vmatprep.subr.mxu0 %v28109_v13  ;;  %v28172_v63 = vand.u32 4294901760, %v28165_v58 }
0x13f2   :  { %v26882_v20 = vpop.eup %26881 }
0x13f3   :  { %v9320_v21 = vmul.f32 %v26882_v20, %v9314_v50  ;;  %v9466_v37 = vsub.f32 %v28165_v58, %v28172_v63  ;;  %v10029_v50 = vand.u32 4294901760, %v10028_v25 }
0x13f4   :  { %v5552_v6 = vpop.permute.xlu0 %5551 }
0x13f5   :  { %v9322_v54 = vsub.f32 2.0, %v9320_v21  ;;  %5558 = vst.msk [vmem:[#allocation3] sm:$0xff] %vm5557_vm6, %v5552_v6  ;;  %v9467_v15 = vand.u32 4294901760, %v9466_v37 }
0x13f6   :  { %v26884_v55 = vpop.eup %26883 }
0x13f7   :  { %v9324_v0 = vmul.f32 %v26882_v20, %v9322_v54  ;;  %v9321_v5 = vmul.f32 %v26884_v55, %v9317_v41  ;;  %25417 = vmatprep.subr.mxu1 %v9467_v15  ;;  %v28262_v41 = vand.u32 4294901760, %v9869_v62 }
0x13f8   :  { %25418 = vmatpush3.msra.mxu1 %v9467_v15  ;;  %v7693_v60 = vpop.permute.xlu0 %7692 }
0x13f9   :  { %v9326_v24 = vmul.f32 %v28121_v7, %v9324_v0  ;;  %v9323_v30 = vsub.f32 2.0, %v9321_v5  ;;  %7698 = vst.msk [vmem:[#allocation3 + $0x10] sm:$0xff] %vm3403_vm4, %v7693_v60  ;;  %25429 = vmatprep.subr.mxu1 %v28106_v59 }
0x13fb   :  { %v9325_v38 = vmul.f32 %v26884_v55, %v9323_v30  ;;  %v9335_v9 = vsel %vm22_vm0, %v9326_v24, 0 }
0x13fc   :  { %v8769_v12 = vpop.permute.xlu0 %8768  ;;  %v28197_v53 = vand.u32 4294901760, %v9335_v9  ;;  %v9852_v23 = vld [vmem:[#allocation3] sm:$0xff] }
0x13fd   :  { %v9327_v18 = vmul.f32 %v28126_v35, %v9325_v38  ;;  %8774 = vst.msk [vmem:[#allocation3 + $0x10] sm:$0xff] %vm4480_vm5, %v8769_v12  ;;  %v9866_v49 = vsel %vm632_vm1, %v9852_v23, 0 }
0x13fe   :  { %25419 = vmatprep.mubr.f32.mxu1 %v28197_v53  ;;  %v9408_v7 = vsub.f32 %v9335_v9, %v28197_v53  ;;  %v28239_v42 = vand.u32 4294901760, %v9866_v49 }
0x13ff   :  { %v9338_v43 = vsel %vm22_vm0, %v9327_v18, 0 }
0x1400   :  { %v28217_v4 = vand.u32 4294901760, %v9338_v43  ;;  %v9409_v35 = vand.u32 4294901760, %v9408_v7  ;;  %v28254_v56 = vsub.f32 %v9866_v49, %v28239_v42 }
0x1402   :  { %v9418_v39 = vsub.f32 %v9338_v43, %v28217_v4  ;;  %25420 = vmatmul.mubr.f32.vlgmr.msra.gmra.mxu1 %v28217_v4  ;;  %v9410_v1 = vsub.f32 %v9408_v7, %v9409_v35  ;;  %v9948_v27 = vand.u32 4294901760, %v28254_v56 }
0x1403   :  { %25430 = vmatpush3.msra.mxu1 %v28106_v59  ;;  %25433 = vmatprep.mubr.f32.mxu1 %v9409_v35 }
0x1404   :  { %25431 = vmatprep.subr.mxu1 %v28162_v33  ;;  %v9411_v3 = vand.u32 4294901760, %v9410_v1  ;;  %v9419_v34 = vand.u32 4294901760, %v9418_v39  ;;  %v9949_v10 = vsub.f32 %v28254_v56, %v9948_v27 }
0x1405   :  { %25432 = vmatpush3.msra.mxu1 %v28162_v33 }
0x1406   :  { %25443 = vmatprep.subr.mxu1 %v28106_v59  ;;  %25412 = vmatprep.mubr.f32.mxu0 %v9411_v3  ;;  %v9420_v45 = vsub.f32 %v9418_v39, %v9419_v34  ;;  %v9950_v20 = vand.u32 4294901760, %v9949_v10 }
0x1407   :  { %25434 = vmatmul.mubr.f32.vlgmr.msra.gmra.mxu1 %v9419_v34 }
0x1408   :  { %25444 = vmatpush3.msra.mxu1 %v28106_v59  ;;  %25447 = vmatprep.mubr.f32.mxu1 %v28197_v53  ;;  %v9421_v46 = vand.u32 4294901760, %v9420_v45  ;;  %v10035_v59 = vsub.f32 %v28232_v8, %v28245_v44 }
0x1409   :  { %25445 = vmatprep.subr.mxu1 %v28162_v33 }
0x140a   :  { %25446 = vmatpush3.msra.mxu1 %v28162_v33  ;;  %25413 = vmatmul.mubr.f32.vlgmr.msra.gmra.mxu0 %v9421_v46  ;;  %v28269_v33 = vsub.f32 %v9869_v62, %v28262_v41 }
0x140b   :  { %25464 = vmatprep.subr.mxu1 %v10015_v19  ;;  %25423 = vmatpush3.msra.mxu0 %v28109_v13  ;;  %v10036_v13 = vand.u32 4294901760, %v10035_v59 }
0x140c   :  { %25448 = vmatmul.mubr.f32.vlgmr.msra.gmra.mxu1 %v28217_v4  ;;  %25424 = vmatprep.subr.mxu0 %v28165_v58 }
0x140d   :  { %25465 = vmatpush3.msra.mxu1 %v10015_v19  ;;  %25426 = vmatprep.mubr.f32.mxu0 %v9408_v7 }
0x140e   :  { %25466 = vmatprep.subr.mxu1 %v10022_v28  ;;  %25472 = vmatprep.mubr.f32.mxu1 %v28239_v42 }
0x140f   :  { %25425 = vmatpush3.msra.mxu0 %v28165_v58  ;;  %25467 = vmatpush3.msra.mxu1 %v10022_v28  ;;  %v9958_v58 = vand.u32 4294901760, %v28269_v33 }
0x1410   :  { %25436 = vmatprep.subr.mxu0 %v28115_v40  ;;  %25468 = vmatprep.subr.mxu1 %v10029_v50 }
0x1411   :  { %25427 = vmatmul.mubr.f32.vlgmr.msra.gmra.mxu0 %v9418_v39  ;;  %25469 = vmatpush3.msra.mxu1 %v10029_v50 }
0x1412   :  { %25437 = vmatpush3.msra.mxu0 %v28115_v40  ;;  %25440 = vmatprep.mubr.f32.mxu0 %v28197_v53  ;;  %v9959_v40 = vsub.f32 %v28269_v33, %v9958_v58 }
0x1413   :  { %25438 = vmatprep.subr.mxu0 %v28172_v63  ;;  %25470 = vmatprep.subr.mxu1 %v10036_v13 }
0x1414   :  { %25439 = vmatpush3.msra.mxu0 %v28172_v63  ;;  %25471 = vmatpush3.msra.mxu1 %v10036_v13  ;;  %v9960_v63 = vand.u32 4294901760, %v9959_v40 }
0x1415   :  { %25450 = vmatprep.subr.mxu0 %v28180_v51  ;;  %25473 = vmatmul.mubr.f32.vlgmr.msra.gmra.mxu1 %v28262_v41 }
0x1416   :  { %25441 = vmatmul.mubr.f32.vlgmr.msra.gmra.mxu0 %v28217_v4  ;;  %25492 = vmatprep.subr.mxu1 %v28180_v51 }
0x1417   :  { %25451 = vmatpush3.msra.mxu0 %v28180_v51  ;;  %25458 = vmatprep.mubr.f32.mxu0 %v9950_v20 }
0x1418   :  { %25452 = vmatprep.subr.mxu0 %v28191_v31  ;;  %25493 = vmatpush3.msra.mxu1 %v28180_v51 }
0x1419   :  { %25453 = vmatpush3.msra.mxu0 %v28191_v31  ;;  %25494 = vmatprep.subr.mxu1 %v28191_v31 }
0x141a   :  { %25454 = vmatprep.subr.mxu0 %v28199_v11  ;;  %25495 = vmatpush3.msra.mxu1 %v28191_v31 }
0x141b   :  { %25455 = vmatpush3.msra.mxu0 %v28199_v11  ;;  %25496 = vmatprep.subr.mxu1 %v28199_v11 }
0x141c   :  { %25456 = vmatprep.subr.mxu0 %v28215_v57  ;;  %25497 = vmatpush3.msra.mxu1 %v28199_v11 }
0x141d   :  { %25457 = vmatpush3.msra.mxu0 %v28215_v57  ;;  %25498 = vmatprep.subr.mxu1 %v28215_v57 }
0x141e   :  { %25459 = vmatmul.mubr.f32.vlgmr.msra.gmra.mxu0 %v9960_v63  ;;  %25499 = vmatpush3.msra.mxu1 %v28215_v57 }
0x141f   :  { %25478 = vmatprep.subr.mxu0 %v28195_v16  ;;  %25520 = vmatprep.subr.mxu1 %v28180_v51 }
0x1420   :  { %25479 = vmatpush3.msra.mxu0 %v28195_v16 }
0x1421   :  { %25480 = vmatprep.subr.mxu0 %v28209_v2 }
0x1422   :  { %25481 = vmatpush3.msra.mxu0 %v28209_v2 }
0x1423   :  { %25482 = vmatprep.subr.mxu0 %v28220_v32 }
0x1424   :  { %25483 = vmatpush3.msra.mxu0 %v28220_v32 }
0x1425   :  { %25484 = vmatprep.subr.mxu0 %v28232_v8 }
0x1426   :  { %25485 = vmatpush3.msra.mxu0 %v28232_v8 }
0x1427   :  { %25506 = vmatprep.subr.mxu0 %v28213_v48 }
0x14c2   :  { %v25421_v21 = vpop.f32.mrf.mxu1 }
0x14c4   :  { %v9504_v37 = vpop.f32.mrf.mxu1 }
0x14c7   :  { %v25435_v54 = vpop.f32.mrf.mxu1 }
0x14c9   :  { %v9668_v0 = vpop.f32.mrf.mxu1 }
0x14ca   :  { %v25414_v6 = vpop.f32.mrf.mxu0 }
0x14cb   :  { %v9511_v15 = vadd.f32 %v25421_v21, %v25414_v6 }
0x14cc   :  { %v9413_v52 = vpop.f32.mrf.mxu0  ;;  %v25449_v29 = vpop.f32.mrf.mxu1 }
0x14cd   :  { %v9505_v5 = vadd.f32 %v9504_v37, %v9413_v52 }
0x14ce   :  { %v9832_v18 = vpop.f32.mrf.mxu1 }
0x14d1   :  { %v25428_v55 = vpop.f32.mrf.mxu0 }
0x14d2   :  { %v9594_v14 = vadd.f32 %v25428_v55, %v9511_v15 }
0x14d3   :  { %v9586_v60 = vpop.f32.mrf.mxu0 }
0x14d4   :  { %v9587_v24 = vadd.f32 %v9586_v60, %v9505_v5  ;;  %v9677_v30 = vadd.f32 %v25435_v54, %v9594_v14 }
0x14d6   :  { %v25442_v38 = vpop.f32.mrf.mxu0  ;;  %v9669_v9 = vadd.f32 %v9668_v0, %v9587_v24 }
0x14d7   :  { %v9760_v16 = vadd.f32 %v25442_v38, %v9677_v30  ;;  %v30384_v38 = vld [vmem:[#allocation7_spill] sm:$0xff] }
0x14d8   :  { %v9753_v12 = vpop.f32.mrf.mxu0 }
0x14d9   :  { %v9839_v53 = vadd.f32 %v25449_v29, %v9760_v16  ;;  %v9754_v26 = vadd.f32 %v9753_v12, %v9669_v9 }
0x14db   :  { %v9833_v7 = vadd.f32 %v9832_v18, %v9754_v26  ;;  %9846 = vrot.lane.b32.xlu1 %v9839_v53, %s27024_s22 }
0x14dd   :  { %9844 = vrot.lane.b32.xlu0 %v9833_v7, %s27024_s22 }
0x154d   :  { %v9847_v2 = vpop.permute.xlu1 %9846 }
0x154e   :  { %9851 = vst.msk [vmem:[#allocation3 + $0x18] sm:$0xff] %vm5557_vm6, %v9847_v2  ;;  %v30385_v2 = vld [vmem:[#allocation8_spill] sm:$0xff] }
0x154f   :  { %v9845_v43 = vpop.permute.xlu0 %9844 }
0x1550   :  { %9850 = vst.msk [vmem:[#allocation3 + $0x10] sm:$0xff] %vm5557_vm6, %v9845_v43 }
0x1555   :  { %v9855_v23 = vld [vmem:[#allocation3 + $0x18] sm:$0xff] }
0x1556   :  { %v9875_v4 = vsel %vm632_vm1, %v9855_v23, 0 }
0x1557   :  { %v9854_v35 = vld [vmem:[#allocation3 + $0x10] sm:$0xff]  ;;  %v9976_v32 = vand.u32 4294901760, %v9875_v4 }
0x1558   :  { %v9872_v39 = vsel %vm632_vm1, %v9854_v35, 0 }
0x1559   :  { %v9966_v1 = vand.u32 4294901760, %v9872_v39  ;;  %v9977_v49 = vsub.f32 %v9875_v4, %v9976_v32 }
0x155b   :  { %25475 = vmatprep.mubr.f32.mxu1 %v9966_v1  ;;  %v9967_v22 = vsub.f32 %v9872_v39, %v9966_v1  ;;  %v9978_v8 = vand.u32 4294901760, %v9977_v49 }
0x155c   :  { %25476 = vmatmul.mubr.f32.gmra.mxu1 %v9976_v32 }
0x155d   :  { %25500 = vmatprep.mubr.f32.mxu1 %v9948_v27  ;;  %v9968_v3 = vand.u32 4294901760, %v9967_v22  ;;  %v9979_v34 = vsub.f32 %v9977_v49, %v9978_v8 }
0x155f   :  { %v9969_v45 = vsub.f32 %v9967_v22, %v9968_v3  ;;  %v9980_v61 = vand.u32 4294901760, %v9979_v34 }
0x1560   :  { %25501 = vmatmul.mubr.f32.vlgmr.msra.gmra.mxu1 %v9958_v58 }
0x1561   :  { %25503 = vmatprep.mubr.f32.mxu1 %v9968_v3  ;;  %25521 = vmatpush3.msra.mxu1 %v28180_v51  ;;  %v9970_v17 = vand.u32 4294901760, %v9969_v45  ;;  %v25474_v51 = vpop.f32.mrf.mxu1 }
0x1562   :  { %25522 = vmatprep.subr.mxu1 %v28191_v31 }
0x1563   :  { %25461 = vmatprep.mubr.f32.mxu0 %v9970_v17  ;;  %25523 = vmatpush3.msra.mxu1 %v28191_v31  ;;  %v10073_v31 = vpop.f32.mrf.mxu1  ;;  %v30387_v17 = vld [vmem:[#allocation9_spill] sm:$0xff] }
0x1564   :  { %25462 = vmatmul.mubr.f32.gmra.mxu0 %v9980_v61  ;;  %25504 = vmatmul.mubr.f32.gmra.mxu1 %v9978_v8 }
0x1565   :  { %25524 = vmatprep.subr.mxu1 %v28199_v11  ;;  %25486 = vmatprep.mubr.f32.mxu0 %v28254_v56 }
0x1566   :  { %25525 = vmatpush3.msra.mxu1 %v28199_v11  ;;  %25528 = vmatprep.mubr.f32.mxu1 %v28239_v42 }
0x1567   :  { %25526 = vmatprep.subr.mxu1 %v28215_v57 }
0x1568   :  { %25527 = vmatpush3.msra.mxu1 %v28215_v57  ;;  %25487 = vmatmul.mubr.f32.vlgmr.msra.gmra.mxu0 %v28269_v33 }
0x1569   :  { %25529 = vmatmul.mubr.f32.vlgmr.msra.gmra.mxu1 %v28262_v41  ;;  %25489 = vmatprep.mubr.f32.mxu0 %v9967_v22 }
0x156a   :  { %25507 = vmatpush3.msra.mxu0 %v28213_v48  ;;  %25531 = vmatprep.mubr.f32.mxu1 %v9966_v1  ;;  %v25460_v48 = vpop.f32.mrf.mxu0 }
0x156b   :  { %25508 = vmatprep.subr.mxu0 %v28225_v47 }
0x156c   :  { %25509 = vmatpush3.msra.mxu0 %v28225_v47  ;;  %v9952_v19 = vpop.f32.mrf.mxu0 }
0x156d   :  { %25490 = vmatmul.mubr.f32.gmra.mxu0 %v9977_v49  ;;  %25510 = vmatprep.subr.mxu0 %v28236_v36 }
0x156e   :  { %25532 = vmatmul.mubr.f32.gmra.mxu1 %v9976_v32  ;;  %25511 = vmatpush3.msra.mxu0 %v28236_v36  ;;  %v23383_v36 = vld [vmem:[%s30370_s1 + $0xd1] ss:$0 sm:$0xff] }
0x156f   :  { %25514 = vmatprep.mubr.f32.mxu0 %v28239_v42  ;;  %25512 = vmatprep.subr.mxu0 %v28245_v44  ;;  %v9963_v62 = vadd.f32 %v25460_v48, %v23383_v36  ;;  %v9953_v56 = vadd.f32 %v23383_v36, %v9952_v19 }
0x1570   :  { %25513 = vmatpush3.msra.mxu0 %v28245_v44 }
0x1571   :  { %25515 = vmatmul.mubr.f32.vlgmr.msra.gmra.mxu0 %v28262_v41  ;;  %v10080_v50 = vadd.f32 %v25474_v51, %v9963_v62  ;;  %v10074_v33 = vadd.f32 %v10073_v31, %v9953_v56  ;;  %v10574_v62 = vld [vmem:[%s30370_s1 + $0x70] sm:$0xff] }
0x1572   :  { %25517 = vmatprep.mubr.f32.mxu0 %v9966_v1  ;;  %v30386_v1 = vld [vmem:[#allocation10_spill] sm:$0xff] }
0x1575   :  { %25518 = vmatmul.mubr.f32.gmra.mxu0 %v9976_v32 }
0x161c   :  { %v25477_v11 = vpop.f32.mrf.mxu1 }
0x161e   :  { %v10085_v57 = vpop.f32.mrf.mxu1 }
0x1620   :  { %v25502_v47 = vpop.f32.mrf.mxu1 }
0x1622   :  { %v10269_v46 = vpop.f32.mrf.mxu1 }
0x1624   :  { %v25463_v42 = vpop.f32.mrf.mxu0  ;;  %v25505_v25 = vpop.f32.mrf.mxu1 }
0x1625   :  { %v9983_v10 = vadd.f32 %v25463_v42, %v23383_v36 }
0x1626   :  { %v9972_v44 = vpop.f32.mrf.mxu0  ;;  %v10285_v59 = vpop.f32.mrf.mxu1 }
0x1627   :  { %v9973_v27 = vadd.f32 %v23383_v36, %v9972_v44  ;;  %v10092_v52 = vadd.f32 %v25477_v11, %v9983_v10 }
0x1628   :  { %v25488_v28 = vpop.f32.mrf.mxu0 }
0x1629   :  { %v10179_v13 = vadd.f32 %v25488_v28, %v10080_v50  ;;  %v25530_v58 = vpop.f32.mrf.mxu1  ;;  %v10086_v21 = vadd.f32 %v10085_v57, %v9973_v27 }
0x162a   :  { %v10171_v41 = vpop.f32.mrf.mxu0 }
0x162b   :  { %v10172_v40 = vadd.f32 %v10171_v41, %v10074_v33  ;;  %v10278_v37 = vadd.f32 %v25502_v47, %v10179_v13  ;;  %v10469_v6 = vpop.f32.mrf.mxu1  ;;  %v10577_v47 = vld [vmem:[%s30370_s1 + $0x88] sm:$0xff] }
0x162c   :  { %v28378_v19 = vand.u32 4294901760, %v10577_v47 }
0x162d   :  { %v25491_v20 = vpop.f32.mrf.mxu0  ;;  %v10270_v0 = vadd.f32 %v10269_v46, %v10172_v40  ;;  %v10576_v46 = vld [vmem:[%s30370_s1 + $0x80] sm:$0xff] }
0x162e   :  { %v10193_v5 = vadd.f32 %v25491_v20, %v10092_v52  ;;  %v25533_v30 = vpop.f32.mrf.mxu1  ;;  %v28384_v36 = vsub.f32 %v10577_v47, %v28378_v19  ;;  %v28386_v42 = vand.u32 4294901760, %v10576_v46  ;;  %25534 = vmatprep.subr.mxu0 %v28378_v19 }
0x162f   :  { %v10185_v63 = vpop.f32.mrf.mxu0  ;;  %25535 = vmatpush3.msra.mxu0 %v28378_v19 }
0x1630   :  { %v10186_v15 = vadd.f32 %v10185_v63, %v10086_v21  ;;  %v10294_v53 = vadd.f32 %v25505_v25, %v10193_v5  ;;  %v10481_v23 = vpop.f32.mrf.mxu1  ;;  %v10575_v25 = vld [vmem:[%s30370_s1 + $0x78] sm:$0xff]  ;;  %v28397_v44 = vand.u32 4294901760, %v28384_v36  ;;  %v28400_v56 = vsub.f32 %v10576_v46, %v28386_v42  ;;  %25536 = vmatprep.subr.mxu0 %v28386_v42 }
0x1631   :  { %v25516_v54 = vpop.f32.mrf.mxu0  ;;  %v28402_v28 = vand.u32 4294901760, %v10575_v25  ;;  %25537 = vmatpush3.msra.mxu0 %v28386_v42 }
0x1632   :  { %v10383_v55 = vadd.f32 %v25516_v54, %v10278_v37  ;;  %v10286_v12 = vadd.f32 %v10285_v59, %v10186_v15  ;;  %v28404_v59 = vand.u32 4294901760, %v10574_v62  ;;  %v10732_v50 = vsub.f32 %v28384_v36, %v28397_v44 }
0x1633   :  { %v10376_v14 = vpop.f32.mrf.mxu0  ;;  %v28411_v41 = vand.u32 4294901760, %v28400_v56  ;;  %v28414_v27 = vsub.f32 %v10575_v25, %v28402_v28  ;;  %25538 = vmatprep.subr.mxu0 %v28402_v28 }
0x1634   :  { %v10476_v60 = vadd.f32 %v25530_v58, %v10383_v55  ;;  %v10377_v24 = vadd.f32 %v10376_v14, %v10270_v0  ;;  %v28417_v13 = vsub.f32 %v10574_v62, %v28404_v59  ;;  %25539 = vmatpush3.msra.mxu0 %v28402_v28  ;;  %v10733_v33 = vand.u32 4294901760, %v10732_v50 }
0x1635   :  { %v25519_v29 = vpop.f32.mrf.mxu0  ;;  %v10739_v10 = vsub.f32 %v28400_v56, %v28411_v41  ;;  %v28424_v58 = vand.u32 4294901760, %v28414_v27  ;;  %25540 = vmatprep.subr.mxu0 %v28404_v59 }
0x1636   :  { %v28344_v9 = vadd.f32 %v10476_v60, %v30384_v38  ;;  %v10470_v16 = vadd.f32 %v10469_v6, %v10377_v24  ;;  %v10395_v4 = vadd.f32 %v25519_v29, %v10294_v53  ;;  %v28427_v20 = vand.u32 4294901760, %v28417_v13  ;;  %25541 = vmatpush3.msra.mxu0 %v28404_v59  ;;  %25548 = vmatprep.subr.mxu1 %v10733_v33 }
0x1637   :  { %v10388_v26 = vpop.f32.mrf.mxu0  ;;  %v10740_v40 = vand.u32 4294901760, %v10739_v10  ;;  %v10746_v63 = vsub.f32 %v28414_v27, %v28424_v58  ;;  %25562 = vmatprep.subr.mxu0 %v28384_v36  ;;  %25549 = vmatpush3.msra.mxu1 %v10733_v33 }
0x1638   :  { %v10389_v18 = vadd.f32 %v10388_v26, %v10286_v12  ;;  %v10500_v7 = vsel %vm632_vm1, %v28344_v9, 0.0  ;;  %v28349_v43 = vadd.f32 %v10470_v16, %v30385_v2  ;;  %v10515_v39 = vmul.f32 %v28344_v9, %v28344_v9 }
0x1639   :  { %10501 = vadd.xlane.f32.xlu1 %v10500_v7  ;;  %v10488_v22 = vadd.f32 %v25533_v30, %v10395_v4  ;;  %v10753_v21 = vsub.f32 %v28417_v13, %v28427_v20  ;;  %25550 = vmatprep.subr.mxu1 %v10740_v40  ;;  %v10747_v37 = vand.u32 4294901760, %v10746_v63 }
0x163a   :  { %v10482_v35 = vadd.f32 %v10481_v23, %v10389_v18  ;;  %v10497_v32 = vsel %vm632_vm1, %v28349_v43, 0.0  ;;  %v10521_v8 = vsel %vm632_vm1, %v10515_v39, 0.0  ;;  %v10514_v34 = vmul.f32 %v28349_v43, %v28349_v43  ;;  %25551 = vmatpush3.msra.mxu1 %v10740_v40 }
0x163b   :  { %10498 = vadd.xlane.f32.xlu0 %v10497_v32  ;;  %v28366_v61 = vadd.f32 %v10488_v22, %v30387_v17  ;;  %v10754_v6 = vand.u32 4294901760, %v10753_v21  ;;  %25552 = vmatprep.subr.mxu1 %v10747_v37  ;;  %v23384_v17 = vld [vmem:[%s30370_s1 + $0xd4] ss:$0 sm:$0xff] }
0x163c   :  { %v28356_v49 = vadd.f32 %v10482_v35, %v30386_v1  ;;  %v10518_v51 = vsel %vm632_vm1, %v10514_v34, 0.0  ;;  %25553 = vmatpush3.msra.mxu1 %v10747_v37 }
0x163d   :  { %v10506_v11 = vsel %vm632_vm1, %v28366_v61, 0.0  ;;  %v10517_v48 = vmul.f32 %v28366_v61, %v28366_v61  ;;  %25554 = vmatprep.subr.mxu1 %v10754_v6 }
0x163e   :  { %v10503_v3 = vsel %vm632_vm1, %v28356_v49, 0.0  ;;  %v10516_v45 = vmul.f32 %v28356_v49, %v28356_v49  ;;  %25555 = vmatpush3.msra.mxu1 %v10754_v6 }
0x163f   :  { %10522 = vadd.xlane.f32.xlu0 %v10521_v8  ;;  %10504 = vadd.xlane.f32.xlu1 %v10503_v3  ;;  %v10527_v57 = vsel %vm632_vm1, %v10517_v48, 0.0 }
0x1640   :  { %v10524_v31 = vsel %vm632_vm1, %v10516_v45, 0.0  ;;  %25576 = vmatprep.subr.mxu1 %v28378_v19 }
0x1643   :  { %10519 = vadd.xlane.f32.xlu0 %v10518_v51  ;;  %10525 = vadd.xlane.f32.xlu1 %v10524_v31  ;;  %v23385_v31 = vld [vmem:[%s30370_s1 + $0xd5] ss:$0 sm:$0xff] }
0x1647   :  { %10507 = vadd.xlane.f32.xlu0 %v10506_v11 }
0x164b   :  { %10528 = vadd.xlane.f32.xlu0 %v10527_v57 }
0x16c2   :  { %v10502_v52 = vpop.xlane.xlu1 %10501 }
0x16c3   :  { %v10511_v15 = vmul.f32 0.03125, %v10502_v52 }
0x16c4   :  { %v10499_v54 = vpop.xlane.xlu0 %10498 }
0x16c5   :  { %v10510_v55 = vmul.f32 0.03125, %v10499_v54  ;;  %v10535_v14 = vmul.f32 %v10511_v15, %v10511_v15  ;;  %v10543_v34 = vsub.f32 %v28344_v9, %v10511_v15 }
0x16c7   :  { %v10534_v29 = vmul.f32 %v10510_v55, %v10510_v55  ;;  %v10542_v11 = vsub.f32 %v28349_v43, %v10510_v55 }
0x16c8   :  { %v10523_v0 = vpop.xlane.xlu0 %10522  ;;  %v10505_v5 = vpop.xlane.xlu1 %10504 }
0x16c9   :  { %v10531_v60 = vmul.f32 0.03125, %v10523_v0  ;;  %v10512_v24 = vmul.f32 0.03125, %v10505_v5 }
0x16cb   :  { %v10539_v30 = vsub.f32 %v10531_v60, %v10535_v14  ;;  %v10536_v53 = vmul.f32 %v10512_v24, %v10512_v24  ;;  %v10544_v47 = vsub.f32 %v28356_v49, %v10512_v24 }
0x16cc   :  { %v10520_v38 = vpop.xlane.xlu0 %10519  ;;  %v10526_v16 = vpop.xlane.xlu1 %10525 }
0x16cd   :  { %v10547_v12 = vadd.f32 1e-05, %v10539_v30  ;;  %v10530_v26 = vmul.f32 0.03125, %v10520_v38  ;;  %v10532_v18 = vmul.f32 0.03125, %v10526_v16 }
0x16cf   :  { %26885 = vrsqrt.f32 %v10547_v12  ;;  %v10538_v7 = vsub.f32 %v10530_v26, %v10534_v29  ;;  %v10540_v2 = vsub.f32 %v10532_v18, %v10536_v53 }
0x16d0   :  { %v10508_v23 = vpop.xlane.xlu0 %10507 }
0x16d1   :  { %v10546_v4 = vadd.f32 1e-05, %v10538_v7  ;;  %v10548_v35 = vadd.f32 1e-05, %v10540_v2  ;;  %v10513_v32 = vmul.f32 0.03125, %v10508_v23 }
0x16d3   :  { %26887 = vrsqrt.f32 %v10546_v4  ;;  %v10537_v1 = vmul.f32 %v10513_v32, %v10513_v32  ;;  %v10545_v49 = vsub.f32 %v28366_v61, %v10513_v32 }
0x16d4   :  { %26889 = vrsqrt.f32 %v10548_v35  ;;  %v10529_v39 = vpop.xlane.xlu0 %10528 }
0x16d5   :  { %v10533_v22 = vmul.f32 0.03125, %v10529_v39 }
0x16d7   :  { %v10541_v8 = vsub.f32 %v10533_v22, %v10537_v1  ;;  %v11216_v1 = vld [vmem:[%s30370_s1 + $0xa8] sm:$0xff] }
0x16d9   :  { %v10549_v3 = vadd.f32 1e-05, %v10541_v8 }
0x16db   :  { %26891 = vrsqrt.f32 %v10549_v3 }
0x16dc   :  { %v26886_v45 = vpop.eup %26885 }
0x16dd   :  { %v10555_v51 = vmul.f32 %v26886_v45, %v10543_v34  ;;  %v28571_v45 = vand.u32 4294901760, %v11216_v1 }
0x16df   :  { %v10563_v48 = vmul.f32 %v23384_v17, %v10555_v51 }
0x16e0   :  { %v26888_v57 = vpop.eup %26887 }
0x16e1   :  { %v26890_v46 = vpop.eup %26889  ;;  %v10554_v25 = vmul.f32 %v26888_v57, %v10542_v11  ;;  %v28446_v9 = vadd.f32 %v23385_v31, %v10563_v48  ;;  %v28585_v57 = vsub.f32 %v11216_v1, %v28571_v45 }
0x16e2   :  { %v10556_v62 = vmul.f32 %v26890_v46, %v10544_v47  ;;  %v11214_v47 = vld [vmem:[%s30370_s1 + $0x98] sm:$0xff] }
0x16e3   :  { %v10562_v50 = vmul.f32 %v23384_v17, %v10554_v25  ;;  %v10587_v33 = vsel %vm632_vm1, %v28446_v9, 0 }
0x16e4   :  { %v28450_v10 = vand.u32 4294901760, %v10587_v33  ;;  %v10564_v40 = vmul.f32 %v23384_v17, %v10556_v62 }
0x16e5   :  { %v28452_v63 = vadd.f32 %v23385_v31, %v10562_v50  ;;  %v28596_v50 = vand.u32 4294901760, %v11214_v47 }
0x16e6   :  { %v28455_v43 = vsub.f32 %v10587_v33, %v28450_v10  ;;  %v28457_v21 = vadd.f32 %v23385_v31, %v10564_v40  ;;  %v28600_v33 = vand.u32 4294901760, %v28585_v57 }
0x16e7   :  { %v10584_v37 = vsel %vm632_vm1, %v28452_v63, 0 }
0x16e8   :  { %v26892_v6 = vpop.eup %26891  ;;  %v28462_v52 = vand.u32 4294901760, %v10584_v37  ;;  %v10590_v54 = vsel %vm632_vm1, %v28457_v21, 0  ;;  %v10676_v0 = vand.u32 4294901760, %v28455_v43 }
0x16e9   :  { %v28466_v15 = vand.u32 4294901760, %v10590_v54  ;;  %v10557_v55 = vmul.f32 %v26892_v6, %v10545_v49  ;;  %v28610_v49 = vsub.f32 %v11214_v47, %v28596_v50  ;;  %v11400_v6 = vsub.f32 %v28585_v57, %v28600_v33 }
0x16ea   :  { %25556 = vmatprep.mubr.f32.mxu1 %v28462_v52  ;;  %v10665_v5 = vsub.f32 %v10584_v37, %v28462_v52  ;;  %v10677_v30 = vsub.f32 %v28455_v43, %v10676_v0 }
0x16eb   :  { %25557 = vmatmul.mubr.f32.vlgmr.msra.gmra.mxu1 %v28450_v10  ;;  %v10565_v61 = vmul.f32 %v23384_v17, %v10557_v55  ;;  %v10685_v14 = vsub.f32 %v10590_v54, %v28466_v15  ;;  %v11215_v17 = vld [vmem:[%s30370_s1 + $0xa0] sm:$0xff]  ;;  %v28621_v54 = vand.u32 4294901760, %v28610_v49  ;;  %v11401_v55 = vand.u32 4294901760, %v11400_v6 }
0x16ec   :  { %25559 = vmatprep.mubr.f32.mxu1 %v28466_v15  ;;  %25577 = vmatpush3.msra.mxu1 %v28378_v19  ;;  %v10666_v60 = vand.u32 4294901760, %v10665_v5  ;;  %v10678_v18 = vand.u32 4294901760, %v10677_v30  ;;  %v28582_v48 = vand.u32 4294901760, %v11215_v17 }
0x16ed   :  { %25578 = vmatprep.subr.mxu1 %v28386_v42  ;;  %v28476_v24 = vadd.f32 %v23385_v31, %v10565_v61  ;;  %v10686_v29 = vand.u32 4294901760, %v10685_v14 }
0x16ee   :  { %25579 = vmatpush3.msra.mxu1 %v28386_v42  ;;  %v10667_v38 = vsub.f32 %v10665_v5, %v10666_v60  ;;  %v28594_v62 = vsub.f32 %v11215_v17, %v28582_v48 }
0x16ef   :  { %v10593_v16 = vsel %vm632_vm1, %v28476_v24, 0  ;;  %25580 = vmatprep.subr.mxu1 %v28402_v28  ;;  %v10687_v12 = vsub.f32 %v10685_v14, %v10686_v29 }
0x16f0   :  { %v10668_v53 = vand.u32 4294901760, %v10667_v38  ;;  %v10694_v26 = vand.u32 4294901760, %v10593_v16  ;;  %25581 = vmatpush3.msra.mxu1 %v28402_v28 }
0x16f1   :  { %25582 = vmatprep.subr.mxu1 %v28404_v59  ;;  %v10688_v2 = vand.u32 4294901760, %v10687_v12 }
0x16f2   :  { %25542 = vmatprep.mubr.f32.mxu0 %v10668_v53  ;;  %v10695_v7 = vsub.f32 %v10593_v16, %v10694_v26  ;;  %25560 = vmatmul.mubr.f32.gmra.mxu1 %v10694_v26 }
0x16f3   :  { %25543 = vmatmul.mubr.f32.vlgmr.msra.gmra.mxu0 %v10678_v18  ;;  %25584 = vmatprep.mubr.f32.mxu1 %v10666_v60 }
0x16f4   :  { %25545 = vmatprep.mubr.f32.mxu0 %v10688_v2  ;;  %25583 = vmatpush3.msra.mxu1 %v28404_v59  ;;  %v10696_v23 = vand.u32 4294901760, %v10695_v7  ;;  %v23386_v2 = vld [vmem:[%s30370_s1 + $0xd2] ss:$0 sm:$0xff] }
0x16f5   :  { %25604 = vmatprep.subr.mxu1 %v28378_v19  ;;  %25563 = vmatpush3.msra.mxu0 %v28384_v36 }
0x16f6   :  { %25585 = vmatmul.mubr.f32.vlgmr.msra.gmra.mxu1 %v10676_v0  ;;  %25564 = vmatprep.subr.mxu0 %v28400_v56  ;;  %v10697_v4 = vsub.f32 %v10695_v7, %v10696_v23 }
0x16f7   :  { %25587 = vmatprep.mubr.f32.mxu1 %v10686_v29  ;;  %25605 = vmatpush3.msra.mxu1 %v28378_v19  ;;  %v11220_v19 = vld [vmem:[%s30370_s1 + $0xc8] sm:$0xff] }
0x16f8   :  { %25606 = vmatprep.subr.mxu1 %v28386_v42  ;;  %25565 = vmatpush3.msra.mxu0 %v28400_v56  ;;  %v10698_v35 = vand.u32 4294901760, %v10697_v4  ;;  %v28519_v36 = vand.u32 4294901760, %v11220_v19 }
0x16f9   :  { %25607 = vmatpush3.msra.mxu1 %v28386_v42  ;;  %25566 = vmatprep.subr.mxu0 %v28414_v27  ;;  %v11219_v42 = vld [vmem:[%s30370_s1 + $0xc0] sm:$0xff] }
0x16fa   :  { %25546 = vmatmul.mubr.f32.gmra.mxu0 %v10698_v35  ;;  %25588 = vmatmul.mubr.f32.gmra.mxu1 %v10696_v23  ;;  %v28527_v56 = vand.u32 4294901760, %v11219_v42 }
0x16fb   :  { %25608 = vmatprep.subr.mxu1 %v28402_v28  ;;  %25567 = vmatpush3.msra.mxu0 %v28414_v27 }
0x16fc   :  { %25570 = vmatprep.mubr.f32.mxu0 %v10665_v5  ;;  %25609 = vmatpush3.msra.mxu1 %v28402_v28  ;;  %v11218_v28 = vld [vmem:[%s30370_s1 + $0xb8] sm:$0xff]  ;;  %v11414_v5 = vsub.f32 %v28610_v49, %v28621_v54 }
0x16fd   :  { %25612 = vmatprep.mubr.f32.mxu1 %v28462_v52  ;;  %25568 = vmatprep.subr.mxu0 %v28417_v13  ;;  %v28540_v27 = vand.u32 4294901760, %v11218_v28 }
0x16fe   :  { %25610 = vmatprep.subr.mxu1 %v28404_v59  ;;  %25569 = vmatpush3.msra.mxu0 %v28417_v13  ;;  %v11217_v13 = vld [vmem:[%s30370_s1 + $0xb0] sm:$0xff] }
0x16ff   :  { %25611 = vmatpush3.msra.mxu1 %v28404_v59  ;;  %25571 = vmatmul.mubr.f32.vlgmr.msra.gmra.mxu0 %v28455_v43  ;;  %v28553_v32 = vsub.f32 %v11218_v28, %v28540_v27  ;;  %v28555_v39 = vand.u32 4294901760, %v11217_v13  ;;  %v28607_v43 = vand.u32 4294901760, %v28594_v62 }
0x1700   :  { %25590 = vmatprep.subr.mxu0 %v28397_v44  ;;  %25613 = vmatmul.mubr.f32.vlgmr.msra.gmra.mxu1 %v28450_v10 }
0x1701   :  { %25573 = vmatprep.mubr.f32.mxu0 %v10685_v14  ;;  %25591 = vmatpush3.msra.mxu0 %v28397_v44  ;;  %v28525_v44 = vsub.f32 %v11220_v19, %v28519_v36  ;;  %v28565_v3 = vand.u32 4294901760, %v28553_v32  ;;  %v28568_v34 = vsub.f32 %v11217_v13, %v28555_v39  ;;  %v11415_v14 = vand.u32 4294901760, %v11414_v5 }
0x1702   :  { %25615 = vmatprep.mubr.f32.mxu1 %v28466_v15  ;;  %25592 = vmatprep.subr.mxu0 %v28411_v41 }
0x1703   :  { %25593 = vmatpush3.msra.mxu0 %v28411_v41  ;;  %v28535_v59 = vand.u32 4294901760, %v28525_v44  ;;  %v28538_v41 = vsub.f32 %v11219_v42, %v28527_v56  ;;  %v11386_v31 = vsub.f32 %v28553_v32, %v28565_v3  ;;  %v28580_v11 = vand.u32 4294901760, %v28568_v34 }
0x1704   :  { %25574 = vmatmul.mubr.f32.gmra.mxu0 %v10695_v7  ;;  %25594 = vmatprep.subr.mxu0 %v28424_v58 }
0x1705   :  { %25616 = vmatmul.mubr.f32.gmra.mxu1 %v10694_v26  ;;  %25595 = vmatpush3.msra.mxu0 %v28424_v58  ;;  %v11372_v58 = vsub.f32 %v28525_v44, %v28535_v59  ;;  %v11387_v46 = vand.u32 4294901760, %v11386_v31  ;;  %v11393_v25 = vsub.f32 %v28568_v34, %v28580_v11 }
0x1706   :  { %25598 = vmatprep.mubr.f32.mxu0 %v28462_v52  ;;  %25596 = vmatprep.subr.mxu0 %v28427_v20  ;;  %v11407_v52 = vsub.f32 %v28594_v62, %v28607_v43 }
0x1707   :  { %25597 = vmatpush3.msra.mxu0 %v28427_v20  ;;  %v28550_v20 = vand.u32 4294901760, %v28538_v41  ;;  %v11373_v22 = vand.u32 4294901760, %v11372_v58  ;;  %v11394_v40 = vand.u32 4294901760, %v11393_v25 }
0x1708   :  { %25599 = vmatmul.mubr.f32.vlgmr.msra.gmra.mxu0 %v28450_v10  ;;  %25618 = vmatprep.subr.mxu0 %v28519_v36  ;;  %v11213_v10 = vld [vmem:[%s30370_s1 + $0x90] sm:$0xff]  ;;  %v11408_v0 = vand.u32 4294901760, %v11407_v52 }
0x1709   :  { %25601 = vmatprep.mubr.f32.mxu0 %v28466_v15  ;;  %25619 = vmatpush3.msra.mxu0 %v28519_v36  ;;  %v11379_v8 = vsub.f32 %v28538_v41, %v28550_v20  ;;  %v28612_v37 = vand.u32 4294901760, %v11213_v10 }
0x170a   :  { %25620 = vmatprep.subr.mxu0 %v28527_v56  ;;  %25640 = vmatprep.subr.mxu1 %v11373_v22 }
0x170b   :  { %25621 = vmatpush3.msra.mxu0 %v28527_v56  ;;  %v11380_v51 = vand.u32 4294901760, %v11379_v8  ;;  %25641 = vmatpush3.msra.mxu1 %v11373_v22  ;;  %v28624_v15 = vsub.f32 %v11213_v10, %v28612_v37 }
0x170c   :  { %25602 = vmatmul.mubr.f32.gmra.mxu0 %v10694_v26  ;;  %25622 = vmatprep.subr.mxu0 %v28540_v27 }
0x170d   :  { %25623 = vmatpush3.msra.mxu0 %v28540_v27  ;;  %25642 = vmatprep.subr.mxu1 %v11380_v51  ;;  %v28631_v61 = vand.u32 4294901760, %v28624_v15 }
0x170e   :  { %25624 = vmatprep.subr.mxu0 %v28555_v39  ;;  %25643 = vmatpush3.msra.mxu1 %v11380_v51 }
0x170f   :  { %25625 = vmatpush3.msra.mxu0 %v28555_v39  ;;  %25644 = vmatprep.subr.mxu1 %v11387_v46  ;;  %v11421_v60 = vsub.f32 %v28624_v15, %v28631_v61 }
0x1710   :  { %25626 = vmatprep.subr.mxu0 %v28571_v45  ;;  %25645 = vmatpush3.msra.mxu1 %v11387_v46 }
0x1711   :  { %25627 = vmatpush3.msra.mxu0 %v28571_v45  ;;  %25646 = vmatprep.subr.mxu1 %v11394_v40  ;;  %v11422_v30 = vand.u32 4294901760, %v11421_v60 }
0x1712   :  { %25628 = vmatprep.subr.mxu0 %v28582_v48  ;;  %25647 = vmatpush3.msra.mxu1 %v11394_v40 }
0x1713   :  { %25629 = vmatpush3.msra.mxu0 %v28582_v48  ;;  %25648 = vmatprep.subr.mxu1 %v11401_v55 }
0x1714   :  { %25630 = vmatprep.subr.mxu0 %v28596_v50  ;;  %25649 = vmatpush3.msra.mxu1 %v11401_v55 }
0x1715   :  { %25631 = vmatpush3.msra.mxu0 %v28596_v50  ;;  %25650 = vmatprep.subr.mxu1 %v11408_v0 }
0x1716   :  { %25632 = vmatprep.subr.mxu0 %v28612_v37  ;;  %25651 = vmatpush3.msra.mxu1 %v11408_v0 }
0x1717   :  { %25633 = vmatpush3.msra.mxu0 %v28612_v37  ;;  %25652 = vmatprep.subr.mxu1 %v11415_v14 }
0x1718   :  { %25662 = vmatprep.subr.mxu0 %v28525_v44  ;;  %25653 = vmatpush3.msra.mxu1 %v11415_v14 }
0x1719   :  { %25654 = vmatprep.subr.mxu1 %v11422_v30 }
0x171a   :  { %25655 = vmatpush3.msra.mxu1 %v11422_v30 }
0x171b   :  { %25684 = vmatprep.subr.mxu1 %v28519_v36 }
0x17ab   :  { %v25558_v29 = vpop.f32.mrf.mxu1 }
0x17ad   :  { %v10791_v38 = vpop.f32.mrf.mxu1 }
0x17b2   :  { %v25561_v16 = vpop.f32.mrf.mxu1 }
0x17b3   :  { %v25544_v12 = vpop.f32.mrf.mxu0 }
0x17b4   :  { %v10803_v53 = vpop.f32.mrf.mxu1  ;;  %v10681_v19 = vadd.f32 %v25544_v12, %v23386_v2 }
0x17b5   :  { %v10670_v18 = vpop.f32.mrf.mxu0 }
0x17b6   :  { %v25586_v26 = vpop.f32.mrf.mxu1  ;;  %v10671_v42 = vadd.f32 %v23386_v2, %v10670_v18  ;;  %v10798_v1 = vadd.f32 %v25558_v29, %v10681_v19 }
0x17b8   :  { %v10987_v7 = vpop.f32.mrf.mxu1  ;;  %v10792_v51 = vadd.f32 %v10791_v38, %v10671_v42 }
0x17ba   :  { %v25547_v23 = vpop.f32.mrf.mxu0  ;;  %v25589_v4 = vpop.f32.mrf.mxu1 }
0x17bb   :  { %v10701_v58 = vadd.f32 %v25547_v23, %v23386_v2 }
0x17bc   :  { %v10690_v35 = vpop.f32.mrf.mxu0  ;;  %v11003_v13 = vpop.f32.mrf.mxu1 }
0x17bd   :  { %v10691_v8 = vadd.f32 %v23386_v2, %v10690_v35  ;;  %v10810_v25 = vadd.f32 %v25561_v16, %v10701_v58 }
0x17bf   :  { %v25572_v28 = vpop.f32.mrf.mxu0  ;;  %v10804_v6 = vadd.f32 %v10803_v53, %v10691_v8 }
0x17c0   :  { %v10897_v17 = vadd.f32 %v25572_v28, %v10798_v1  ;;  %v25614_v31 = vpop.f32.mrf.mxu1 }
0x17c1   :  { %v10889_v22 = vpop.f32.mrf.mxu0 }
0x17c2   :  { %v10890_v46 = vadd.f32 %v10889_v22, %v10792_v51  ;;  %v10996_v52 = vadd.f32 %v25586_v26, %v10897_v17  ;;  %v11187_v55 = vpop.f32.mrf.mxu1 }
0x17c4   :  { %v25575_v47 = vpop.f32.mrf.mxu0  ;;  %v10988_v60 = vadd.f32 %v10987_v7, %v10890_v46 }
0x17c5   :  { %v10911_v40 = vadd.f32 %v25575_v47, %v10810_v25  ;;  %v25617_v2 = vpop.f32.mrf.mxu1 }
0x17c6   :  { %v10903_v10 = vpop.f32.mrf.mxu0 }
0x17c7   :  { %v10904_v5 = vadd.f32 %v10903_v10, %v10804_v6  ;;  %v11012_v18 = vadd.f32 %v25589_v4, %v10911_v40  ;;  %v11199_v1 = vpop.f32.mrf.mxu1 }
0x17c8   :  { %v25600_v0 = vpop.f32.mrf.mxu0 }
0x17c9   :  { %v11101_v14 = vadd.f32 %v25600_v0, %v10996_v52  ;;  %v11004_v16 = vadd.f32 %v11003_v13, %v10904_v5 }
0x17ca   :  { %v11094_v30 = vpop.f32.mrf.mxu0 }
0x17cb   :  { %v11194_v12 = vadd.f32 %v25614_v31, %v11101_v14  ;;  %v11095_v29 = vadd.f32 %v11094_v30, %v10988_v60 }
0x17cc   :  { %v25603_v38 = vpop.f32.mrf.mxu0 }
0x17cd   :  { %v11210_v23 = vmax.f32 %v11194_v12, 0.0  ;;  %v11188_v35 = vadd.f32 %v11187_v55, %v11095_v29  ;;  %v11113_v19 = vadd.f32 %v25603_v38, %v11012_v18 }
0x17ce   :  { %v11106_v42 = vpop.f32.mrf.mxu0 }
0x17cf   :  { %v11231_v53 = vsel %vm11226_vm7, %v11210_v23, 0  ;;  %v11209_v26 = vmax.f32 %v11188_v35, 0.0  ;;  %v11206_v28 = vadd.f32 %v25617_v2, %v11113_v19  ;;  %v11107_v58 = vadd.f32 %v11106_v42, %v11004_v16 }
0x17d0   :  { %v28642_v22 = vand.u32 4294901760, %v11231_v53 }
0x17d1   :  { %v11228_v7 = vsel %vm11226_vm7, %v11209_v26, 0  ;;  %v11212_v8 = vmax.f32 %v11206_v28, 0.0  ;;  %v11200_v4 = vadd.f32 %v11199_v1, %v11107_v58 }
0x17d2   :  { %v28646_v17 = vsub.f32 %v11231_v53, %v28642_v22  ;;  %v28648_v51 = vand.u32 4294901760, %v11228_v7 }
0x17d3   :  { %v11237_v13 = vsel %vm11226_vm7, %v11212_v8, 0  ;;  %v11211_v31 = vmax.f32 %v11200_v4, 0.0 }
0x17d4   :  { %v11324_v47 = vand.u32 4294901760, %v28646_v17  ;;  %v11313_v46 = vsub.f32 %v11228_v7, %v28648_v51  ;;  %v28653_v25 = vand.u32 4294901760, %v11237_v13  ;;  %25656 = vmatprep.mubr.f32.mxu1 %v28648_v51 }
0x17d5   :  { %v11234_v10 = vsel %vm11226_vm7, %v11211_v31, 0  ;;  %25657 = vmatmul.mubr.f32.vlgmr.msra.gmra.mxu1 %v28642_v22 }
0x17d6   :  { %v28659_v40 = vsub.f32 %v11237_v13, %v28653_v25  ;;  %v28661_v6 = vand.u32 4294901760, %v11234_v10  ;;  %25685 = vmatpush3.msra.mxu1 %v28519_v36  ;;  %v11314_v52 = vand.u32 4294901760, %v11313_v46  ;;  %v11325_v55 = vsub.f32 %v28646_v17, %v11324_v47 }
0x17d7   :  { %25686 = vmatprep.subr.mxu1 %v28527_v56 }
0x17d8   :  { %v11333_v0 = vsub.f32 %v11234_v10, %v28661_v6  ;;  %25687 = vmatpush3.msra.mxu1 %v28527_v56  ;;  %25659 = vmatprep.mubr.f32.mxu1 %v28661_v6  ;;  %v11315_v5 = vsub.f32 %v11313_v46, %v11314_v52  ;;  %v11344_v14 = vand.u32 4294901760, %v28659_v40  ;;  %v11326_v12 = vand.u32 4294901760, %v11325_v55 }
0x17d9   :  { %25688 = vmatprep.subr.mxu1 %v28540_v27  ;;  %25660 = vmatmul.mubr.f32.gmra.mxu1 %v28653_v25 }
0x17da   :  { %25689 = vmatpush3.msra.mxu1 %v28540_v27  ;;  %25700 = vmatprep.mubr.f32.mxu1 %v11314_v52  ;;  %v11316_v60 = vand.u32 4294901760, %v11315_v5  ;;  %v11334_v30 = vand.u32 4294901760, %v11333_v0  ;;  %v11345_v18 = vsub.f32 %v28659_v40, %v11344_v14 }
0x17db   :  { %25690 = vmatprep.subr.mxu1 %v28555_v39 }
0x17dc   :  { %25691 = vmatpush3.msra.mxu1 %v28555_v39  ;;  %25634 = vmatprep.mubr.f32.mxu0 %v11316_v60  ;;  %v11335_v29 = vsub.f32 %v11333_v0, %v11334_v30  ;;  %v11346_v38 = vand.u32 4294901760, %v11345_v18 }
0x17dd   :  { %25692 = vmatprep.subr.mxu1 %v28571_v45  ;;  %25635 = vmatmul.mubr.f32.vlgmr.msra.gmra.mxu0 %v11326_v12 }
0x17de   :  { %25663 = vmatpush3.msra.mxu0 %v28525_v44  ;;  %25693 = vmatpush3.msra.mxu1 %v28571_v45  ;;  %v11336_v2 = vand.u32 4294901760, %v11335_v29 }
0x17df   :  { %25664 = vmatprep.subr.mxu0 %v28538_v41  ;;  %25694 = vmatprep.subr.mxu1 %v28582_v48 }
0x17e0   :  { %25665 = vmatpush3.msra.mxu0 %v28538_v41  ;;  %25695 = vmatpush3.msra.mxu1 %v28582_v48 }
0x17e1   :  { %25637 = vmatprep.mubr.f32.mxu0 %v11336_v2  ;;  %25666 = vmatprep.subr.mxu0 %v28553_v32 }
0x17e2   :  { %25696 = vmatprep.subr.mxu1 %v28596_v50  ;;  %25638 = vmatmul.mubr.f32.gmra.mxu0 %v11346_v38 }
0x17e3   :  { %25667 = vmatpush3.msra.mxu0 %v28553_v32  ;;  %25697 = vmatpush3.msra.mxu1 %v28596_v50 }
0x17e4   :  { %25668 = vmatprep.subr.mxu0 %v28568_v34  ;;  %25678 = vmatprep.mubr.f32.mxu0 %v11313_v46 }
0x17e5   :  { %25698 = vmatprep.subr.mxu1 %v28612_v37  ;;  %25669 = vmatpush3.msra.mxu0 %v28568_v34 }
0x17e6   :  { %25699 = vmatpush3.msra.mxu1 %v28612_v37  ;;  %25670 = vmatprep.subr.mxu0 %v28585_v57 }
0x17e7   :  { %25701 = vmatmul.mubr.f32.vlgmr.msra.gmra.mxu1 %v11324_v47  ;;  %25728 = vmatprep.subr.mxu1 %v28519_v36 }
0x17e8   :  { %25671 = vmatpush3.msra.mxu0 %v28585_v57  ;;  %25703 = vmatprep.mubr.f32.mxu1 %v11334_v30 }
0x17e9   :  { %25729 = vmatpush3.msra.mxu1 %v28519_v36  ;;  %25672 = vmatprep.subr.mxu0 %v28594_v62 }
0x17ea   :  { %25730 = vmatprep.subr.mxu1 %v28527_v56  ;;  %25673 = vmatpush3.msra.mxu0 %v28594_v62 }
0x17eb   :  { %25731 = vmatpush3.msra.mxu1 %v28527_v56  ;;  %25674 = vmatprep.subr.mxu0 %v28610_v49 }
0x17ec   :  { %25704 = vmatmul.mubr.f32.gmra.mxu1 %v11344_v14  ;;  %25732 = vmatprep.subr.mxu1 %v28540_v27 }
0x17ed   :  { %25675 = vmatpush3.msra.mxu0 %v28610_v49  ;;  %25733 = vmatpush3.msra.mxu1 %v28540_v27 }
0x17ee   :  { %25744 = vmatprep.mubr.f32.mxu1 %v28648_v51  ;;  %25676 = vmatprep.subr.mxu0 %v28624_v15 }
0x17ef   :  { %25734 = vmatprep.subr.mxu1 %v28555_v39  ;;  %25677 = vmatpush3.msra.mxu0 %v28624_v15 }
0x17f0   :  { %25735 = vmatpush3.msra.mxu1 %v28555_v39  ;;  %25679 = vmatmul.mubr.f32.vlgmr.msra.gmra.mxu0 %v28646_v17 }
0x17f1   :  { %25706 = vmatprep.subr.mxu0 %v28535_v59  ;;  %25736 = vmatprep.subr.mxu1 %v28571_v45 }
0x17f2   :  { %25681 = vmatprep.mubr.f32.mxu0 %v11333_v0  ;;  %25707 = vmatpush3.msra.mxu0 %v28535_v59 }
0x17f3   :  { %25737 = vmatpush3.msra.mxu1 %v28571_v45  ;;  %25708 = vmatprep.subr.mxu0 %v28550_v20 }
0x17f4   :  { %25738 = vmatprep.subr.mxu1 %v28582_v48  ;;  %25709 = vmatpush3.msra.mxu0 %v28550_v20 }
0x17f5   :  { %25739 = vmatpush3.msra.mxu1 %v28582_v48  ;;  %25682 = vmatmul.mubr.f32.gmra.mxu0 %v28659_v40 }
0x17f6   :  { %25710 = vmatprep.subr.mxu0 %v28565_v3  ;;  %25740 = vmatprep.subr.mxu1 %v28596_v50 }
0x17f7   :  { %25711 = vmatpush3.msra.mxu0 %v28565_v3  ;;  %25722 = vmatprep.mubr.f32.mxu0 %v28648_v51  ;;  %v23387_v3 = vld [vmem:[%s30370_s1 + $0xd3] ss:$0 sm:$0xff] }
0x17f8   :  { %25741 = vmatpush3.msra.mxu1 %v28596_v50  ;;  %25712 = vmatprep.subr.mxu0 %v28580_v11 }
0x17f9   :  { %25742 = vmatprep.subr.mxu1 %v28612_v37  ;;  %25713 = vmatpush3.msra.mxu0 %v28580_v11 }
0x17fa   :  { %25743 = vmatpush3.msra.mxu1 %v28612_v37  ;;  %25714 = vmatprep.subr.mxu0 %v28600_v33 }
0x17fb   :  { %25745 = vmatmul.mubr.f32.vlgmr.msra.gmra.mxu1 %v28642_v22  ;;  %25715 = vmatpush3.msra.mxu0 %v28600_v33 }
0x17fc   :  { %25747 = vmatprep.mubr.f32.mxu1 %v28661_v6  ;;  %25716 = vmatprep.subr.mxu0 %v28607_v43 }
0x17fd   :  { %25717 = vmatpush3.msra.mxu0 %v28607_v43 }
0x17fe   :  { %25718 = vmatprep.subr.mxu0 %v28621_v54 }
0x17ff   :  { %25748 = vmatmul.mubr.f32.gmra.mxu1 %v28653_v25  ;;  %25719 = vmatpush3.msra.mxu0 %v28621_v54 }
0x1800   :  { %25720 = vmatprep.subr.mxu0 %v28631_v61 }
0x1801   :  { %25721 = vmatpush3.msra.mxu0 %v28631_v61 }
0x1802   :  { %25723 = vmatmul.mubr.f32.vlgmr.msra.gmra.mxu0 %v28642_v22 }
0x1803   :  { %25725 = vmatprep.mubr.f32.mxu0 %v28661_v6 }
0x1806   :  { %25726 = vmatmul.mubr.f32.gmra.mxu0 %v28653_v25 }
0x1895   :  { %v25658_v36 = vpop.f32.mrf.mxu1 }
0x1897   :  { %v11459_v44 = vpop.f32.mrf.mxu1 }
0x1899   :  { %v25661_v59 = vpop.f32.mrf.mxu1 }
0x189b   :  { %v11471_v27 = vpop.f32.mrf.mxu1 }
0x189d   :  { %v25636_v56 = vpop.f32.mrf.mxu0 }
0x189e   :  { %v11329_v11 = vadd.f32 %v25636_v56, %v23387_v3 }
0x189f   :  { %v11318_v41 = vpop.f32.mrf.mxu0 }
0x18a0   :  { %v11319_v62 = vadd.f32 %v23387_v3, %v11318_v41  ;;  %v11466_v33 = vadd.f32 %v25658_v36, %v11329_v11 }
0x18a2   :  { %v25639_v20 = vpop.f32.mrf.mxu0  ;;  %v11460_v15 = vadd.f32 %v11459_v44, %v11319_v62  ;;  %v11990_v44 = vld [vmem:[%s30370_s1 + $0xf0] sm:$0xff] }
0x18a3   :  { %v11349_v50 = vadd.f32 %v25639_v20, %v23387_v3  ;;  %v28779_v56 = vand.u32 4294901760, %v11990_v44  ;;  %v11988_v20 = vld [vmem:[%s30370_s1 + $0xe0] sm:$0xff] }
0x18a4   :  { %v11338_v39 = vpop.f32.mrf.mxu0 }
0x18a5   :  { %v11339_v37 = vadd.f32 %v23387_v3, %v11338_v39  ;;  %v11478_v35 = vadd.f32 %v25661_v59, %v11349_v50  ;;  %v11989_v59 = vld [vmem:[%s30370_s1 + $0xe8] sm:$0xff]  ;;  %v28785_v41 = vsub.f32 %v11990_v44, %v28779_v56  ;;  %25750 = vmatprep.subr.mxu0 %v28779_v56  ;;  %v28800_v3 = vand.u32 4294901760, %v11988_v20 }
0x18a6   :  { %25751 = vmatpush3.msra.mxu0 %v28779_v56 }
0x18a7   :  { %v25702_v32 = vpop.f32.mrf.mxu1  ;;  %v11472_v42 = vadd.f32 %v11471_v27, %v11339_v37  ;;  %v28787_v27 = vand.u32 4294901760, %v11989_v59 }
0x18a9   :  { %v11667_v34 = vpop.f32.mrf.mxu1  ;;  %v28798_v39 = vsub.f32 %v11989_v59, %v28787_v27  ;;  %25752 = vmatprep.subr.mxu0 %v28787_v27 }
0x18aa   :  { %25753 = vmatpush3.msra.mxu0 %v28787_v27 }
0x18ab   :  { %v28810_v11 = vand.u32 4294901760, %v28798_v39  ;;  %25754 = vmatprep.subr.mxu0 %v28800_v3 }
0x18ac   :  { %v25705_v48 = vpop.f32.mrf.mxu1  ;;  %25755 = vmatpush3.msra.mxu0 %v28800_v3 }
0x18ad   :  { %v12152_v50 = vsub.f32 %v28798_v39, %v28810_v11 }
0x18ae   :  { %v11683_v43 = vpop.f32.mrf.mxu1 }
0x18b0   :  { %v25680_v45 = vpop.f32.mrf.mxu0 }
0x18b1   :  { %v11573_v54 = vadd.f32 %v25680_v45, %v11466_v33 }
0x18b2   :  { %v11565_v57 = vpop.f32.mrf.mxu0 }
0x18b3   :  { %v11566_v23 = vadd.f32 %v11565_v57, %v11460_v15  ;;  %v11676_v53 = vadd.f32 %v25702_v32, %v11573_v54  ;;  %v28795_v32 = vand.u32 4294901760, %v28785_v41 }
0x18b5   :  { %v25683_v49 = vpop.f32.mrf.mxu0  ;;  %v11668_v22 = vadd.f32 %v11667_v34, %v11566_v23  ;;  %v11987_v34 = vld [vmem:[%s30370_s1 + $0xd8] sm:$0xff]  ;;  %v12145_v45 = vsub.f32 %v28785_v41, %v28795_v32 }
0x18b6   :  { %v11587_v16 = vadd.f32 %v25683_v49, %v11478_v35  ;;  %v28815_v57 = vand.u32 4294901760, %v11987_v34  ;;  %v12153_v49 = vand.u32 4294901760, %v12152_v50 }
0x18b7   :  { %v11579_v19 = vpop.f32.mrf.mxu0  ;;  %v12146_v62 = vand.u32 4294901760, %v12145_v45 }
0x18b8   :  { %v11580_v58 = vadd.f32 %v11579_v19, %v11472_v42  ;;  %v11692_v17 = vadd.f32 %v25705_v48, %v11587_v16  ;;  %v28813_v48 = vsub.f32 %v11988_v20, %v28800_v3  ;;  %25756 = vmatprep.subr.mxu0 %v28815_v57 }
0x18b9   :  { %25757 = vmatpush3.msra.mxu0 %v28815_v57  ;;  %25764 = vmatprep.subr.mxu1 %v12146_v62 }
0x18ba   :  { %v11684_v25 = vadd.f32 %v11683_v43, %v11580_v58  ;;  %v28822_v33 = vand.u32 4294901760, %v28813_v48  ;;  %v28825_v43 = vsub.f32 %v11987_v34, %v28815_v57  ;;  %25778 = vmatprep.subr.mxu0 %v28785_v41  ;;  %25765 = vmatpush3.msra.mxu1 %v12146_v62 }
0x18bb   :  { %v25746_v61 = vpop.f32.mrf.mxu1  ;;  %25766 = vmatprep.subr.mxu1 %v12153_v49 }
0x18bc   :  { %v12159_v37 = vsub.f32 %v28813_v48, %v28822_v33  ;;  %v28832_v54 = vand.u32 4294901760, %v28825_v43  ;;  %25767 = vmatpush3.msra.mxu1 %v12153_v49 }
0x18bd   :  { %v11883_v26 = vpop.f32.mrf.mxu1 }
0x18be   :  { %v12160_v15 = vand.u32 4294901760, %v12159_v37 }
0x18bf   :  { %v25749_v51 = vpop.f32.mrf.mxu1 }
0x18c0   :  { %25768 = vmatprep.subr.mxu1 %v12160_v15 }
0x18c1   :  { %v11895_v0 = vpop.f32.mrf.mxu1  ;;  %25769 = vmatpush3.msra.mxu1 %v12160_v15 }
0x18c2   :  { %v25724_v28 = vpop.f32.mrf.mxu0 }
0x18c3   :  { %v11793_v1 = vadd.f32 %v25724_v28, %v11676_v53 }
0x18c4   :  { %v11786_v7 = vpop.f32.mrf.mxu0 }
0x18c5   :  { %v11890_v8 = vadd.f32 %v25746_v61, %v11793_v1  ;;  %v11787_v4 = vadd.f32 %v11786_v7, %v11668_v22  ;;  %v12166_v61 = vsub.f32 %v28825_v43, %v28832_v54 }
0x18c6   :  { %v25727_v13 = vpop.f32.mrf.mxu0 }
0x18c7   :  { %v28745_v31 = vadd.f32 %v11890_v8, %v28446_v9  ;;  %v11884_v47 = vadd.f32 %v11883_v26, %v11787_v4  ;;  %v11805_v46 = vadd.f32 %v25727_v13, %v11692_v17  ;;  %v12167_v23 = vand.u32 4294901760, %v12166_v61 }
0x18c8   :  { %v11798_v10 = vpop.f32.mrf.mxu0 }
0x18c9   :  { %v28748_v40 = vadd.f32 %v11884_v47, %v28452_v63  ;;  %v11902_v6 = vadd.f32 %v25749_v51, %v11805_v46  ;;  %v11799_v52 = vadd.f32 %v11798_v10, %v11684_v25  ;;  %v11914_v55 = vsel %vm632_vm1, %v28745_v31, 0.0  ;;  %25770 = vmatprep.subr.mxu1 %v12167_v23 }
0x18ca   :  { %11915 = vadd.xlane.f32.xlu0 %v11914_v55  ;;  %v11928_v5 = vmul.f32 %v28745_v31, %v28745_v31  ;;  %25771 = vmatpush3.msra.mxu1 %v12167_v23 }
0x18cb   :  { %v11896_v14 = vadd.f32 %v11895_v0, %v11799_v52  ;;  %v11911_v9 = vsel %vm632_vm1, %v28748_v40, 0.0  ;;  %v11927_v60 = vmul.f32 %v28748_v40, %v28748_v40  ;;  %v28759_v63 = vadd.f32 %v11902_v6, %v28476_v24  ;;  %25792 = vmatprep.subr.mxu1 %v28779_v56 }
0x18cc   :  { %11912 = vadd.xlane.f32.xlu1 %v11911_v9  ;;  %v11934_v30 = vsel %vm632_vm1, %v11928_v5, 0.0 }
0x18cd   :  { %v28763_v12 = vadd.f32 %v11896_v14, %v28457_v21  ;;  %v11931_v29 = vsel %vm632_vm1, %v11927_v60, 0.0  ;;  %v11920_v18 = vsel %vm632_vm1, %v28759_v63, 0.0  ;;  %v11930_v2 = vmul.f32 %v28759_v63, %v28759_v63 }
0x18ce   :  { %11935 = vadd.xlane.f32.xlu0 %v11934_v30 }
0x18cf   :  { %v11917_v24 = vsel %vm632_vm1, %v28763_v12, 0.0  ;;  %v11929_v38 = vmul.f32 %v28763_v12, %v28763_v12  ;;  %v11940_v21 = vsel %vm632_vm1, %v11930_v2, 0.0 }
0x18d0   :  { %11932 = vadd.xlane.f32.xlu1 %v11931_v29 }
0x18d1   :  { %v11937_v36 = vsel %vm632_vm1, %v11929_v38, 0.0 }
0x18d2   :  { %11921 = vadd.xlane.f32.xlu0 %v11920_v18  ;;  %v23388_v18 = vld [vmem:[%s30370_s1 + $0xd6] ss:$0 sm:$0xff] }
0x18d4   :  { %11918 = vadd.xlane.f32.xlu1 %v11917_v24 }
0x18d6   :  { %11941 = vadd.xlane.f32.xlu0 %v11940_v21  ;;  %v23389_v21 = vld [vmem:[%s30370_s1 + $0xd7] ss:$0 sm:$0xff] }
0x18d8   :  { %11938 = vadd.xlane.f32.xlu1 %v11937_v36 }
0x1953   :  { %v11916_v35 = vpop.xlane.xlu0 %11915 }
0x1954   :  { %v11924_v19 = vmul.f32 0.03125, %v11916_v35 }
0x1955   :  { %v11913_v16 = vpop.xlane.xlu1 %11912 }
0x1956   :  { %v11923_v42 = vmul.f32 0.03125, %v11913_v16  ;;  %v11948_v26 = vmul.f32 %v11924_v19, %v11924_v19  ;;  %v11956_v30 = vsub.f32 %v28745_v31, %v11924_v19 }
0x1957   :  { %v11936_v53 = vpop.xlane.xlu0 %11935 }
0x1958   :  { %v11944_v28 = vmul.f32 0.03125, %v11936_v53  ;;  %v11947_v1 = vmul.f32 %v11923_v42, %v11923_v42  ;;  %v11955_v2 = vsub.f32 %v28748_v40, %v11923_v42 }
0x1959   :  { %v11933_v58 = vpop.xlane.xlu1 %11932 }
0x195a   :  { %v11952_v22 = vsub.f32 %v11944_v28, %v11948_v26  ;;  %v11943_v7 = vmul.f32 0.03125, %v11933_v58 }
0x195b   :  { %v11922_v8 = vpop.xlane.xlu0 %11921 }
0x195c   :  { %v11960_v4 = vadd.f32 1e-05, %v11952_v22  ;;  %v11951_v17 = vsub.f32 %v11943_v7, %v11947_v1  ;;  %v11926_v51 = vmul.f32 0.03125, %v11922_v8 }
0x195d   :  { %v11919_v13 = vpop.xlane.xlu1 %11918 }
0x195e   :  { %26893 = vrsqrt.f32 %v11960_v4  ;;  %v11959_v47 = vadd.f32 1e-05, %v11951_v17  ;;  %v11925_v46 = vmul.f32 0.03125, %v11919_v13  ;;  %v11950_v10 = vmul.f32 %v11926_v51, %v11926_v51 }
0x195f   :  { %v11942_v25 = vpop.xlane.xlu0 %11941  ;;  %v11958_v31 = vsub.f32 %v28759_v63, %v11926_v51 }
0x1960   :  { %26895 = vrsqrt.f32 %v11959_v47  ;;  %v11946_v6 = vmul.f32 0.03125, %v11942_v25  ;;  %v11949_v55 = vmul.f32 %v11925_v46, %v11925_v46  ;;  %v11957_v50 = vsub.f32 %v28763_v12, %v11925_v46 }
0x1961   :  { %v11939_v52 = vpop.xlane.xlu1 %11938 }
0x1962   :  { %v11954_v0 = vsub.f32 %v11946_v6, %v11950_v10  ;;  %v11945_v5 = vmul.f32 0.03125, %v11939_v52 }
0x1964   :  { %v11962_v14 = vadd.f32 1e-05, %v11954_v0  ;;  %v11953_v9 = vsub.f32 %v11945_v5, %v11949_v55 }
0x1966   :  { %26897 = vrsqrt.f32 %v11962_v14  ;;  %v11961_v60 = vadd.f32 1e-05, %v11953_v9 }
0x1968   :  { %26899 = vrsqrt.f32 %v11961_v60 }
0x196b   :  { %v26894_v29 = vpop.eup %26893 }
0x196c   :  { %v11968_v24 = vmul.f32 %v26894_v29, %v11956_v30 }
0x196d   :  { %v26896_v38 = vpop.eup %26895 }
0x196e   :  { %v11967_v36 = vmul.f32 %v26896_v38, %v11955_v2  ;;  %v11976_v44 = vmul.f32 %v23388_v18, %v11968_v24 }
0x1970   :  { %v11975_v59 = vmul.f32 %v23388_v18, %v11967_v36  ;;  %v28846_v20 = vadd.f32 %v23389_v21, %v11976_v44 }
0x1972   :  { %v28849_v34 = vadd.f32 %v23389_v21, %v11975_v59  ;;  %v12000_v45 = vsel %vm632_vm1, %v28846_v20, 0 }
0x1973   :  { %v26898_v62 = vpop.eup %26897  ;;  %v28853_v40 = vand.u32 4294901760, %v12000_v45 }
0x1974   :  { %v11997_v49 = vsel %vm632_vm1, %v28849_v34, 0  ;;  %v11970_v37 = vmul.f32 %v26898_v62, %v11958_v31 }
0x1975   :  { %v26900_v15 = vpop.eup %26899  ;;  %v28858_v61 = vand.u32 4294901760, %v11997_v49  ;;  %v12088_v23 = vsub.f32 %v12000_v45, %v28853_v40 }
0x1976   :  { %v11969_v63 = vmul.f32 %v26900_v15, %v11957_v50  ;;  %v11978_v35 = vmul.f32 %v23388_v18, %v11970_v37 }
0x1977   :  { %25772 = vmatprep.mubr.f32.mxu1 %v28858_v61  ;;  %v12078_v19 = vsub.f32 %v11997_v49, %v28858_v61  ;;  %v12089_v16 = vand.u32 4294901760, %v12088_v23 }
0x1978   :  { %25773 = vmatmul.mubr.f32.vlgmr.msra.gmra.mxu1 %v28853_v40  ;;  %v11977_v42 = vmul.f32 %v23388_v18, %v11969_v63  ;;  %v28864_v12 = vadd.f32 %v23389_v21, %v11978_v35 }
0x1979   :  { %25793 = vmatpush3.msra.mxu1 %v28779_v56  ;;  %v12079_v53 = vand.u32 4294901760, %v12078_v19  ;;  %v12090_v28 = vsub.f32 %v12088_v23, %v12089_v16 }
0x197a   :  { %25794 = vmatprep.subr.mxu1 %v28787_v27  ;;  %v28868_v26 = vadd.f32 %v23389_v21, %v11977_v42  ;;  %v12006_v58 = vsel %vm632_vm1, %v28864_v12, 0 }
0x197b   :  { %v12080_v1 = vsub.f32 %v12078_v19, %v12079_v53  ;;  %25795 = vmatpush3.msra.mxu1 %v28787_v27  ;;  %v12107_v22 = vand.u32 4294901760, %v12006_v58  ;;  %v12091_v51 = vand.u32 4294901760, %v12090_v28 }
0x197c   :  { %v12003_v7 = vsel %vm632_vm1, %v28868_v26, 0  ;;  %25796 = vmatprep.subr.mxu1 %v28800_v3 }
0x197d   :  { %v12081_v8 = vand.u32 4294901760, %v12080_v1  ;;  %v12097_v4 = vand.u32 4294901760, %v12003_v7  ;;  %v12108_v17 = vsub.f32 %v12006_v58, %v12107_v22  ;;  %25797 = vmatpush3.msra.mxu1 %v28800_v3 }
0x197e   :  { %25798 = vmatprep.subr.mxu1 %v28815_v57 }
0x197f   :  { %25758 = vmatprep.mubr.f32.mxu0 %v12081_v8  ;;  %25775 = vmatprep.mubr.f32.mxu1 %v12097_v4  ;;  %v12098_v13 = vsub.f32 %v12003_v7, %v12097_v4  ;;  %v12109_v47 = vand.u32 4294901760, %v12108_v17 }
0x1980   :  { %25759 = vmatmul.mubr.f32.vlgmr.msra.gmra.mxu0 %v12091_v51  ;;  %25776 = vmatmul.mubr.f32.gmra.mxu1 %v12107_v22 }
0x1981   :  { %25800 = vmatprep.mubr.f32.mxu1 %v12079_v53  ;;  %25799 = vmatpush3.msra.mxu1 %v28815_v57  ;;  %v12099_v46 = vand.u32 4294901760, %v12098_v13  ;;  %v12110_v25 = vsub.f32 %v12108_v17, %v12109_v47 }
0x1982   :  { %25820 = vmatprep.subr.mxu1 %v28779_v56  ;;  %25779 = vmatpush3.msra.mxu0 %v28785_v41 }
0x1983   :  { %25780 = vmatprep.subr.mxu0 %v28798_v39  ;;  %v12100_v10 = vsub.f32 %v12098_v13, %v12099_v46  ;;  %v12111_v52 = vand.u32 4294901760, %v12110_v25 }
0x1984   :  { %25801 = vmatmul.mubr.f32.vlgmr.msra.gmra.mxu1 %v12089_v16  ;;  %25781 = vmatpush3.msra.mxu0 %v28798_v39 }
0x1985   :  { %25803 = vmatprep.mubr.f32.mxu1 %v12099_v46  ;;  %25821 = vmatpush3.msra.mxu1 %v28779_v56  ;;  %v12101_v6 = vand.u32 4294901760, %v12100_v10 }
0x1986   :  { %25822 = vmatprep.subr.mxu1 %v28787_v27  ;;  %25782 = vmatprep.subr.mxu0 %v28813_v48 }
0x1987   :  { %25761 = vmatprep.mubr.f32.mxu0 %v12101_v6  ;;  %25823 = vmatpush3.msra.mxu1 %v28787_v27 }
0x1988   :  { %25762 = vmatmul.mubr.f32.gmra.mxu0 %v12111_v52  ;;  %25804 = vmatmul.mubr.f32.gmra.mxu1 %v12109_v47 }
0x1989   :  { %25824 = vmatprep.subr.mxu1 %v28800_v3  ;;  %25783 = vmatpush3.msra.mxu0 %v28813_v48 }
0x198a   :  { %25786 = vmatprep.mubr.f32.mxu0 %v12078_v19  ;;  %25825 = vmatpush3.msra.mxu1 %v28800_v3 }
0x198b   :  { %25828 = vmatprep.mubr.f32.mxu1 %v28858_v61  ;;  %25784 = vmatprep.subr.mxu0 %v28825_v43 }
0x198c   :  { %25826 = vmatprep.subr.mxu1 %v28815_v57  ;;  %25785 = vmatpush3.msra.mxu0 %v28825_v43 }
0x198d   :  { %25827 = vmatpush3.msra.mxu1 %v28815_v57  ;;  %25787 = vmatmul.mubr.f32.vlgmr.msra.gmra.mxu0 %v12088_v23  ;;  %v23390_v57 = vld [vmem:[%s30370_s1 + $0x178] ss:$0 sm:$0xff] }
0x198e   :  { %25806 = vmatprep.subr.mxu0 %v28795_v32  ;;  %25829 = vmatmul.mubr.f32.vlgmr.msra.gmra.mxu1 %v28853_v40 }
0x198f   :  { %25789 = vmatprep.mubr.f32.mxu0 %v12098_v13  ;;  %25807 = vmatpush3.msra.mxu0 %v28795_v32 }
0x1990   :  { %25831 = vmatprep.mubr.f32.mxu1 %v12097_v4  ;;  %25808 = vmatprep.subr.mxu0 %v28810_v11 }
0x1991   :  { %25809 = vmatpush3.msra.mxu0 %v28810_v11 }
0x1992   :  { %25790 = vmatmul.mubr.f32.gmra.mxu0 %v12108_v17  ;;  %25810 = vmatprep.subr.mxu0 %v28822_v33 }
0x1993   :  { %25832 = vmatmul.mubr.f32.gmra.mxu1 %v12107_v22  ;;  %25811 = vmatpush3.msra.mxu0 %v28822_v33 }
0x1994   :  { %25814 = vmatprep.mubr.f32.mxu0 %v28858_v61  ;;  %25812 = vmatprep.subr.mxu0 %v28832_v54 }
0x1995   :  { %25813 = vmatpush3.msra.mxu0 %v28832_v54 }
0x1996   :  { %25815 = vmatmul.mubr.f32.vlgmr.msra.gmra.mxu0 %v28853_v40 }
0x1997   :  { %25817 = vmatprep.mubr.f32.mxu0 %v12097_v4 }
0x199a   :  { %25818 = vmatmul.mubr.f32.gmra.mxu0 %v12107_v22 }
0x1a38   :  { %v25774_v56 = vpop.f32.mrf.mxu1 }
0x1a3a   :  { %v12204_v41 = vpop.f32.mrf.mxu1 }
0x1a40   :  { %v25777_v27 = vpop.f32.mrf.mxu1  ;;  %v25760_v32 = vpop.f32.mrf.mxu0 }
0x1a41   :  { %v12094_v54 = vadd.f32 %v25760_v32, %v23390_v57 }
0x1a42   :  { %v12216_v39 = vpop.f32.mrf.mxu1  ;;  %v12083_v11 = vpop.f32.mrf.mxu0 }
0x1a43   :  { %v12084_v0 = vadd.f32 %v23390_v57, %v12083_v11  ;;  %v12211_v60 = vadd.f32 %v25774_v56, %v12094_v54 }
0x1a44   :  { %v25802_v3 = vpop.f32.mrf.mxu1 }
0x1a45   :  { %v12205_v2 = vadd.f32 %v12204_v41, %v12084_v0 }
0x1a46   :  { %v12400_v48 = vpop.f32.mrf.mxu1 }
0x1a48   :  { %v25763_v33 = vpop.f32.mrf.mxu0  ;;  %v25805_v43 = vpop.f32.mrf.mxu1 }
0x1a49   :  { %v12114_v9 = vadd.f32 %v25763_v33, %v23390_v57 }
0x1a4a   :  { %v12103_v55 = vpop.f32.mrf.mxu0  ;;  %v12416_v14 = vpop.f32.mrf.mxu1 }
0x1a4b   :  { %v12104_v29 = vadd.f32 %v23390_v57, %v12103_v55  ;;  %v12223_v36 = vadd.f32 %v25777_v27, %v12114_v9 }
0x1a4d   :  { %v25788_v5 = vpop.f32.mrf.mxu0  ;;  %v12217_v31 = vadd.f32 %v12216_v39, %v12104_v29 }
0x1a4e   :  { %v12310_v18 = vadd.f32 %v25788_v5, %v12211_v60  ;;  %v25830_v24 = vpop.f32.mrf.mxu1 }
0x1a4f   :  { %v12302_v30 = vpop.f32.mrf.mxu0 }
0x1a50   :  { %v12303_v21 = vadd.f32 %v12302_v30, %v12205_v2  ;;  %v12409_v45 = vadd.f32 %v25802_v3, %v12310_v18  ;;  %v12600_v62 = vpop.f32.mrf.mxu1 }
0x1a52   :  { %v25791_v38 = vpop.f32.mrf.mxu0  ;;  %v12401_v37 = vadd.f32 %v12400_v48, %v12303_v21 }
0x1a53   :  { %v12324_v59 = vadd.f32 %v25791_v38, %v12223_v36  ;;  %v25833_v35 = vpop.f32.mrf.mxu1 }
0x1a54   :  { %v12316_v44 = vpop.f32.mrf.mxu0 }
0x1a55   :  { %v12317_v50 = vadd.f32 %v12316_v44, %v12217_v31  ;;  %v12425_v63 = vadd.f32 %v25805_v43, %v12324_v59  ;;  %v12612_v22 = vpop.f32.mrf.mxu1 }
0x1a56   :  { %v25816_v40 = vpop.f32.mrf.mxu0 }
0x1a57   :  { %v12514_v49 = vadd.f32 %v25816_v40, %v12409_v45  ;;  %v12417_v53 = vadd.f32 %v12416_v14, %v12317_v50 }
0x1a58   :  { %v12507_v15 = vpop.f32.mrf.mxu0 }
0x1a59   :  { %v12607_v61 = vadd.f32 %v25830_v24, %v12514_v49  ;;  %v12508_v23 = vadd.f32 %v12507_v15, %v12401_v37 }
0x1a5a   :  { %v25819_v19 = vpop.f32.mrf.mxu0 }
0x1a5b   :  { %12623 = vst.msk [vmem:[#allocation2 + $0x8] sm:$0xff] %vm1259_vm2, %v12607_v61  ;;  %v12601_v16 = vadd.f32 %v12600_v62, %v12508_v23  ;;  %v12526_v42 = vadd.f32 %v25819_v19, %v12425_v63 }
0x1a5c   :  { %v12519_v28 = vpop.f32.mrf.mxu0 }
0x1a5d   :  { %12622 = vst.msk [vmem:[#allocation2] sm:$0xff] %vm1259_vm2, %v12601_v16  ;;  %v12619_v58 = vadd.f32 %v25833_v35, %v12526_v42  ;;  %v12520_v1 = vadd.f32 %v12519_v28, %v12417_v53 }
0x1a5f   :  { %12625 = vst.msk [vmem:[#allocation2 + $0x18] sm:$0xff] %vm1259_vm2, %v12619_v58  ;;  %v12613_v7 = vadd.f32 %v12612_v22, %v12520_v1 }
0x1a61   :  { %12624 = vst.msk [vmem:[#allocation2 + $0x10] sm:$0xff] %vm1259_vm2, %v12613_v7 }
0x1a62   :  { %v28913_v8 = vld [vmem:[#allocation2 + $0x8] sm:$0xff] }
0x1a63   :  { %12632 = vrot.lane.b32.xlu1 %v28913_v8, %s27011_s10  ;;  %v12636_v10 = vsel %vm1272_vm3, %v28913_v8, 0 }
0x1a64   :  { %v28917_v4 = vld [vmem:[#allocation2] sm:$0xff]  ;;  %v12719_v6 = vand.u32 4294901760, %v12636_v10 }
0x1a65   :  { %12630 = vrot.lane.b32.xlu0 %v28917_v4, %s27011_s10  ;;  %v12634_v17 = vsel %vm1272_vm3, %v28917_v4, 0 }
0x1a66   :  { %v12709_v51 = vand.u32 4294901760, %v12634_v17  ;;  %v12720_v52 = vsub.f32 %v12636_v10, %v12719_v6 }
0x1a68   :  { %v12710_v13 = vsub.f32 %v12634_v17, %v12709_v51  ;;  %25845 = vmatprep.mubr.f32.mxu1 %v12709_v51  ;;  %v12721_v27 = vand.u32 4294901760, %v12720_v52 }
0x1a6a   :  { %v12711_v47 = vand.u32 4294901760, %v12710_v13  ;;  %v12722_v57 = vsub.f32 %v12720_v52, %v12721_v27 }
0x1a6c   :  { %v12712_v46 = vsub.f32 %v12710_v13, %v12711_v47  ;;  %v12723_v0 = vand.u32 4294901760, %v12722_v57 }
0x1a6e   :  { %v12713_v25 = vand.u32 4294901760, %v12712_v46 }
0x1a70   :  { %25838 = vmatprep.mubr.f32.mxu0 %v12713_v25 }
0x1ad5   :  { %v12633_v56 = vpop.permute.xlu1 %12632 }
0x1ad6   :  { %v12640_v41 = vsel %vm1272_vm3, %v12633_v56, 0 }
0x1ad7   :  { %v12671_v32 = vand.u32 4294901760, %v12640_v41  ;;  %v12631_v39 = vpop.permute.xlu0 %12630 }
0x1ad8   :  { %v12638_v3 = vsel %vm1272_vm3, %v12631_v39, 0 }
0x1ad9   :  { %v12759_v11 = vsub.f32 %v12640_v41, %v12671_v32  ;;  %v12674_v48 = vand.u32 4294901760, %v12638_v3  ;;  %25834 = vmatprep.subr.mxu0 %v12671_v32 }
0x1ada   :  { %25835 = vmatpush3.xpose.msra.mxu0 %v12671_v32 }
0x1adb   :  { %v12766_v33 = vsub.f32 %v12638_v3, %v12674_v48  ;;  %25836 = vmatprep.subr.mxu0 %v12674_v48  ;;  %v12760_v43 = vand.u32 4294901760, %v12759_v11 }
0x1add   :  { %v12761_v55 = vsub.f32 %v12759_v11, %v12760_v43  ;;  %v12767_v54 = vand.u32 4294901760, %v12766_v33 }
0x1ade   :  { %25837 = vmatpush3.xpose.msra.mxu0 %v12674_v48 }
0x1adf   :  { %25848 = vmatprep.subr.mxu0 %v12759_v11  ;;  %v12762_v5 = vand.u32 4294901760, %v12761_v55  ;;  %v12768_v14 = vsub.f32 %v12766_v33, %v12767_v54 }
0x1ae1   :  { %25839 = vmatmul.mubr.f32.vlgmr.msra.gmra.mxu0 %v12723_v0  ;;  %25841 = vmatprep.subr.mxu1 %v12762_v5  ;;  %v12769_v9 = vand.u32 4294901760, %v12768_v14 }
0x1ae2   :  { %25842 = vmatpush3.xpose.msra.mxu1 %v12762_v5  ;;  %25849 = vmatpush3.xpose.msra.mxu0 %v12759_v11 }
0x1ae3   :  { %25852 = vmatprep.mubr.f32.mxu0 %v12710_v13  ;;  %25843 = vmatprep.subr.mxu1 %v12769_v9 }
0x1ae4   :  { %25850 = vmatprep.subr.mxu0 %v12766_v33 }
0x1ae6   :  { %25844 = vmatpush3.xpose.msra.mxu1 %v12769_v9  ;;  %25851 = vmatpush3.xpose.msra.mxu0 %v12766_v33 }
0x1ae7   :  { %25855 = vmatprep.subr.mxu1 %v12671_v32  ;;  %25862 = vmatprep.subr.mxu0 %v12760_v43 }
0x1ae9   :  { %25846 = vmatmul.mubr.f32.vlgmr.msra.gmra.mxu1 %v12719_v6  ;;  %25853 = vmatmul.mubr.f32.vlgmr.msra.gmra.mxu0 %v12720_v52 }
0x1aea   :  { %25856 = vmatpush3.xpose.msra.mxu1 %v12671_v32  ;;  %25859 = vmatprep.mubr.f32.mxu1 %v12711_v47 }
0x1aeb   :  { %25863 = vmatpush3.xpose.msra.mxu0 %v12760_v43  ;;  %25866 = vmatprep.mubr.f32.mxu0 %v12709_v51 }
0x1aec   :  { %25857 = vmatprep.subr.mxu1 %v12674_v48  ;;  %25864 = vmatprep.subr.mxu0 %v12767_v54 }
0x1aee   :  { %25858 = vmatpush3.xpose.msra.mxu1 %v12674_v48 }
0x1aef   :  { %25865 = vmatpush3.xpose.msra.mxu0 %v12767_v54  ;;  %25869 = vmatprep.subr.mxu1 %v12671_v32 }
0x1af1   :  { %25860 = vmatmul.mubr.f32.vlgmr.msra.gmra.mxu1 %v12721_v27 }
0x1af2   :  { %25867 = vmatmul.mubr.f32.vlgmr.msra.gmra.mxu0 %v12719_v6  ;;  %25870 = vmatpush3.xpose.msra.mxu1 %v12671_v32 }
0x1af3   :  { %25873 = vmatprep.mubr.f32.mxu1 %v12709_v51  ;;  %25871 = vmatprep.subr.mxu1 %v12674_v48 }
0x1af6   :  { %25872 = vmatpush3.xpose.msra.mxu1 %v12674_v48 }
0x1af9   :  { %25874 = vmatmul.mubr.f32.vlgmr.msra.gmra.mxu1 %v12719_v6 }
0x1ba1   :  { %v25840_v60 = vpop.f32.mrf.mxu0 }
0x1ba3   :  { %v12715_v29 = vpop.f32.mrf.mxu0 }
0x1ba9   :  { %v25847_v30 = vpop.f32.mrf.mxu1  ;;  %v25854_v24 = vpop.f32.mrf.mxu0 }
0x1baa   :  { %v12813_v2 = vadd.f32 %v25847_v30, %v25840_v60 }
0x1bab   :  { %v12806_v18 = vpop.f32.mrf.mxu1  ;;  %v12888_v44 = vpop.f32.mrf.mxu0 }
0x1bac   :  { %v12807_v38 = vadd.f32 %v12806_v18, %v12715_v29  ;;  %v12896_v36 = vadd.f32 %v25854_v24, %v12813_v2 }
0x1bae   :  { %v12889_v31 = vadd.f32 %v12888_v44, %v12807_v38 }
0x1bb1   :  { %v25861_v21 = vpop.f32.mrf.mxu1 }
0x1bb2   :  { %v12979_v45 = vadd.f32 %v25861_v21, %v12896_v36  ;;  %v25868_v62 = vpop.f32.mrf.mxu0 }
0x1bb3   :  { %v12970_v59 = vpop.f32.mrf.mxu1 }
0x1bb4   :  { %v12971_v40 = vadd.f32 %v12970_v59, %v12889_v31  ;;  %v13062_v50 = vadd.f32 %v25868_v62, %v12979_v45  ;;  %v13055_v49 = vpop.f32.mrf.mxu0 }
0x1bb6   :  { %v13056_v15 = vadd.f32 %v13055_v49, %v12971_v40 }
0x1bb9   :  { %v25875_v37 = vpop.f32.mrf.mxu1 }
0x1bba   :  { %v13141_v61 = vadd.f32 %v25875_v37, %v13062_v50 }
0x1bbb   :  { %v13134_v23 = vpop.f32.mrf.mxu1 }
0x1bbc   :  { %v13145_v63 = vmul.f32 0.35355338, %v13141_v61  ;;  %v13135_v35 = vadd.f32 %v13134_v23, %v13056_v15 }
0x1bbe   :  { %v13144_v19 = vmul.f32 0.35355338, %v13135_v35  ;;  %v13149_v16 = vsel %vm22_vm0, %v13145_v63, -inf }
0x1bbf   :  { %13150 = vmax.xlane.f32.xlu0 %v13149_v16 }
0x1bc0   :  { %v13146_v42 = vsel %vm22_vm0, %v13144_v19, -inf }
0x1bc1   :  { %13147 = vmax.xlane.f32.xlu1 %v13146_v42 }
0x1c48   :  { %v13151_v53 = vpop.xlane.xlu0 %13150 }
0x1c49   :  { %v13153_v28 = vsub.f32 %v13145_v63, %v13151_v53 }
0x1c4a   :  { %v13148_v58 = vpop.xlane.xlu1 %13147 }
0x1c4b   :  { %v13156_v1 = vmul.f32 1.442695, %v13153_v28  ;;  %v13152_v22 = vsub.f32 %v13144_v19, %v13148_v58 }
0x1c4d   :  { %26901 = vpow2.f32 %v13156_v1  ;;  %v13154_v7 = vmul.f32 1.442695, %v13152_v22 }
0x1c4f   :  { %26903 = vpow2.f32 %v13154_v7 }
0x1c5a   :  { %v26902_v17 = vpop.eup %26901 }
0x1c5b   :  { %v13161_v51 = vsel %vm22_vm0, %v26902_v17, 0.0 }
0x1c5c   :  { %v26904_v13 = vpop.eup %26903  ;;  %13162 = vadd.xlane.f32.xlu0 %v13161_v51 }
0x1c5d   :  { %v13158_v47 = vsel %vm22_vm0, %v26904_v13, 0.0 }
0x1c5e   :  { %13159 = vadd.xlane.f32.xlu1 %v13158_v47 }
0x1c6f   :  { %13176 = vrot.lane.b32.xlu1 %v28913_v8, %s27012_s11 }
0x1c72   :  { %13174 = vrot.lane.b32.xlu0 %v28917_v4, %s27012_s11 }
0x1c73   :  { %13700 = vrot.lane.b32.xlu1 %v28913_v8, %s27014_s13 }
0x1c76   :  { %13694 = vrot.lane.b32.xlu0 %v28917_v4, %s27013_s12 }
0x1c77   :  { %13698 = vrot.lane.b32.xlu1 %v28917_v4, %s27014_s13 }
0x1c7b   :  { %13696 = vrot.lane.b32.xlu1 %v28913_v8, %s27013_s12 }
0x1ce5   :  { %v13163_v46 = vpop.xlane.xlu0 %13162 }
0x1ce6   :  { %26905 = vrcp.f32 %v13163_v46 }
0x1ce7   :  { %v13160_v25 = vpop.xlane.xlu1 %13159 }
0x1ce8   :  { %26907 = vrcp.f32 %v13160_v25 }
0x1ce9   :  { %v13175_v10 = vpop.permute.xlu0 %13174 }
0x1cea   :  { %v28943_v6 = vand.u32 4294901760, %v13175_v10 }
0x1ceb   :  { %v13177_v52 = vpop.permute.xlu1 %13176 }
0x1cec   :  { %v28946_v56 = vsub.f32 %v13175_v10, %v28943_v6  ;;  %v13215_v41 = vand.u32 4294901760, %v13177_v52 }
0x1ced   :  { %v13695_v31 = vpop.permute.xlu0 %13694 }
0x1cee   :  { %v28948_v27 = vsub.f32 %v13177_v52, %v13215_v41  ;;  %25876 = vmatprep.subr.mxu0 %v13215_v41  ;;  %v28951_v32 = vand.u32 4294901760, %v28946_v56  ;;  %v13702_v37 = vsel %vm1272_vm3, %v13695_v31, 0 }
0x1cef   :  { %25877 = vmatpush3.msra.mxu0 %v13215_v41  ;;  %v13701_v39 = vpop.permute.xlu1 %13700  ;;  %v28984_v35 = vand.u32 4294901760, %v13702_v37 }
0x1cf0   :  { %25878 = vmatprep.subr.mxu0 %v28943_v6  ;;  %v28955_v3 = vand.u32 4294901760, %v28948_v27  ;;  %v13312_v48 = vsub.f32 %v28946_v56, %v28951_v32  ;;  %v13708_v54 = vsel %vm1272_vm3, %v13701_v39, 0 }
0x1cf1   :  { %25879 = vmatpush3.msra.mxu0 %v28943_v6  ;;  %v28964_v29 = vand.u32 4294901760, %v13708_v54  ;;  %v13778_v22 = vsub.f32 %v13702_v37, %v28984_v35 }
0x1cf2   :  { %25890 = vmatprep.subr.mxu0 %v28948_v27  ;;  %v13305_v11 = vsub.f32 %v28948_v27, %v28955_v3  ;;  %v13313_v9 = vand.u32 4294901760, %v13312_v48 }
0x1cf3   :  { %v26906_v57 = vpop.eup %26905  ;;  %v13699_v0 = vpop.permute.xlu1 %13698  ;;  %v28971_v44 = vsub.f32 %v13708_v54, %v28964_v29  ;;  %v13779_v47 = vand.u32 4294901760, %v13778_v22 }
0x1cf4   :  { %v13167_v33 = vmul.f32 %v26906_v57, %v13163_v46  ;;  %v13306_v43 = vand.u32 4294901760, %v13305_v11  ;;  %v13706_v18 = vsel %vm1272_vm3, %v13699_v0, 0 }
0x1cf5   :  { %v26908_v55 = vpop.eup %26907  ;;  %v28967_v38 = vand.u32 4294901760, %v13706_v18  ;;  %v28978_v49 = vand.u32 4294901760, %v28971_v44 }
0x1cf6   :  { %v13169_v5 = vsub.f32 2.0, %v13167_v33  ;;  %v13166_v14 = vmul.f32 %v26908_v55, %v13160_v25  ;;  %25883 = vmatprep.subr.mxu1 %v13306_v43  ;;  %v13780_v25 = vsub.f32 %v13778_v22, %v13779_v47 }
0x1cf7   :  { %25884 = vmatpush3.msra.mxu1 %v13306_v43  ;;  %v28975_v40 = vsub.f32 %v13706_v18, %v28967_v38  ;;  %v13697_v19 = vpop.permute.xlu1 %13696  ;;  %v13829_v16 = vsub.f32 %v28971_v44, %v28978_v49 }
0x1cf8   :  { %v13171_v60 = vmul.f32 %v26906_v57, %v13169_v5  ;;  %v13168_v30 = vsub.f32 2.0, %v13166_v14  ;;  %25885 = vmatprep.subr.mxu1 %v13313_v9  ;;  %v13704_v28 = vsel %vm1272_vm3, %v13697_v19, 0 }
0x1cf9   :  { %25886 = vmatpush3.msra.mxu1 %v13313_v9  ;;  %v28982_v63 = vand.u32 4294901760, %v28975_v40  ;;  %v13830_v7 = vand.u32 4294901760, %v13829_v16  ;;  %v13787_v51 = vand.u32 4294901760, %v13704_v28 }
0x1cfa   :  { %v13173_v2 = vmul.f32 %v26902_v17, %v13171_v60  ;;  %v13170_v24 = vmul.f32 %v26908_v55, %v13168_v30  ;;  %25897 = vmatprep.subr.mxu1 %v13215_v41 }
0x1cfb   :  { %v13836_v1 = vsub.f32 %v28975_v40, %v28982_v63  ;;  %v13788_v46 = vsub.f32 %v13704_v28, %v13787_v51 }
0x1cfc   :  { %v13184_v21 = vsel %vm22_vm0, %v13173_v2, 0  ;;  %v13172_v36 = vmul.f32 %v26904_v13, %v13170_v24 }
0x1cfd   :  { %v13263_v59 = vand.u32 4294901760, %v13184_v21  ;;  %v13837_v13 = vand.u32 4294901760, %v13836_v1  ;;  %v13789_v10 = vand.u32 4294901760, %v13788_v46 }
0x1cfe   :  { %v13181_v45 = vsel %vm22_vm0, %v13172_v36, 0 }
0x1cff   :  { %v13264_v62 = vsub.f32 %v13184_v21, %v13263_v59  ;;  %v13253_v50 = vand.u32 4294901760, %v13181_v45  ;;  %v13790_v52 = vsub.f32 %v13788_v46, %v13789_v10 }
0x1d01   :  { %25887 = vmatprep.mubr.f32.mxu1 %v13253_v50  ;;  %v13254_v15 = vsub.f32 %v13181_v45, %v13253_v50  ;;  %v13265_v61 = vand.u32 4294901760, %v13264_v62 }
0x1d02   :  { %25888 = vmatmul.mubr.f32.vlgmr.msra.gmra.mxu1 %v13263_v59 }
0x1d03   :  { %25898 = vmatpush3.msra.mxu1 %v13215_v41  ;;  %v13255_v23 = vand.u32 4294901760, %v13254_v15  ;;  %v13266_v42 = vsub.f32 %v13264_v62, %v13265_v61 }
0x1d04   :  { %25899 = vmatprep.subr.mxu1 %v28943_v6 }
0x1d05   :  { %25900 = vmatpush3.msra.mxu1 %v28943_v6  ;;  %25901 = vmatprep.mubr.f32.mxu1 %v13255_v23  ;;  %v13256_v53 = vsub.f32 %v13254_v15, %v13255_v23  ;;  %v13267_v17 = vand.u32 4294901760, %v13266_v42 }
0x1d06   :  { %25911 = vmatprep.subr.mxu1 %v13215_v41  ;;  %25902 = vmatmul.mubr.f32.vlgmr.msra.gmra.mxu1 %v13265_v61 }
0x1d07   :  { %25912 = vmatpush3.msra.mxu1 %v13215_v41  ;;  %25915 = vmatprep.mubr.f32.mxu1 %v13253_v50  ;;  %v13257_v58 = vand.u32 4294901760, %v13256_v53 }
0x1d08   :  { %25913 = vmatprep.subr.mxu1 %v28943_v6 }
0x1d09   :  { %25914 = vmatpush3.msra.mxu1 %v28943_v6  ;;  %25880 = vmatprep.mubr.f32.mxu0 %v13257_v58  ;;  %v13781_v6 = vand.u32 4294901760, %v13780_v25 }
0x1d0a   :  { %25925 = vmatprep.subr.mxu1 %v13830_v7  ;;  %25881 = vmatmul.mubr.f32.vlgmr.msra.gmra.mxu0 %v13267_v17 }
0x1d0b   :  { %25891 = vmatpush3.msra.mxu0 %v28948_v27  ;;  %25916 = vmatmul.mubr.f32.vlgmr.msra.gmra.mxu1 %v13263_v59 }
0x1d0c   :  { %25926 = vmatpush3.xpose.msra.mxu1 %v13830_v7  ;;  %25892 = vmatprep.subr.mxu0 %v28946_v56 }
0x1d0d   :  { %25894 = vmatprep.mubr.f32.mxu0 %v13254_v15  ;;  %25927 = vmatprep.subr.mxu1 %v13837_v13 }
0x1d0e   :  { %25929 = vmatprep.mubr.f32.mxu1 %v28984_v35  ;;  %25893 = vmatpush3.msra.mxu0 %v28946_v56  ;;  %v13791_v56 = vand.u32 4294901760, %v13790_v52 }
0x1d0f   :  { %25904 = vmatprep.subr.mxu0 %v28955_v3  ;;  %25895 = vmatmul.mubr.f32.vlgmr.msra.gmra.mxu0 %v13264_v62 }
0x1d10   :  { %25905 = vmatpush3.msra.mxu0 %v28955_v3  ;;  %25928 = vmatpush3.xpose.msra.mxu1 %v13837_v13 }
0x1d11   :  { %25906 = vmatprep.subr.mxu0 %v28951_v32  ;;  %25908 = vmatprep.mubr.f32.mxu0 %v13253_v50 }
0x1d12   :  { %25939 = vmatprep.subr.mxu1 %v28964_v29  ;;  %25907 = vmatpush3.msra.mxu0 %v28951_v32 }
0x1d13   :  { %25918 = vmatprep.subr.mxu0 %v28964_v29  ;;  %25930 = vmatmul.mubr.f32.vlgmr.msra.gmra.mxu1 %v13787_v51 }
0x1d14   :  { %25909 = vmatmul.mubr.f32.vlgmr.msra.gmra.mxu0 %v13263_v59  ;;  %25940 = vmatpush3.xpose.msra.mxu1 %v28964_v29 }
0x1d15   :  { %25919 = vmatpush3.xpose.msra.mxu0 %v28964_v29  ;;  %25943 = vmatprep.mubr.f32.mxu1 %v13779_v47 }
0x1d16   :  { %25920 = vmatprep.subr.mxu0 %v28967_v38  ;;  %25922 = vmatprep.mubr.f32.mxu0 %v13781_v6 }
0x1d17   :  { %25941 = vmatprep.subr.mxu1 %v28967_v38 }
0x1d18   :  { %25942 = vmatpush3.xpose.msra.mxu1 %v28967_v38 }
0x1d19   :  { %25921 = vmatpush3.xpose.msra.mxu0 %v28967_v38  ;;  %25953 = vmatprep.subr.mxu1 %v28964_v29 }
0x1d1a   :  { %25932 = vmatprep.subr.mxu0 %v28971_v44 }
0x1d1b   :  { %25944 = vmatmul.mubr.f32.vlgmr.msra.gmra.mxu1 %v13789_v10 }
0x1d1c   :  { %25923 = vmatmul.mubr.f32.vlgmr.msra.gmra.mxu0 %v13791_v56  ;;  %25954 = vmatpush3.xpose.msra.mxu1 %v28964_v29 }
0x1d1d   :  { %25933 = vmatpush3.xpose.msra.mxu0 %v28971_v44  ;;  %25936 = vmatprep.mubr.f32.mxu0 %v13778_v22 }
0x1d1e   :  { %25957 = vmatprep.mubr.f32.mxu1 %v28984_v35  ;;  %25934 = vmatprep.subr.mxu0 %v28975_v40 }
0x1d1f   :  { %25955 = vmatprep.subr.mxu1 %v28967_v38 }
0x1d20   :  { %25956 = vmatpush3.xpose.msra.mxu1 %v28967_v38 }
0x1d21   :  { %25935 = vmatpush3.xpose.msra.mxu0 %v28975_v40 }
0x1d22   :  { %25946 = vmatprep.subr.mxu0 %v28978_v49 }
0x1d23   :  { %25958 = vmatmul.mubr.f32.vlgmr.msra.gmra.mxu1 %v13787_v51 }
0x1d24   :  { %25937 = vmatmul.mubr.f32.vlgmr.msra.gmra.mxu0 %v13788_v46 }
0x1d25   :  { %25947 = vmatpush3.xpose.msra.mxu0 %v28978_v49  ;;  %25950 = vmatprep.mubr.f32.mxu0 %v28984_v35 }
0x1d26   :  { %25948 = vmatprep.subr.mxu0 %v28982_v63 }
0x1d29   :  { %25949 = vmatpush3.xpose.msra.mxu0 %v28982_v63 }
0x1d2c   :  { %25951 = vmatmul.mubr.f32.vlgmr.msra.gmra.mxu0 %v13787_v51 }
0x1dc2   :  { %v25889_v41 = vpop.f32.mrf.mxu1 }
0x1dc4   :  { %v13350_v27 = vpop.f32.mrf.mxu1 }
0x1dc6   :  { %v25903_v39 = vpop.f32.mrf.mxu1 }
0x1dc8   :  { %v13514_v57 = vpop.f32.mrf.mxu1 }
0x1dca   :  { %v25882_v32 = vpop.f32.mrf.mxu0 }
0x1dcb   :  { %v13357_v11 = vadd.f32 %v25889_v41, %v25882_v32  ;;  %v25917_v5 = vpop.f32.mrf.mxu1 }
0x1dcc   :  { %v13259_v3 = vpop.f32.mrf.mxu0 }
0x1dcd   :  { %v13351_v33 = vadd.f32 %v13350_v27, %v13259_v3  ;;  %v13678_v2 = vpop.f32.mrf.mxu1 }
0x1dcf   :  { %v25896_v48 = vpop.f32.mrf.mxu0 }
0x1dd0   :  { %v13440_v43 = vadd.f32 %v25896_v48, %v13357_v11 }
0x1dd1   :  { %v13432_v55 = vpop.f32.mrf.mxu0 }
0x1dd2   :  { %v13433_v54 = vadd.f32 %v13432_v55, %v13351_v33  ;;  %v13523_v0 = vadd.f32 %v25903_v39, %v13440_v43 }
0x1dd3   :  { %v25931_v21 = vpop.f32.mrf.mxu1 }
0x1dd4   :  { %v25910_v14 = vpop.f32.mrf.mxu0  ;;  %v13515_v9 = vadd.f32 %v13514_v57, %v13433_v54 }
0x1dd5   :  { %v13606_v60 = vadd.f32 %v25910_v14, %v13523_v0  ;;  %v13874_v44 = vpop.f32.mrf.mxu1 }
0x1dd6   :  { %v13599_v30 = vpop.f32.mrf.mxu0 }
0x1dd7   :  { %v13685_v29 = vadd.f32 %v25917_v5, %v13606_v60  ;;  %v13600_v18 = vadd.f32 %v13599_v30, %v13515_v9 }
0x1dd9   :  { %13689 = vst.msk [vmem:[#allocation3 + $0x8] sm:$0xff] %vm1272_vm3, %v13685_v29  ;;  %v13679_v24 = vadd.f32 %v13678_v2, %v13600_v18 }
0x1ddb   :  { %13688 = vst.msk [vmem:[#allocation3] sm:$0xff] %vm1272_vm3, %v13679_v24  ;;  %v25945_v45 = vpop.f32.mrf.mxu1 }
0x1ddc   :  { %v25924_v38 = vpop.f32.mrf.mxu0 }
0x1ddd   :  { %v13881_v31 = vadd.f32 %v25931_v21, %v25924_v38  ;;  %v14038_v37 = vpop.f32.mrf.mxu1 }
0x1dde   :  { %v13783_v36 = vpop.f32.mrf.mxu0 }
0x1ddf   :  { %v13875_v40 = vadd.f32 %v13874_v44, %v13783_v36 }
0x1de3   :  { %v25959_v61 = vpop.f32.mrf.mxu1 }
0x1de4   :  { %v25938_v59 = vpop.f32.mrf.mxu0 }
0x1de5   :  { %v13964_v50 = vadd.f32 %v25938_v59, %v13881_v31  ;;  %v14202_v53 = vpop.f32.mrf.mxu1 }
0x1de6   :  { %v13956_v62 = vpop.f32.mrf.mxu0 }
0x1de7   :  { %v13957_v49 = vadd.f32 %v13956_v62, %v13875_v40  ;;  %v14047_v15 = vadd.f32 %v25945_v45, %v13964_v50 }
0x1de9   :  { %v14039_v35 = vadd.f32 %v14038_v37, %v13957_v49 }
0x1dec   :  { %v25952_v23 = vpop.f32.mrf.mxu0 }
0x1ded   :  { %v14130_v63 = vadd.f32 %v25952_v23, %v14047_v15 }
0x1dee   :  { %v14123_v19 = vpop.f32.mrf.mxu0 }
0x1def   :  { %v14209_v16 = vadd.f32 %v25959_v61, %v14130_v63  ;;  %v14124_v42 = vadd.f32 %v14123_v19, %v14039_v35 }
0x1df1   :  { %v14213_v28 = vmul.f32 0.35355338, %v14209_v16  ;;  %v14203_v58 = vadd.f32 %v14202_v53, %v14124_v42 }
0x1df3   :  { %v14217_v1 = vsel %vm22_vm0, %v14213_v28, -inf  ;;  %v14212_v22 = vmul.f32 0.35355338, %v14203_v58 }
0x1df4   :  { %14218 = vmax.xlane.f32.xlu1 %v14217_v1 }
0x1df5   :  { %v14214_v7 = vsel %vm22_vm0, %v14212_v22, -inf }
0x1df6   :  { %14215 = vmax.xlane.f32.xlu0 %v14214_v7 }
0x1e05   :  { %14244 = vrot.lane.b32.xlu1 %v28913_v8, %s27015_s14 }
0x1e09   :  { %14776 = vrot.lane.b32.xlu1 %v28913_v8, %s27017_s16 }
0x1e0d   :  { %14774 = vrot.lane.b32.xlu1 %v28917_v4, %s27017_s16 }
0x1e11   :  { %14772 = vrot.lane.b32.xlu1 %v28913_v8, %s27016_s15 }
0x1e7d   :  { %v14219_v17 = vpop.xlane.xlu1 %14218 }
0x1e7e   :  { %v14221_v51 = vsub.f32 %v14213_v28, %v14219_v17 }
0x1e7f   :  { %v14216_v13 = vpop.xlane.xlu0 %14215 }
0x1e80   :  { %v14220_v47 = vsub.f32 %v14212_v22, %v14216_v13  ;;  %v14224_v25 = vmul.f32 1.442695, %v14221_v51 }
0x1e81   :  { %v14245_v46 = vpop.permute.xlu1 %14244 }
0x1e82   :  { %v14222_v10 = vmul.f32 1.442695, %v14220_v47  ;;  %v29038_v6 = vand.u32 4294901760, %v14245_v46 }
0x1e84   :  { %26909 = vpow2.f32 %v14222_v10  ;;  %v29041_v52 = vsub.f32 %v14245_v46, %v29038_v6  ;;  %25960 = vmatprep.subr.mxu0 %v29038_v6 }
0x1e85   :  { %25961 = vmatpush3.msra.mxu0 %v29038_v6  ;;  %26911 = vpow2.f32 %v14224_v25  ;;  %v14777_v55 = vpop.permute.xlu1 %14776 }
0x1e86   :  { %v29046_v8 = vand.u32 4294901760, %v29041_v52  ;;  %v14784_v30 = vsel %vm1272_vm3, %v14777_v55, 0 }
0x1e87   :  { %v29070_v24 = vand.u32 4294901760, %v14784_v30 }
0x1e88   :  { %v14373_v56 = vsub.f32 %v29041_v52, %v29046_v8 }
0x1e89   :  { %v14775_v29 = vpop.permute.xlu1 %14774  ;;  %v29078_v62 = vsub.f32 %v14784_v30, %v29070_v24 }
0x1e8a   :  { %v14374_v41 = vand.u32 4294901760, %v14373_v56  ;;  %v14782_v38 = vsel %vm1272_vm3, %v14775_v29, 0 }
0x1e8b   :  { %v29075_v31 = vand.u32 4294901760, %v14782_v38  ;;  %v29085_v63 = vand.u32 4294901760, %v29078_v62 }
0x1e8c   :  { %25967 = vmatprep.subr.mxu1 %v14374_v41 }
0x1e8d   :  { %25968 = vmatpush3.msra.mxu1 %v14374_v41  ;;  %v29082_v15 = vsub.f32 %v14782_v38, %v29075_v31  ;;  %v14773_v58 = vpop.permute.xlu1 %14772  ;;  %v14905_v22 = vsub.f32 %v29078_v62, %v29085_v63 }
0x1e8e   :  { %v14780_v17 = vsel %vm1272_vm3, %v14773_v58, 0 }
0x1e8f   :  { %v29091_v28 = vand.u32 4294901760, %v29082_v15  ;;  %v14906_v46 = vand.u32 4294901760, %v14905_v22  ;;  %v14863_v25 = vand.u32 4294901760, %v14780_v17 }
0x1e91   :  { %v26910_v27 = vpop.eup %26909  ;;  %v14912_v13 = vsub.f32 %v29082_v15, %v29091_v28  ;;  %v14864_v56 = vsub.f32 %v14780_v17, %v14863_v25 }
0x1e92   :  { %v14226_v32 = vsel %vm22_vm0, %v26910_v27, 0.0  ;;  %v26912_v39 = vpop.eup %26911 }
0x1e93   :  { %14227 = vadd.xlane.f32.xlu0 %v14226_v32  ;;  %v14229_v3 = vsel %vm22_vm0, %v26912_v39, 0.0  ;;  %v14913_v10 = vand.u32 4294901760, %v14912_v13  ;;  %v14865_v41 = vand.u32 4294901760, %v14864_v56  ;;  %v29142_v13 = vld [vmem:[#allocation2 + $0x8] sm:$0xff] }
0x1e97   :  { %14230 = vadd.xlane.f32.xlu0 %v14229_v3 }
0x1ead   :  { %14242 = vrot.lane.b32.xlu0 %v28917_v4, %s27015_s14 }
0x1eb1   :  { %14770 = vrot.lane.b32.xlu0 %v28917_v4, %s27016_s15 }
0x1f1c   :  { %v14228_v11 = vpop.xlane.xlu0 %14227 }
0x1f1d   :  { %26913 = vrcp.f32 %v14228_v11 }
0x1f20   :  { %v14231_v48 = vpop.xlane.xlu0 %14230 }
0x1f21   :  { %26915 = vrcp.f32 %v14231_v48 }
0x1f24   :  { %v14243_v57 = vpop.permute.xlu0 %14242 }
0x1f25   :  { %v29056_v33 = vand.u32 4294901760, %v14243_v57 }
0x1f27   :  { %v29059_v43 = vsub.f32 %v14243_v57, %v29056_v33  ;;  %25962 = vmatprep.subr.mxu0 %v29056_v33 }
0x1f28   :  { %25963 = vmatpush3.msra.mxu0 %v29056_v33  ;;  %v14771_v37 = vpop.permute.xlu0 %14770 }
0x1f29   :  { %25974 = vmatprep.subr.mxu0 %v29041_v52  ;;  %v29065_v54 = vand.u32 4294901760, %v29059_v43  ;;  %v14778_v19 = vsel %vm1272_vm3, %v14771_v37, 0 }
0x1f2a   :  { %v26914_v4 = vpop.eup %26913  ;;  %v29093_v1 = vand.u32 4294901760, %v14778_v19 }
0x1f2b   :  { %v14234_v0 = vmul.f32 %v26914_v4, %v14228_v11  ;;  %v14380_v5 = vsub.f32 %v29059_v43, %v29065_v54 }
0x1f2c   :  { %v14854_v47 = vsub.f32 %v14778_v19, %v29093_v1 }
0x1f2d   :  { %v14236_v14 = vsub.f32 2.0, %v14234_v0  ;;  %v14381_v9 = vand.u32 4294901760, %v14380_v5 }
0x1f2e   :  { %v26916_v60 = vpop.eup %26915 }
0x1f2f   :  { %v14238_v18 = vmul.f32 %v26914_v4, %v14236_v14  ;;  %v14235_v2 = vmul.f32 %v26916_v60, %v14231_v48  ;;  %25969 = vmatprep.subr.mxu1 %v14381_v9 }
0x1f30   :  { %25970 = vmatpush3.msra.mxu1 %v14381_v9 }
0x1f31   :  { %v14240_v21 = vmul.f32 %v26910_v27, %v14238_v18  ;;  %v14237_v36 = vsub.f32 2.0, %v14235_v2  ;;  %25981 = vmatprep.subr.mxu1 %v29038_v6 }
0x1f33   :  { %v14249_v44 = vsel %vm22_vm0, %v14240_v21, 0  ;;  %v14239_v59 = vmul.f32 %v26916_v60, %v14237_v36 }
0x1f34   :  { %v14321_v45 = vand.u32 4294901760, %v14249_v44 }
0x1f35   :  { %v14241_v40 = vmul.f32 %v26912_v39, %v14239_v59 }
0x1f36   :  { %25971 = vmatprep.mubr.f32.mxu1 %v14321_v45  ;;  %v14322_v50 = vsub.f32 %v14249_v44, %v14321_v45 }
0x1f37   :  { %v14252_v49 = vsel %vm22_vm0, %v14241_v40, 0 }
0x1f38   :  { %v14331_v61 = vand.u32 4294901760, %v14252_v49  ;;  %v14323_v23 = vand.u32 4294901760, %v14322_v50 }
0x1f3a   :  { %v14332_v35 = vsub.f32 %v14252_v49, %v14331_v61  ;;  %25972 = vmatmul.mubr.f32.vlgmr.msra.gmra.mxu1 %v14331_v61  ;;  %v14324_v16 = vsub.f32 %v14322_v50, %v14323_v23 }
0x1f3b   :  { %25982 = vmatpush3.msra.mxu1 %v29038_v6  ;;  %25985 = vmatprep.mubr.f32.mxu1 %v14323_v23 }
0x1f3c   :  { %25983 = vmatprep.subr.mxu1 %v29056_v33  ;;  %v14325_v42 = vand.u32 4294901760, %v14324_v16  ;;  %v14333_v53 = vand.u32 4294901760, %v14332_v35 }
0x1f3d   :  { %25984 = vmatpush3.msra.mxu1 %v29056_v33 }
0x1f3e   :  { %25995 = vmatprep.subr.mxu1 %v29038_v6  ;;  %25964 = vmatprep.mubr.f32.mxu0 %v14325_v42  ;;  %v14334_v7 = vsub.f32 %v14332_v35, %v14333_v53 }
0x1f3f   :  { %25986 = vmatmul.mubr.f32.vlgmr.msra.gmra.mxu1 %v14333_v53 }
0x1f40   :  { %25996 = vmatpush3.msra.mxu1 %v29038_v6  ;;  %25999 = vmatprep.mubr.f32.mxu1 %v14321_v45  ;;  %v14335_v51 = vand.u32 4294901760, %v14334_v7  ;;  %v14855_v6 = vand.u32 4294901760, %v14854_v47 }
0x1f41   :  { %25997 = vmatprep.subr.mxu1 %v29056_v33 }
0x1f42   :  { %25998 = vmatpush3.msra.mxu1 %v29056_v33  ;;  %25965 = vmatmul.mubr.f32.vlgmr.msra.gmra.mxu0 %v14335_v51 }
0x1f43   :  { %26009 = vmatprep.subr.mxu1 %v14906_v46  ;;  %25975 = vmatpush3.msra.mxu0 %v29041_v52  ;;  %v14856_v52 = vsub.f32 %v14854_v47, %v14855_v6 }
0x1f44   :  { %26000 = vmatmul.mubr.f32.vlgmr.msra.gmra.mxu1 %v14331_v61  ;;  %25976 = vmatprep.subr.mxu0 %v29059_v43 }
0x1f45   :  { %26010 = vmatpush3.xpose.msra.mxu1 %v14906_v46  ;;  %25978 = vmatprep.mubr.f32.mxu0 %v14322_v50  ;;  %v14857_v27 = vand.u32 4294901760, %v14856_v52 }
0x1f46   :  { %26011 = vmatprep.subr.mxu1 %v14913_v10  ;;  %26013 = vmatprep.mubr.f32.mxu1 %v29093_v1 }
0x1f47   :  { %25977 = vmatpush3.msra.mxu0 %v29059_v43 }
0x1f48   :  { %25988 = vmatprep.subr.mxu0 %v29046_v8  ;;  %25979 = vmatmul.mubr.f32.vlgmr.msra.gmra.mxu0 %v14332_v35 }
0x1f49   :  { %25989 = vmatpush3.msra.mxu0 %v29046_v8  ;;  %26012 = vmatpush3.xpose.msra.mxu1 %v14913_v10  ;;  %v14866_v8 = vsub.f32 %v14864_v56, %v14865_v41 }
0x1f4a   :  { %25990 = vmatprep.subr.mxu0 %v29065_v54  ;;  %25992 = vmatprep.mubr.f32.mxu0 %v14321_v45 }
0x1f4b   :  { %26023 = vmatprep.subr.mxu1 %v29070_v24  ;;  %25991 = vmatpush3.msra.mxu0 %v29065_v54  ;;  %v14867_v32 = vand.u32 4294901760, %v14866_v8 }
0x1f4c   :  { %26002 = vmatprep.subr.mxu0 %v29070_v24  ;;  %26014 = vmatmul.mubr.f32.vlgmr.msra.gmra.mxu1 %v14863_v25 }
0x1f4d   :  { %25993 = vmatmul.mubr.f32.vlgmr.msra.gmra.mxu0 %v14331_v61  ;;  %26024 = vmatpush3.xpose.msra.mxu1 %v29070_v24 }
0x1f4e   :  { %26003 = vmatpush3.xpose.msra.mxu0 %v29070_v24  ;;  %26027 = vmatprep.mubr.f32.mxu1 %v14855_v6 }
0x1f4f   :  { %26004 = vmatprep.subr.mxu0 %v29075_v31  ;;  %26006 = vmatprep.mubr.f32.mxu0 %v14857_v27 }
0x1f50   :  { %26025 = vmatprep.subr.mxu1 %v29075_v31 }
0x1f51   :  { %26026 = vmatpush3.xpose.msra.mxu1 %v29075_v31 }
0x1f52   :  { %26005 = vmatpush3.xpose.msra.mxu0 %v29075_v31  ;;  %26037 = vmatprep.subr.mxu1 %v29070_v24 }
0x1f53   :  { %26016 = vmatprep.subr.mxu0 %v29078_v62 }
0x1f54   :  { %26028 = vmatmul.mubr.f32.vlgmr.msra.gmra.mxu1 %v14865_v41 }
0x1f55   :  { %26007 = vmatmul.mubr.f32.vlgmr.msra.gmra.mxu0 %v14867_v32  ;;  %26038 = vmatpush3.xpose.msra.mxu1 %v29070_v24 }
0x1f56   :  { %26017 = vmatpush3.xpose.msra.mxu0 %v29078_v62  ;;  %26020 = vmatprep.mubr.f32.mxu0 %v14854_v47  ;;  %v29148_v47 = vld [vmem:[#allocation2] sm:$0xff] }
0x1f57   :  { %26041 = vmatprep.mubr.f32.mxu1 %v29093_v1  ;;  %26018 = vmatprep.subr.mxu0 %v29082_v15 }
0x1f58   :  { %26039 = vmatprep.subr.mxu1 %v29075_v31 }
0x1f59   :  { %26040 = vmatpush3.xpose.msra.mxu1 %v29075_v31 }
0x1f5a   :  { %26019 = vmatpush3.xpose.msra.mxu0 %v29082_v15 }
0x1f5b   :  { %26030 = vmatprep.subr.mxu0 %v29085_v63 }
0x1f5c   :  { %26042 = vmatmul.mubr.f32.vlgmr.msra.gmra.mxu1 %v14863_v25 }
0x1f5d   :  { %26021 = vmatmul.mubr.f32.vlgmr.msra.gmra.mxu0 %v14864_v56 }
0x1f5e   :  { %26031 = vmatpush3.xpose.msra.mxu0 %v29085_v63  ;;  %26034 = vmatprep.mubr.f32.mxu0 %v29093_v1 }
0x1f5f   :  { %26032 = vmatprep.subr.mxu0 %v29091_v28 }
0x1f62   :  { %26033 = vmatpush3.xpose.msra.mxu0 %v29091_v28 }
0x1f65   :  { %26035 = vmatmul.mubr.f32.vlgmr.msra.gmra.mxu0 %v14863_v25 }
0x1ffa   :  { %v25973_v39 = vpop.f32.mrf.mxu1 }
0x1ffc   :  { %v14418_v3 = vpop.f32.mrf.mxu1 }
0x1fff   :  { %v25987_v33 = vpop.f32.mrf.mxu1 }
0x2001   :  { %v14582_v55 = vpop.f32.mrf.mxu1 }
0x2002   :  { %v25966_v11 = vpop.f32.mrf.mxu0 }
0x2003   :  { %v14425_v48 = vadd.f32 %v25973_v39, %v25966_v11 }
0x2004   :  { %v14327_v57 = vpop.f32.mrf.mxu0  ;;  %v26001_v9 = vpop.f32.mrf.mxu1 }
0x2005   :  { %v14419_v54 = vadd.f32 %v14418_v3, %v14327_v57 }
0x2006   :  { %v14746_v38 = vpop.f32.mrf.mxu1 }
0x2008   :  { %v25980_v43 = vpop.f32.mrf.mxu0 }
0x2009   :  { %v14508_v4 = vadd.f32 %v25980_v43, %v14425_v48 }
0x200a   :  { %v14500_v0 = vpop.f32.mrf.mxu0 }
0x200b   :  { %v14501_v5 = vadd.f32 %v14500_v0, %v14419_v54  ;;  %v14591_v14 = vadd.f32 %v25987_v33, %v14508_v4 }
0x200c   :  { %v26015_v44 = vpop.f32.mrf.mxu1 }
0x200d   :  { %v25994_v60 = vpop.f32.mrf.mxu0  ;;  %v14583_v30 = vadd.f32 %v14582_v55, %v14501_v5 }
0x200e   :  { %v14674_v29 = vadd.f32 %v25994_v60, %v14591_v14  ;;  %v14950_v31 = vpop.f32.mrf.mxu1 }
0x200f   :  { %v14667_v18 = vpop.f32.mrf.mxu0 }
0x2010   :  { %v29136_v2 = vadd.f32 %v26001_v9, %v14674_v29  ;;  %v14668_v24 = vadd.f32 %v14667_v18, %v14583_v30 }
0x2012   :  { %v29138_v21 = vadd.f32 %v14746_v38, %v14668_v24 }
0x2014   :  { %v26029_v40 = vpop.f32.mrf.mxu1 }
0x2015   :  { %v26008_v36 = vpop.f32.mrf.mxu0 }
0x2016   :  { %v14957_v62 = vadd.f32 %v26015_v44, %v26008_v36  ;;  %v15114_v61 = vpop.f32.mrf.mxu1 }
0x2017   :  { %v14859_v59 = vpop.f32.mrf.mxu0 }
0x2018   :  { %v14951_v49 = vadd.f32 %v14950_v31, %v14859_v59 }
0x201c   :  { %v26043_v63 = vpop.f32.mrf.mxu1 }
0x201d   :  { %v26022_v45 = vpop.f32.mrf.mxu0 }
0x201e   :  { %v15040_v37 = vadd.f32 %v26022_v45, %v14957_v62  ;;  %v15278_v58 = vpop.f32.mrf.mxu1 }
0x201f   :  { %v15032_v50 = vpop.f32.mrf.mxu0 }
0x2020   :  { %v15033_v15 = vadd.f32 %v15032_v50, %v14951_v49  ;;  %v15123_v23 = vadd.f32 %v26029_v40, %v15040_v37 }
0x2022   :  { %v15115_v16 = vadd.f32 %v15114_v61, %v15033_v15 }
0x2025   :  { %v26036_v35 = vpop.f32.mrf.mxu0 }
0x2026   :  { %v15206_v19 = vadd.f32 %v26036_v35, %v15123_v23 }
0x2027   :  { %v15199_v42 = vpop.f32.mrf.mxu0 }
0x2028   :  { %v15285_v53 = vadd.f32 %v26043_v63, %v15206_v19  ;;  %v15200_v28 = vadd.f32 %v15199_v42, %v15115_v16 }
0x202a   :  { %v15289_v1 = vmul.f32 0.35355338, %v15285_v53  ;;  %v15279_v22 = vadd.f32 %v15278_v58, %v15200_v28 }
0x202c   :  { %v15288_v7 = vmul.f32 0.35355338, %v15279_v22  ;;  %v15293_v17 = vsel %vm22_vm0, %v15289_v1, -inf }
0x202d   :  { %15294 = vmax.xlane.f32.xlu1 %v15293_v17 }
0x202e   :  { %v15290_v51 = vsel %vm22_vm0, %v15288_v7, -inf }
0x202f   :  { %15291 = vmax.xlane.f32.xlu0 %v15290_v51 }
0x203e   :  { %15320 = vrot.lane.b32.xlu1 %v29142_v13, %s27018_s17 }
0x2042   :  { %15852 = vrot.lane.b32.xlu1 %v29142_v13, %s27019_s18 }
0x2046   :  { %15850 = vrot.lane.b32.xlu1 %v29148_v47, %s27019_s18 }
0x204a   :  { %15848 = vrot.lane.b32.xlu1 %v29142_v13, %s27020_s19 }
0x20b6   :  { %v15295_v46 = vpop.xlane.xlu1 %15294 }
0x20b7   :  { %v15297_v25 = vsub.f32 %v15289_v1, %v15295_v46 }
0x20b8   :  { %v15292_v10 = vpop.xlane.xlu0 %15291 }
0x20b9   :  { %v15296_v6 = vsub.f32 %v15288_v7, %v15292_v10  ;;  %v15300_v52 = vmul.f32 1.442695, %v15297_v25 }
0x20ba   :  { %v15321_v56 = vpop.permute.xlu1 %15320 }
0x20bb   :  { %v15298_v41 = vmul.f32 1.442695, %v15296_v6  ;;  %v29154_v27 = vand.u32 4294901760, %v15321_v56 }
0x20bd   :  { %26917 = vpow2.f32 %v15298_v41  ;;  %v29157_v8 = vsub.f32 %v15321_v56, %v29154_v27  ;;  %26044 = vmatprep.subr.mxu0 %v29154_v27 }
0x20be   :  { %26045 = vmatpush3.msra.mxu0 %v29154_v27  ;;  %26919 = vpow2.f32 %v15300_v52  ;;  %v15853_v5 = vpop.permute.xlu1 %15852 }
0x20bf   :  { %v29162_v32 = vand.u32 4294901760, %v29157_v8  ;;  %v15860_v38 = vsel %vm1272_vm3, %v15853_v5, 0 }
0x20c0   :  { %v29186_v31 = vand.u32 4294901760, %v15860_v38 }
0x20c1   :  { %v15449_v39 = vsub.f32 %v29157_v8, %v29162_v32 }
0x20c2   :  { %v15851_v36 = vpop.permute.xlu1 %15850  ;;  %v29194_v61 = vsub.f32 %v15860_v38, %v29186_v31 }
0x20c3   :  { %v15450_v3 = vand.u32 4294901760, %v15449_v39  ;;  %v15858_v45 = vsel %vm1272_vm3, %v15851_v36, 0 }
0x20c4   :  { %v29191_v37 = vand.u32 4294901760, %v15858_v45  ;;  %v29201_v28 = vand.u32 4294901760, %v29194_v61 }
0x20c5   :  { %26051 = vmatprep.subr.mxu1 %v15450_v3 }
0x20c6   :  { %26052 = vmatpush3.msra.mxu1 %v15450_v3  ;;  %v29198_v16 = vsub.f32 %v15858_v45, %v29191_v37  ;;  %v15849_v46 = vpop.permute.xlu1 %15848  ;;  %v15981_v10 = vsub.f32 %v29194_v61, %v29201_v28 }
0x20c7   :  { %v15856_v56 = vsel %vm1272_vm3, %v15849_v46, 0 }
0x20c8   :  { %v29207_v51 = vand.u32 4294901760, %v29198_v16  ;;  %v15982_v3 = vand.u32 4294901760, %v15981_v10 }
0x20ca   :  { %v26918_v11 = vpop.eup %26917  ;;  %v15988_v41 = vsub.f32 %v29198_v16, %v29207_v51 }
0x20cb   :  { %v15302_v48 = vsel %vm22_vm0, %v26918_v11, 0.0  ;;  %v26920_v57 = vpop.eup %26919 }
0x20cc   :  { %15303 = vadd.xlane.f32.xlu0 %v15302_v48  ;;  %v15305_v33 = vsel %vm22_vm0, %v26920_v57, 0.0 }
0x20d0   :  { %15306 = vadd.xlane.f32.xlu0 %v15305_v33 }
0x20e6   :  { %15318 = vrot.lane.b32.xlu0 %v29148_v47, %s27018_s17 }
0x20ea   :  { %15846 = vrot.lane.b32.xlu0 %v29148_v47, %s27020_s19 }
0x2155   :  { %v15304_v43 = vpop.xlane.xlu0 %15303 }
0x2156   :  { %26921 = vrcp.f32 %v15304_v43 }
0x2159   :  { %v15307_v55 = vpop.xlane.xlu0 %15306 }
0x215a   :  { %26923 = vrcp.f32 %v15307_v55 }
0x215d   :  { %v15319_v54 = vpop.permute.xlu0 %15318 }
0x215e   :  { %v29172_v4 = vand.u32 4294901760, %v15319_v54 }
0x2160   :  { %v29175_v0 = vsub.f32 %v15319_v54, %v29172_v4  ;;  %26046 = vmatprep.subr.mxu0 %v29172_v4 }
0x2161   :  { %26047 = vmatpush3.msra.mxu0 %v29172_v4  ;;  %v15847_v19 = vpop.permute.xlu0 %15846 }
0x2162   :  { %26058 = vmatprep.subr.mxu0 %v29157_v8  ;;  %v29181_v14 = vand.u32 4294901760, %v29175_v0  ;;  %v15854_v1 = vsel %vm1272_vm3, %v15847_v19, 0 }
0x2163   :  { %v26922_v9 = vpop.eup %26921  ;;  %v29209_v25 = vand.u32 4294901760, %v15854_v1 }
0x2164   :  { %v15310_v60 = vmul.f32 %v26922_v9, %v15304_v43  ;;  %v15456_v30 = vsub.f32 %v29175_v0, %v29181_v14 }
0x2165   :  { %v15930_v39 = vsub.f32 %v15854_v1, %v29209_v25 }
0x2166   :  { %v15312_v29 = vsub.f32 2.0, %v15310_v60  ;;  %v15457_v18 = vand.u32 4294901760, %v15456_v30 }
0x2167   :  { %v26924_v24 = vpop.eup %26923  ;;  %v15931_v48 = vand.u32 4294901760, %v15930_v39 }
0x2168   :  { %v15314_v44 = vmul.f32 %v26922_v9, %v15312_v29  ;;  %v15311_v59 = vmul.f32 %v26924_v24, %v15307_v55  ;;  %26053 = vmatprep.subr.mxu1 %v15457_v18 }
0x2169   :  { %26054 = vmatpush3.msra.mxu1 %v15457_v18 }
0x216a   :  { %v15316_v62 = vmul.f32 %v26918_v11, %v15314_v44  ;;  %v15313_v40 = vsub.f32 2.0, %v15311_v59  ;;  %26065 = vmatprep.subr.mxu1 %v29154_v27  ;;  %v15939_v11 = vand.u32 4294901760, %v15856_v56 }
0x216c   :  { %v15325_v50 = vsel %vm22_vm0, %v15316_v62, 0  ;;  %v15315_v49 = vmul.f32 %v26924_v24, %v15313_v40 }
0x216d   :  { %v15397_v15 = vand.u32 4294901760, %v15325_v50 }
0x216e   :  { %v15317_v23 = vmul.f32 %v26920_v57, %v15315_v49  ;;  %v15940_v57 = vsub.f32 %v15856_v56, %v15939_v11 }
0x216f   :  { %26055 = vmatprep.mubr.f32.mxu1 %v15397_v15  ;;  %v15398_v63 = vsub.f32 %v15325_v50, %v15397_v15 }
0x2170   :  { %v15328_v35 = vsel %vm22_vm0, %v15317_v23, 0  ;;  %v15941_v33 = vand.u32 4294901760, %v15940_v57 }
0x2171   :  { %v15407_v42 = vand.u32 4294901760, %v15328_v35  ;;  %v15399_v53 = vand.u32 4294901760, %v15398_v63 }
0x2173   :  { %v15408_v58 = vsub.f32 %v15328_v35, %v15407_v42  ;;  %26056 = vmatmul.mubr.f32.vlgmr.msra.gmra.mxu1 %v15407_v42  ;;  %v15400_v22 = vsub.f32 %v15398_v63, %v15399_v53 }
0x2174   :  { %26066 = vmatpush3.msra.mxu1 %v29154_v27  ;;  %26069 = vmatprep.mubr.f32.mxu1 %v15399_v53 }
0x2175   :  { %26067 = vmatprep.subr.mxu1 %v29172_v4  ;;  %v15401_v7 = vand.u32 4294901760, %v15400_v22  ;;  %v15409_v17 = vand.u32 4294901760, %v15408_v58 }
0x2176   :  { %26068 = vmatpush3.msra.mxu1 %v29172_v4 }
0x2177   :  { %26079 = vmatprep.subr.mxu1 %v29154_v27  ;;  %26048 = vmatprep.mubr.f32.mxu0 %v15401_v7  ;;  %v15410_v6 = vsub.f32 %v15408_v58, %v15409_v17 }
0x2178   :  { %26070 = vmatmul.mubr.f32.vlgmr.msra.gmra.mxu1 %v15409_v17 }
0x2179   :  { %26080 = vmatpush3.msra.mxu1 %v29154_v27  ;;  %26083 = vmatprep.mubr.f32.mxu1 %v15397_v15  ;;  %v15411_v52 = vand.u32 4294901760, %v15410_v6  ;;  %v15989_v27 = vand.u32 4294901760, %v15988_v41 }
0x217a   :  { %26081 = vmatprep.subr.mxu1 %v29172_v4 }
0x217b   :  { %26082 = vmatpush3.msra.mxu1 %v29172_v4  ;;  %26049 = vmatmul.mubr.f32.vlgmr.msra.gmra.mxu0 %v15411_v52 }
0x217c   :  { %26093 = vmatprep.subr.mxu1 %v15982_v3  ;;  %26059 = vmatpush3.msra.mxu0 %v29157_v8  ;;  %v15932_v8 = vsub.f32 %v15930_v39, %v15931_v48 }
0x217d   :  { %26084 = vmatmul.mubr.f32.vlgmr.msra.gmra.mxu1 %v15407_v42  ;;  %26060 = vmatprep.subr.mxu0 %v29175_v0 }
0x217e   :  { %26094 = vmatpush3.xpose.msra.mxu1 %v15982_v3  ;;  %26062 = vmatprep.mubr.f32.mxu0 %v15398_v63  ;;  %v15933_v43 = vand.u32 4294901760, %v15932_v8 }
0x217f   :  { %26095 = vmatprep.subr.mxu1 %v15989_v27  ;;  %26097 = vmatprep.mubr.f32.mxu1 %v29209_v25 }
0x2180   :  { %26061 = vmatpush3.msra.mxu0 %v29175_v0 }
0x2181   :  { %26072 = vmatprep.subr.mxu0 %v29162_v32  ;;  %26063 = vmatmul.mubr.f32.vlgmr.msra.gmra.mxu0 %v15408_v58 }
0x2182   :  { %26073 = vmatpush3.msra.mxu0 %v29162_v32  ;;  %26096 = vmatpush3.xpose.msra.mxu1 %v15989_v27  ;;  %v15942_v32 = vsub.f32 %v15940_v57, %v15941_v33  ;;  %v29260_v27 = vld [vmem:[#allocation2 + $0x18] sm:$0xff] }
0x2183   :  { %26074 = vmatprep.subr.mxu0 %v29181_v14  ;;  %26076 = vmatprep.mubr.f32.mxu0 %v15397_v15 }
0x2184   :  { %26107 = vmatprep.subr.mxu1 %v29186_v31  ;;  %26075 = vmatpush3.msra.mxu0 %v29181_v14  ;;  %v15943_v55 = vand.u32 4294901760, %v15942_v32 }
0x2185   :  { %26086 = vmatprep.subr.mxu0 %v29186_v31  ;;  %26098 = vmatmul.mubr.f32.vlgmr.msra.gmra.mxu1 %v15939_v11 }
0x2186   :  { %26077 = vmatmul.mubr.f32.vlgmr.msra.gmra.mxu0 %v15407_v42  ;;  %26108 = vmatpush3.xpose.msra.mxu1 %v29186_v31 }
0x2187   :  { %26087 = vmatpush3.xpose.msra.mxu0 %v29186_v31  ;;  %26111 = vmatprep.mubr.f32.mxu1 %v15931_v48  ;;  %v29264_v48 = vld [vmem:[#allocation2 + $0x10] sm:$0xff] }
0x2188   :  { %26088 = vmatprep.subr.mxu0 %v29191_v37  ;;  %26090 = vmatprep.mubr.f32.mxu0 %v15933_v43 }
0x2189   :  { %26109 = vmatprep.subr.mxu1 %v29191_v37 }
0x218a   :  { %26110 = vmatpush3.xpose.msra.mxu1 %v29191_v37 }
0x218b   :  { %26089 = vmatpush3.xpose.msra.mxu0 %v29191_v37  ;;  %26121 = vmatprep.subr.mxu1 %v29186_v31 }
0x218c   :  { %26100 = vmatprep.subr.mxu0 %v29194_v61 }
0x218d   :  { %26112 = vmatmul.mubr.f32.vlgmr.msra.gmra.mxu1 %v15941_v33 }
0x218e   :  { %26091 = vmatmul.mubr.f32.vlgmr.msra.gmra.mxu0 %v15943_v55  ;;  %26122 = vmatpush3.xpose.msra.mxu1 %v29186_v31 }
0x218f   :  { %26101 = vmatpush3.xpose.msra.mxu0 %v29194_v61  ;;  %26104 = vmatprep.mubr.f32.mxu0 %v15930_v39 }
0x2190   :  { %26125 = vmatprep.mubr.f32.mxu1 %v29209_v25  ;;  %26102 = vmatprep.subr.mxu0 %v29198_v16 }
0x2191   :  { %26123 = vmatprep.subr.mxu1 %v29191_v37 }
0x2192   :  { %26124 = vmatpush3.xpose.msra.mxu1 %v29191_v37 }
0x2193   :  { %26103 = vmatpush3.xpose.msra.mxu0 %v29198_v16 }
0x2194   :  { %26114 = vmatprep.subr.mxu0 %v29201_v28 }
0x2195   :  { %26126 = vmatmul.mubr.f32.vlgmr.msra.gmra.mxu1 %v15939_v11 }
0x2196   :  { %26105 = vmatmul.mubr.f32.vlgmr.msra.gmra.mxu0 %v15940_v57 }
0x2197   :  { %26115 = vmatpush3.xpose.msra.mxu0 %v29201_v28  ;;  %26118 = vmatprep.mubr.f32.mxu0 %v29209_v25 }
0x2198   :  { %26116 = vmatprep.subr.mxu0 %v29207_v51 }
0x219b   :  { %26117 = vmatpush3.xpose.msra.mxu0 %v29207_v51 }
0x219e   :  { %26119 = vmatmul.mubr.f32.vlgmr.msra.gmra.mxu0 %v15939_v11 }
0x2233   :  { %v26057_v54 = vpop.f32.mrf.mxu1 }
0x2235   :  { %v15494_v4 = vpop.f32.mrf.mxu1 }
0x2238   :  { %v26071_v9 = vpop.f32.mrf.mxu1 }
0x223a   :  { %v15658_v29 = vpop.f32.mrf.mxu1 }
0x223b   :  { %v26050_v0 = vpop.f32.mrf.mxu0 }
0x223c   :  { %v15501_v5 = vadd.f32 %v26057_v54, %v26050_v0 }
0x223d   :  { %v15403_v14 = vpop.f32.mrf.mxu0  ;;  %v26085_v44 = vpop.f32.mrf.mxu1 }
0x223e   :  { %v15495_v60 = vadd.f32 %v15494_v4, %v15403_v14 }
0x223f   :  { %v15822_v49 = vpop.f32.mrf.mxu1 }
0x2241   :  { %v26064_v30 = vpop.f32.mrf.mxu0 }
0x2242   :  { %v15584_v18 = vadd.f32 %v26064_v30, %v15501_v5 }
0x2243   :  { %v15576_v24 = vpop.f32.mrf.mxu0 }
0x2244   :  { %v15577_v38 = vadd.f32 %v15576_v24, %v15495_v60  ;;  %v15667_v36 = vadd.f32 %v26071_v9, %v15584_v18 }
0x2245   :  { %v26099_v61 = vpop.f32.mrf.mxu1 }
0x2246   :  { %v26078_v59 = vpop.f32.mrf.mxu0  ;;  %v15659_v31 = vadd.f32 %v15658_v29, %v15577_v38 }
0x2247   :  { %v15750_v45 = vadd.f32 %v26078_v59, %v15667_v36  ;;  %v16026_v63 = vpop.f32.mrf.mxu1 }
0x2248   :  { %v15743_v62 = vpop.f32.mrf.mxu0 }
0x2249   :  { %v29252_v40 = vadd.f32 %v26085_v44, %v15750_v45  ;;  %v15744_v50 = vadd.f32 %v15743_v62, %v15659_v31 }
0x224b   :  { %v29254_v37 = vadd.f32 %v15822_v49, %v15744_v50 }
0x224d   :  { %v26113_v16 = vpop.f32.mrf.mxu1 }
0x224e   :  { %v26092_v15 = vpop.f32.mrf.mxu0 }
0x224f   :  { %v16033_v19 = vadd.f32 %v26099_v61, %v26092_v15  ;;  %v16190_v1 = vpop.f32.mrf.mxu1 }
0x2250   :  { %v15935_v23 = vpop.f32.mrf.mxu0 }
0x2251   :  { %v16027_v53 = vadd.f32 %v16026_v63, %v15935_v23 }
0x2255   :  { %v26127_v7 = vpop.f32.mrf.mxu1 }
0x2256   :  { %v26106_v35 = vpop.f32.mrf.mxu0 }
0x2257   :  { %v16116_v28 = vadd.f32 %v26106_v35, %v16033_v19  ;;  %v16354_v56 = vpop.f32.mrf.mxu1 }
0x2258   :  { %v16108_v42 = vpop.f32.mrf.mxu0 }
0x2259   :  { %v16109_v58 = vadd.f32 %v16108_v42, %v16027_v53  ;;  %v16199_v22 = vadd.f32 %v26113_v16, %v16116_v28 }
0x225b   :  { %v16191_v46 = vadd.f32 %v16190_v1, %v16109_v58 }
0x225e   :  { %v26120_v17 = vpop.f32.mrf.mxu0 }
0x225f   :  { %v16282_v51 = vadd.f32 %v26120_v17, %v16199_v22 }
0x2260   :  { %v16275_v25 = vpop.f32.mrf.mxu0 }
0x2261   :  { %v16361_v10 = vadd.f32 %v26127_v7, %v16282_v51  ;;  %v16276_v6 = vadd.f32 %v16275_v25, %v16191_v46 }
0x2263   :  { %v16365_v52 = vmul.f32 0.35355338, %v16361_v10  ;;  %v16355_v41 = vadd.f32 %v16354_v56, %v16276_v6 }
0x2265   :  { %v16364_v39 = vmul.f32 0.35355338, %v16355_v41  ;;  %v16369_v3 = vsel %vm22_vm0, %v16365_v52, -inf }
0x2266   :  { %16370 = vmax.xlane.f32.xlu1 %v16369_v3 }
0x2267   :  { %v16366_v11 = vsel %vm22_vm0, %v16364_v39, -inf }
0x2268   :  { %16367 = vmax.xlane.f32.xlu0 %v16366_v11 }
0x2277   :  { %16396 = vrot.lane.b32.xlu1 %v29142_v13, %s27021_s20 }
0x227b   :  { %16924 = vrot.lane.b32.xlu1 %v29260_v27, %s27011_s10 }
0x227f   :  { %16922 = vrot.lane.b32.xlu1 %v29264_v48, %s27011_s10 }
0x22ef   :  { %v16371_v57 = vpop.xlane.xlu1 %16370 }
0x22f0   :  { %v16373_v8 = vsub.f32 %v16365_v52, %v16371_v57  ;;  %v16926_v52 = vsel %vm1272_vm3, %v29264_v48, 0 }
0x22f1   :  { %v16368_v33 = vpop.xlane.xlu0 %16367 }
0x22f2   :  { %v16372_v43 = vsub.f32 %v16364_v39, %v16368_v33  ;;  %v16376_v55 = vmul.f32 1.442695, %v16373_v8  ;;  %v29316_v8 = vand.u32 4294901760, %v16926_v52 }
0x22f3   :  { %v16397_v32 = vpop.permute.xlu1 %16396 }
0x22f4   :  { %v16374_v54 = vmul.f32 1.442695, %v16372_v43  ;;  %v29268_v4 = vand.u32 4294901760, %v16397_v32 }
0x22f6   :  { %26925 = vpow2.f32 %v16374_v54  ;;  %v29271_v13 = vsub.f32 %v16397_v32, %v29268_v4  ;;  %26128 = vmatprep.subr.mxu0 %v29268_v4  ;;  %v16928_v32 = vsel %vm1272_vm3, %v29260_v27, 0 }
0x22f7   :  { %26129 = vmatpush3.msra.mxu0 %v29268_v4  ;;  %26927 = vpow2.f32 %v16376_v55  ;;  %v16925_v59 = vpop.permute.xlu1 %16924 }
0x22f8   :  { %v29276_v0 = vand.u32 4294901760, %v29271_v13  ;;  %v16932_v61 = vsel %vm1272_vm3, %v16925_v59, 0 }
0x22f9   :  { %v29293_v19 = vand.u32 4294901760, %v16932_v61 }
0x22fa   :  { %v16525_v5 = vsub.f32 %v29271_v13, %v29276_v0 }
0x22fb   :  { %v16923_v23 = vpop.permute.xlu1 %16922  ;;  %v29301_v7 = vsub.f32 %v16932_v61, %v29293_v19 }
0x22fc   :  { %v16526_v14 = vand.u32 4294901760, %v16525_v5  ;;  %v16930_v16 = vsel %vm1272_vm3, %v16923_v23, 0  ;;  %v17002_v5 = vsub.f32 %v16926_v52, %v29316_v8 }
0x22fd   :  { %v29298_v1 = vand.u32 4294901760, %v16930_v16  ;;  %v29308_v56 = vand.u32 4294901760, %v29301_v7 }
0x22fe   :  { %26135 = vmatprep.subr.mxu1 %v16526_v14 }
0x22ff   :  { %26136 = vmatpush3.msra.mxu1 %v16526_v14  ;;  %v29305_v25 = vsub.f32 %v16930_v16, %v29298_v1  ;;  %v17053_v33 = vsub.f32 %v29301_v7, %v29308_v56 }
0x2301   :  { %v29314_v57 = vand.u32 4294901760, %v29305_v25  ;;  %v17054_v14 = vand.u32 4294901760, %v17053_v33 }
0x2303   :  { %v26926_v9 = vpop.eup %26925  ;;  %v17060_v54 = vsub.f32 %v29305_v25, %v29314_v57 }
0x2304   :  { %v16378_v60 = vsel %vm22_vm0, %v26926_v9, 0.0  ;;  %v26928_v30 = vpop.eup %26927 }
0x2305   :  { %16379 = vadd.xlane.f32.xlu0 %v16378_v60  ;;  %v16381_v29 = vsel %vm22_vm0, %v26928_v30, 0.0  ;;  %v17061_v60 = vand.u32 4294901760, %v17060_v54 }
0x2309   :  { %16382 = vadd.xlane.f32.xlu0 %v16381_v29 }
0x231f   :  { %16394 = vrot.lane.b32.xlu0 %v29148_v47, %s27021_s20 }
0x238e   :  { %v16380_v18 = vpop.xlane.xlu0 %16379 }
0x238f   :  { %26929 = vrcp.f32 %v16380_v18 }
0x2392   :  { %v16383_v24 = vpop.xlane.xlu0 %16382 }
0x2393   :  { %26931 = vrcp.f32 %v16383_v24 }
0x2396   :  { %v16395_v38 = vpop.permute.xlu0 %16394 }
0x2397   :  { %v16438_v36 = vand.u32 4294901760, %v16395_v38 }
0x2399   :  { %v29284_v44 = vsub.f32 %v16395_v38, %v16438_v36  ;;  %26130 = vmatprep.subr.mxu0 %v16438_v36 }
0x239a   :  { %26131 = vmatpush3.msra.mxu0 %v16438_v36 }
0x239b   :  { %26142 = vmatprep.subr.mxu0 %v29271_v13  ;;  %v29288_v31 = vand.u32 4294901760, %v29284_v44 }
0x239c   :  { %v26930_v45 = vpop.eup %26929 }
0x239d   :  { %v16386_v62 = vmul.f32 %v26930_v45, %v16380_v18  ;;  %v16532_v47 = vsub.f32 %v29284_v44, %v29288_v31 }
0x239f   :  { %v16388_v50 = vsub.f32 2.0, %v16386_v62  ;;  %v16533_v49 = vand.u32 4294901760, %v16532_v47 }
0x23a0   :  { %v26932_v15 = vpop.eup %26931 }
0x23a1   :  { %v16390_v63 = vmul.f32 %v26930_v45, %v16388_v50  ;;  %v16387_v35 = vmul.f32 %v26932_v15, %v16383_v24  ;;  %26137 = vmatprep.subr.mxu1 %v16533_v49 }
0x23a2   :  { %26138 = vmatpush3.msra.mxu1 %v16533_v49 }
0x23a3   :  { %v16392_v42 = vmul.f32 %v26926_v9, %v16390_v63  ;;  %v16389_v53 = vsub.f32 2.0, %v16387_v35  ;;  %26149 = vmatprep.subr.mxu1 %v29268_v4  ;;  %v17011_v9 = vand.u32 4294901760, %v16928_v32 }
0x23a5   :  { %v16401_v28 = vsel %vm22_vm0, %v16392_v42, 0  ;;  %v16391_v58 = vmul.f32 %v26932_v15, %v16389_v53 }
0x23a6   :  { %v16473_v22 = vand.u32 4294901760, %v16401_v28 }
0x23a7   :  { %v16393_v17 = vmul.f32 %v26928_v30, %v16391_v58  ;;  %v17012_v30 = vsub.f32 %v16928_v32, %v17011_v9 }
0x23a8   :  { %26139 = vmatprep.mubr.f32.mxu1 %v16473_v22  ;;  %v16474_v51 = vsub.f32 %v16401_v28, %v16473_v22 }
0x23a9   :  { %v16404_v46 = vsel %vm22_vm0, %v16393_v17, 0  ;;  %v17013_v29 = vand.u32 4294901760, %v17012_v30 }
0x23aa   :  { %v16483_v10 = vand.u32 4294901760, %v16404_v46  ;;  %v16475_v6 = vand.u32 4294901760, %v16474_v51 }
0x23ac   :  { %v16484_v41 = vsub.f32 %v16404_v46, %v16483_v10  ;;  %26140 = vmatmul.mubr.f32.vlgmr.msra.gmra.mxu1 %v16483_v10  ;;  %v16476_v39 = vsub.f32 %v16474_v51, %v16475_v6 }
0x23ad   :  { %26150 = vmatpush3.msra.mxu1 %v29268_v4  ;;  %26153 = vmatprep.mubr.f32.mxu1 %v16475_v6 }
0x23ae   :  { %26151 = vmatprep.subr.mxu1 %v16438_v36  ;;  %v16477_v3 = vand.u32 4294901760, %v16476_v39  ;;  %v16485_v11 = vand.u32 4294901760, %v16484_v41 }
0x23af   :  { %26152 = vmatpush3.msra.mxu1 %v16438_v36 }
0x23b0   :  { %26163 = vmatprep.subr.mxu1 %v29268_v4  ;;  %26132 = vmatprep.mubr.f32.mxu0 %v16477_v3  ;;  %v16486_v43 = vsub.f32 %v16484_v41, %v16485_v11 }
0x23b1   :  { %26154 = vmatmul.mubr.f32.vlgmr.msra.gmra.mxu1 %v16485_v11 }
0x23b2   :  { %26164 = vmatpush3.msra.mxu1 %v29268_v4  ;;  %26167 = vmatprep.mubr.f32.mxu1 %v16473_v22  ;;  %v16487_v55 = vand.u32 4294901760, %v16486_v43  ;;  %v17003_v4 = vand.u32 4294901760, %v17002_v5 }
0x23b3   :  { %26165 = vmatprep.subr.mxu1 %v16438_v36 }
0x23b4   :  { %26166 = vmatpush3.msra.mxu1 %v16438_v36  ;;  %26133 = vmatmul.mubr.f32.vlgmr.msra.gmra.mxu0 %v16487_v55 }
0x23b5   :  { %26177 = vmatprep.subr.mxu1 %v17054_v14  ;;  %26143 = vmatpush3.msra.mxu0 %v29271_v13  ;;  %v17004_v13 = vsub.f32 %v17002_v5, %v17003_v4 }
0x23b6   :  { %26168 = vmatmul.mubr.f32.vlgmr.msra.gmra.mxu1 %v16483_v10  ;;  %26144 = vmatprep.subr.mxu0 %v29284_v44 }
0x23b7   :  { %26178 = vmatpush3.xpose.msra.mxu1 %v17054_v14  ;;  %26146 = vmatprep.mubr.f32.mxu0 %v16474_v51  ;;  %v17005_v18 = vand.u32 4294901760, %v17004_v13 }
0x23b8   :  { %26179 = vmatprep.subr.mxu1 %v17061_v60  ;;  %26181 = vmatprep.mubr.f32.mxu1 %v29316_v8 }
0x23b9   :  { %26145 = vmatpush3.msra.mxu0 %v29284_v44 }
0x23ba   :  { %26156 = vmatprep.subr.mxu0 %v29276_v0  ;;  %26147 = vmatmul.mubr.f32.vlgmr.msra.gmra.mxu0 %v16484_v41 }
0x23bb   :  { %26157 = vmatpush3.msra.mxu0 %v29276_v0  ;;  %26180 = vmatpush3.xpose.msra.mxu1 %v17061_v60  ;;  %v17014_v0 = vsub.f32 %v17012_v30, %v17013_v29 }
0x23bc   :  { %26158 = vmatprep.subr.mxu0 %v29288_v31  ;;  %26160 = vmatprep.mubr.f32.mxu0 %v16473_v22 }
0x23bd   :  { %26191 = vmatprep.subr.mxu1 %v29293_v19  ;;  %26159 = vmatpush3.msra.mxu0 %v29288_v31  ;;  %v17015_v24 = vand.u32 4294901760, %v17014_v0 }
0x23be   :  { %26170 = vmatprep.subr.mxu0 %v29293_v19  ;;  %26182 = vmatmul.mubr.f32.vlgmr.msra.gmra.mxu1 %v17011_v9 }
0x23bf   :  { %26161 = vmatmul.mubr.f32.vlgmr.msra.gmra.mxu0 %v16483_v10  ;;  %26192 = vmatpush3.xpose.msra.mxu1 %v29293_v19 }
0x23c0   :  { %26171 = vmatpush3.xpose.msra.mxu0 %v29293_v19  ;;  %26195 = vmatprep.mubr.f32.mxu1 %v17003_v4 }
0x23c1   :  { %26172 = vmatprep.subr.mxu0 %v29298_v1  ;;  %26174 = vmatprep.mubr.f32.mxu0 %v17005_v18 }
0x23c2   :  { %26193 = vmatprep.subr.mxu1 %v29298_v1 }
0x23c3   :  { %26194 = vmatpush3.xpose.msra.mxu1 %v29298_v1 }
0x23c4   :  { %26173 = vmatpush3.xpose.msra.mxu0 %v29298_v1  ;;  %26205 = vmatprep.subr.mxu1 %v29293_v19 }
0x23c5   :  { %26184 = vmatprep.subr.mxu0 %v29301_v7 }
0x23c6   :  { %26196 = vmatmul.mubr.f32.vlgmr.msra.gmra.mxu1 %v17013_v29 }
0x23c7   :  { %26175 = vmatmul.mubr.f32.vlgmr.msra.gmra.mxu0 %v17015_v24  ;;  %26206 = vmatpush3.xpose.msra.mxu1 %v29293_v19 }
0x23c8   :  { %26185 = vmatpush3.xpose.msra.mxu0 %v29301_v7  ;;  %26188 = vmatprep.mubr.f32.mxu0 %v17002_v5 }
0x23c9   :  { %26209 = vmatprep.mubr.f32.mxu1 %v29316_v8  ;;  %26186 = vmatprep.subr.mxu0 %v29305_v25 }
0x23ca   :  { %26207 = vmatprep.subr.mxu1 %v29298_v1 }
0x23cb   :  { %26208 = vmatpush3.xpose.msra.mxu1 %v29298_v1 }
0x23cc   :  { %26187 = vmatpush3.xpose.msra.mxu0 %v29305_v25 }
0x23cd   :  { %26198 = vmatprep.subr.mxu0 %v29308_v56 }
0x23ce   :  { %26210 = vmatmul.mubr.f32.vlgmr.msra.gmra.mxu1 %v17011_v9 }
0x23cf   :  { %26189 = vmatmul.mubr.f32.vlgmr.msra.gmra.mxu0 %v17012_v30 }
0x23d0   :  { %26199 = vmatpush3.xpose.msra.mxu0 %v29308_v56  ;;  %26202 = vmatprep.mubr.f32.mxu0 %v29316_v8 }
0x23d1   :  { %26200 = vmatprep.subr.mxu0 %v29314_v57 }
0x23d4   :  { %26201 = vmatpush3.xpose.msra.mxu0 %v29314_v57 }
0x23d7   :  { %26203 = vmatmul.mubr.f32.vlgmr.msra.gmra.mxu0 %v17011_v9 }
0x246c   :  { %v26141_v38 = vpop.f32.mrf.mxu1 }
0x246e   :  { %v16570_v36 = vpop.f32.mrf.mxu1 }
0x2471   :  { %v26155_v45 = vpop.f32.mrf.mxu1 }
0x2473   :  { %v16734_v50 = vpop.f32.mrf.mxu1 }
0x2474   :  { %v26134_v44 = vpop.f32.mrf.mxu0 }
0x2475   :  { %v16577_v59 = vadd.f32 %v26141_v38, %v26134_v44 }
0x2476   :  { %v16479_v31 = vpop.f32.mrf.mxu0  ;;  %v26169_v63 = vpop.f32.mrf.mxu1 }
0x2477   :  { %v16571_v62 = vadd.f32 %v16570_v36, %v16479_v31 }
0x2478   :  { %v16898_v58 = vpop.f32.mrf.mxu1 }
0x247a   :  { %v26148_v47 = vpop.f32.mrf.mxu0 }
0x247b   :  { %v16660_v49 = vadd.f32 %v26148_v47, %v16577_v59 }
0x247c   :  { %v16652_v15 = vpop.f32.mrf.mxu0 }
0x247d   :  { %v16653_v61 = vadd.f32 %v16652_v15, %v16571_v62  ;;  %v16743_v23 = vadd.f32 %v26155_v45, %v16660_v49 }
0x247e   :  { %v26183_v7 = vpop.f32.mrf.mxu1 }
0x247f   :  { %v26162_v35 = vpop.f32.mrf.mxu0  ;;  %v16735_v19 = vadd.f32 %v16734_v50, %v16653_v61 }
0x2480   :  { %v16826_v16 = vadd.f32 %v26162_v35, %v16743_v23  ;;  %v17098_v51 = vpop.f32.mrf.mxu1 }
0x2481   :  { %v16819_v42 = vpop.f32.mrf.mxu0 }
0x2482   :  { %v29357_v53 = vadd.f32 %v26169_v63, %v16826_v16  ;;  %v16820_v28 = vadd.f32 %v16819_v42, %v16735_v19 }
0x2484   :  { %v29359_v1 = vadd.f32 %v16898_v58, %v16820_v28 }
0x2486   :  { %v26197_v10 = vpop.f32.mrf.mxu1 }
0x2487   :  { %v26176_v22 = vpop.f32.mrf.mxu0 }
0x2488   :  { %v17105_v25 = vadd.f32 %v26183_v7, %v26176_v22  ;;  %v17262_v39 = vpop.f32.mrf.mxu1 }
0x2489   :  { %v17007_v17 = vpop.f32.mrf.mxu0 }
0x248a   :  { %v17099_v56 = vadd.f32 %v17098_v51, %v17007_v17 }
0x248e   :  { %v26211_v11 = vpop.f32.mrf.mxu1 }
0x248f   :  { %v26190_v46 = vpop.f32.mrf.mxu0 }
0x2490   :  { %v17188_v52 = vadd.f32 %v26190_v46, %v17105_v25  ;;  %v17426_v54 = vpop.f32.mrf.mxu1 }
0x2491   :  { %v17180_v6 = vpop.f32.mrf.mxu0 }
0x2492   :  { %v17181_v41 = vadd.f32 %v17180_v6, %v17099_v56  ;;  %v17271_v3 = vadd.f32 %v26197_v10, %v17188_v52 }
0x2494   :  { %v17263_v33 = vadd.f32 %v17262_v39, %v17181_v41 }
0x2497   :  { %v26204_v57 = vpop.f32.mrf.mxu0 }
0x2498   :  { %v17354_v8 = vadd.f32 %v26204_v57, %v17271_v3 }
0x2499   :  { %v17347_v43 = vpop.f32.mrf.mxu0 }
0x249a   :  { %v17433_v32 = vadd.f32 %v26211_v11, %v17354_v8  ;;  %v17348_v55 = vadd.f32 %v17347_v43, %v17263_v33 }
0x249c   :  { %v17437_v5 = vmul.f32 0.35355338, %v17433_v32  ;;  %v17427_v14 = vadd.f32 %v17426_v54, %v17348_v55 }
0x249e   :  { %v17436_v9 = vmul.f32 0.35355338, %v17427_v14  ;;  %v17441_v60 = vsel %vm22_vm0, %v17437_v5, -inf }
0x249f   :  { %17442 = vmax.xlane.f32.xlu1 %v17441_v60 }
0x24a0   :  { %v17438_v4 = vsel %vm22_vm0, %v17436_v9, -inf }
0x24a1   :  { %17439 = vmax.xlane.f32.xlu0 %v17438_v4 }
0x24b0   :  { %17468 = vrot.lane.b32.xlu1 %v29260_v27, %s27012_s11 }
0x24b4   :  { %17992 = vrot.lane.b32.xlu1 %v29260_v27, %s27014_s13 }
0x24b8   :  { %17990 = vrot.lane.b32.xlu1 %v29264_v48, %s27014_s13 }
0x24bc   :  { %17988 = vrot.lane.b32.xlu1 %v29260_v27, %s27013_s12 }
0x2528   :  { %v17443_v30 = vpop.xlane.xlu1 %17442 }
0x2529   :  { %v17445_v13 = vsub.f32 %v17437_v5, %v17443_v30 }
0x252a   :  { %v17440_v29 = vpop.xlane.xlu0 %17439 }
0x252b   :  { %v17444_v18 = vsub.f32 %v17436_v9, %v17440_v29  ;;  %v17448_v24 = vmul.f32 1.442695, %v17445_v13 }
0x252c   :  { %v17469_v0 = vpop.permute.xlu1 %17468 }
0x252d   :  { %v17446_v38 = vmul.f32 1.442695, %v17444_v18  ;;  %v29371_v36 = vand.u32 4294901760, %v17469_v0 }
0x252f   :  { %26933 = vpow2.f32 %v17446_v38  ;;  %v29374_v44 = vsub.f32 %v17469_v0, %v29371_v36  ;;  %26212 = vmatprep.subr.mxu0 %v29371_v36 }
0x2530   :  { %26213 = vmatpush3.msra.mxu0 %v29371_v36  ;;  %26935 = vpow2.f32 %v17448_v24  ;;  %v17993_v19 = vpop.permute.xlu1 %17992 }
0x2531   :  { %v29379_v59 = vand.u32 4294901760, %v29374_v44  ;;  %v18000_v51 = vsel %vm1272_vm3, %v17993_v19, 0 }
0x2532   :  { %v29403_v6 = vand.u32 4294901760, %v18000_v51 }
0x2533   :  { %v17597_v31 = vsub.f32 %v29374_v44, %v29379_v59 }
0x2534   :  { %v17991_v46 = vpop.permute.xlu1 %17990  ;;  %v29411_v8 = vsub.f32 %v18000_v51, %v29403_v6 }
0x2535   :  { %v17598_v45 = vand.u32 4294901760, %v17597_v31  ;;  %v17998_v56 = vsel %vm1272_vm3, %v17991_v46, 0 }
0x2536   :  { %v29408_v11 = vand.u32 4294901760, %v17998_v56  ;;  %v29418_v9 = vand.u32 4294901760, %v29411_v8 }
0x2537   :  { %26219 = vmatprep.subr.mxu1 %v17598_v45 }
0x2538   :  { %26220 = vmatpush3.msra.mxu1 %v17598_v45  ;;  %v29415_v54 = vsub.f32 %v17998_v56, %v29408_v11  ;;  %v17989_v0 = vpop.permute.xlu1 %17988  ;;  %v18121_v38 = vsub.f32 %v29411_v8, %v29418_v9 }
0x2539   :  { %v17996_v45 = vsel %vm1272_vm3, %v17989_v0, 0 }
0x253a   :  { %v29424_v18 = vand.u32 4294901760, %v29415_v54 }
0x253c   :  { %v26934_v62 = vpop.eup %26933 }
0x253d   :  { %v17450_v47 = vsel %vm22_vm0, %v26934_v62, 0.0  ;;  %v26936_v50 = vpop.eup %26935 }
0x253e   :  { %17451 = vadd.xlane.f32.xlu0 %v17450_v47  ;;  %v17453_v49 = vsel %vm22_vm0, %v26936_v50, 0.0  ;;  %v18128_v47 = vsub.f32 %v29415_v54, %v29424_v18 }
0x2542   :  { %17454 = vadd.xlane.f32.xlu0 %v17453_v49  ;;  %v18122_v49 = vand.u32 4294901760, %v18121_v38 }
0x2558   :  { %17466 = vrot.lane.b32.xlu0 %v29264_v48, %s27012_s11 }
0x255c   :  { %17986 = vrot.lane.b32.xlu0 %v29264_v48, %s27013_s12 }
0x25c7   :  { %v17452_v15 = vpop.xlane.xlu0 %17451 }
0x25c8   :  { %26937 = vrcp.f32 %v17452_v15 }
0x25cb   :  { %v17455_v61 = vpop.xlane.xlu0 %17454 }
0x25cc   :  { %26939 = vrcp.f32 %v17455_v61 }
0x25cf   :  { %v17467_v23 = vpop.permute.xlu0 %17466 }
0x25d0   :  { %v29389_v63 = vand.u32 4294901760, %v17467_v23 }
0x25d2   :  { %v29392_v35 = vsub.f32 %v17467_v23, %v29389_v63  ;;  %26214 = vmatprep.subr.mxu0 %v29389_v63 }
0x25d3   :  { %26215 = vmatpush3.msra.mxu0 %v29389_v63  ;;  %v17987_v55 = vpop.permute.xlu0 %17986 }
0x25d4   :  { %26226 = vmatprep.subr.mxu0 %v29374_v44  ;;  %v29398_v16 = vand.u32 4294901760, %v29392_v35  ;;  %v17994_v4 = vsel %vm1272_vm3, %v17987_v55, 0 }
0x25d5   :  { %v26938_v42 = vpop.eup %26937  ;;  %v29426_v24 = vand.u32 4294901760, %v17994_v4 }
0x25d6   :  { %v17458_v28 = vmul.f32 %v26938_v42, %v17452_v15  ;;  %v17604_v58 = vsub.f32 %v29392_v35, %v29398_v16  ;;  %v18079_v15 = vand.u32 4294901760, %v17996_v45 }
0x25d8   :  { %v17460_v22 = vsub.f32 2.0, %v17458_v28  ;;  %v17605_v7 = vand.u32 4294901760, %v17604_v58  ;;  %v18080_v23 = vsub.f32 %v17996_v45, %v18079_v15 }
0x25d9   :  { %v26940_v17 = vpop.eup %26939 }
0x25da   :  { %v17462_v25 = vmul.f32 %v26938_v42, %v17460_v22  ;;  %v17459_v10 = vmul.f32 %v26940_v17, %v17455_v61  ;;  %26221 = vmatprep.subr.mxu1 %v17605_v7 }
0x25db   :  { %26222 = vmatpush3.msra.mxu1 %v17605_v7 }
0x25dc   :  { %v17464_v52 = vmul.f32 %v26934_v62, %v17462_v25  ;;  %v17461_v41 = vsub.f32 2.0, %v17459_v10  ;;  %26233 = vmatprep.subr.mxu1 %v29371_v36 }
0x25de   :  { %v17473_v39 = vsel %vm22_vm0, %v17464_v52, 0  ;;  %v17463_v3 = vmul.f32 %v26940_v17, %v17461_v41 }
0x25df   :  { %v17545_v57 = vand.u32 4294901760, %v17473_v39 }
0x25e0   :  { %v17465_v33 = vmul.f32 %v26936_v50, %v17463_v3  ;;  %v18070_v50 = vsub.f32 %v17994_v4, %v29426_v24 }
0x25e1   :  { %26223 = vmatprep.mubr.f32.mxu1 %v17545_v57  ;;  %v17546_v43 = vsub.f32 %v17473_v39, %v17545_v57 }
0x25e2   :  { %v17476_v32 = vsel %vm22_vm0, %v17465_v33, 0  ;;  %v18071_v61 = vand.u32 4294901760, %v18070_v50 }
0x25e3   :  { %v17555_v5 = vand.u32 4294901760, %v17476_v32  ;;  %v17547_v14 = vand.u32 4294901760, %v17546_v43 }
0x25e5   :  { %v17556_v60 = vsub.f32 %v17476_v32, %v17555_v5  ;;  %26224 = vmatmul.mubr.f32.vlgmr.msra.gmra.mxu1 %v17555_v5  ;;  %v17548_v30 = vsub.f32 %v17546_v43, %v17547_v14 }
0x25e6   :  { %26234 = vmatpush3.msra.mxu1 %v29371_v36  ;;  %26237 = vmatprep.mubr.f32.mxu1 %v17547_v14 }
0x25e7   :  { %26235 = vmatprep.subr.mxu1 %v29389_v63  ;;  %v17549_v13 = vand.u32 4294901760, %v17548_v30  ;;  %v17557_v29 = vand.u32 4294901760, %v17556_v60 }
0x25e8   :  { %26236 = vmatpush3.msra.mxu1 %v29389_v63 }
0x25e9   :  { %26247 = vmatprep.subr.mxu1 %v29371_v36  ;;  %26216 = vmatprep.mubr.f32.mxu0 %v17549_v13  ;;  %v17558_v31 = vsub.f32 %v17556_v60, %v17557_v29 }
0x25ea   :  { %26238 = vmatmul.mubr.f32.vlgmr.msra.gmra.mxu1 %v17557_v29 }
0x25eb   :  { %26248 = vmatpush3.msra.mxu1 %v29371_v36  ;;  %26251 = vmatprep.mubr.f32.mxu1 %v17545_v57  ;;  %v17559_v62 = vand.u32 4294901760, %v17558_v31  ;;  %v18129_v36 = vand.u32 4294901760, %v18128_v47 }
0x25ec   :  { %26249 = vmatprep.subr.mxu1 %v29389_v63 }
0x25ed   :  { %26250 = vmatpush3.msra.mxu1 %v29389_v63  ;;  %26217 = vmatmul.mubr.f32.vlgmr.msra.gmra.mxu0 %v17559_v62  ;;  %v18081_v63 = vand.u32 4294901760, %v18080_v23 }
0x25ee   :  { %26261 = vmatprep.subr.mxu1 %v18122_v49  ;;  %26227 = vmatpush3.msra.mxu0 %v29374_v44  ;;  %v18072_v44 = vsub.f32 %v18070_v50, %v18071_v61 }
0x25ef   :  { %26252 = vmatmul.mubr.f32.vlgmr.msra.gmra.mxu1 %v17555_v5  ;;  %26228 = vmatprep.subr.mxu0 %v29392_v35 }
0x25f0   :  { %26262 = vmatpush3.xpose.msra.mxu1 %v18122_v49  ;;  %26230 = vmatprep.mubr.f32.mxu0 %v17546_v43 }
0x25f1   :  { %26263 = vmatprep.subr.mxu1 %v18129_v36  ;;  %26265 = vmatprep.mubr.f32.mxu1 %v29426_v24 }
0x25f2   :  { %26229 = vmatpush3.msra.mxu0 %v29392_v35  ;;  %v18073_v35 = vand.u32 4294901760, %v18072_v44 }
0x25f3   :  { %26240 = vmatprep.subr.mxu0 %v29379_v59  ;;  %26231 = vmatmul.mubr.f32.vlgmr.msra.gmra.mxu0 %v17556_v60 }
0x25f4   :  { %26241 = vmatpush3.msra.mxu0 %v29379_v59  ;;  %26264 = vmatpush3.xpose.msra.mxu1 %v18129_v36  ;;  %v18082_v59 = vsub.f32 %v18080_v23, %v18081_v63 }
0x25f5   :  { %26242 = vmatprep.subr.mxu0 %v29398_v16  ;;  %26244 = vmatprep.mubr.f32.mxu0 %v17545_v57 }
0x25f6   :  { %26275 = vmatprep.subr.mxu1 %v29403_v6  ;;  %26243 = vmatpush3.msra.mxu0 %v29398_v16  ;;  %v18083_v19 = vand.u32 4294901760, %v18082_v59 }
0x25f7   :  { %26254 = vmatprep.subr.mxu0 %v29403_v6  ;;  %26266 = vmatmul.mubr.f32.vlgmr.msra.gmra.mxu1 %v18079_v15 }
0x25f8   :  { %26245 = vmatmul.mubr.f32.vlgmr.msra.gmra.mxu0 %v17555_v5  ;;  %26276 = vmatpush3.xpose.msra.mxu1 %v29403_v6 }
0x25f9   :  { %26255 = vmatpush3.xpose.msra.mxu0 %v29403_v6  ;;  %26279 = vmatprep.mubr.f32.mxu1 %v18071_v61 }
0x25fa   :  { %26256 = vmatprep.subr.mxu0 %v29408_v11  ;;  %26258 = vmatprep.mubr.f32.mxu0 %v18073_v35 }
0x25fb   :  { %26277 = vmatprep.subr.mxu1 %v29408_v11 }
0x25fc   :  { %26278 = vmatpush3.xpose.msra.mxu1 %v29408_v11 }
0x25fd   :  { %26257 = vmatpush3.xpose.msra.mxu0 %v29408_v11  ;;  %26289 = vmatprep.subr.mxu1 %v29403_v6 }
0x25fe   :  { %26268 = vmatprep.subr.mxu0 %v29411_v8 }
0x25ff   :  { %26280 = vmatmul.mubr.f32.vlgmr.msra.gmra.mxu1 %v18081_v63 }
0x2600   :  { %26259 = vmatmul.mubr.f32.vlgmr.msra.gmra.mxu0 %v18083_v19  ;;  %26290 = vmatpush3.xpose.msra.mxu1 %v29403_v6 }
0x2601   :  { %26269 = vmatpush3.xpose.msra.mxu0 %v29411_v8  ;;  %26272 = vmatprep.mubr.f32.mxu0 %v18070_v50 }
0x2602   :  { %26293 = vmatprep.mubr.f32.mxu1 %v29426_v24  ;;  %26270 = vmatprep.subr.mxu0 %v29415_v54 }
0x2603   :  { %26291 = vmatprep.subr.mxu1 %v29408_v11 }
0x2604   :  { %26292 = vmatpush3.xpose.msra.mxu1 %v29408_v11 }
0x2605   :  { %26271 = vmatpush3.xpose.msra.mxu0 %v29415_v54 }
0x2606   :  { %26282 = vmatprep.subr.mxu0 %v29418_v9 }
0x2607   :  { %26294 = vmatmul.mubr.f32.vlgmr.msra.gmra.mxu1 %v18079_v15 }
0x2608   :  { %26273 = vmatmul.mubr.f32.vlgmr.msra.gmra.mxu0 %v18080_v23 }
0x2609   :  { %26283 = vmatpush3.xpose.msra.mxu0 %v29418_v9  ;;  %26286 = vmatprep.mubr.f32.mxu0 %v29426_v24 }
0x260a   :  { %26284 = vmatprep.subr.mxu0 %v29424_v18 }
0x260d   :  { %26285 = vmatpush3.xpose.msra.mxu0 %v29424_v18 }
0x2610   :  { %26287 = vmatmul.mubr.f32.vlgmr.msra.gmra.mxu0 %v18079_v15 }
0x26a5   :  { %v26225_v16 = vpop.f32.mrf.mxu1 }
0x26a7   :  { %v17642_v42 = vpop.f32.mrf.mxu1 }
0x26aa   :  { %v26239_v22 = vpop.f32.mrf.mxu1 }
0x26ac   :  { %v17806_v51 = vpop.f32.mrf.mxu1 }
0x26ad   :  { %v26218_v28 = vpop.f32.mrf.mxu0 }
0x26ae   :  { %v17649_v7 = vadd.f32 %v26225_v16, %v26218_v28 }
0x26af   :  { %v17551_v58 = vpop.f32.mrf.mxu0  ;;  %v26253_v52 = vpop.f32.mrf.mxu1 }
0x26b0   :  { %v17643_v46 = vadd.f32 %v17642_v42, %v17551_v58 }
0x26b1   :  { %v17970_v33 = vpop.f32.mrf.mxu1 }
0x26b3   :  { %v26232_v17 = vpop.f32.mrf.mxu0 }
0x26b4   :  { %v17732_v25 = vadd.f32 %v26232_v17, %v17649_v7 }
0x26b5   :  { %v17724_v10 = vpop.f32.mrf.mxu0 }
0x26b6   :  { %v17725_v6 = vadd.f32 %v17724_v10, %v17643_v46  ;;  %v17815_v56 = vadd.f32 %v26239_v22, %v17732_v25 }
0x26b7   :  { %v26267_v55 = vpop.f32.mrf.mxu1 }
0x26b8   :  { %v26246_v41 = vpop.f32.mrf.mxu0  ;;  %v17807_v39 = vadd.f32 %v17806_v51, %v17725_v6 }
0x26b9   :  { %v17898_v3 = vadd.f32 %v26246_v41, %v17815_v56  ;;  %v18166_v5 = vpop.f32.mrf.mxu1 }
0x26ba   :  { %v17891_v11 = vpop.f32.mrf.mxu0 }
0x26bb   :  { %v17977_v57 = vadd.f32 %v26253_v52, %v17898_v3  ;;  %v17892_v8 = vadd.f32 %v17891_v11, %v17807_v39 }
0x26bd   :  { %17981 = vst.msk [vmem:[#allocation3 + $0x18] sm:$0xff] %vm1272_vm3, %v17977_v57  ;;  %v17971_v43 = vadd.f32 %v17970_v33, %v17892_v8 }
0x26bf   :  { %17980 = vst.msk [vmem:[#allocation3 + $0x10] sm:$0xff] %vm1272_vm3, %v17971_v43  ;;  %v26281_v60 = vpop.f32.mrf.mxu1 }
0x26c0   :  { %v26260_v32 = vpop.f32.mrf.mxu0 }
0x26c1   :  { %v18173_v9 = vadd.f32 %v26267_v55, %v26260_v32  ;;  %v18330_v18 = vpop.f32.mrf.mxu1 }
0x26c2   :  { %v18075_v54 = vpop.f32.mrf.mxu0 }
0x26c3   :  { %v18167_v30 = vadd.f32 %v18166_v5, %v18075_v54 }
0x26c7   :  { %v26295_v24 = vpop.f32.mrf.mxu1 }
0x26c8   :  { %v26274_v14 = vpop.f32.mrf.mxu0 }
0x26c9   :  { %v18256_v13 = vadd.f32 %v26274_v14, %v18173_v9  ;;  %v18494_v49 = vpop.f32.mrf.mxu1 }
0x26ca   :  { %v18248_v4 = vpop.f32.mrf.mxu0 }
0x26cb   :  { %v18249_v29 = vadd.f32 %v18248_v4, %v18167_v30  ;;  %v18339_v0 = vadd.f32 %v26281_v60, %v18256_v13 }
0x26cd   :  { %v18331_v45 = vadd.f32 %v18330_v18, %v18249_v29 }
0x26d0   :  { %v26288_v38 = vpop.f32.mrf.mxu0 }
0x26d1   :  { %v18422_v31 = vadd.f32 %v26288_v38, %v18339_v0 }
0x26d2   :  { %v18415_v62 = vpop.f32.mrf.mxu0 }
0x26d3   :  { %v18501_v47 = vadd.f32 %v26295_v24, %v18422_v31  ;;  %v18416_v50 = vadd.f32 %v18415_v62, %v18331_v45 }
0x26d5   :  { %v18505_v15 = vmul.f32 0.35355338, %v18501_v47  ;;  %v18495_v36 = vadd.f32 %v18494_v49, %v18416_v50 }
0x26d7   :  { %v18504_v61 = vmul.f32 0.35355338, %v18495_v36  ;;  %v18509_v23 = vsel %vm22_vm0, %v18505_v15, -inf }
0x26d8   :  { %18510 = vmax.xlane.f32.xlu1 %v18509_v23 }
0x26d9   :  { %v18506_v44 = vsel %vm22_vm0, %v18504_v61, -inf }
0x26da   :  { %18507 = vmax.xlane.f32.xlu0 %v18506_v44 }
0x26e9   :  { %18536 = vrot.lane.b32.xlu1 %v29260_v27, %s27015_s14 }
0x26ed   :  { %19068 = vrot.lane.b32.xlu1 %v29260_v27, %s27017_s16 }
0x26f1   :  { %19066 = vrot.lane.b32.xlu1 %v29264_v48, %s27017_s16 }
0x26f5   :  { %19064 = vrot.lane.b32.xlu1 %v29260_v27, %s27016_s15 }
0x2761   :  { %v18511_v63 = vpop.xlane.xlu1 %18510 }
0x2762   :  { %v18513_v35 = vsub.f32 %v18505_v15, %v18511_v63 }
0x2763   :  { %v18508_v59 = vpop.xlane.xlu0 %18507 }
0x2764   :  { %v18512_v19 = vsub.f32 %v18504_v61, %v18508_v59  ;;  %v18516_v42 = vmul.f32 1.442695, %v18513_v35 }
0x2765   :  { %v18537_v16 = vpop.permute.xlu1 %18536 }
0x2766   :  { %v18514_v28 = vmul.f32 1.442695, %v18512_v19  ;;  %v29481_v58 = vand.u32 4294901760, %v18537_v16 }
0x2768   :  { %26941 = vpow2.f32 %v18514_v28  ;;  %v29484_v22 = vsub.f32 %v18537_v16, %v29481_v58  ;;  %26296 = vmatprep.subr.mxu0 %v29481_v58 }
0x2769   :  { %26297 = vmatpush3.msra.mxu0 %v29481_v58  ;;  %26943 = vpow2.f32 %v18516_v42  ;;  %v19069_v3 = vpop.permute.xlu1 %19068 }
0x276a   :  { %v29489_v27 = vand.u32 4294901760, %v29484_v22  ;;  %v19076_v55 = vsel %vm1272_vm3, %v19069_v3, 0 }
0x276b   :  { %v29513_v9 = vand.u32 4294901760, %v19076_v55 }
0x276c   :  { %v18665_v7 = vsub.f32 %v29484_v22, %v29489_v27 }
0x276d   :  { %v19067_v54 = vpop.permute.xlu1 %19066  ;;  %v29521_v24 = vsub.f32 %v19076_v55, %v29513_v9 }
0x276e   :  { %v18666_v17 = vand.u32 4294901760, %v18665_v7  ;;  %v19074_v60 = vsel %vm1272_vm3, %v19067_v54, 0 }
0x276f   :  { %v29518_v18 = vand.u32 4294901760, %v19074_v60  ;;  %v29528_v15 = vand.u32 4294901760, %v29521_v24 }
0x2770   :  { %26303 = vmatprep.subr.mxu1 %v18666_v17 }
0x2771   :  { %26304 = vmatpush3.msra.mxu1 %v18666_v17  ;;  %v29525_v47 = vsub.f32 %v19074_v60, %v29518_v18  ;;  %v19065_v59 = vpop.permute.xlu1 %19064  ;;  %v19197_v16 = vsub.f32 %v29521_v24, %v29528_v15 }
0x2772   :  { %v19072_v28 = vsel %vm1272_vm3, %v19065_v59, 0 }
0x2773   :  { %v29534_v35 = vand.u32 4294901760, %v29525_v47 }
0x2775   :  { %v26942_v51 = vpop.eup %26941  ;;  %v19204_v17 = vsub.f32 %v29525_v47, %v29534_v35 }
0x2776   :  { %v18518_v46 = vsel %vm22_vm0, %v26942_v51, 0.0  ;;  %v26944_v25 = vpop.eup %26943 }
0x2777   :  { %18519 = vadd.xlane.f32.xlu0 %v18518_v46  ;;  %v18521_v10 = vsel %vm22_vm0, %v26944_v25, 0.0  ;;  %v19198_v46 = vand.u32 4294901760, %v19197_v16 }
0x277b   :  { %18522 = vadd.xlane.f32.xlu0 %v18521_v10 }
0x2791   :  { %18534 = vrot.lane.b32.xlu0 %v29264_v48, %s27015_s14 }
0x2795   :  { %19062 = vrot.lane.b32.xlu0 %v29264_v48, %s27016_s15 }
0x2800   :  { %v18520_v6 = vpop.xlane.xlu0 %18519 }
0x2801   :  { %26945 = vrcp.f32 %v18520_v6 }
0x2804   :  { %v18523_v56 = vpop.xlane.xlu0 %18522 }
0x2805   :  { %26947 = vrcp.f32 %v18523_v56 }
0x2808   :  { %v18535_v52 = vpop.permute.xlu0 %18534 }
0x2809   :  { %v29499_v41 = vand.u32 4294901760, %v18535_v52 }
0x280b   :  { %v29502_v39 = vsub.f32 %v18535_v52, %v29499_v41  ;;  %26298 = vmatprep.subr.mxu0 %v29499_v41 }
0x280c   :  { %26299 = vmatpush3.msra.mxu0 %v29499_v41  ;;  %v19063_v62 = vpop.permute.xlu0 %19062 }
0x280d   :  { %26310 = vmatprep.subr.mxu0 %v29484_v22  ;;  %v29508_v11 = vand.u32 4294901760, %v29502_v39  ;;  %v19070_v61 = vsel %vm1272_vm3, %v19063_v62, 0 }
0x280e   :  { %v26946_v48 = vpop.eup %26945  ;;  %v29536_v19 = vand.u32 4294901760, %v19070_v61 }
0x280f   :  { %v18526_v57 = vmul.f32 %v26946_v48, %v18520_v6  ;;  %v18672_v8 = vsub.f32 %v29502_v39, %v29508_v11 }
0x2811   :  { %v18528_v33 = vsub.f32 2.0, %v18526_v57  ;;  %v18673_v43 = vand.u32 4294901760, %v18672_v8 }
0x2812   :  { %v26948_v32 = vpop.eup %26947 }
0x2813   :  { %v18530_v5 = vmul.f32 %v26946_v48, %v18528_v33  ;;  %v18527_v14 = vmul.f32 %v26948_v32, %v18523_v56  ;;  %26305 = vmatprep.subr.mxu1 %v18673_v43 }
0x2814   :  { %26306 = vmatpush3.msra.mxu1 %v18673_v43 }
0x2815   :  { %v18532_v4 = vmul.f32 %v26942_v51, %v18530_v5  ;;  %v18529_v30 = vsub.f32 2.0, %v18527_v14  ;;  %26317 = vmatprep.subr.mxu1 %v29481_v58  ;;  %v19146_v51 = vsub.f32 %v19070_v61, %v29536_v19 }
0x2817   :  { %v18541_v13 = vsel %vm22_vm0, %v18532_v4, 0  ;;  %v18531_v29 = vmul.f32 %v26948_v32, %v18529_v30  ;;  %v19147_v10 = vand.u32 4294901760, %v19146_v51 }
0x2818   :  { %v18613_v0 = vand.u32 4294901760, %v18541_v13 }
0x2819   :  { %v18533_v38 = vmul.f32 %v26944_v25, %v18531_v29  ;;  %v19155_v25 = vand.u32 4294901760, %v19072_v28 }
0x281a   :  { %26307 = vmatprep.mubr.f32.mxu1 %v18613_v0  ;;  %v18614_v31 = vsub.f32 %v18541_v13, %v18613_v0 }
0x281b   :  { %v18544_v45 = vsel %vm22_vm0, %v18533_v38, 0  ;;  %v19156_v6 = vsub.f32 %v19072_v28, %v19155_v25 }
0x281c   :  { %v18623_v50 = vand.u32 4294901760, %v18544_v45  ;;  %v18615_v49 = vand.u32 4294901760, %v18614_v31 }
0x281d   :  { %v19157_v56 = vand.u32 4294901760, %v19156_v6 }
0x281e   :  { %v18624_v36 = vsub.f32 %v18544_v45, %v18623_v50  ;;  %26308 = vmatmul.mubr.f32.vlgmr.msra.gmra.mxu1 %v18623_v50  ;;  %v18616_v23 = vsub.f32 %v18614_v31, %v18615_v49 }
0x281f   :  { %26318 = vmatpush3.msra.mxu1 %v29481_v58  ;;  %26321 = vmatprep.mubr.f32.mxu1 %v18615_v49 }
0x2820   :  { %26319 = vmatprep.subr.mxu1 %v29499_v41  ;;  %v18617_v44 = vand.u32 4294901760, %v18616_v23  ;;  %v18625_v63 = vand.u32 4294901760, %v18624_v36 }
0x2821   :  { %26320 = vmatpush3.msra.mxu1 %v29499_v41 }
0x2822   :  { %26331 = vmatprep.subr.mxu1 %v29481_v58  ;;  %26300 = vmatprep.mubr.f32.mxu0 %v18617_v44  ;;  %v18626_v42 = vsub.f32 %v18624_v36, %v18625_v63 }
0x2823   :  { %26322 = vmatmul.mubr.f32.vlgmr.msra.gmra.mxu1 %v18625_v63 }
0x2824   :  { %26332 = vmatpush3.msra.mxu1 %v29481_v58  ;;  %26335 = vmatprep.mubr.f32.mxu1 %v18613_v0  ;;  %v18627_v7 = vand.u32 4294901760, %v18626_v42  ;;  %v19205_v58 = vand.u32 4294901760, %v19204_v17 }
0x2825   :  { %26333 = vmatprep.subr.mxu1 %v29499_v41 }
0x2826   :  { %26334 = vmatpush3.msra.mxu1 %v29499_v41  ;;  %26301 = vmatmul.mubr.f32.vlgmr.msra.gmra.mxu0 %v18627_v7 }
0x2827   :  { %26345 = vmatprep.subr.mxu1 %v19198_v46  ;;  %26311 = vmatpush3.msra.mxu0 %v29484_v22  ;;  %v19148_v22 = vsub.f32 %v19146_v51, %v19147_v10 }
0x2828   :  { %26336 = vmatmul.mubr.f32.vlgmr.msra.gmra.mxu1 %v18623_v50  ;;  %26312 = vmatprep.subr.mxu0 %v29502_v39 }
0x2829   :  { %26346 = vmatpush3.xpose.msra.mxu1 %v19198_v46  ;;  %26314 = vmatprep.mubr.f32.mxu0 %v18614_v31  ;;  %v19149_v52 = vand.u32 4294901760, %v19148_v22  ;;  %v29586_v22 = vld [vmem:[#allocation2 + $0x18] sm:$0xff] }
0x282a   :  { %26347 = vmatprep.subr.mxu1 %v19205_v58  ;;  %26349 = vmatprep.mubr.f32.mxu1 %v29536_v19 }
0x282b   :  { %26313 = vmatpush3.msra.mxu0 %v29502_v39 }
0x282c   :  { %26324 = vmatprep.subr.mxu0 %v29489_v27  ;;  %26315 = vmatmul.mubr.f32.vlgmr.msra.gmra.mxu0 %v18624_v36 }
0x282d   :  { %26325 = vmatpush3.msra.mxu0 %v29489_v27  ;;  %26348 = vmatpush3.xpose.msra.mxu1 %v19205_v58  ;;  %v19158_v27 = vsub.f32 %v19156_v6, %v19157_v56 }
0x282e   :  { %26326 = vmatprep.subr.mxu0 %v29508_v11  ;;  %26328 = vmatprep.mubr.f32.mxu0 %v18613_v0 }
0x282f   :  { %26359 = vmatprep.subr.mxu1 %v29513_v9  ;;  %26327 = vmatpush3.msra.mxu0 %v29508_v11  ;;  %v19159_v41 = vand.u32 4294901760, %v19158_v27 }
0x2830   :  { %26338 = vmatprep.subr.mxu0 %v29513_v9  ;;  %26350 = vmatmul.mubr.f32.vlgmr.msra.gmra.mxu1 %v19155_v25 }
0x2831   :  { %26329 = vmatmul.mubr.f32.vlgmr.msra.gmra.mxu0 %v18623_v50  ;;  %26360 = vmatpush3.xpose.msra.mxu1 %v29513_v9 }
0x2832   :  { %26339 = vmatpush3.xpose.msra.mxu0 %v29513_v9  ;;  %26363 = vmatprep.mubr.f32.mxu1 %v19147_v10 }
0x2833   :  { %26340 = vmatprep.subr.mxu0 %v29518_v18  ;;  %26342 = vmatprep.mubr.f32.mxu0 %v19149_v52 }
0x2834   :  { %26361 = vmatprep.subr.mxu1 %v29518_v18 }
0x2835   :  { %26362 = vmatpush3.xpose.msra.mxu1 %v29518_v18 }
0x2836   :  { %26341 = vmatpush3.xpose.msra.mxu0 %v29518_v18  ;;  %26373 = vmatprep.subr.mxu1 %v29513_v9 }
0x2837   :  { %26352 = vmatprep.subr.mxu0 %v29521_v24 }
0x2838   :  { %26364 = vmatmul.mubr.f32.vlgmr.msra.gmra.mxu1 %v19157_v56  ;;  %v29590_v56 = vld [vmem:[#allocation2 + $0x10] sm:$0xff] }
0x2839   :  { %26343 = vmatmul.mubr.f32.vlgmr.msra.gmra.mxu0 %v19159_v41  ;;  %26374 = vmatpush3.xpose.msra.mxu1 %v29513_v9 }
0x283a   :  { %26353 = vmatpush3.xpose.msra.mxu0 %v29521_v24  ;;  %26356 = vmatprep.mubr.f32.mxu0 %v19146_v51 }
0x283b   :  { %26377 = vmatprep.mubr.f32.mxu1 %v29536_v19  ;;  %26354 = vmatprep.subr.mxu0 %v29525_v47 }
0x283c   :  { %26375 = vmatprep.subr.mxu1 %v29518_v18 }
0x283d   :  { %26376 = vmatpush3.xpose.msra.mxu1 %v29518_v18 }
0x283e   :  { %26355 = vmatpush3.xpose.msra.mxu0 %v29525_v47 }
0x283f   :  { %26366 = vmatprep.subr.mxu0 %v29528_v15 }
0x2840   :  { %26378 = vmatmul.mubr.f32.vlgmr.msra.gmra.mxu1 %v19155_v25 }
0x2841   :  { %26357 = vmatmul.mubr.f32.vlgmr.msra.gmra.mxu0 %v19156_v6  ;;  %v26987_v6 = vld [vmem:[#allocation2 + $0x18] sm:$0xff] }
0x2842   :  { %26367 = vmatpush3.xpose.msra.mxu0 %v29528_v15  ;;  %26370 = vmatprep.mubr.f32.mxu0 %v29536_v19 }
0x2843   :  { %26368 = vmatprep.subr.mxu0 %v29534_v35 }
0x2846   :  { %26369 = vmatpush3.xpose.msra.mxu0 %v29534_v35 }
0x2849   :  { %26371 = vmatmul.mubr.f32.vlgmr.msra.gmra.mxu0 %v19155_v25 }
0x28de   :  { %v26309_v39 = vpop.f32.mrf.mxu1 }
0x28e0   :  { %v18710_v3 = vpop.f32.mrf.mxu1 }
0x28e3   :  { %v26323_v8 = vpop.f32.mrf.mxu1 }
0x28e5   :  { %v18874_v32 = vpop.f32.mrf.mxu1 }
0x28e6   :  { %v26302_v11 = vpop.f32.mrf.mxu0 }
0x28e7   :  { %v18717_v48 = vadd.f32 %v26309_v39, %v26302_v11 }
0x28e8   :  { %v18619_v57 = vpop.f32.mrf.mxu0  ;;  %v26337_v9 = vpop.f32.mrf.mxu1 }
0x28e9   :  { %v18711_v33 = vadd.f32 %v18710_v3, %v18619_v57 }
0x28ea   :  { %v19038_v0 = vpop.f32.mrf.mxu1 }
0x28ec   :  { %v26316_v43 = vpop.f32.mrf.mxu0 }
0x28ed   :  { %v18800_v55 = vadd.f32 %v26316_v43, %v18717_v48 }
0x28ee   :  { %v18792_v54 = vpop.f32.mrf.mxu0 }
0x28ef   :  { %v18793_v5 = vadd.f32 %v18792_v54, %v18711_v33  ;;  %v18883_v14 = vadd.f32 %v26323_v8, %v18800_v55 }
0x28f0   :  { %v26351_v31 = vpop.f32.mrf.mxu1 }
0x28f1   :  { %v26330_v60 = vpop.f32.mrf.mxu0  ;;  %v18875_v4 = vadd.f32 %v18874_v32, %v18793_v5 }
0x28f2   :  { %v18966_v30 = vadd.f32 %v26330_v60, %v18883_v14  ;;  %v19242_v62 = vpop.f32.mrf.mxu1 }
0x28f3   :  { %v18959_v13 = vpop.f32.mrf.mxu0 }
0x28f4   :  { %v29579_v29 = vadd.f32 %v26337_v9, %v18966_v30  ;;  %v18960_v18 = vadd.f32 %v18959_v13, %v18875_v4  ;;  %v26988_v9 = vld [vmem:[#allocation2 + $0x10] sm:$0xff] }
0x28f6   :  { %v29581_v24 = vadd.f32 %v19038_v0, %v18960_v18 }
0x28f8   :  { %v26365_v49 = vpop.f32.mrf.mxu1 }
0x28f9   :  { %v26344_v38 = vpop.f32.mrf.mxu0 }
0x28fa   :  { %v19249_v50 = vadd.f32 %v26351_v31, %v26344_v38  ;;  %v19406_v44 = vpop.f32.mrf.mxu1 }
0x28fb   :  { %v19151_v45 = vpop.f32.mrf.mxu0 }
0x28fc   :  { %v19243_v36 = vadd.f32 %v19242_v62, %v19151_v45 }
0x2900   :  { %v26379_v35 = vpop.f32.mrf.mxu1 }
0x2901   :  { %v26358_v47 = vpop.f32.mrf.mxu0 }
0x2902   :  { %v19332_v61 = vadd.f32 %v26358_v47, %v19249_v50  ;;  %v19570_v17 = vpop.f32.mrf.mxu1 }
0x2903   :  { %v19324_v15 = vpop.f32.mrf.mxu0 }
0x2904   :  { %v19325_v23 = vadd.f32 %v19324_v15, %v19243_v36  ;;  %v19415_v63 = vadd.f32 %v26365_v49, %v19332_v61 }
0x2906   :  { %v19407_v16 = vadd.f32 %v19406_v44, %v19325_v23 }
0x2909   :  { %v26372_v59 = vpop.f32.mrf.mxu0 }
0x290a   :  { %v19498_v19 = vadd.f32 %v26372_v59, %v19415_v63 }
0x290b   :  { %v19491_v42 = vpop.f32.mrf.mxu0 }
0x290c   :  { %v19577_v28 = vadd.f32 %v26379_v35, %v19498_v19  ;;  %v19492_v7 = vadd.f32 %v19491_v42, %v19407_v16 }
0x290e   :  { %v19581_v51 = vmul.f32 0.35355338, %v19577_v28  ;;  %v19571_v46 = vadd.f32 %v19570_v17, %v19492_v7 }
0x2910   :  { %v19580_v25 = vmul.f32 0.35355338, %v19571_v46  ;;  %v19585_v58 = vsel %vm22_vm0, %v19581_v51, -inf }
0x2911   :  { %19586 = vmax.xlane.f32.xlu1 %v19585_v58 }
0x2912   :  { %v19582_v10 = vsel %vm22_vm0, %v19580_v25, -inf }
0x2913   :  { %19583 = vmax.xlane.f32.xlu0 %v19582_v10 }
0x2922   :  { %19612 = vrot.lane.b32.xlu1 %v26987_v6, %s27018_s17 }
0x2926   :  { %20144 = vrot.lane.b32.xlu1 %v29586_v22, %s27019_s18 }
0x292a   :  { %20142 = vrot.lane.b32.xlu1 %v29590_v56, %s27019_s18 }
0x292e   :  { %20140 = vrot.lane.b32.xlu1 %v29586_v22, %s27020_s19 }
0x299a   :  { %v19587_v52 = vpop.xlane.xlu1 %19586 }
0x299b   :  { %v19589_v27 = vsub.f32 %v19581_v51, %v19587_v52 }
0x299c   :  { %v19584_v41 = vpop.xlane.xlu0 %19583 }
0x299d   :  { %v19588_v39 = vsub.f32 %v19580_v25, %v19584_v41  ;;  %v19592_v11 = vmul.f32 1.442695, %v19589_v27 }
0x299e   :  { %v19613_v3 = vpop.permute.xlu1 %19612 }
0x299f   :  { %v19590_v48 = vmul.f32 1.442695, %v19588_v39  ;;  %v29596_v57 = vand.u32 4294901760, %v19613_v3 }
0x29a1   :  { %26949 = vpow2.f32 %v19590_v48  ;;  %v29599_v8 = vsub.f32 %v19613_v3, %v29596_v57  ;;  %26380 = vmatprep.subr.mxu0 %v29596_v57 }
0x29a2   :  { %26381 = vmatpush3.msra.mxu0 %v29596_v57  ;;  %26951 = vpow2.f32 %v19592_v11  ;;  %v20145_v0 = vpop.permute.xlu1 %20144 }
0x29a3   :  { %v29604_v33 = vand.u32 4294901760, %v29599_v8  ;;  %v20152_v15 = vsel %vm1272_vm3, %v20145_v0, 0 }
0x29a4   :  { %v29627_v44 = vand.u32 4294901760, %v20152_v15 }
0x29a5   :  { %v19741_v43 = vsub.f32 %v29599_v8, %v29604_v33 }
0x29a6   :  { %v20143_v36 = vpop.permute.xlu1 %20142  ;;  %v29635_v7 = vsub.f32 %v20152_v15, %v29627_v44 }
0x29a7   :  { %v19742_v32 = vand.u32 4294901760, %v19741_v43  ;;  %v20150_v63 = vsel %vm1272_vm3, %v20143_v36, 0 }
0x29a8   :  { %v29632_v42 = vand.u32 4294901760, %v20150_v63  ;;  %v29642_v52 = vand.u32 4294901760, %v29635_v7 }
0x29a9   :  { %26387 = vmatprep.subr.mxu1 %v19742_v32 }
0x29aa   :  { %26388 = vmatpush3.msra.mxu1 %v19742_v32  ;;  %v29639_v58 = vsub.f32 %v20150_v63, %v29632_v42  ;;  %v20141_v43 = vpop.permute.xlu1 %20140 }
0x29ac   :  { %v29648_v48 = vand.u32 4294901760, %v29639_v58 }
0x29ae   :  { %v26950_v55 = vpop.eup %26949 }
0x29af   :  { %v19594_v54 = vsel %vm22_vm0, %v26950_v55, 0.0  ;;  %v26952_v5 = vpop.eup %26951 }
0x29b0   :  { %19595 = vadd.xlane.f32.xlu0 %v19594_v54  ;;  %v19597_v14 = vsel %vm22_vm0, %v26952_v5, 0.0 }
0x29b4   :  { %19598 = vadd.xlane.f32.xlu0 %v19597_v14 }
0x29ca   :  { %19610 = vrot.lane.b32.xlu0 %v26988_v9, %s27018_s17  ;;  %v20280_v9 = vsub.f32 %v29639_v58, %v29648_v48 }
0x29ce   :  { %20138 = vrot.lane.b32.xlu0 %v29590_v56, %s27020_s19 }
0x2a39   :  { %v19596_v60 = vpop.xlane.xlu0 %19595 }
0x2a3a   :  { %26953 = vrcp.f32 %v19596_v60 }
0x2a3d   :  { %v19599_v4 = vpop.xlane.xlu0 %19598 }
0x2a3e   :  { %26955 = vrcp.f32 %v19599_v4 }
0x2a41   :  { %v19611_v30 = vpop.permute.xlu0 %19610 }
0x2a42   :  { %v29613_v13 = vand.u32 4294901760, %v19611_v30 }
0x2a44   :  { %v29616_v18 = vsub.f32 %v19611_v30, %v29613_v13  ;;  %26382 = vmatprep.subr.mxu0 %v29613_v13 }
0x2a45   :  { %26383 = vmatpush3.msra.mxu0 %v29613_v13  ;;  %v20139_v25 = vpop.permute.xlu0 %20138 }
0x2a46   :  { %26394 = vmatprep.subr.mxu0 %v29599_v8  ;;  %v29622_v38 = vand.u32 4294901760, %v29616_v18  ;;  %v20146_v41 = vsel %vm1272_vm3, %v20139_v25, 0 }
0x2a47   :  { %v26954_v31 = vpop.eup %26953  ;;  %v29650_v32 = vand.u32 4294901760, %v20146_v41 }
0x2a48   :  { %v19602_v45 = vmul.f32 %v26954_v31, %v19596_v60  ;;  %v19748_v62 = vsub.f32 %v29616_v18, %v29622_v38 }
0x2a49   :  { %v20222_v60 = vsub.f32 %v20146_v41, %v29650_v32 }
0x2a4a   :  { %v19604_v47 = vsub.f32 2.0, %v19602_v45  ;;  %v19749_v50 = vand.u32 4294901760, %v19748_v62 }
0x2a4b   :  { %v26956_v49 = vpop.eup %26955  ;;  %v20223_v0 = vand.u32 4294901760, %v20222_v60 }
0x2a4c   :  { %v19606_v61 = vmul.f32 %v26954_v31, %v19604_v47  ;;  %v19603_v23 = vmul.f32 %v26956_v49, %v19599_v4  ;;  %26389 = vmatprep.subr.mxu1 %v19749_v50 }
0x2a4d   :  { %26390 = vmatpush3.msra.mxu1 %v19749_v50 }
0x2a4e   :  { %v19608_v35 = vmul.f32 %v26950_v55, %v19606_v61  ;;  %v19605_v59 = vsub.f32 2.0, %v19603_v23  ;;  %26401 = vmatprep.subr.mxu1 %v29596_v57  ;;  %v20273_v55 = vsub.f32 %v29635_v7, %v29642_v52 }
0x2a50   :  { %v19617_v19 = vsel %vm22_vm0, %v19608_v35, 0  ;;  %v19607_v16 = vmul.f32 %v26956_v49, %v19605_v59  ;;  %v20274_v4 = vand.u32 4294901760, %v20273_v55 }
0x2a51   :  { %v19689_v28 = vand.u32 4294901760, %v19617_v19 }
0x2a52   :  { %v19609_v17 = vmul.f32 %v26952_v5, %v19607_v16  ;;  %v20148_v5 = vsel %vm1272_vm3, %v20141_v43, 0 }
0x2a53   :  { %26391 = vmatprep.mubr.f32.mxu1 %v19689_v28  ;;  %v19690_v51 = vsub.f32 %v19617_v19, %v19689_v28  ;;  %v20231_v30 = vand.u32 4294901760, %v20148_v5 }
0x2a54   :  { %v19620_v46 = vsel %vm22_vm0, %v19609_v17, 0 }
0x2a55   :  { %v19699_v10 = vand.u32 4294901760, %v19620_v46  ;;  %v19691_v6 = vand.u32 4294901760, %v19690_v51  ;;  %v20232_v31 = vsub.f32 %v20148_v5, %v20231_v30 }
0x2a57   :  { %v19700_v27 = vsub.f32 %v19620_v46, %v19699_v10  ;;  %26392 = vmatmul.mubr.f32.vlgmr.msra.gmra.mxu1 %v19699_v10  ;;  %v19692_v39 = vsub.f32 %v19690_v51, %v19691_v6 }
0x2a58   :  { %26402 = vmatpush3.msra.mxu1 %v29596_v57  ;;  %26405 = vmatprep.mubr.f32.mxu1 %v19691_v6 }
0x2a59   :  { %26403 = vmatprep.subr.mxu1 %v29613_v13  ;;  %v19693_v3 = vand.u32 4294901760, %v19692_v39  ;;  %v19701_v11 = vand.u32 4294901760, %v19700_v27 }
0x2a5a   :  { %26404 = vmatpush3.msra.mxu1 %v29613_v13 }
0x2a5b   :  { %26415 = vmatprep.subr.mxu1 %v29596_v57  ;;  %26384 = vmatprep.mubr.f32.mxu0 %v19693_v3  ;;  %v19702_v54 = vsub.f32 %v19700_v27, %v19701_v11 }
0x2a5c   :  { %26406 = vmatmul.mubr.f32.vlgmr.msra.gmra.mxu1 %v19701_v11 }
0x2a5d   :  { %26416 = vmatpush3.msra.mxu1 %v29596_v57  ;;  %26419 = vmatprep.mubr.f32.mxu1 %v19689_v28  ;;  %v19703_v14 = vand.u32 4294901760, %v19702_v54  ;;  %v20281_v57 = vand.u32 4294901760, %v20280_v9 }
0x2a5e   :  { %26417 = vmatprep.subr.mxu1 %v29613_v13 }
0x2a5f   :  { %26418 = vmatpush3.msra.mxu1 %v29613_v13  ;;  %26385 = vmatmul.mubr.f32.vlgmr.msra.gmra.mxu0 %v19703_v14  ;;  %v20233_v13 = vand.u32 4294901760, %v20232_v31 }
0x2a60   :  { %26429 = vmatprep.subr.mxu1 %v20274_v4  ;;  %26395 = vmatpush3.msra.mxu0 %v29599_v8  ;;  %v20224_v8 = vsub.f32 %v20222_v60, %v20223_v0 }
0x2a61   :  { %26420 = vmatmul.mubr.f32.vlgmr.msra.gmra.mxu1 %v19699_v10  ;;  %26396 = vmatprep.subr.mxu0 %v29616_v18 }
0x2a62   :  { %26430 = vmatpush3.xpose.msra.mxu1 %v20274_v4  ;;  %26398 = vmatprep.mubr.f32.mxu0 %v19690_v51 }
0x2a63   :  { %26431 = vmatprep.subr.mxu1 %v20281_v57  ;;  %26433 = vmatprep.mubr.f32.mxu1 %v29650_v32 }
0x2a64   :  { %26397 = vmatpush3.msra.mxu0 %v29616_v18  ;;  %v20225_v18 = vand.u32 4294901760, %v20224_v8 }
0x2a65   :  { %26408 = vmatprep.subr.mxu0 %v29604_v33  ;;  %26399 = vmatmul.mubr.f32.vlgmr.msra.gmra.mxu0 %v19700_v27 }
0x2a66   :  { %26409 = vmatpush3.msra.mxu0 %v29604_v33  ;;  %26432 = vmatpush3.xpose.msra.mxu1 %v20281_v57  ;;  %v20234_v33 = vsub.f32 %v20232_v31, %v20233_v13 }
0x2a67   :  { %26410 = vmatprep.subr.mxu0 %v29622_v38  ;;  %26412 = vmatprep.mubr.f32.mxu0 %v19689_v28 }
0x2a68   :  { %26443 = vmatprep.subr.mxu1 %v29627_v44  ;;  %26411 = vmatpush3.msra.mxu0 %v29622_v38  ;;  %v20235_v38 = vand.u32 4294901760, %v20234_v33 }
0x2a69   :  { %26422 = vmatprep.subr.mxu0 %v29627_v44  ;;  %26434 = vmatmul.mubr.f32.vlgmr.msra.gmra.mxu1 %v20231_v30 }
0x2a6a   :  { %26413 = vmatmul.mubr.f32.vlgmr.msra.gmra.mxu0 %v19699_v10  ;;  %26444 = vmatpush3.xpose.msra.mxu1 %v29627_v44 }
0x2a6b   :  { %26423 = vmatpush3.xpose.msra.mxu0 %v29627_v44  ;;  %26447 = vmatprep.mubr.f32.mxu1 %v20223_v0 }
0x2a6c   :  { %26424 = vmatprep.subr.mxu0 %v29632_v42  ;;  %26426 = vmatprep.mubr.f32.mxu0 %v20225_v18 }
0x2a6d   :  { %26445 = vmatprep.subr.mxu1 %v29632_v42 }
0x2a6e   :  { %26446 = vmatpush3.xpose.msra.mxu1 %v29632_v42 }
0x2a6f   :  { %26425 = vmatpush3.xpose.msra.mxu0 %v29632_v42  ;;  %26457 = vmatprep.subr.mxu1 %v29627_v44 }
0x2a70   :  { %26436 = vmatprep.subr.mxu0 %v29635_v7 }
0x2a71   :  { %26448 = vmatmul.mubr.f32.vlgmr.msra.gmra.mxu1 %v20233_v13 }
0x2a72   :  { %26427 = vmatmul.mubr.f32.vlgmr.msra.gmra.mxu0 %v20235_v38  ;;  %26458 = vmatpush3.xpose.msra.mxu1 %v29627_v44 }
0x2a73   :  { %26437 = vmatpush3.xpose.msra.mxu0 %v29635_v7  ;;  %26440 = vmatprep.mubr.f32.mxu0 %v20222_v60 }
0x2a74   :  { %26461 = vmatprep.mubr.f32.mxu1 %v29650_v32  ;;  %26438 = vmatprep.subr.mxu0 %v29639_v58 }
0x2a75   :  { %26459 = vmatprep.subr.mxu1 %v29632_v42 }
0x2a76   :  { %26460 = vmatpush3.xpose.msra.mxu1 %v29632_v42 }
0x2a77   :  { %26439 = vmatpush3.xpose.msra.mxu0 %v29639_v58 }
0x2a78   :  { %26450 = vmatprep.subr.mxu0 %v29642_v52 }
0x2a79   :  { %26462 = vmatmul.mubr.f32.vlgmr.msra.gmra.mxu1 %v20231_v30 }
0x2a7a   :  { %26441 = vmatmul.mubr.f32.vlgmr.msra.gmra.mxu0 %v20232_v31 }
0x2a7b   :  { %26451 = vmatpush3.xpose.msra.mxu0 %v29642_v52  ;;  %26454 = vmatprep.mubr.f32.mxu0 %v29650_v32 }
0x2a7c   :  { %26452 = vmatprep.subr.mxu0 %v29648_v48 }
0x2a7f   :  { %26453 = vmatpush3.xpose.msra.mxu0 %v29648_v48 }
0x2a82   :  { %26455 = vmatmul.mubr.f32.vlgmr.msra.gmra.mxu0 %v20231_v30 }
0x2b17   :  { %v26393_v45 = vpop.f32.mrf.mxu1 }
0x2b19   :  { %v19786_v62 = vpop.f32.mrf.mxu1 }
0x2b1c   :  { %v26407_v49 = vpop.f32.mrf.mxu1 }
0x2b1e   :  { %v19950_v61 = vpop.f32.mrf.mxu1 }
0x2b1f   :  { %v26386_v47 = vpop.f32.mrf.mxu0 }
0x2b20   :  { %v19793_v0 = vadd.f32 %v26393_v45, %v26386_v47 }
0x2b21   :  { %v19695_v50 = vpop.f32.mrf.mxu0  ;;  %v26421_v63 = vpop.f32.mrf.mxu1 }
0x2b22   :  { %v19787_v15 = vadd.f32 %v19786_v62, %v19695_v50 }
0x2b23   :  { %v20114_v42 = vpop.f32.mrf.mxu1 }
0x2b25   :  { %v26400_v36 = vpop.f32.mrf.mxu0 }
0x2b26   :  { %v19876_v31 = vadd.f32 %v26400_v36, %v19793_v0 }
0x2b27   :  { %v19868_v23 = vpop.f32.mrf.mxu0 }
0x2b28   :  { %v19869_v44 = vadd.f32 %v19868_v23, %v19787_v15  ;;  %v19959_v8 = vadd.f32 %v26407_v49, %v19876_v31 }
0x2b29   :  { %v26435_v17 = vpop.f32.mrf.mxu1 }
0x2b2a   :  { %v26414_v35 = vpop.f32.mrf.mxu0  ;;  %v19951_v59 = vadd.f32 %v19950_v61, %v19869_v44 }
0x2b2b   :  { %v20318_v46 = vpop.f32.mrf.mxu1  ;;  %v20042_v13 = vadd.f32 %v26414_v35, %v19959_v8 }
0x2b2c   :  { %v20035_v19 = vpop.f32.mrf.mxu0 }
0x2b2d   :  { %v20036_v16 = vadd.f32 %v20035_v19, %v19951_v59 }
0x2b2f   :  { %v29693_v28 = vadd.f32 %v20114_v42, %v20036_v16 }
0x2b31   :  { %v26449_v10 = vpop.f32.mrf.mxu1 }
0x2b32   :  { %v26428_v7 = vpop.f32.mrf.mxu0 }
0x2b33   :  { %v20325_v58 = vadd.f32 %v26435_v17, %v26428_v7  ;;  %v20482_v39 = vpop.f32.mrf.mxu1 }
0x2b34   :  { %v20227_v51 = vpop.f32.mrf.mxu0 }
0x2b35   :  { %v20319_v52 = vadd.f32 %v20318_v46, %v20227_v51 }
0x2b39   :  { %v26463_v11 = vpop.f32.mrf.mxu1 }
0x2b3a   :  { %v26442_v25 = vpop.f32.mrf.mxu0 }
0x2b3b   :  { %v20408_v27 = vadd.f32 %v26442_v25, %v20325_v58  ;;  %v20646_v14 = vpop.f32.mrf.mxu1  ;;  %v21217_v25 = vld [vmem:[%s30370_s1 + $0x110] sm:$0xff] }
0x2b3c   :  { %v20400_v6 = vpop.f32.mrf.mxu0 }
0x2b3d   :  { %v20401_v41 = vadd.f32 %v20400_v6, %v20319_v52  ;;  %v20491_v3 = vadd.f32 %v26449_v10, %v20408_v27 }
0x2b3f   :  { %v20483_v32 = vadd.f32 %v20482_v39, %v20401_v41  ;;  %v29758_v41 = vand.u32 4294901760, %v21217_v25  ;;  %v21216_v39 = vld [vmem:[%s30370_s1 + $0x108] sm:$0xff] }
0x2b42   :  { %v26456_v48 = vpop.f32.mrf.mxu0 }
0x2b43   :  { %v20574_v43 = vadd.f32 %v26456_v48, %v20491_v3 }
0x2b44   :  { %v20567_v55 = vpop.f32.mrf.mxu0 }
0x2b45   :  { %v20653_v54 = vadd.f32 %v26463_v11, %v20574_v43  ;;  %v20568_v5 = vadd.f32 %v20567_v55, %v20483_v32  ;;  %v21215_v43 = vld [vmem:[%s30370_s1 + $0x100] sm:$0xff]  ;;  %v29768_v32 = vand.u32 4294901760, %v21216_v39 }
0x2b47   :  { %v20657_v9 = vmul.f32 0.35355338, %v20653_v54  ;;  %v20647_v60 = vadd.f32 %v20646_v14, %v20568_v5  ;;  %v29772_v5 = vsub.f32 %v21217_v25, %v29758_v41  ;;  %v29785_v0 = vsub.f32 %v21216_v39, %v29768_v32 }
0x2b49   :  { %v20656_v4 = vmul.f32 0.35355338, %v20647_v60  ;;  %v20661_v30 = vsel %vm22_vm0, %v20657_v9, -inf  ;;  %v29776_v60 = vand.u32 4294901760, %v21215_v43  ;;  %v29789_v8 = vand.u32 4294901760, %v29772_v5 }
0x2b4a   :  { %20662 = vmax.xlane.f32.xlu1 %v20661_v30 }
0x2b4b   :  { %v20658_v57 = vsel %vm22_vm0, %v20656_v4, -inf }
0x2b4c   :  { %20659 = vmax.xlane.f32.xlu0 %v20658_v57 }
0x2b5b   :  { %20688 = vrot.lane.b32.xlu1 %v29586_v22, %s27021_s20  ;;  %v20121_v22 = vadd.f32 %v26421_v63, %v20042_v13 }
0x2b5f   :  { %14758 = vrot.lane.b32.xlu1 %v29138_v21, %s27022_s0 }
0x2b63   :  { %14760 = vrot.lane.b32.xlu1 %v29136_v2, %s27022_s0 }
0x2b67   :  { %15836 = vrot.lane.b32.xlu1 %v29252_v40, %s27023_s21 }
0x2b6b   :  { %16912 = vrot.lane.b32.xlu1 %v29357_v53, %s27024_s22 }
0x2b6f   :  { %19052 = vrot.lane.b32.xlu1 %v29579_v29, %s27022_s0 }
0x2b73   :  { %20128 = vrot.lane.b32.xlu1 %v20121_v22, %s27023_s21 }
0x2bd3   :  { %v20663_v21 = vpop.xlane.xlu1 %20662 }
0x2bd4   :  { %v20665_v18 = vsub.f32 %v20657_v9, %v20663_v21 }
0x2bd5   :  { %v20660_v33 = vpop.xlane.xlu0 %20659 }
0x2bd6   :  { %v20664_v38 = vsub.f32 %v20656_v4, %v20660_v33  ;;  %v20668_v45 = vmul.f32 1.442695, %v20665_v18  ;;  %v21214_v4 = vld [vmem:[%s30370_s1 + $0xf8] sm:$0xff]  ;;  %v29796_v33 = vsub.f32 %v21215_v43, %v29776_v60 }
0x2bd7   :  { %v20689_v2 = vpop.permute.xlu1 %20688  ;;  %v29791_v22 = vand.u32 4294901760, %v21214_v4 }
0x2bd8   :  { %v20666_v62 = vmul.f32 1.442695, %v20664_v38  ;;  %v29710_v47 = vand.u32 4294901760, %v20689_v2 }
0x2bda   :  { %26957 = vpow2.f32 %v20666_v62  ;;  %v29713_v40 = vsub.f32 %v20689_v2, %v29710_v47  ;;  %26464 = vmatprep.subr.mxu0 %v29710_v47 }
0x2bdb   :  { %26465 = vmatpush3.msra.mxu0 %v29710_v47  ;;  %v14759_v53 = vpop.permute.xlu1 %14758  ;;  %26959 = vpow2.f32 %v20668_v45  ;;  %v29801_v45 = vand.u32 4294901760, %v29785_v0 }
0x2bdc   :  { %14764 = vst.msk [vmem:[#allocation3] sm:$0xff] %vm3403_vm4, %v14759_v53  ;;  %v29719_v29 = vand.u32 4294901760, %v29713_v40  ;;  %v21372_v53 = vsub.f32 %v29772_v5, %v29789_v8 }
0x2bde   :  { %v20817_v50 = vsub.f32 %v29713_v40, %v29719_v29 }
0x2bdf   :  { %v14761_v49 = vpop.permute.xlu1 %14760 }
0x2be0   :  { %14765 = vst.msk [vmem:[#allocation3 + $0x8] sm:$0xff] %vm3403_vm4, %v14761_v49  ;;  %v20818_v15 = vand.u32 4294901760, %v20817_v50  ;;  %v29808_v50 = vsub.f32 %v21214_v4, %v29791_v22 }
0x2be2   :  { %26471 = vmatprep.subr.mxu1 %v20818_v15 }
0x2be3   :  { %26472 = vmatpush3.msra.mxu1 %v20818_v15  ;;  %v15837_v36 = vpop.permute.xlu1 %15836 }
0x2be4   :  { %15841 = vst.msk [vmem:[#allocation3 + $0x8] sm:$0xff] %vm4480_vm5, %v15837_v36  ;;  %v29812_v36 = vand.u32 4294901760, %v29796_v33 }
0x2be7   :  { %v26958_v61 = vpop.eup %26957  ;;  %v16913_v23 = vpop.permute.xlu1 %16912 }
0x2be8   :  { %16917 = vst.msk [vmem:[#allocation3 + $0x8] sm:$0xff] %vm5557_vm6, %v16913_v23  ;;  %v20670_v44 = vsel %vm22_vm0, %v26958_v61, 0.0  ;;  %v26960_v63 = vpop.eup %26959 }
0x2be9   :  { %20671 = vadd.xlane.f32.xlu0 %v20670_v44  ;;  %v20673_v59 = vsel %vm22_vm0, %v26960_v63, 0.0  ;;  %v21379_v44 = vsub.f32 %v29785_v0, %v29801_v45 }
0x2beb   :  { %v19053_v35 = vpop.permute.xlu1 %19052 }
0x2bec   :  { %19057 = vst.msk [vmem:[#allocation3 + $0x18] sm:$0xff] %vm3403_vm4, %v19053_v35  ;;  %v21373_v35 = vand.u32 4294901760, %v21372_v53 }
0x2bed   :  { %20674 = vadd.xlane.f32.xlu0 %v20673_v59  ;;  %v29821_v59 = vand.u32 4294901760, %v29808_v50 }
0x2bef   :  { %v20129_v19 = vpop.permute.xlu1 %20128 }
0x2bf0   :  { %20133 = vst.msk [vmem:[#allocation3 + $0x18] sm:$0xff] %vm4480_vm5, %v20129_v19 }
0x2c03   :  { %20686 = vrot.lane.b32.xlu0 %v29590_v56, %s27021_s20 }
0x2c07   :  { %15834 = vrot.lane.b32.xlu0 %v29254_v37, %s27023_s21 }
0x2c0b   :  { %16910 = vrot.lane.b32.xlu0 %v29359_v1, %s27024_s22 }
0x2c0f   :  { %19050 = vrot.lane.b32.xlu0 %v29581_v24, %s27022_s0 }
0x2c13   :  { %20126 = vrot.lane.b32.xlu0 %v29693_v28, %s27023_s21 }
0x2c72   :  { %v20672_v16 = vpop.xlane.xlu0 %20671 }
0x2c73   :  { %26961 = vrcp.f32 %v20672_v16 }
0x2c76   :  { %v20675_v42 = vpop.xlane.xlu0 %20674 }
0x2c77   :  { %26963 = vrcp.f32 %v20675_v42 }
0x2c7a   :  { %v20687_v7 = vpop.permute.xlu0 %20686 }
0x2c7b   :  { %v29740_v17 = vand.u32 4294901760, %v20687_v7 }
0x2c7d   :  { %v29743_v56 = vsub.f32 %v20687_v7, %v29740_v17  ;;  %26466 = vmatprep.subr.mxu0 %v29740_v17 }
0x2c7e   :  { %26467 = vmatpush3.msra.mxu0 %v29740_v17  ;;  %v15835_v37 = vpop.permute.xlu0 %15834 }
0x2c7f   :  { %15840 = vst.msk [vmem:[#allocation3] sm:$0xff] %vm4480_vm5, %v15835_v37  ;;  %26478 = vmatprep.subr.mxu0 %v29713_v40  ;;  %v29750_v1 = vand.u32 4294901760, %v29743_v56  ;;  %v21380_v37 = vand.u32 4294901760, %v21379_v44 }
0x2c80   :  { %v26962_v24 = vpop.eup %26961 }
0x2c81   :  { %v20678_v28 = vmul.f32 %v26962_v24, %v20672_v16  ;;  %v20824_v51 = vsub.f32 %v29743_v56, %v29750_v1  ;;  %v21386_v16 = vsub.f32 %v29796_v33, %v29812_v36 }
0x2c82   :  { %v16911_v46 = vpop.permute.xlu0 %16910 }
0x2c83   :  { %v20680_v58 = vsub.f32 2.0, %v20678_v28  ;;  %16916 = vst.msk [vmem:[#allocation3] sm:$0xff] %vm5557_vm6, %v16911_v46  ;;  %v20825_v10 = vand.u32 4294901760, %v20824_v51 }
0x2c84   :  { %v26964_v6 = vpop.eup %26963 }
0x2c85   :  { %v20682_v52 = vmul.f32 %v26962_v24, %v20680_v58  ;;  %v20679_v27 = vmul.f32 %v26964_v6, %v20675_v42  ;;  %26473 = vmatprep.subr.mxu1 %v20825_v10  ;;  %v21387_v24 = vand.u32 4294901760, %v21386_v16 }
0x2c86   :  { %26474 = vmatpush3.msra.mxu1 %v20825_v10  ;;  %v19051_v3 = vpop.permute.xlu0 %19050 }
0x2c87   :  { %v20684_v11 = vmul.f32 %v26958_v61, %v20682_v52  ;;  %v20681_v48 = vsub.f32 2.0, %v20679_v27  ;;  %19056 = vst.msk [vmem:[#allocation3 + $0x10] sm:$0xff] %vm3403_vm4, %v19051_v3  ;;  %26485 = vmatprep.subr.mxu1 %v29710_v47 }
0x2c89   :  { %v20693_v55 = vsel %vm22_vm0, %v20684_v11, 0  ;;  %v20683_v54 = vmul.f32 %v26964_v6, %v20681_v48 }
0x2c8a   :  { %v20127_v14 = vpop.permute.xlu0 %20126  ;;  %v29774_v9 = vand.u32 4294901760, %v20693_v55  ;;  %v21210_v13 = vld [vmem:[#allocation3] sm:$0xff] }
0x2c8b   :  { %v20685_v30 = vmul.f32 %v26960_v63, %v20683_v54  ;;  %20132 = vst.msk [vmem:[#allocation3 + $0x10] sm:$0xff] %vm4480_vm5, %v20127_v14  ;;  %v21224_v62 = vsel %vm632_vm1, %v21210_v13, 0  ;;  %v21211_v63 = vld [vmem:[#allocation3 + $0x8] sm:$0xff] }
0x2c8c   :  { %26475 = vmatprep.mubr.f32.mxu1 %v29774_v9  ;;  %v20766_v57 = vsub.f32 %v20693_v55, %v29774_v9  ;;  %v29815_v61 = vand.u32 4294901760, %v21224_v62  ;;  %v21227_v42 = vsel %vm632_vm1, %v21211_v63, 0 }
0x2c8d   :  { %v20696_v31 = vsel %vm22_vm0, %v20685_v30, 0  ;;  %v29838_v28 = vand.u32 4294901760, %v21227_v42 }
0x2c8e   :  { %v29793_v21 = vand.u32 4294901760, %v20696_v31  ;;  %v20767_v18 = vand.u32 4294901760, %v20766_v57  ;;  %v29830_v7 = vsub.f32 %v21224_v62, %v29815_v61 }
0x2c90   :  { %v20776_v38 = vsub.f32 %v20696_v31, %v29793_v21  ;;  %26476 = vmatmul.mubr.f32.vlgmr.msra.gmra.mxu1 %v29793_v21  ;;  %v20768_v2 = vsub.f32 %v20766_v57, %v20767_v18  ;;  %v21306_v51 = vand.u32 4294901760, %v29830_v7 }
0x2c91   :  { %26486 = vmatpush3.msra.mxu1 %v29710_v47  ;;  %26489 = vmatprep.mubr.f32.mxu1 %v20767_v18 }
0x2c92   :  { %26487 = vmatprep.subr.mxu1 %v29740_v17  ;;  %v20769_v49 = vand.u32 4294901760, %v20768_v2  ;;  %v20777_v15 = vand.u32 4294901760, %v20776_v38  ;;  %v21307_v46 = vsub.f32 %v29830_v7, %v21306_v51 }
0x2c93   :  { %26488 = vmatpush3.msra.mxu1 %v29740_v17 }
0x2c94   :  { %26499 = vmatprep.subr.mxu1 %v29710_v47  ;;  %26468 = vmatprep.mubr.f32.mxu0 %v20769_v49  ;;  %v20778_v23 = vsub.f32 %v20776_v38, %v20777_v15  ;;  %v21308_v25 = vand.u32 4294901760, %v21307_v46 }
0x2c95   :  { %26490 = vmatmul.mubr.f32.vlgmr.msra.gmra.mxu1 %v20777_v15 }
0x2c96   :  { %26500 = vmatpush3.msra.mxu1 %v29710_v47  ;;  %26503 = vmatprep.mubr.f32.mxu1 %v29774_v9  ;;  %v20779_v19 = vand.u32 4294901760, %v20778_v23  ;;  %v21393_v47 = vsub.f32 %v29808_v50, %v29821_v59 }
0x2c97   :  { %26501 = vmatprep.subr.mxu1 %v29740_v17 }
0x2c98   :  { %26502 = vmatpush3.msra.mxu1 %v29740_v17  ;;  %26469 = vmatmul.mubr.f32.vlgmr.msra.gmra.mxu0 %v20779_v19  ;;  %v29845_v17 = vsub.f32 %v21227_v42, %v29838_v28 }
0x2c99   :  { %26520 = vmatprep.subr.mxu1 %v21373_v35  ;;  %26479 = vmatpush3.msra.mxu0 %v29713_v40  ;;  %v21394_v40 = vand.u32 4294901760, %v21393_v47 }
0x2c9a   :  { %26504 = vmatmul.mubr.f32.vlgmr.msra.gmra.mxu1 %v29793_v21  ;;  %26480 = vmatprep.subr.mxu0 %v29743_v56 }
0x2c9b   :  { %26521 = vmatpush3.msra.mxu1 %v21373_v35  ;;  %26482 = vmatprep.mubr.f32.mxu0 %v20766_v57 }
0x2c9c   :  { %26522 = vmatprep.subr.mxu1 %v21380_v37  ;;  %26528 = vmatprep.mubr.f32.mxu1 %v29815_v61 }
0x2c9d   :  { %26481 = vmatpush3.msra.mxu0 %v29743_v56  ;;  %26523 = vmatpush3.msra.mxu1 %v21380_v37  ;;  %v21316_v56 = vand.u32 4294901760, %v29845_v17 }
0x2c9e   :  { %26492 = vmatprep.subr.mxu0 %v29719_v29  ;;  %26524 = vmatprep.subr.mxu1 %v21387_v24 }
0x2c9f   :  { %26483 = vmatmul.mubr.f32.vlgmr.msra.gmra.mxu0 %v20776_v38  ;;  %26525 = vmatpush3.msra.mxu1 %v21387_v24 }
0x2ca0   :  { %26493 = vmatpush3.msra.mxu0 %v29719_v29  ;;  %26496 = vmatprep.mubr.f32.mxu0 %v29774_v9  ;;  %v21317_v29 = vsub.f32 %v29845_v17, %v21316_v56 }
0x2ca1   :  { %26494 = vmatprep.subr.mxu0 %v29750_v1  ;;  %26526 = vmatprep.subr.mxu1 %v21394_v40 }
0x2ca2   :  { %26495 = vmatpush3.msra.mxu0 %v29750_v1  ;;  %26527 = vmatpush3.msra.mxu1 %v21394_v40  ;;  %v21318_v1 = vand.u32 4294901760, %v21317_v29 }
0x2ca3   :  { %26506 = vmatprep.subr.mxu0 %v29758_v41  ;;  %26529 = vmatmul.mubr.f32.vlgmr.msra.gmra.mxu1 %v29838_v28 }
0x2ca4   :  { %26497 = vmatmul.mubr.f32.vlgmr.msra.gmra.mxu0 %v29793_v21  ;;  %26548 = vmatprep.subr.mxu1 %v29758_v41 }
0x2ca5   :  { %26507 = vmatpush3.msra.mxu0 %v29758_v41  ;;  %26514 = vmatprep.mubr.f32.mxu0 %v21308_v25 }
0x2ca6   :  { %26508 = vmatprep.subr.mxu0 %v29768_v32  ;;  %26549 = vmatpush3.msra.mxu1 %v29758_v41 }
0x2ca7   :  { %26509 = vmatpush3.msra.mxu0 %v29768_v32  ;;  %26550 = vmatprep.subr.mxu1 %v29768_v32 }
0x2ca8   :  { %26510 = vmatprep.subr.mxu0 %v29776_v60  ;;  %26551 = vmatpush3.msra.mxu1 %v29768_v32 }
0x2ca9   :  { %26511 = vmatpush3.msra.mxu0 %v29776_v60  ;;  %26552 = vmatprep.subr.mxu1 %v29776_v60 }
0x2caa   :  { %26512 = vmatprep.subr.mxu0 %v29791_v22  ;;  %26553 = vmatpush3.msra.mxu1 %v29776_v60 }
0x2cab   :  { %26513 = vmatpush3.msra.mxu0 %v29791_v22  ;;  %26554 = vmatprep.subr.mxu1 %v29791_v22 }
0x2cac   :  { %26515 = vmatmul.mubr.f32.vlgmr.msra.gmra.mxu0 %v21318_v1  ;;  %26555 = vmatpush3.msra.mxu1 %v29791_v22 }
0x2cad   :  { %26534 = vmatprep.subr.mxu0 %v29772_v5  ;;  %26576 = vmatprep.subr.mxu1 %v29758_v41 }
0x2cae   :  { %26535 = vmatpush3.msra.mxu0 %v29772_v5 }
0x2caf   :  { %26536 = vmatprep.subr.mxu0 %v29785_v0 }
0x2cb0   :  { %26537 = vmatpush3.msra.mxu0 %v29785_v0 }
0x2cb1   :  { %26538 = vmatprep.subr.mxu0 %v29796_v33 }
0x2cb2   :  { %26539 = vmatpush3.msra.mxu0 %v29796_v33 }
0x2cb3   :  { %26540 = vmatprep.subr.mxu0 %v29808_v50 }
0x2cb4   :  { %26541 = vmatpush3.msra.mxu0 %v29808_v50 }
0x2cb5   :  { %26562 = vmatprep.subr.mxu0 %v29789_v8 }
0x2d50   :  { %v26477_v58 = vpop.f32.mrf.mxu1 }
0x2d52   :  { %v20862_v10 = vpop.f32.mrf.mxu1 }
0x2d55   :  { %v26491_v27 = vpop.f32.mrf.mxu1 }
0x2d57   :  { %v21026_v11 = vpop.f32.mrf.mxu1 }
0x2d58   :  { %v26470_v6 = vpop.f32.mrf.mxu0 }
0x2d59   :  { %v20869_v39 = vadd.f32 %v26477_v58, %v26470_v6 }
0x2d5a   :  { %v20771_v52 = vpop.f32.mrf.mxu0  ;;  %v26505_v14 = vpop.f32.mrf.mxu1 }
0x2d5b   :  { %v20863_v48 = vadd.f32 %v20862_v10, %v20771_v52 }
0x2d5c   :  { %v21190_v13 = vpop.f32.mrf.mxu1 }
0x2d5f   :  { %v26484_v3 = vpop.f32.mrf.mxu0 }
0x2d60   :  { %v20952_v43 = vadd.f32 %v26484_v3, %v20869_v39 }
0x2d61   :  { %v20944_v55 = vpop.f32.mrf.mxu0 }
0x2d62   :  { %v20945_v54 = vadd.f32 %v20944_v55, %v20863_v48  ;;  %v21035_v5 = vadd.f32 %v26491_v27, %v20952_v43 }
0x2d64   :  { %v26498_v9 = vpop.f32.mrf.mxu0  ;;  %v21027_v4 = vadd.f32 %v21026_v11, %v20945_v54 }
0x2d65   :  { %v21118_v30 = vadd.f32 %v26498_v9, %v21035_v5 }
0x2d66   :  { %v21111_v57 = vpop.f32.mrf.mxu0 }
0x2d67   :  { %v21197_v0 = vadd.f32 %v26505_v14, %v21118_v30  ;;  %v21112_v31 = vadd.f32 %v21111_v57, %v21027_v4 }
0x2d69   :  { %v21191_v21 = vadd.f32 %v21190_v13, %v21112_v31  ;;  %21204 = vrot.lane.b32.xlu1 %v21197_v0, %s27024_s22 }
0x2d6b   :  { %21202 = vrot.lane.b32.xlu0 %v21191_v21, %s27024_s22 }
0x2ddb   :  { %v21205_v18 = vpop.permute.xlu1 %21204 }
0x2ddc   :  { %21209 = vst.msk [vmem:[#allocation3 + $0x18] sm:$0xff] %vm5557_vm6, %v21205_v18 }
0x2ddd   :  { %v21203_v33 = vpop.permute.xlu0 %21202 }
0x2dde   :  { %21208 = vst.msk [vmem:[#allocation3 + $0x10] sm:$0xff] %vm5557_vm6, %v21203_v33 }
0x2de3   :  { %v21213_v38 = vld [vmem:[#allocation3 + $0x18] sm:$0xff] }
0x2de4   :  { %v21233_v2 = vsel %vm632_vm1, %v21213_v38, 0 }
0x2de5   :  { %v21212_v62 = vld [vmem:[#allocation3 + $0x10] sm:$0xff]  ;;  %v21334_v53 = vand.u32 4294901760, %v21233_v2 }
0x2de6   :  { %v21230_v50 = vsel %vm632_vm1, %v21212_v62, 0 }
0x2de7   :  { %v21324_v49 = vand.u32 4294901760, %v21230_v50  ;;  %v21335_v15 = vsub.f32 %v21233_v2, %v21334_v53 }
0x2de9   :  { %26531 = vmatprep.mubr.f32.mxu1 %v21324_v49  ;;  %v21325_v23 = vsub.f32 %v21230_v50, %v21324_v49  ;;  %v21336_v44 = vand.u32 4294901760, %v21335_v15 }
0x2dea   :  { %26532 = vmatmul.mubr.f32.gmra.mxu1 %v21334_v53 }
0x2deb   :  { %26556 = vmatprep.mubr.f32.mxu1 %v21306_v51  ;;  %v21326_v63 = vand.u32 4294901760, %v21325_v23  ;;  %v21337_v35 = vsub.f32 %v21335_v15, %v21336_v44 }
0x2ded   :  { %v21327_v19 = vsub.f32 %v21325_v23, %v21326_v63  ;;  %v21338_v42 = vand.u32 4294901760, %v21337_v35 }
0x2dee   :  { %26557 = vmatmul.mubr.f32.vlgmr.msra.gmra.mxu1 %v21316_v56 }
0x2def   :  { %26559 = vmatprep.mubr.f32.mxu1 %v21326_v63  ;;  %26577 = vmatpush3.msra.mxu1 %v29758_v41  ;;  %v21328_v16 = vand.u32 4294901760, %v21327_v19  ;;  %v26530_v41 = vpop.f32.mrf.mxu1 }
0x2df0   :  { %26578 = vmatprep.subr.mxu1 %v29768_v32 }
0x2df1   :  { %26517 = vmatprep.mubr.f32.mxu0 %v21328_v16  ;;  %26579 = vmatpush3.msra.mxu1 %v29768_v32  ;;  %v21431_v32 = vpop.f32.mrf.mxu1 }
0x2df2   :  { %26518 = vmatmul.mubr.f32.gmra.mxu0 %v21338_v42  ;;  %26560 = vmatmul.mubr.f32.gmra.mxu1 %v21336_v44 }
0x2df3   :  { %26580 = vmatprep.subr.mxu1 %v29776_v60  ;;  %26542 = vmatprep.mubr.f32.mxu0 %v29830_v7 }
0x2df4   :  { %26581 = vmatpush3.msra.mxu1 %v29776_v60  ;;  %26584 = vmatprep.mubr.f32.mxu1 %v29815_v61 }
0x2df5   :  { %26582 = vmatprep.subr.mxu1 %v29791_v22 }
0x2df6   :  { %26583 = vmatpush3.msra.mxu1 %v29791_v22  ;;  %26543 = vmatmul.mubr.f32.vlgmr.msra.gmra.mxu0 %v29845_v17 }
0x2df7   :  { %26585 = vmatmul.mubr.f32.vlgmr.msra.gmra.mxu1 %v29838_v28  ;;  %26545 = vmatprep.mubr.f32.mxu0 %v21325_v23 }
0x2df8   :  { %26563 = vmatpush3.msra.mxu0 %v29789_v8  ;;  %26587 = vmatprep.mubr.f32.mxu1 %v21324_v49  ;;  %v26516_v8 = vpop.f32.mrf.mxu0 }
0x2df9   :  { %26564 = vmatprep.subr.mxu0 %v29801_v45 }
0x2dfa   :  { %26565 = vmatpush3.msra.mxu0 %v29801_v45  ;;  %v21310_v7 = vpop.f32.mrf.mxu0 }
0x2dfb   :  { %26546 = vmatmul.mubr.f32.gmra.mxu0 %v21335_v15  ;;  %26566 = vmatprep.subr.mxu0 %v29812_v36 }
0x2dfc   :  { %26588 = vmatmul.mubr.f32.gmra.mxu1 %v21334_v53  ;;  %26567 = vmatpush3.msra.mxu0 %v29812_v36  ;;  %v23391_v36 = vld [vmem:[%s30370_s1 + $0x179] ss:$0 sm:$0xff] }
0x2dfd   :  { %26570 = vmatprep.mubr.f32.mxu0 %v29815_v61  ;;  %26568 = vmatprep.subr.mxu0 %v29821_v59  ;;  %v21321_v24 = vadd.f32 %v26516_v8, %v23391_v36  ;;  %v21311_v51 = vadd.f32 %v23391_v36, %v21310_v7  ;;  %v21933_v8 = vld [vmem:[%s30370_s1 + $0x128] sm:$0xff]  ;;  %v21932_v7 = vld [vmem:[%s30370_s1 + $0x120] sm:$0xff] }
0x2dfe   :  { %26569 = vmatpush3.msra.mxu0 %v29821_v59 }
0x2dff   :  { %26571 = vmatmul.mubr.f32.vlgmr.msra.gmra.mxu0 %v29838_v28  ;;  %v21438_v17 = vadd.f32 %v26530_v41, %v21321_v24  ;;  %v21432_v29 = vadd.f32 %v21431_v32, %v21311_v51 }
0x2e00   :  { %26573 = vmatprep.mubr.f32.mxu0 %v21324_v49 }
0x2e03   :  { %26574 = vmatmul.mubr.f32.gmra.mxu0 %v21334_v53 }
0x2eaa   :  { %v26533_v60 = vpop.f32.mrf.mxu1 }
0x2eac   :  { %v21443_v22 = vpop.f32.mrf.mxu1 }
0x2eae   :  { %v26558_v45 = vpop.f32.mrf.mxu1 }
0x2eb0   :  { %v21627_v37 = vpop.f32.mrf.mxu1 }
0x2eb2   :  { %v26519_v61 = vpop.f32.mrf.mxu0  ;;  %v26561_v47 = vpop.f32.mrf.mxu1 }
0x2eb3   :  { %v21341_v1 = vadd.f32 %v26519_v61, %v23391_v36 }
0x2eb4   :  { %v21330_v59 = vpop.f32.mrf.mxu0  ;;  %v21643_v40 = vpop.f32.mrf.mxu1 }
0x2eb5   :  { %v21331_v56 = vadd.f32 %v23391_v36, %v21330_v59  ;;  %v21450_v11 = vadd.f32 %v26533_v60, %v21341_v1 }
0x2eb6   :  { %v26544_v28 = vpop.f32.mrf.mxu0 }
0x2eb7   :  { %v21537_v25 = vadd.f32 %v26544_v28, %v21438_v17  ;;  %v26586_v58 = vpop.f32.mrf.mxu1  ;;  %v21444_v27 = vadd.f32 %v21443_v22, %v21331_v56 }
0x2eb8   :  { %v21529_v46 = vpop.f32.mrf.mxu0 }
0x2eb9   :  { %v21530_v6 = vadd.f32 %v21529_v46, %v21432_v29  ;;  %v21636_v39 = vadd.f32 %v26558_v45, %v21537_v25  ;;  %v21827_v3 = vpop.f32.mrf.mxu1  ;;  %v29962_v45 = vand.u32 4294901760, %v21933_v8 }
0x2ebb   :  { %v26547_v10 = vpop.f32.mrf.mxu0  ;;  %v21628_v54 = vadd.f32 %v21627_v37, %v21530_v6  ;;  %v21931_v37 = vld [vmem:[%s30370_s1 + $0x118] sm:$0xff]  ;;  %v29976_v61 = vsub.f32 %v21933_v8, %v29962_v45 }
0x2ebc   :  { %v21551_v5 = vadd.f32 %v26547_v10, %v21450_v11  ;;  %v26589_v30 = vpop.f32.mrf.mxu1  ;;  %v29980_v24 = vand.u32 4294901760, %v21931_v37 }
0x2ebd   :  { %v21543_v52 = vpop.f32.mrf.mxu0  ;;  %v29987_v51 = vand.u32 4294901760, %v29976_v61 }
0x2ebe   :  { %v21544_v43 = vadd.f32 %v21543_v52, %v21444_v27  ;;  %v21652_v21 = vadd.f32 %v26561_v47, %v21551_v5  ;;  %v21839_v62 = vpop.f32.mrf.mxu1  ;;  %v29978_v47 = vand.u32 4294901760, %v21932_v7 }
0x2ebf   :  { %v26572_v48 = vpop.f32.mrf.mxu0  ;;  %v22096_v46 = vsub.f32 %v29976_v61, %v29987_v51 }
0x2ec0   :  { %v21741_v55 = vadd.f32 %v26572_v48, %v21636_v39  ;;  %v21644_v13 = vadd.f32 %v21643_v40, %v21544_v43  ;;  %v29990_v28 = vsub.f32 %v21932_v7, %v29978_v47  ;;  %v29993_v40 = vsub.f32 %v21931_v37, %v29980_v24 }
0x2ec1   :  { %v21734_v14 = vpop.f32.mrf.mxu0  ;;  %v22097_v29 = vand.u32 4294901760, %v22096_v46 }
0x2ec2   :  { %v21834_v9 = vadd.f32 %v26586_v58, %v21741_v55  ;;  %v21735_v4 = vadd.f32 %v21734_v14, %v21628_v54  ;;  %v30000_v56 = vand.u32 4294901760, %v29990_v28  ;;  %v30003_v25 = vand.u32 4294901760, %v29993_v40 }
0x2ec3   :  { %v26575_v57 = vpop.f32.mrf.mxu0 }
0x2ec4   :  { %v29920_v0 = vadd.f32 %v21834_v9, %v28846_v20  ;;  %v21828_v31 = vadd.f32 %v21827_v3, %v21735_v4  ;;  %v21753_v53 = vadd.f32 %v26575_v57, %v21652_v21  ;;  %v22103_v1 = vsub.f32 %v29990_v28, %v30000_v56 }
0x2ec5   :  { %v21746_v18 = vpop.f32.mrf.mxu0  ;;  %v22110_v58 = vsub.f32 %v29993_v40, %v30003_v25 }
0x2ec6   :  { %v29923_v33 = vadd.f32 %v21828_v31, %v28849_v34  ;;  %v21747_v38 = vadd.f32 %v21746_v18, %v21644_v13  ;;  %v21858_v2 = vsel %vm632_vm1, %v29920_v0, 0.0  ;;  %v21872_v20 = vmul.f32 %v29920_v0, %v29920_v0 }
0x2ec7   :  { %21859 = vadd.xlane.f32.xlu1 %v21858_v2  ;;  %v21846_v34 = vadd.f32 %v26589_v30, %v21753_v53  ;;  %v22104_v10 = vand.u32 4294901760, %v22103_v1  ;;  %v22111_v6 = vand.u32 4294901760, %v22110_v58 }
0x2ec8   :  { %v21840_v50 = vadd.f32 %v21839_v62, %v21747_v38  ;;  %v21855_v49 = vsel %vm632_vm1, %v29923_v33, 0.0  ;;  %v21878_v23 = vsel %vm632_vm1, %v21872_v20, 0.0  ;;  %v21871_v63 = vmul.f32 %v29923_v33, %v29923_v33 }
0x2ec9   :  { %21856 = vadd.xlane.f32.xlu0 %v21855_v49  ;;  %v29942_v19 = vadd.f32 %v21846_v34, %v28864_v12  ;;  %v21934_v12 = vld [vmem:[%s30370_s1 + $0x130] sm:$0xff] }
0x2eca   :  { %v29932_v15 = vadd.f32 %v21840_v50, %v28868_v26  ;;  %v21875_v26 = vsel %vm632_vm1, %v21871_v63, 0.0  ;;  %v29954_v60 = vand.u32 4294901760, %v21934_v12 }
0x2ecb   :  { %v21864_v42 = vsel %vm632_vm1, %v29942_v19, 0.0  ;;  %v21874_v41 = vmul.f32 %v29942_v19, %v29942_v19 }
0x2ecc   :  { %v21861_v44 = vsel %vm632_vm1, %v29932_v15, 0.0  ;;  %v21873_v35 = vmul.f32 %v29932_v15, %v29932_v15  ;;  %v29960_v22 = vsub.f32 %v21934_v12, %v29954_v60  ;;  %26590 = vmatprep.subr.mxu0 %v29954_v60 }
0x2ecd   :  { %21879 = vadd.xlane.f32.xlu0 %v21878_v23  ;;  %21862 = vadd.xlane.f32.xlu1 %v21861_v44  ;;  %v21884_v32 = vsel %vm632_vm1, %v21874_v41, 0.0 }
0x2ece   :  { %v21881_v16 = vsel %vm632_vm1, %v21873_v35, 0.0  ;;  %26591 = vmatpush3.msra.mxu0 %v29954_v60  ;;  %v29973_v36 = vand.u32 4294901760, %v29960_v22  ;;  %v23392_v35 = vld [vmem:[%s30370_s1 + $0x17c] ss:$0 sm:$0xff] }
0x2ecf   :  { %26592 = vmatprep.subr.mxu0 %v29962_v45 }
0x2ed0   :  { %26593 = vmatpush3.msra.mxu0 %v29962_v45  ;;  %v22089_v59 = vsub.f32 %v29960_v22, %v29973_v36 }
0x2ed1   :  { %21876 = vadd.xlane.f32.xlu0 %v21875_v26  ;;  %21882 = vadd.xlane.f32.xlu1 %v21881_v16  ;;  %v23393_v16 = vld [vmem:[%s30370_s1 + $0x17d] ss:$0 sm:$0xff] }
0x2ed2   :  { %26594 = vmatprep.subr.mxu0 %v29978_v47  ;;  %v22090_v17 = vand.u32 4294901760, %v22089_v59 }
0x2ed3   :  { %26595 = vmatpush3.msra.mxu0 %v29978_v47 }
0x2ed4   :  { %26596 = vmatprep.subr.mxu0 %v29980_v24  ;;  %26604 = vmatprep.subr.mxu1 %v22090_v17 }
0x2ed5   :  { %21865 = vadd.xlane.f32.xlu0 %v21864_v42  ;;  %26597 = vmatpush3.msra.mxu0 %v29980_v24 }
0x2ed6   :  { %26618 = vmatprep.subr.mxu0 %v29960_v22  ;;  %26605 = vmatpush3.msra.mxu1 %v22090_v17 }
0x2ed7   :  { %26606 = vmatprep.subr.mxu1 %v22097_v29 }
0x2ed8   :  { %26607 = vmatpush3.msra.mxu1 %v22097_v29 }
0x2ed9   :  { %21885 = vadd.xlane.f32.xlu0 %v21884_v32  ;;  %26608 = vmatprep.subr.mxu1 %v22104_v10 }
0x2eda   :  { %26609 = vmatpush3.msra.mxu1 %v22104_v10 }
0x2edb   :  { %26610 = vmatprep.subr.mxu1 %v22111_v6 }
0x2edc   :  { %26611 = vmatpush3.msra.mxu1 %v22111_v6 }
0x2edd   :  { %26632 = vmatprep.subr.mxu1 %v29954_v60 }
0x2f50   :  { %v21860_v52 = vpop.xlane.xlu1 %21859 }
0x2f51   :  { %v21868_v39 = vmul.f32 0.03125, %v21860_v52 }
0x2f52   :  { %v21857_v27 = vpop.xlane.xlu0 %21856 }
0x2f53   :  { %v21867_v3 = vmul.f32 0.03125, %v21857_v27  ;;  %v21892_v43 = vmul.f32 %v21868_v39, %v21868_v39  ;;  %v21900_v44 = vsub.f32 %v29920_v0, %v21868_v39 }
0x2f55   :  { %v21891_v14 = vmul.f32 %v21867_v3, %v21867_v3  ;;  %v21899_v42 = vsub.f32 %v29923_v33, %v21867_v3 }
0x2f56   :  { %v21880_v11 = vpop.xlane.xlu0 %21879  ;;  %v21863_v48 = vpop.xlane.xlu1 %21862 }
0x2f57   :  { %v21888_v55 = vmul.f32 0.03125, %v21880_v11  ;;  %v21869_v54 = vmul.f32 0.03125, %v21863_v48 }
0x2f59   :  { %v21896_v5 = vsub.f32 %v21888_v55, %v21892_v43  ;;  %v21893_v57 = vmul.f32 %v21869_v54, %v21869_v54  ;;  %v21901_v12 = vsub.f32 %v29932_v15, %v21869_v54 }
0x2f5a   :  { %v21877_v9 = vpop.xlane.xlu0 %21876  ;;  %v21883_v4 = vpop.xlane.xlu1 %21882 }
0x2f5b   :  { %v21904_v30 = vadd.f32 1e-05, %v21896_v5  ;;  %v21887_v31 = vmul.f32 0.03125, %v21877_v9  ;;  %v21889_v13 = vmul.f32 0.03125, %v21883_v4 }
0x2f5d   :  { %26965 = vrsqrt.f32 %v21904_v30  ;;  %v21895_v21 = vsub.f32 %v21887_v31, %v21891_v14  ;;  %v21897_v18 = vsub.f32 %v21889_v13, %v21893_v57 }
0x2f5e   :  { %v21866_v38 = vpop.xlane.xlu0 %21865 }
0x2f5f   :  { %v21903_v2 = vadd.f32 1e-05, %v21895_v21  ;;  %v21905_v62 = vadd.f32 1e-05, %v21897_v18  ;;  %v21870_v53 = vmul.f32 0.03125, %v21866_v38 }
0x2f61   :  { %26967 = vrsqrt.f32 %v21903_v2  ;;  %v21894_v49 = vmul.f32 %v21870_v53, %v21870_v53  ;;  %v21902_v15 = vsub.f32 %v29942_v19, %v21870_v53 }
0x2f62   :  { %26969 = vrsqrt.f32 %v21905_v62  ;;  %v21886_v50 = vpop.xlane.xlu0 %21885 }
0x2f63   :  { %v21890_v20 = vmul.f32 0.03125, %v21886_v50 }
0x2f65   :  { %v21898_v34 = vsub.f32 %v21890_v20, %v21894_v49  ;;  %v22573_v49 = vld [vmem:[%s30370_s1 + $0x150] sm:$0xff] }
0x2f67   :  { %v21906_v23 = vadd.f32 1e-05, %v21898_v34 }
0x2f69   :  { %26971 = vrsqrt.f32 %v21906_v23 }
0x2f6a   :  { %v26966_v63 = vpop.eup %26965 }
0x2f6b   :  { %v21912_v26 = vmul.f32 %v26966_v63, %v21900_v44  ;;  %v30147_v63 = vand.u32 4294901760, %v22573_v49 }
0x2f6d   :  { %v21920_v41 = vmul.f32 %v23392_v35, %v21912_v26 }
0x2f6e   :  { %v26968_v32 = vpop.eup %26967 }
0x2f6f   :  { %v26970_v8 = vpop.eup %26969  ;;  %v21911_v7 = vmul.f32 %v26968_v32, %v21899_v42  ;;  %v30022_v0 = vadd.f32 %v23393_v16, %v21920_v41  ;;  %v30161_v32 = vsub.f32 %v22573_v49, %v30147_v63 }
0x2f70   :  { %v21913_v37 = vmul.f32 %v26970_v8, %v21901_v12  ;;  %v22571_v12 = vld [vmem:[%s30370_s1 + $0x140] sm:$0xff] }
0x2f71   :  { %v21919_v59 = vmul.f32 %v23392_v35, %v21911_v7  ;;  %v21944_v17 = vsel %vm632_vm1, %v30022_v0, 0 }
0x2f72   :  { %v30026_v46 = vand.u32 4294901760, %v21944_v17  ;;  %v21921_v29 = vmul.f32 %v23392_v35, %v21913_v37 }
0x2f73   :  { %v30028_v1 = vadd.f32 %v23393_v16, %v21919_v59  ;;  %v30172_v59 = vand.u32 4294901760, %v22571_v12 }
0x2f74   :  { %v30031_v33 = vsub.f32 %v21944_v17, %v30026_v46  ;;  %v30033_v58 = vadd.f32 %v23393_v16, %v21921_v29  ;;  %v30176_v17 = vand.u32 4294901760, %v30161_v32 }
0x2f75   :  { %v21941_v10 = vsel %vm632_vm1, %v30028_v1, 0 }
0x2f76   :  { %v26972_v6 = vpop.eup %26971  ;;  %v30038_v52 = vand.u32 4294901760, %v21941_v10  ;;  %v21947_v27 = vsel %vm632_vm1, %v30033_v58, 0  ;;  %v22033_v11 = vand.u32 4294901760, %v30031_v33 }
0x2f77   :  { %v30042_v39 = vand.u32 4294901760, %v21947_v27  ;;  %v21914_v3 = vmul.f32 %v26972_v6, %v21902_v15  ;;  %v30186_v15 = vsub.f32 %v22571_v12, %v30172_v59  ;;  %v22756_v6 = vsub.f32 %v30161_v32, %v30176_v17 }
0x2f78   :  { %26612 = vmatprep.mubr.f32.mxu1 %v30038_v52  ;;  %v22022_v48 = vsub.f32 %v21941_v10, %v30038_v52  ;;  %v22034_v5 = vsub.f32 %v30031_v33, %v22033_v11 }
0x2f79   :  { %26613 = vmatmul.mubr.f32.vlgmr.msra.gmra.mxu1 %v30026_v46  ;;  %v21922_v19 = vmul.f32 %v23392_v35, %v21914_v3  ;;  %v22042_v43 = vsub.f32 %v21947_v27, %v30042_v39  ;;  %v22572_v35 = vld [vmem:[%s30370_s1 + $0x148] sm:$0xff]  ;;  %v30197_v27 = vand.u32 4294901760, %v30186_v15  ;;  %v22757_v3 = vand.u32 4294901760, %v22756_v6 }
0x2f7a   :  { %26615 = vmatprep.mubr.f32.mxu1 %v30042_v39  ;;  %26633 = vmatpush3.msra.mxu1 %v29954_v60  ;;  %v22023_v55 = vand.u32 4294901760, %v22022_v48  ;;  %v22035_v13 = vand.u32 4294901760, %v22034_v5  ;;  %v30158_v41 = vand.u32 4294901760, %v22572_v35 }
0x2f7b   :  { %26634 = vmatprep.subr.mxu1 %v29962_v45  ;;  %v30052_v54 = vadd.f32 %v23393_v16, %v21922_v19  ;;  %v22043_v14 = vand.u32 4294901760, %v22042_v43 }
0x2f7c   :  { %26635 = vmatpush3.msra.mxu1 %v29962_v45  ;;  %v22024_v9 = vsub.f32 %v22022_v48, %v22023_v55  ;;  %v30170_v37 = vsub.f32 %v22572_v35, %v30158_v41 }
0x2f7d   :  { %v21950_v4 = vsel %vm632_vm1, %v30052_v54, 0  ;;  %26636 = vmatprep.subr.mxu1 %v29978_v47  ;;  %v22044_v30 = vsub.f32 %v22042_v43, %v22043_v14 }
0x2f7e   :  { %v22025_v57 = vand.u32 4294901760, %v22024_v9  ;;  %v22051_v31 = vand.u32 4294901760, %v21950_v4  ;;  %26637 = vmatpush3.msra.mxu1 %v29978_v47 }
0x2f7f   :  { %26638 = vmatprep.subr.mxu1 %v29980_v24  ;;  %v22045_v18 = vand.u32 4294901760, %v22044_v30 }
0x2f80   :  { %26598 = vmatprep.mubr.f32.mxu0 %v22025_v57  ;;  %v22052_v21 = vsub.f32 %v21950_v4, %v22051_v31  ;;  %26616 = vmatmul.mubr.f32.gmra.mxu1 %v22051_v31 }
0x2f81   :  { %26599 = vmatmul.mubr.f32.vlgmr.msra.gmra.mxu0 %v22035_v13  ;;  %26640 = vmatprep.mubr.f32.mxu1 %v22023_v55 }
0x2f82   :  { %26601 = vmatprep.mubr.f32.mxu0 %v22045_v18  ;;  %26639 = vmatpush3.msra.mxu1 %v29980_v24  ;;  %v22053_v38 = vand.u32 4294901760, %v22052_v21  ;;  %v23394_v18 = vld [vmem:[%s30370_s1 + $0x17a] ss:$0 sm:$0xff] }
0x2f83   :  { %26660 = vmatprep.subr.mxu1 %v29954_v60  ;;  %26619 = vmatpush3.msra.mxu0 %v29960_v22 }
0x2f84   :  { %26641 = vmatmul.mubr.f32.vlgmr.msra.gmra.mxu1 %v22033_v11  ;;  %26620 = vmatprep.subr.mxu0 %v29976_v61  ;;  %v22054_v2 = vsub.f32 %v22052_v21, %v22053_v38 }
0x2f85   :  { %26643 = vmatprep.mubr.f32.mxu1 %v22043_v14  ;;  %26661 = vmatpush3.msra.mxu1 %v29954_v60  ;;  %v22577_v60 = vld [vmem:[%s30370_s1 + $0x170] sm:$0xff] }
0x2f86   :  { %26662 = vmatprep.subr.mxu1 %v29962_v45  ;;  %26621 = vmatpush3.msra.mxu0 %v29976_v61  ;;  %v22055_v62 = vand.u32 4294901760, %v22054_v2  ;;  %v30095_v22 = vand.u32 4294901760, %v22577_v60 }
0x2f87   :  { %26663 = vmatpush3.msra.mxu1 %v29962_v45  ;;  %26622 = vmatprep.subr.mxu0 %v29990_v28  ;;  %v22576_v45 = vld [vmem:[%s30370_s1 + $0x168] sm:$0xff] }
0x2f88   :  { %26602 = vmatmul.mubr.f32.gmra.mxu0 %v22055_v62  ;;  %26644 = vmatmul.mubr.f32.gmra.mxu1 %v22053_v38  ;;  %v30103_v61 = vand.u32 4294901760, %v22576_v45 }
0x2f89   :  { %26664 = vmatprep.subr.mxu1 %v29978_v47  ;;  %26623 = vmatpush3.msra.mxu0 %v29990_v28 }
0x2f8a   :  { %26626 = vmatprep.mubr.f32.mxu0 %v22022_v48  ;;  %26665 = vmatpush3.msra.mxu1 %v29978_v47  ;;  %v22575_v47 = vld [vmem:[%s30370_s1 + $0x160] sm:$0xff]  ;;  %v22770_v48 = vsub.f32 %v30186_v15, %v30197_v27 }
0x2f8b   :  { %26668 = vmatprep.mubr.f32.mxu1 %v30038_v52  ;;  %26624 = vmatprep.subr.mxu0 %v29993_v40  ;;  %v30116_v28 = vand.u32 4294901760, %v22575_v47 }
0x2f8c   :  { %26666 = vmatprep.subr.mxu1 %v29980_v24  ;;  %26625 = vmatpush3.msra.mxu0 %v29993_v40  ;;  %v22574_v40 = vld [vmem:[%s30370_s1 + $0x158] sm:$0xff] }
0x2f8d   :  { %26667 = vmatpush3.msra.mxu1 %v29980_v24  ;;  %26627 = vmatmul.mubr.f32.vlgmr.msra.gmra.mxu0 %v30031_v33  ;;  %v30129_v53 = vsub.f32 %v22575_v47, %v30116_v28  ;;  %v30131_v50 = vand.u32 4294901760, %v22574_v40  ;;  %v30183_v33 = vand.u32 4294901760, %v30170_v37 }
0x2f8e   :  { %26646 = vmatprep.subr.mxu0 %v29973_v36  ;;  %26669 = vmatmul.mubr.f32.vlgmr.msra.gmra.mxu1 %v30026_v46 }
0x2f8f   :  { %26629 = vmatprep.mubr.f32.mxu0 %v22042_v43  ;;  %26647 = vmatpush3.msra.mxu0 %v29973_v36  ;;  %v30101_v36 = vsub.f32 %v22577_v60, %v30095_v22  ;;  %v30141_v23 = vand.u32 4294901760, %v30129_v53  ;;  %v30144_v44 = vsub.f32 %v22574_v40, %v30131_v50  ;;  %v22771_v43 = vand.u32 4294901760, %v22770_v48 }
0x2f90   :  { %26671 = vmatprep.mubr.f32.mxu1 %v30042_v39  ;;  %26648 = vmatprep.subr.mxu0 %v29987_v51 }
0x2f91   :  { %26649 = vmatpush3.msra.mxu0 %v29987_v51  ;;  %v30111_v24 = vand.u32 4294901760, %v30101_v36  ;;  %v30114_v51 = vsub.f32 %v22576_v45, %v30103_v61  ;;  %v22742_v16 = vsub.f32 %v30129_v53, %v30141_v23  ;;  %v30156_v42 = vand.u32 4294901760, %v30144_v44 }
0x2f92   :  { %26630 = vmatmul.mubr.f32.gmra.mxu0 %v22052_v21  ;;  %26650 = vmatprep.subr.mxu0 %v30000_v56 }
0x2f93   :  { %26672 = vmatmul.mubr.f32.gmra.mxu1 %v22051_v31  ;;  %26651 = vmatpush3.msra.mxu0 %v30000_v56  ;;  %v22728_v56 = vsub.f32 %v30101_v36, %v30111_v24  ;;  %v22743_v8 = vand.u32 4294901760, %v22742_v16  ;;  %v22749_v7 = vsub.f32 %v30144_v44, %v30156_v42 }
0x2f94   :  { %26654 = vmatprep.mubr.f32.mxu0 %v30038_v52  ;;  %26652 = vmatprep.subr.mxu0 %v30003_v25  ;;  %v22763_v52 = vsub.f32 %v30170_v37, %v30183_v33 }
0x2f95   :  { %26653 = vmatpush3.msra.mxu0 %v30003_v25  ;;  %v30126_v25 = vand.u32 4294901760, %v30114_v51  ;;  %v22729_v20 = vand.u32 4294901760, %v22728_v56  ;;  %v22750_v29 = vand.u32 4294901760, %v22749_v7 }
0x2f96   :  { %26655 = vmatmul.mubr.f32.vlgmr.msra.gmra.mxu0 %v30026_v46  ;;  %26674 = vmatprep.subr.mxu0 %v30095_v22  ;;  %v22570_v46 = vld [vmem:[%s30370_s1 + $0x138] sm:$0xff]  ;;  %v22764_v11 = vand.u32 4294901760, %v22763_v52 }
0x2f97   :  { %26657 = vmatprep.mubr.f32.mxu0 %v30042_v39  ;;  %26675 = vmatpush3.msra.mxu0 %v30095_v22  ;;  %v22735_v34 = vsub.f32 %v30114_v51, %v30126_v25  ;;  %v30188_v10 = vand.u32 4294901760, %v22570_v46 }
0x2f98   :  { %26676 = vmatprep.subr.mxu0 %v30103_v61  ;;  %26696 = vmatprep.subr.mxu1 %v22729_v20 }
0x2f99   :  { %26677 = vmatpush3.msra.mxu0 %v30103_v61  ;;  %v22736_v26 = vand.u32 4294901760, %v22735_v34  ;;  %26697 = vmatpush3.msra.mxu1 %v22729_v20  ;;  %v30200_v39 = vsub.f32 %v22570_v46, %v30188_v10 }
0x2f9a   :  { %26658 = vmatmul.mubr.f32.gmra.mxu0 %v22051_v31  ;;  %26678 = vmatprep.subr.mxu0 %v30116_v28 }
0x2f9b   :  { %26679 = vmatpush3.msra.mxu0 %v30116_v28  ;;  %26698 = vmatprep.subr.mxu1 %v22736_v26  ;;  %v30207_v19 = vand.u32 4294901760, %v30200_v39 }
0x2f9c   :  { %26680 = vmatprep.subr.mxu0 %v30131_v50  ;;  %26699 = vmatpush3.msra.mxu1 %v22736_v26 }
0x2f9d   :  { %26681 = vmatpush3.msra.mxu0 %v30131_v50  ;;  %26700 = vmatprep.subr.mxu1 %v22743_v8  ;;  %v22777_v55 = vsub.f32 %v30200_v39, %v30207_v19 }
0x2f9e   :  { %26682 = vmatprep.subr.mxu0 %v30147_v63  ;;  %26701 = vmatpush3.msra.mxu1 %v22743_v8 }
0x2f9f   :  { %26683 = vmatpush3.msra.mxu0 %v30147_v63  ;;  %26702 = vmatprep.subr.mxu1 %v22750_v29  ;;  %v22778_v5 = vand.u32 4294901760, %v22777_v55 }
0x2fa0   :  { %26684 = vmatprep.subr.mxu0 %v30158_v41  ;;  %26703 = vmatpush3.msra.mxu1 %v22750_v29 }
0x2fa1   :  { %26685 = vmatpush3.msra.mxu0 %v30158_v41  ;;  %26704 = vmatprep.subr.mxu1 %v22757_v3 }
0x2fa2   :  { %26686 = vmatprep.subr.mxu0 %v30172_v59  ;;  %26705 = vmatpush3.msra.mxu1 %v22757_v3 }
0x2fa3   :  { %26687 = vmatpush3.msra.mxu0 %v30172_v59  ;;  %26706 = vmatprep.subr.mxu1 %v22764_v11 }
0x2fa4   :  { %26688 = vmatprep.subr.mxu0 %v30188_v10  ;;  %26707 = vmatpush3.msra.mxu1 %v22764_v11 }
0x2fa5   :  { %26689 = vmatpush3.msra.mxu0 %v30188_v10  ;;  %26708 = vmatprep.subr.mxu1 %v22771_v43 }
0x2fa6   :  { %26718 = vmatprep.subr.mxu0 %v30101_v36  ;;  %26709 = vmatpush3.msra.mxu1 %v22771_v43 }
0x2fa7   :  { %26710 = vmatprep.subr.mxu1 %v22778_v5 }
0x2fa8   :  { %26711 = vmatpush3.msra.mxu1 %v22778_v5 }
0x2fa9   :  { %26740 = vmatprep.subr.mxu1 %v30095_v22 }
0x3039   :  { %v26614_v14 = vpop.f32.mrf.mxu1 }
0x303b   :  { %v22148_v9 = vpop.f32.mrf.mxu1 }
0x3040   :  { %v26617_v4 = vpop.f32.mrf.mxu1 }
0x3041   :  { %v26600_v30 = vpop.f32.mrf.mxu0 }
0x3042   :  { %v22160_v57 = vpop.f32.mrf.mxu1  ;;  %v22038_v60 = vadd.f32 %v26600_v30, %v23394_v18 }
0x3043   :  { %v22027_v13 = vpop.f32.mrf.mxu0 }
0x3044   :  { %v26642_v31 = vpop.f32.mrf.mxu1  ;;  %v22028_v45 = vadd.f32 %v23394_v18, %v22027_v13  ;;  %v22155_v49 = vadd.f32 %v26614_v14, %v22038_v60 }
0x3046   :  { %v22344_v21 = vpop.f32.mrf.mxu1  ;;  %v22149_v26 = vadd.f32 %v22148_v9, %v22028_v45 }
0x3048   :  { %v26603_v38 = vpop.f32.mrf.mxu0  ;;  %v26645_v2 = vpop.f32.mrf.mxu1 }
0x3049   :  { %v22058_v56 = vadd.f32 %v26603_v38, %v23394_v18 }
0x304a   :  { %v22047_v62 = vpop.f32.mrf.mxu0  ;;  %v22360_v40 = vpop.f32.mrf.mxu1 }
0x304b   :  { %v22048_v34 = vadd.f32 %v23394_v18, %v22047_v62  ;;  %v22167_v7 = vadd.f32 %v26617_v4, %v22058_v56 }
0x304d   :  { %v26628_v47 = vpop.f32.mrf.mxu0  ;;  %v22161_v6 = vadd.f32 %v22160_v57, %v22048_v34 }
0x304e   :  { %v22254_v35 = vadd.f32 %v26628_v47, %v22155_v49  ;;  %v26670_v16 = vpop.f32.mrf.mxu1 }
0x304f   :  { %v22246_v20 = vpop.f32.mrf.mxu0 }
0x3050   :  { %v22247_v8 = vadd.f32 %v22246_v20, %v22149_v26  ;;  %v22353_v52 = vadd.f32 %v26642_v31, %v22254_v35  ;;  %v22544_v3 = vpop.f32.mrf.mxu1 }
0x3052   :  { %v26631_v12 = vpop.f32.mrf.mxu0  ;;  %v22345_v55 = vadd.f32 %v22344_v21, %v22247_v8 }
0x3053   :  { %v22268_v29 = vadd.f32 %v26631_v12, %v22167_v7  ;;  %v26673_v18 = vpop.f32.mrf.mxu1 }
0x3054   :  { %v22260_v46 = vpop.f32.mrf.mxu0 }
0x3055   :  { %v22261_v48 = vadd.f32 %v22260_v46, %v22161_v6  ;;  %v22369_v13 = vadd.f32 %v26645_v2, %v22268_v29  ;;  %v22556_v49 = vpop.f32.mrf.mxu1 }
0x3056   :  { %v26656_v11 = vpop.f32.mrf.mxu0 }
0x3057   :  { %v22458_v43 = vadd.f32 %v26656_v11, %v22353_v52  ;;  %v22361_v45 = vadd.f32 %v22360_v40, %v22261_v48 }
0x3058   :  { %v22451_v5 = vpop.f32.mrf.mxu0 }
0x3059   :  { %v22551_v30 = vadd.f32 %v26670_v16, %v22458_v43  ;;  %v22452_v14 = vadd.f32 %v22451_v5, %v22345_v55 }
0x305a   :  { %v26659_v38 = vpop.f32.mrf.mxu0 }
0x305b   :  { %v22567_v9 = vmax.f32 %v22551_v30, 0.0  ;;  %v22545_v62 = vadd.f32 %v22544_v3, %v22452_v14  ;;  %v22470_v60 = vadd.f32 %v26659_v38, %v22369_v13 }
0x305c   :  { %v22463_v4 = vpop.f32.mrf.mxu0 }
0x305d   :  { %v22587_v47 = vsel %vm11226_vm7, %v22567_v9, 0  ;;  %v22566_v57 = vmax.f32 %v22545_v62, 0.0  ;;  %v22563_v31 = vadd.f32 %v26673_v18, %v22470_v60  ;;  %v22464_v56 = vadd.f32 %v22463_v4, %v22361_v45 }
0x305e   :  { %v30218_v20 = vand.u32 4294901760, %v22587_v47 }
0x305f   :  { %v22584_v21 = vsel %vm11226_vm7, %v22566_v57, 0  ;;  %v22569_v34 = vmax.f32 %v22563_v31, 0.0  ;;  %v22557_v35 = vadd.f32 %v22556_v49, %v22464_v56 }
0x3060   :  { %v30222_v2 = vsub.f32 %v22587_v47, %v30218_v20  ;;  %v30224_v26 = vand.u32 4294901760, %v22584_v21 }
0x3061   :  { %v22593_v40 = vsel %vm11226_vm7, %v22569_v34, 0  ;;  %v22568_v16 = vmax.f32 %v22557_v35, 0.0 }
0x3062   :  { %v22680_v12 = vand.u32 4294901760, %v30222_v2  ;;  %v22669_v8 = vsub.f32 %v22584_v21, %v30224_v26  ;;  %v30229_v7 = vand.u32 4294901760, %v22593_v40  ;;  %26712 = vmatprep.mubr.f32.mxu1 %v30224_v26 }
0x3063   :  { %v22590_v46 = vsel %vm11226_vm7, %v22568_v16, 0  ;;  %26713 = vmatmul.mubr.f32.vlgmr.msra.gmra.mxu1 %v30218_v20 }
0x3064   :  { %v30235_v29 = vsub.f32 %v22593_v40, %v30229_v7  ;;  %v30237_v6 = vand.u32 4294901760, %v22590_v46  ;;  %26741 = vmatpush3.msra.mxu1 %v30095_v22  ;;  %v22670_v52 = vand.u32 4294901760, %v22669_v8  ;;  %v22681_v3 = vsub.f32 %v30222_v2, %v22680_v12 }
0x3065   :  { %26742 = vmatprep.subr.mxu1 %v30103_v61 }
0x3066   :  { %v22689_v11 = vsub.f32 %v22590_v46, %v30237_v6  ;;  %26743 = vmatpush3.msra.mxu1 %v30103_v61  ;;  %26715 = vmatprep.mubr.f32.mxu1 %v30237_v6  ;;  %v22671_v48 = vsub.f32 %v22669_v8, %v22670_v52  ;;  %v22700_v43 = vand.u32 4294901760, %v30235_v29  ;;  %v22682_v30 = vand.u32 4294901760, %v22681_v3 }
0x3067   :  { %26744 = vmatprep.subr.mxu1 %v30116_v28  ;;  %26716 = vmatmul.mubr.f32.gmra.mxu1 %v30229_v7 }
0x3068   :  { %26745 = vmatpush3.msra.mxu1 %v30116_v28  ;;  %26756 = vmatprep.mubr.f32.mxu1 %v22670_v52  ;;  %v22672_v55 = vand.u32 4294901760, %v22671_v48  ;;  %v22690_v5 = vand.u32 4294901760, %v22689_v11  ;;  %v22701_v13 = vsub.f32 %v30235_v29, %v22700_v43 }
0x3069   :  { %26746 = vmatprep.subr.mxu1 %v30131_v50 }
0x306a   :  { %26747 = vmatpush3.msra.mxu1 %v30131_v50  ;;  %26690 = vmatprep.mubr.f32.mxu0 %v22672_v55  ;;  %v22691_v14 = vsub.f32 %v22689_v11, %v22690_v5  ;;  %v22702_v38 = vand.u32 4294901760, %v22701_v13 }
0x306b   :  { %26748 = vmatprep.subr.mxu1 %v30147_v63  ;;  %26691 = vmatmul.mubr.f32.vlgmr.msra.gmra.mxu0 %v22682_v30 }
0x306c   :  { %26719 = vmatpush3.msra.mxu0 %v30101_v36  ;;  %26749 = vmatpush3.msra.mxu1 %v30147_v63  ;;  %v22692_v18 = vand.u32 4294901760, %v22691_v14 }
0x306d   :  { %26720 = vmatprep.subr.mxu0 %v30114_v51  ;;  %26750 = vmatprep.subr.mxu1 %v30158_v41 }
0x306e   :  { %26721 = vmatpush3.msra.mxu0 %v30114_v51  ;;  %26751 = vmatpush3.msra.mxu1 %v30158_v41 }
0x306f   :  { %26693 = vmatprep.mubr.f32.mxu0 %v22692_v18  ;;  %26722 = vmatprep.subr.mxu0 %v30129_v53 }
0x3070   :  { %26752 = vmatprep.subr.mxu1 %v30172_v59  ;;  %26694 = vmatmul.mubr.f32.gmra.mxu0 %v22702_v38 }
0x3071   :  { %26723 = vmatpush3.msra.mxu0 %v30129_v53  ;;  %26753 = vmatpush3.msra.mxu1 %v30172_v59 }
0x3072   :  { %26724 = vmatprep.subr.mxu0 %v30144_v44  ;;  %26734 = vmatprep.mubr.f32.mxu0 %v22669_v8 }
0x3073   :  { %26754 = vmatprep.subr.mxu1 %v30188_v10  ;;  %26725 = vmatpush3.msra.mxu0 %v30144_v44 }
0x3074   :  { %26755 = vmatpush3.msra.mxu1 %v30188_v10  ;;  %26726 = vmatprep.subr.mxu0 %v30161_v32 }
0x3075   :  { %26757 = vmatmul.mubr.f32.vlgmr.msra.gmra.mxu1 %v22680_v12  ;;  %26784 = vmatprep.subr.mxu1 %v30095_v22 }
0x3076   :  { %26727 = vmatpush3.msra.mxu0 %v30161_v32  ;;  %26759 = vmatprep.mubr.f32.mxu1 %v22690_v5 }
0x3077   :  { %26785 = vmatpush3.msra.mxu1 %v30095_v22  ;;  %26728 = vmatprep.subr.mxu0 %v30170_v37 }
0x3078   :  { %26786 = vmatprep.subr.mxu1 %v30103_v61  ;;  %26729 = vmatpush3.msra.mxu0 %v30170_v37 }
0x3079   :  { %26787 = vmatpush3.msra.mxu1 %v30103_v61  ;;  %26730 = vmatprep.subr.mxu0 %v30186_v15 }
0x307a   :  { %26760 = vmatmul.mubr.f32.gmra.mxu1 %v22700_v43  ;;  %26788 = vmatprep.subr.mxu1 %v30116_v28 }
0x307b   :  { %26731 = vmatpush3.msra.mxu0 %v30186_v15  ;;  %26789 = vmatpush3.msra.mxu1 %v30116_v28 }
0x307c   :  { %26800 = vmatprep.mubr.f32.mxu1 %v30224_v26  ;;  %26732 = vmatprep.subr.mxu0 %v30200_v39 }
0x307d   :  { %26790 = vmatprep.subr.mxu1 %v30131_v50  ;;  %26733 = vmatpush3.msra.mxu0 %v30200_v39 }
0x307e   :  { %26791 = vmatpush3.msra.mxu1 %v30131_v50  ;;  %26735 = vmatmul.mubr.f32.vlgmr.msra.gmra.mxu0 %v30222_v2 }
0x307f   :  { %26762 = vmatprep.subr.mxu0 %v30111_v24  ;;  %26792 = vmatprep.subr.mxu1 %v30147_v63 }
0x3080   :  { %26737 = vmatprep.mubr.f32.mxu0 %v22689_v11  ;;  %26763 = vmatpush3.msra.mxu0 %v30111_v24 }
0x3081   :  { %26793 = vmatpush3.msra.mxu1 %v30147_v63  ;;  %26764 = vmatprep.subr.mxu0 %v30126_v25 }
0x3082   :  { %26794 = vmatprep.subr.mxu1 %v30158_v41  ;;  %26765 = vmatpush3.msra.mxu0 %v30126_v25 }
0x3083   :  { %26795 = vmatpush3.msra.mxu1 %v30158_v41  ;;  %26738 = vmatmul.mubr.f32.gmra.mxu0 %v30235_v29 }
0x3084   :  { %26766 = vmatprep.subr.mxu0 %v30141_v23  ;;  %26796 = vmatprep.subr.mxu1 %v30172_v59 }
0x3085   :  { %26767 = vmatpush3.msra.mxu0 %v30141_v23  ;;  %26778 = vmatprep.mubr.f32.mxu0 %v30224_v26  ;;  %v23395_v23 = vld [vmem:[%s30370_s1 + $0x17b] ss:$0 sm:$0xff] }
0x3086   :  { %26797 = vmatpush3.msra.mxu1 %v30172_v59  ;;  %26768 = vmatprep.subr.mxu0 %v30156_v42 }
0x3087   :  { %26798 = vmatprep.subr.mxu1 %v30188_v10  ;;  %26769 = vmatpush3.msra.mxu0 %v30156_v42 }
0x3088   :  { %26799 = vmatpush3.msra.mxu1 %v30188_v10  ;;  %26770 = vmatprep.subr.mxu0 %v30176_v17 }
0x3089   :  { %26801 = vmatmul.mubr.f32.vlgmr.msra.gmra.mxu1 %v30218_v20  ;;  %26771 = vmatpush3.msra.mxu0 %v30176_v17 }
0x308a   :  { %26803 = vmatprep.mubr.f32.mxu1 %v30237_v6  ;;  %26772 = vmatprep.subr.mxu0 %v30183_v33 }
0x308b   :  { %26773 = vmatpush3.msra.mxu0 %v30183_v33 }
0x308c   :  { %26774 = vmatprep.subr.mxu0 %v30197_v27 }
0x308d   :  { %26804 = vmatmul.mubr.f32.gmra.mxu1 %v30229_v7  ;;  %26775 = vmatpush3.msra.mxu0 %v30197_v27 }
0x308e   :  { %26776 = vmatprep.subr.mxu0 %v30207_v19 }
0x308f   :  { %26777 = vmatpush3.msra.mxu0 %v30207_v19 }
0x3090   :  { %26779 = vmatmul.mubr.f32.vlgmr.msra.gmra.mxu0 %v30218_v20 }
0x3091   :  { %26781 = vmatprep.mubr.f32.mxu0 %v30237_v6 }
0x3094   :  { %26782 = vmatmul.mubr.f32.gmra.mxu0 %v30229_v7 }
0x3123   :  { %v26714_v22 = vpop.f32.mrf.mxu1 }
0x3125   :  { %v22815_v36 = vpop.f32.mrf.mxu1 }
0x3127   :  { %v26717_v24 = vpop.f32.mrf.mxu1 }
0x3129   :  { %v22827_v28 = vpop.f32.mrf.mxu1 }
0x312b   :  { %v26692_v61 = vpop.f32.mrf.mxu0 }
0x312c   :  { %v22685_v42 = vadd.f32 %v26692_v61, %v23395_v23 }
0x312d   :  { %v22674_v51 = vpop.f32.mrf.mxu0 }
0x312e   :  { %v22675_v37 = vadd.f32 %v23395_v23, %v22674_v51  ;;  %v22822_v17 = vadd.f32 %v26714_v22, %v22685_v42 }
0x3130   :  { %v26695_v25 = vpop.f32.mrf.mxu0  ;;  %v22816_v39 = vadd.f32 %v22815_v36, %v22675_v37 }
0x3131   :  { %v22705_v59 = vadd.f32 %v26695_v25, %v23395_v23 }
0x3132   :  { %v22694_v50 = vpop.f32.mrf.mxu0 }
0x3133   :  { %v22695_v10 = vadd.f32 %v23395_v23, %v22694_v50  ;;  %v22834_v62 = vadd.f32 %v26717_v24, %v22705_v59 }
0x3135   :  { %v26758_v53 = vpop.f32.mrf.mxu1  ;;  %v22828_v4 = vadd.f32 %v22827_v28, %v22695_v10 }
0x3137   :  { %v23023_v44 = vpop.f32.mrf.mxu1 }
0x313a   :  { %v26761_v41 = vpop.f32.mrf.mxu1 }
0x313c   :  { %v23039_v33 = vpop.f32.mrf.mxu1 }
0x313e   :  { %v26736_v63 = vpop.f32.mrf.mxu0 }
0x313f   :  { %v22929_v27 = vadd.f32 %v26736_v63, %v22822_v17 }
0x3140   :  { %v22921_v32 = vpop.f32.mrf.mxu0 }
0x3141   :  { %v22922_v9 = vadd.f32 %v22921_v32, %v22816_v39  ;;  %v23032_v47 = vadd.f32 %v26758_v53, %v22929_v27 }
0x3143   :  { %v26739_v15 = vpop.f32.mrf.mxu0  ;;  %v23024_v20 = vadd.f32 %v23023_v44, %v22922_v9 }
0x3144   :  { %v22943_v45 = vadd.f32 %v26739_v15, %v22834_v62 }
0x3145   :  { %v22935_v60 = vpop.f32.mrf.mxu0 }
0x3146   :  { %v22936_v56 = vadd.f32 %v22935_v60, %v22828_v4  ;;  %v23048_v2 = vadd.f32 %v26761_v41, %v22943_v45 }
0x3148   :  { %v23040_v7 = vadd.f32 %v23039_v33, %v22936_v56 }
0x3149   :  { %v26802_v19 = vpop.f32.mrf.mxu1 }
0x314b   :  { %v23239_v57 = vpop.f32.mrf.mxu1 }
0x314d   :  { %v26805_v26 = vpop.f32.mrf.mxu1 }
0x314f   :  { %v23251_v11 = vpop.f32.mrf.mxu1 }
0x3150   :  { %v26780_v31 = vpop.f32.mrf.mxu0 }
0x3151   :  { %v23149_v49 = vadd.f32 %v26780_v31, %v23032_v47  ;;  %v23396_v31 = vld [vmem:[%s30370_s1 + $0x17e] ss:$0 sm:$0xff] }
0x3152   :  { %v23142_v21 = vpop.f32.mrf.mxu0 }
0x3153   :  { %v23246_v34 = vadd.f32 %v26802_v19, %v23149_v49  ;;  %v23143_v35 = vadd.f32 %v23142_v21, %v23024_v20  ;;  %v23397_v21 = vld [vmem:[%s30370_s1 + $0x17f] ss:$0 sm:$0xff]  ;;  %s27025_s1 = smov [#allocation4]  }
0x3154   :  { %v26783_v40 = vpop.f32.mrf.mxu0  ;;  %s23374_s9 = sshll.u32 %s27025_s1, 4  ;;  %s23375_s9 = int_to_ptr.vmem [resolvable:$true] %s23374_s9 }
0x3155   :  { %v30321_v16 = vadd.f32 %v23246_v34, %v30022_v0  ;;  %v23240_v12 = vadd.f32 %v23239_v57, %v23143_v35  ;;  %v23161_v8 = vadd.f32 %v26783_v40, %v23048_v2  ;;  %s26989_s23 = scalar_lea.vmem %s23375_s9, 32  ;;  %p26994_p1 = scmp.lt.s32.totalorder %s23375_s9, %s23375_s9 }
0x3156   :  { %v23154_v46 = vpop.f32.mrf.mxu0  ;;  %p26990_p0 = scmp.ne.s32.totalorder %s23375_s9, %s26989_s23  ;;  %p26995_p2 = scmp.lt.s32.totalorder %s26989_s23, %s26989_s23 }
0x3157   :  { %v30324_v29 = vadd.f32 %v23240_v12, %v30028_v1  ;;  %v23258_v6 = vadd.f32 %v26805_v26, %v23161_v8  ;;  %v23155_v52 = vadd.f32 %v23154_v46, %v23040_v7  ;;  %v23270_v3 = vsel %vm632_vm1, %v30321_v16, 0.0 }
0x3158   :  { %23271 = vadd.xlane.f32.xlu0 %v23270_v3  ;;  %v23284_v48 = vmul.f32 %v30321_v16, %v30321_v16  ;;  %p26996_p3 = por %p26995_p2, %p26994_p1 }
0x3159   :  { %v23252_v43 = vadd.f32 %v23251_v11, %v23155_v52  ;;  %v23267_v0 = vsel %vm632_vm1, %v30324_v29, 0.0  ;;  %v23283_v55 = vmul.f32 %v30324_v29, %v30324_v29  ;;  %v30335_v1 = vadd.f32 %v23258_v6, %v30052_v54 }
0x315a   :  { %23268 = vadd.xlane.f32.xlu1 %v23267_v0  ;;  %v23290_v5 = vsel %vm632_vm1, %v23284_v48, 0.0  ;;  %p26997_p4 = pnand %p26996_p3, %p26990_p0 }
0x315b   :  { %v30339_v30 = vadd.f32 %v23252_v43, %v30033_v58  ;;  %v23287_v14 = vsel %vm632_vm1, %v23283_v55, 0.0  ;;  %v23276_v13 = vsel %vm632_vm1, %v30335_v1, 0.0  ;;  %v23286_v18 = vmul.f32 %v30335_v1, %v30335_v1 }
0x315c   :  { %23291 = vadd.xlane.f32.xlu0 %v23290_v5 }
0x315d   :  { %v23273_v54 = vsel %vm632_vm1, %v30339_v30, 0.0  ;;  %v23285_v38 = vmul.f32 %v30339_v30, %v30339_v30  ;;  %v23296_v58 = vsel %vm632_vm1, %v23286_v18, 0.0 }
0x315e   :  { %23288 = vadd.xlane.f32.xlu1 %v23287_v14 }
0x315f   :  { %v23293_v22 = vsel %vm632_vm1, %v23285_v38, 0.0 }
0x3160   :  { %23277 = vadd.xlane.f32.xlu0 %v23276_v13 }
0x3162   :  { %23274 = vadd.xlane.f32.xlu1 %v23273_v54 }
0x3164   :  { %23297 = vadd.xlane.f32.xlu0 %v23296_v58 }
0x3166   :  { %23294 = vadd.xlane.f32.xlu1 %v23293_v22 }
0x31e1   :  { %v23272_v36 = vpop.xlane.xlu0 %23271 }
0x31e2   :  { %v23280_v61 = vmul.f32 0.03125, %v23272_v36 }
0x31e3   :  { %v23269_v24 = vpop.xlane.xlu1 %23268 }
0x31e4   :  { %v23279_v51 = vmul.f32 0.03125, %v23269_v24  ;;  %v23304_v25 = vmul.f32 %v23280_v61, %v23280_v61  ;;  %v23312_v47 = vsub.f32 %v30321_v16, %v23280_v61 }
0x31e5   :  { %v23292_v28 = vpop.xlane.xlu0 %23291 }
0x31e6   :  { %v23300_v53 = vmul.f32 0.03125, %v23292_v28  ;;  %v23303_v23 = vmul.f32 %v23279_v51, %v23279_v51  ;;  %v23311_v56 = vsub.f32 %v30324_v29, %v23279_v51 }
0x31e7   :  { %v23289_v50 = vpop.xlane.xlu1 %23288 }
0x31e8   :  { %v23308_v44 = vsub.f32 %v23300_v53, %v23304_v25  ;;  %v23299_v63 = vmul.f32 0.03125, %v23289_v50 }
0x31e9   :  { %v23278_v42 = vpop.xlane.xlu0 %23277 }
0x31ea   :  { %v23316_v41 = vadd.f32 1e-05, %v23308_v44  ;;  %v23307_v32 = vsub.f32 %v23299_v63, %v23303_v23  ;;  %v23282_v37 = vmul.f32 0.03125, %v23278_v42 }
0x31eb   :  { %v23275_v59 = vpop.xlane.xlu1 %23274 }
0x31ec   :  { %26973 = vrsqrt.f32 %v23316_v41  ;;  %v23315_v17 = vadd.f32 1e-05, %v23307_v32  ;;  %v23281_v33 = vmul.f32 0.03125, %v23275_v59  ;;  %v23306_v10 = vmul.f32 %v23282_v37, %v23282_v37 }
0x31ed   :  { %v23298_v15 = vpop.xlane.xlu0 %23297  ;;  %v23314_v40 = vsub.f32 %v30335_v1, %v23282_v37 }
0x31ee   :  { %26975 = vrsqrt.f32 %v23315_v17  ;;  %v23302_v27 = vmul.f32 0.03125, %v23298_v15  ;;  %v23305_v19 = vmul.f32 %v23281_v33, %v23281_v33  ;;  %v23313_v8 = vsub.f32 %v30339_v30, %v23281_v33 }
0x31ef   :  { %v23295_v39 = vpop.xlane.xlu1 %23294 }
0x31f0   :  { %v23310_v9 = vsub.f32 %v23302_v27, %v23306_v10  ;;  %v23301_v62 = vmul.f32 0.03125, %v23295_v39 }
0x31f2   :  { %v23318_v60 = vadd.f32 1e-05, %v23310_v9  ;;  %v23309_v45 = vsub.f32 %v23301_v62, %v23305_v19 }
0x31f4   :  { %26977 = vrsqrt.f32 %v23318_v60  ;;  %v23317_v4 = vadd.f32 1e-05, %v23309_v45 }
0x31f6   :  { %26979 = vrsqrt.f32 %v23317_v4 }
0x31f9   :  { %v26974_v57 = vpop.eup %26973 }
0x31fa   :  { %v23324_v49 = vmul.f32 %v26974_v57, %v23312_v47 }
0x31fb   :  { %v26976_v20 = vpop.eup %26975 }
0x31fc   :  { %v23323_v34 = vmul.f32 %v26976_v20, %v23311_v56  ;;  %v23332_v35 = vmul.f32 %v23396_v31, %v23324_v49 }
0x31fe   :  { %v23331_v2 = vmul.f32 %v23396_v31, %v23323_v34  ;;  %v23340_v26 = vadd.f32 %v23397_v21, %v23332_v35 }
0x3200   :  { %v23339_v16 = vadd.f32 %v23397_v21, %v23331_v2  ;;  %v23344_v29 = vsel %vm632_vm1, %v23340_v26, 0.0 }
0x3201   :  { %v26978_v12 = vpop.eup %26977 }
0x3202   :  { %v23326_v7 = vmul.f32 %v26978_v12, %v23314_v40  ;;  %v23343_v46 = vsel %vm632_vm1, %v23339_v16, 0.0 }
0x3203   :  { %v26980_v6 = vpop.eup %26979  ;;  %v23345_v52 = vadd.f32 %v23344_v29, %v23343_v46 }
0x3204   :  { %v23325_v3 = vmul.f32 %v26980_v6, %v23313_v8  ;;  %v23334_v11 = vmul.f32 %v23396_v31, %v23326_v7 }
0x3205   :  { %v23346_v48 = vrot.slane %v23345_v52, 4 }
0x3206   :  { %v23333_v43 = vmul.f32 %v23396_v31, %v23325_v3  ;;  %v23342_v0 = vadd.f32 %v23397_v21, %v23334_v11 }
0x3207   :  { %v23347_v55 = vadd.f32 %v23346_v48, %v23345_v52 }
0x3208   :  { %v23341_v5 = vadd.f32 %v23397_v21, %v23333_v43  ;;  %v23355_v13 = vsel %vm632_vm1, %v23342_v0, 0.0 }
0x3209   :  { %v23348_v14 = vrot.slane %v23347_v55, 2 }
0x320a   :  { %v23354_v1 = vsel %vm632_vm1, %v23341_v5, 0.0 }
0x320b   :  { %v23356_v30 = vadd.f32 %v23355_v13, %v23354_v1  ;;  %v23349_v18 = vadd.f32 %v23348_v14, %v23347_v55 }
0x320d   :  { %v23357_v54 = vrot.slane %v23356_v30, 4  ;;  %v23350_v58 = vrot.slane %v23349_v18, 1 }
0x320f   :  { %v23358_v38 = vadd.f32 %v23357_v54, %v23356_v30  ;;  %v23351_v61 = vadd.f32 %v23350_v58, %v23349_v18 }
0x3211   :  { %v23359_v22 = vrot.slane %v23358_v38, 2  ;;  %v23353_v28 = vmul.f32 0.0625, %v23351_v61 }
0x3213   :  { %v23360_v36 = vadd.f32 %v23359_v22, %v23358_v38 }
0x3215   :  { %v23361_v24 = vrot.slane %v23360_v36, 1 }
0x3217   :  { %v23362_v51 = vadd.f32 %v23361_v24, %v23360_v36 }
0x3219   :  { %v23363_v25 = vmul.f32 0.0625, %v23362_v51 }
0x321b   :  { %v23365_v53 = vsel %vm23364_vm8, %v23353_v28, %v23363_v25 }
0x321c   :  { %23367 = vst.msk [vmem:[#allocation4] sm:$0x3] %vm23366_vm9, %v23365_v53 }
0x321d   :  { %27000 = shalt.err (!%p26997_p4)
}
0x321e   :  { %23377 = dma.vmem_to_hbm [thread:$0]  %s23375_s9, 32, %s30371_s2, [#allocation5]  }
0x321f   :  { %27009 = dma.done.wait [#allocation5], 32  }
0x3220   :  { %27010 = vsyncadd [#allocation5], 4294967264 }
0x3221   :  { %23381 = vsyncpa [#allocation5], 1 }

</bundles_post_ra>
